<compile_context>
chip_gen: v5e
topology: v5e:2x2
jax: 0.10.0
libtpu: 0.0.40
codegen_flags: <defaults>
</compile_context>

<pallas_src>
import functools

import jax
import jax.numpy as jnp
from jax.experimental import pallas as pl
from jax.experimental.pallas import tpu as pltpu

PAD_INDEX = 0
BOS_INDEX = 1
EOS_INDEX = 2

VMEM_LIMIT_BYTES = 32 * 1024 * 1024   # safe on v5e/v6e (128 MiB) and v7x (64 MiB)


def _round_up(x, m):
    return ((x + m - 1) // m) * m


def _pick(dim, prefs, min_blocks=1):
    """Largest preferred tile that divides `dim` and leaves >= min_blocks blocks."""
    for p in prefs:
        if dim % p == 0 and dim // p >= min_blocks:
            return p
    for p in prefs:
        if dim % p == 0:
            return p
    # Hidden-size axes are multiples of 128 in all real BERT configs; the vocab
    # axis (the one that can be odd, e.g. 30522) is handled by padding + in-kernel
    # masking in pallas_logits_ce, so this fallback is only hit for tiny demo dims.
    return dim


# ----------------------------------------------------------------------------
# Generic tiled matmul (used for the fused QKV / Q / KV projections)
# ----------------------------------------------------------------------------
def _matmul_kernel(x_ref, w_ref, b_ref, o_ref, acc_ref):
    @pl.when(pl.program_id(2) == 0)
    def _():
        acc_ref[...] = jnp.zeros_like(acc_ref)

    acc_ref[...] += jnp.dot(x_ref[...], w_ref[...],
                            preferred_element_type=jnp.float32)

    @pl.when(pl.program_id(2) == pl.num_programs(2) - 1)
    def _():
        o_ref[...] = (acc_ref[...] + b_ref[...]).astype(o_ref.dtype)


def pallas_matmul(x, w, b, out_dtype=jnp.bfloat16):
    """y = x @ w + b.  x:[M,K] bf16, w:[K,N] bf16, b:[N] f32 -> [M,N]."""
    M, K = x.shape
    K2, N = w.shape
    assert K == K2
    tm = _pick(M, (256, 128, 64, 32, 16, 8), min_blocks=2)
    tn = _pick(N, (512, 256, 128))
    tk = _pick(K, (512, 256, 128))
    return pl.pallas_call(
        _matmul_kernel,
        out_shape=jax.ShapeDtypeStruct((M, N), out_dtype),
        grid=(M // tm, N // tn, K // tk),
        in_specs=[
            pl.BlockSpec((tm, tk), lambda i, j, k: (i, k)),
            pl.BlockSpec((tk, tn), lambda i, j, k: (k, j)),
            pl.BlockSpec((1, tn), lambda i, j, k: (0, j)),
        ],
        out_specs=pl.BlockSpec((tm, tn), lambda i, j, k: (i, j)),
        scratch_shapes=[pltpu.VMEM((tm, tn), jnp.float32)],
        compiler_params=pltpu.CompilerParams(
            dimension_semantics=("parallel", "parallel", "arbitrary"),
            vmem_limit_bytes=VMEM_LIMIT_BYTES),
    )(x, w, b.reshape(1, N).astype(jnp.float32))


# ----------------------------------------------------------------------------
# Standalone LayerNorm (embedding LN and ffn_layer_norm)
# ----------------------------------------------------------------------------
def _layernorm_kernel(x_ref, g_ref, beta_ref, o_ref, *, eps):
    x = x_ref[...].astype(jnp.float32)
    mean = jnp.mean(x, axis=-1, keepdims=True)
    var = jnp.mean((x - mean) ** 2, axis=-1, keepdims=True)
    y = (x - mean) * jax.lax.rsqrt(var + eps)
    o_ref[...] = (y * g_ref[...] + beta_ref[...]).astype(o_ref.dtype)


def pallas_layernorm(x, gamma, beta, eps=1e-5, out_dtype=jnp.bfloat16):
    M, H = x.shape
    tm = _pick(M, (256, 128, 64, 32, 16, 8), min_blocks=2)
    return pl.pallas_call(
        functools.partial(_layernorm_kernel, eps=eps),
        out_shape=jax.ShapeDtypeStruct((M, H), out_dtype),
        grid=(M // tm,),
        in_specs=[
            pl.BlockSpec((tm, H), lambda i: (i, 0)),
            pl.BlockSpec((1, H), lambda i: (0, 0)),
            pl.BlockSpec((1, H), lambda i: (0, 0)),
        ],
        out_specs=pl.BlockSpec((tm, H), lambda i: (i, 0)),
        compiler_params=pltpu.CompilerParams(
            dimension_semantics=("parallel",),
            vmem_limit_bytes=VMEM_LIMIT_BYTES),
    )(x, gamma.reshape(1, H).astype(jnp.float32),
      beta.reshape(1, H).astype(jnp.float32))


# ----------------------------------------------------------------------------
# Fused MHA block: attention + output projection + residual + LayerNorm
# ----------------------------------------------------------------------------
def _mha_block_kernel(q_ref, k_ref, v_ref, keep_ref, wo_ref, bo_ref, res_ref,
                      g_ref, beta_ref, o_ref, *, num_heads, scale, eps, causal):
    tq = q_ref.shape[1]
    H = q_ref.shape[2]
    Tk = k_ref.shape[1]
    d = H // num_heads

    q = q_ref[0]                       # (tq, H) bf16
    k = k_ref[0]                       # (Tk, H) bf16
    v = v_ref[0]                       # (Tk, H) bf16

    # Additive mask built in-kernel from a [1, Tk] keep vector (+ causal iota);
    # no dense [B, Tq, Tk] mask is streamed from HBM.
    allowed = keep_ref[0] > 0.5                                   # (1, Tk) bool
    if causal:
        q0 = pl.program_id(1) * tq
        rows = jax.lax.broadcasted_iota(jnp.int32, (tq, Tk), 0) + q0
        cols = jax.lax.broadcasted_iota(jnp.int32, (tq, Tk), 1)
        allowed = jnp.logical_and(allowed, cols <= rows)          # (tq, Tk)
    neg = jnp.where(allowed, 0.0, -1e9)

    outs = []
    for h in range(num_heads):
        sl = slice(h * d, (h + 1) * d)
        s = jax.lax.dot_general(q[:, sl], k[:, sl], (((1,), (1,)), ((), ())),
                                preferred_element_type=jnp.float32)
        s = s * scale + neg
        s = s - jnp.max(s, axis=-1, keepdims=True)
        p = jnp.exp(s)
        p = p * pl.reciprocal(jnp.sum(p, axis=-1, keepdims=True), approx=True)
        outs.append(jnp.dot(p.astype(jnp.bfloat16), v[:, sl],
                            preferred_element_type=jnp.float32))   # (tq, d)
    ctx = jnp.concatenate(outs, axis=-1)                           # (tq, H) f32

    # single full-width output projection (one H-contraction instead of nh tiny ones)
    y = jnp.dot(ctx.astype(jnp.bfloat16), wo_ref[...],
                preferred_element_type=jnp.float32)
    y = y + bo_ref[...] + res_ref[0].astype(jnp.float32)           # residual add
    mean = jnp.mean(y, axis=-1, keepdims=True)
    var = jnp.mean((y - mean) ** 2, axis=-1, keepdims=True)
    yn = (y - mean) * jax.lax.rsqrt(var + eps)
    o_ref[0] = (yn * g_ref[...] + beta_ref[...]).astype(o_ref.dtype)


def _slot_map_q(slot):
    def im(b, qi):
        return (b, qi, slot)
    return im


def _slot_map_kv(slot):
    def im(b, qi):
        return (b, 0, slot)
    return im


def pallas_mha_block(q_src, q_slot, k_src, k_slot, v_src, v_slot, keep,
                     wo, bo, residual, gamma, beta, num_heads,
                     causal=False, eps=1e-5):
    """q_src:[B,Tq,nq*H], k_src/v_src:[B,Tk,nk*H] (Q/K/V column blocks selected
    by the BlockSpec via *_slot), keep:[B,Tk] f32, residual:[B,Tq,H]."""
    H = wo.shape[0]
    B, Tq = q_src.shape[0], q_src.shape[1]
    Tk = k_src.shape[1]
    d = H // num_heads
    tq = _pick(Tq, (128, 64, 32, 16, 8), min_blocks=2)
    kernel = functools.partial(_mha_block_kernel, num_heads=num_heads,
                               scale=1.0 / (d ** 0.5), eps=eps, causal=causal)
    return pl.pallas_call(
        kernel,
        out_shape=jax.ShapeDtypeStruct((B, Tq, H), jnp.bfloat16),
        grid=(B, Tq // tq),
        in_specs=[
            pl.BlockSpec((1, tq, H), _slot_map_q(q_slot)),
            pl.BlockSpec((1, Tk, H), _slot_map_kv(k_slot)),
            pl.BlockSpec((1, Tk, H), _slot_map_kv(v_slot)),
            pl.BlockSpec((1, 1, Tk), lambda b, qi: (b, 0, 0)),
            pl.BlockSpec((H, H), lambda b, qi: (0, 0)),
            pl.BlockSpec((1, H), lambda b, qi: (0, 0)),
            pl.BlockSpec((1, tq, H), lambda b, qi: (b, qi, 0)),
            pl.BlockSpec((1, H), lambda b, qi: (0, 0)),
            pl.BlockSpec((1, H), lambda b, qi: (0, 0)),
        ],
        out_specs=pl.BlockSpec((1, tq, H), lambda b, qi: (b, qi, 0)),
        compiler_params=pltpu.CompilerParams(
            dimension_semantics=("parallel", "parallel"),
            vmem_limit_bytes=VMEM_LIMIT_BYTES),
    )(q_src, k_src, v_src,
      keep.reshape(B, 1, Tk).astype(jnp.float32),
      wo, bo.reshape(1, H).astype(jnp.float32), residual,
      gamma.reshape(1, H).astype(jnp.float32),
      beta.reshape(1, H).astype(jnp.float32))


# ----------------------------------------------------------------------------
# Fused FFN block: gelu(x@W1+b1)@W2+b2 + residual + LayerNorm
# ----------------------------------------------------------------------------
def _ffn_block_kernel(x_ref, w1_ref, b1_ref, w2_ref, b2_ref, g_ref, beta_ref,
                      o_ref, *, eps):
    x = x_ref[...]                                               # (tm, H) bf16
    h = jnp.dot(x, w1_ref[...], preferred_element_type=jnp.float32) + b1_ref[...]
    # TODO(synk): tanh-approx GELU (jax.nn.gelu default); torch nn.GELU is erf-based.
    h = jax.nn.gelu(h)
    y = jnp.dot(h.astype(jnp.bfloat16), w2_ref[...],
                preferred_element_type=jnp.float32) + b2_ref[...]
    y = y + x.astype(jnp.float32)
    mean = jnp.mean(y, axis=-1, keepdims=True)
    var = jnp.mean((y - mean) ** 2, axis=-1, keepdims=True)
    yn = (y - mean) * jax.lax.rsqrt(var + eps)
    o_ref[...] = (yn * g_ref[...] + beta_ref[...]).astype(o_ref.dtype)


def pallas_ffn_block(x, w1, b1, w2, b2, gamma, beta, eps=1e-5):
    M, H = x.shape
    F = w1.shape[1]
    tm = _pick(M, (256, 128, 64, 32, 16, 8), min_blocks=2)
    return pl.pallas_call(
        functools.partial(_ffn_block_kernel, eps=eps),
        out_shape=jax.ShapeDtypeStruct((M, H), jnp.bfloat16),
        grid=(M // tm,),
        in_specs=[
            pl.BlockSpec((tm, H), lambda i: (i, 0)),
            pl.BlockSpec((H, F), lambda i: (0, 0)),
            pl.BlockSpec((1, F), lambda i: (0, 0)),
            pl.BlockSpec((F, H), lambda i: (0, 0)),
            pl.BlockSpec((1, H), lambda i: (0, 0)),
            pl.BlockSpec((1, H), lambda i: (0, 0)),
            pl.BlockSpec((1, H), lambda i: (0, 0)),
        ],
        out_specs=pl.BlockSpec((tm, H), lambda i: (i, 0)),
        compiler_params=pltpu.CompilerParams(
            dimension_semantics=("parallel",),
            vmem_limit_bytes=VMEM_LIMIT_BYTES),
    )(x, w1, b1.reshape(1, F).astype(jnp.float32), w2,
      b2.reshape(1, H).astype(jnp.float32),
      gamma.reshape(1, H).astype(jnp.float32),
      beta.reshape(1, H).astype(jnp.float32))


# ----------------------------------------------------------------------------
# Fused tied-embedding logits + flag bias + cross-entropy (vocab-streamed)
# ----------------------------------------------------------------------------
def _logits_ce_kernel(x_ref, e_ref, f_ref, gold_ref, nll_ref, valid_ref,
                      m_sc, l_sc, g_sc, *, ignore_index, vocab_size):
    j = pl.program_id(1)
    tv = e_ref.shape[0]

    @pl.when(j == 0)
    def _():
        m_sc[...] = jnp.full_like(m_sc, -jnp.inf)
        l_sc[...] = jnp.zeros_like(l_sc)
        g_sc[...] = jnp.zeros_like(g_sc)

    # logits tile = x @ emb_tile^T + flag_tile  (contract on emb axis 1)
    s = jax.lax.dot_general(x_ref[...], e_ref[...], (((1,), (1,)), ((), ())),
                            preferred_element_type=jnp.float32)
    s = s + f_ref[...].astype(jnp.float32)
    cols = jax.lax.broadcasted_iota(jnp.int32, s.shape, 1) + j * tv
    s = jnp.where(cols < vocab_size, s, -1e30)          # mask padded vocab tail

    gold = gold_ref[...]                                # (tm, 1) int32
    g_sc[...] += jnp.sum(jnp.where(cols == gold, s, 0.0), axis=-1, keepdims=True)

    m_prev = m_sc[...]
    m_new = jnp.maximum(m_prev, jnp.max(s, axis=-1, keepdims=True))
    l_sc[...] = (l_sc[...] * jnp.exp(m_prev - m_new)
                 + jnp.sum(jnp.exp(s - m_new), axis=-1, keepdims=True))
    m_sc[...] = m_new

    @pl.when(j == pl.num_programs(1) - 1)
    def _():
        lse = m_sc[...] + jnp.log(l_sc[...])
        valid = (gold != ignore_index).astype(jnp.float32)
        nll_ref[...] = (lse - g_sc[...]) * valid
        valid_ref[...] = valid


def pallas_logits_ce(x, emb, flag, gold, ignore_index=PAD_INDEX):
    """Fused: logits = x@emb^T + flag, then mean CE over non-ignored rows.
    x:[M,H] bf16, emb:[V,H] bf16 (tied), flag:[M,V], gold:[M] int -> scalar."""
    M, H = x.shape
    V = emb.shape[0]
    tv = min(512, _round_up(V, 128))
    Vp = _round_up(V, tv)
    Mp = _round_up(M, 8)
    tm = _pick(Mp, (128, 64, 32, 16, 8), min_blocks=2)

    flag = flag.astype(jnp.bfloat16)                 # halve HBM transit of flag
    gold = gold.astype(jnp.int32)
    if Mp != M:
        x = jnp.pad(x, ((0, Mp - M), (0, 0)))
        flag = jnp.pad(flag, ((0, Mp - M), (0, 0)))
        gold = jnp.pad(gold, ((0, Mp - M),), constant_values=ignore_index)
    if Vp != V:
        emb = jnp.pad(emb, ((0, Vp - V), (0, 0)))
        flag = jnp.pad(flag, ((0, 0), (0, Vp - V)))
    gold2 = gold.reshape(Mp, 1)

    nll, valid = pl.pallas_call(
        functools.partial(_logits_ce_kernel, ignore_index=ignore_index,
                          vocab_size=V),
        out_shape=(jax.ShapeDtypeStruct((Mp, 1), jnp.float32),
                   jax.ShapeDtypeStruct((Mp, 1), jnp.float32)),
        grid=(Mp // tm, Vp // tv),
        in_specs=[
            pl.BlockSpec((tm, H), lambda i, j: (i, 0)),
            pl.BlockSpec((tv, H), lambda i, j: (j, 0)),
            pl.BlockSpec((tm, tv), lambda i, j: (i, j)),
            pl.BlockSpec((tm, 1), lambda i, j: (i, 0)),
        ],
        out_specs=(pl.BlockSpec((tm, 1), lambda i, j: (i, 0)),
                   pl.BlockSpec((tm, 1), lambda i, j: (i, 0))),
        scratch_shapes=[pltpu.VMEM((tm, 1), jnp.float32)] * 3,
        compiler_params=pltpu.CompilerParams(
            dimension_semantics=("parallel", "arbitrary"),
            vmem_limit_bytes=VMEM_LIMIT_BYTES),
    )(x, emb, flag, gold2)
    # Matches torch CrossEntropyLoss: mean over non-ignored targets (NaN if all ignored).
    return jnp.sum(nll) / jnp.sum(valid)


# ----------------------------------------------------------------------------
# Model glue (plain JAX around the Pallas kernels)
# ----------------------------------------------------------------------------
def encoder_layer(x, enc_keep, p, num_heads):
    B, S, H = x.shape
    a = p["attn"]
    qkv = pallas_matmul(x.reshape(B * S, H), a["wqkv"], a["bqkv"]).reshape(B, S, 3 * H)
    x = pallas_mha_block(qkv, 0, qkv, 1, qkv, 2, enc_keep, a["wo"], a["bo"],
                         x, p["ln1_g"], p["ln1_b"], num_heads, causal=False)
    x = pallas_ffn_block(x.reshape(B * S, H), p["w1"], p["b1"], p["w2"], p["b2"],
                         p["ln2_g"], p["ln2_b"]).reshape(B, S, H)
    return x


def decoder_layer(y, enc_out, tgt_keep, enc_keep, p, num_heads):
    B, T, H = y.shape
    S = enc_out.shape[1]
    sa = p["self_attn"]
    qkv = pallas_matmul(y.reshape(B * T, H), sa["wqkv"], sa["bqkv"]).reshape(B, T, 3 * H)
    y = pallas_mha_block(qkv, 0, qkv, 1, qkv, 2, tgt_keep, sa["wo"], sa["bo"],
                         y, p["ln1_g"], p["ln1_b"], num_heads, causal=True)
    ca = p["cross_attn"]
    q = pallas_matmul(y.reshape(B * T, H), ca["wq"], ca["bq"]).reshape(B, T, H)
    kv = pallas_matmul(enc_out.reshape(B * S, H), ca["wkv"], ca["bkv"]).reshape(B, S, 2 * H)
    y = pallas_mha_block(q, 0, kv, 0, kv, 1, enc_keep, ca["wo"], ca["bo"],
                         y, p["ln2_g"], p["ln2_b"], num_heads, causal=False)
    y = pallas_ffn_block(y.reshape(B * T, H), p["w1"], p["b1"], p["w2"], p["b2"],
                         p["ln3_g"], p["ln3_b"]).reshape(B, T, H)
    return y


def bert2tf_forward(params, words, target, flag, *, num_heads):
    """Mirrors Bert2tf.forward(words, target, flag) -> {'loss': scalar}."""
    tok_emb = params["tok_emb"]                        # [V, H] bf16 (shared)
    vocab, H = tok_emb.shape
    B, S = words.shape

    # --- BERT-style encoder: encoder_output = encoder(words)[0] ---
    x = tok_emb[words] + params["pos_emb"][:S][None, :, :]   # XLA gather (no Pallas gather)
    x = pallas_layernorm(x.reshape(B * S, H), params["emb_ln_g"],
                         params["emb_ln_b"]).reshape(B, S, H)
    enc_keep = (words != PAD_INDEX).astype(jnp.float32)       # encoder_mask [B,S]
    for lp in params["enc_layers"]:
        x = encoder_layer(x, enc_keep, lp, num_heads)

    # --- encoder_output = ffn_layer_norm(encoder_output) ---
    enc_out = pallas_layernorm(x.reshape(B * S, H), params["ffn_ln_g"],
                               params["ffn_ln_b"]).reshape(B, S, H)

    # --- decoder(target[:, :-1], state, flag[:, :-1, :]) ---
    tgt_in = target[:, :-1]
    T = tgt_in.shape[1]
    y = tok_emb[tgt_in]                                # pos_embed=None in the module
    tgt_keep = (tgt_in != PAD_INDEX).astype(jnp.float32)      # [B,T]
    for lp in params["dec_layers"]:
        y = decoder_layer(y, enc_out, tgt_keep, enc_keep, lp, num_heads)

    # output projection tied to the shared embedding, fused with flag bias + CE.
    # TODO(synk): TransformerSeq2SeqDecoder's exact use of `flag` is not shown in the
    # reference code; flag[:, :-1, :] is treated as an additive bias on the output logits.
    gold = target[:, 1:].reshape(B * T)
    flag_bias = flag[:, :-1, :].reshape(B * T, vocab)
    loss = pallas_logits_ce(y.reshape(B * T, H), tok_emb, flag_bias, gold,
                            ignore_index=PAD_INDEX)
    return {"loss": loss}


# ----------------------------------------------------------------------------
# Deterministic parameter initialization (bf16 weights, f32 biases/LN params)
# ----------------------------------------------------------------------------
def init_params(key, vocab, hidden, ffn, n_enc, n_dec, max_pos):
    cnt = [0]

    def nk():
        cnt[0] += 1
        return jax.random.fold_in(key, cnt[0])

    def dense(shape):
        return (jax.random.normal(nk(), shape, jnp.float32) * 0.02).astype(jnp.bfloat16)

    def zeros(n):
        return jnp.zeros((n,), jnp.float32)

    def ln():
        return jnp.ones((hidden,), jnp.float32), jnp.zeros((hidden,), jnp.float32)

    def self_attn_p():     # fused QKV projection
        return {"wqkv": dense((hidden, 3 * hidden)), "bqkv": zeros(3 * hidden),
                "wo": dense((hidden, hidden)), "bo": zeros(hidden)}

    def cross_attn_p():    # separate Q, fused KV projection
        return {"wq": dense((hidden, hidden)), "bq": zeros(hidden),
                "wkv": dense((hidden, 2 * hidden)), "bkv": zeros(2 * hidden),
                "wo": dense((hidden, hidden)), "bo": zeros(hidden)}

    enc_layers = []
    for _ in range(n_enc):
        g1, b1 = ln(); g2, b2 = ln()
        enc_layers.append({"attn": self_attn_p(),
                           "ln1_g": g1, "ln1_b": b1,
                           "w1": dense((hidden, ffn)), "b1": zeros(ffn),
                           "w2": dense((ffn, hidden)), "b2": zeros(hidden),
                           "ln2_g": g2, "ln2_b": b2})
    dec_layers = []
    for _ in range(n_dec):
        g1, b1 = ln(); g2, b2 = ln(); g3, b3 = ln()
        dec_layers.append({"self_attn": self_attn_p(), "cross_attn": cross_attn_p(),
                           "ln1_g": g1, "ln1_b": b1, "ln2_g": g2, "ln2_b": b2,
                           "w1": dense((hidden, ffn)), "b1": zeros(ffn),
                           "w2": dense((ffn, hidden)), "b2": zeros(hidden),
                           "ln3_g": g3, "ln3_b": b3})
    emb_g, emb_b = ln()
    ffn_g, ffn_b = ln()
    # TODO(synk): no pretrained bert-base weights / tokenizer; synthetic params only.
    return {"tok_emb": dense((vocab, hidden)),
            "pos_emb": dense((max_pos, hidden)),
            "emb_ln_g": emb_g, "emb_ln_b": emb_b,
            "ffn_ln_g": ffn_g, "ffn_ln_b": ffn_b,
            "enc_layers": enc_layers, "dec_layers": dec_layers}


# ----------------------------------------------------------------------------
if __name__ == "__main__":
    # Small, lane-dense shapes consistent with the forward: words:[B,S],
    # target:[B,T+1], flag:[B,T+1,V] (vocab-wide per-position additive features).
    B, S, T_TOT = 2, 16, 9
    HIDDEN, FFN_DIM, VOCAB, NUM_HEADS = 128, 256, 256, 4
    N_ENC, N_DEC = 2, 2

    key = jax.random.PRNGKey(0)
    kp, kw, kt, kf = jax.random.split(key, 4)

    params = init_params(kp, VOCAB, HIDDEN, FFN_DIM, N_ENC, N_DEC, max_pos=S)

    words = jax.random.randint(kw, (B, S), 3, VOCAB, dtype=jnp.int32)
    words = words.at[:, 0].set(BOS_INDEX)
    words = words.at[:, -4:].set(PAD_INDEX)          # padded tail -> encoder_mask

    target = jax.random.randint(kt, (B, T_TOT), 3, VOCAB, dtype=jnp.int32)
    target = target.at[:, 0].set(BOS_INDEX)
    target = target.at[0, -2:].set(PAD_INDEX)        # pad tokens ignored by the loss

    flag = jax.random.normal(kf, (B, T_TOT, VOCAB), jnp.float32) * 0.1

    fwd = jax.jit(functools.partial(bert2tf_forward, num_heads=NUM_HEADS))
    out = fwd(params, words, target, flag)
    loss = jax.block_until_ready(out["loss"])
    assert loss.shape == () and bool(jnp.isfinite(loss))
    print("KERNEL_OK")
</pallas_src>

<mosaic_0001>
module attributes {stable_mosaic.version = 11 : i64} {
  func.func @_matmul_kernel(%arg0: i32, %arg1: i32, %arg2: i32, %arg3: memref<16x128xbf16, #tpu.memory_space<vmem>>, %arg4: memref<128x128xbf16, #tpu.memory_space<vmem>>, %arg5: memref<1x128xf32, #tpu.memory_space<vmem>>, %arg6: memref<16x128xbf16, #tpu.memory_space<vmem>>, %arg7: memref<16x128xf32, #tpu.memory_space<vmem>>) attributes {dimension_semantics = [#tpu.dimension_semantics<parallel>, #tpu.dimension_semantics<parallel>, #tpu.dimension_semantics<arbitrary>], iteration_bounds = array<i64: 2, 3, 1>, scalar_prefetch = 0 : i64, scratch_operands = 1 : i64, tpu.core_type = #tpu.core_type<tc>, window_params = [{transform_indices = @transform_0, window_bounds = array<i64: 16, 128>}, {transform_indices = @transform_1, window_bounds = array<i64: 128, 128>}, {transform_indices = @transform_2, window_bounds = array<i64: 1, 128>}, {transform_indices = @transform_3, window_bounds = array<i64: 16, 128>}]} {
    %c0_i32 = arith.constant 0 : i32
    %0 = arith.cmpi eq, %arg2, %c0_i32 : i32
    %1 = arith.extui %0 : i1 to i32
    %c0_i32_0 = arith.constant 0 : i32
    %2 = arith.cmpi ne, %1, %c0_i32_0 : i32
    scf.if %2 {
      %cst_10 = arith.constant 0.000000e+00 : f32
      %12 = vector.broadcast %cst_10 : f32 to vector<16x128xf32>
      %c0_11 = arith.constant 0 : index
      %c0_12 = arith.constant 0 : index
      %13 = vector.load %arg7[%c0_11, %c0_12] : memref<16x128xf32, #tpu.memory_space<vmem>>, vector<16x128xf32>
      tpu.vector_store %arg7[%c0_11, %c0_12], %12 {strides = array<i32>} : memref<16x128xf32, #tpu.memory_space<vmem>>, vector<16x128xf32>,
    } else {
    }
    %c0 = arith.constant 0 : index
    %c0_1 = arith.constant 0 : index
    %3 = vector.load %arg7[%c0, %c0_1] : memref<16x128xf32, #tpu.memory_space<vmem>>, vector<16x128xf32>
    %c0_2 = arith.constant 0 : index
    %c0_3 = arith.constant 0 : index
    %4 = vector.load %arg3[%c0_2, %c0_3] : memref<16x128xbf16, #tpu.memory_space<vmem>>, vector<16x128xbf16>
    %c0_4 = arith.constant 0 : index
    %c0_5 = arith.constant 0 : index
    %5 = vector.load %arg4[%c0_4, %c0_5] : memref<128x128xbf16, #tpu.memory_space<vmem>>, vector<128x128xbf16>
    %cst = arith.constant dense<0.000000e+00> : vector<16x128xf32>
    %6 = tpu.matmul %4, %5, %cst {dimension_numbers = #tpu.dot_dimension_numbers<[1], [0], [0], [1], [0, 0, 1, 1], [], []>} : vector<16x128xbf16>, vector<128x128xbf16>, vector<16x128xf32> -> vector<16x128xf32>
    %7 = arith.addf %3, %6 : vector<16x128xf32>
    %c0_6 = arith.constant 0 : index
    %c0_7 = arith.constant 0 : index
    %8 = vector.load %arg7[%c0_6, %c0_7] : memref<16x128xf32, #tpu.memory_space<vmem>>, vector<16x128xf32>
    tpu.vector_store %arg7[%c0_6, %c0_7], %7 {strides = array<i32>} : memref<16x128xf32, #tpu.memory_space<vmem>>, vector<16x128xf32>,
    %c0_i32_8 = arith.constant 0 : i32
    %9 = arith.cmpi eq, %arg2, %c0_i32_8 : i32
    %10 = arith.extui %9 : i1 to i32
    %c0_i32_9 = arith.constant 0 : i32
    %11 = arith.cmpi ne, %10, %c0_i32_9 : i32
    scf.if %11 {
      %c0_10 = arith.constant 0 : index
      %c0_11 = arith.constant 0 : index
      %12 = vector.load %arg7[%c0_10, %c0_11] : memref<16x128xf32, #tpu.memory_space<vmem>>, vector<16x128xf32>
      %c0_12 = arith.constant 0 : index
      %c0_13 = arith.constant 0 : index
      %13 = vector.load %arg5[%c0_12, %c0_13] : memref<1x128xf32, #tpu.memory_space<vmem>>, vector<1x128xf32>
      %14 = vector.broadcast %13 : vector<1x128xf32> to vector<16x128xf32>
      %15 = arith.addf %12, %14 : vector<16x128xf32>
      %16 = arith.truncf %15 : vector<16x128xf32> to vector<16x128xbf16>
      %c0_14 = arith.constant 0 : index
      %c0_15 = arith.constant 0 : index
      %17 = vector.load %arg6[%c0_14, %c0_15] : memref<16x128xbf16, #tpu.memory_space<vmem>>, vector<16x128xbf16>
      tpu.vector_store %arg6[%c0_14, %c0_15], %16 {strides = array<i32>} : memref<16x128xbf16, #tpu.memory_space<vmem>>, vector<16x128xbf16>,
    } else {
    }
    return
  }
  func.func @transform_0(%arg0: i32, %arg1: i32, %arg2: i32) -> (i32, i32) {
    %c0_i32 = arith.constant 0 : i32
    return %arg0, %arg2 : i32, i32
  }
  func.func @transform_1(%arg0: i32, %arg1: i32, %arg2: i32) -> (i32, i32) {
    %c0_i32 = arith.constant 0 : i32
    return %arg2, %arg1 : i32, i32
  }
  func.func @transform_2(%arg0: i32, %arg1: i32, %arg2: i32) -> (i32, i32) {
    %c0_i32 = arith.constant 0 : i32
    %c0_i32_0 = arith.constant 0 : i32
    return %c0_i32, %arg1 : i32, i32
  }
  func.func @transform_3(%arg0: i32, %arg1: i32, %arg2: i32) -> (i32, i32) {
    %c0_i32 = arith.constant 0 : i32
    return %arg0, %arg1 : i32, i32
  }
}

module attributes {stable_mosaic.version = 11 : i64} {
  func.func @_mha_block_kernel(%arg0: i32, %arg1: i32, %arg2: memref<1x8x128xbf16, #tpu.memory_space<vmem>>, %arg3: memref<1x16x128xbf16, #tpu.memory_space<vmem>>, %arg4: memref<1x16x128xbf16, #tpu.memory_space<vmem>>, %arg5: memref<1x1x16xf32, #tpu.memory_space<vmem>>, %arg6: memref<128x128xbf16, #tpu.memory_space<vmem>>, %arg7: memref<1x128xf32, #tpu.memory_space<vmem>>, %arg8: memref<1x8x128xbf16, #tpu.memory_space<vmem>>, %arg9: memref<1x128xf32, #tpu.memory_space<vmem>>, %arg10: memref<1x128xf32, #tpu.memory_space<vmem>>, %arg11: memref<1x8x128xbf16, #tpu.memory_space<vmem>>) attributes {dimension_semantics = [#tpu.dimension_semantics<parallel>, #tpu.dimension_semantics<parallel>], iteration_bounds = array<i64: 2, 2>, scalar_prefetch = 0 : i64, scratch_operands = 0 : i64, tpu.core_type = #tpu.core_type<tc>, window_params = [{transform_indices = @transform_0, window_bounds = array<i64: 1, 8, 128>}, {transform_indices = @transform_1, window_bounds = array<i64: 1, 16, 128>}, {transform_indices = @transform_2, window_bounds = array<i64: 1, 16, 128>}, {transform_indices = @transform_3, window_bounds = array<i64: 1, 1, 16>}, {pipeline_mode = #tpu.pipeline_mode<synchronous>, transform_indices = @transform_4, window_bounds = array<i64: 128, 128>}, {pipeline_mode = #tpu.pipeline_mode<synchronous>, transform_indices = @transform_5, window_bounds = array<i64: 1, 128>}, {transform_indices = @transform_6, window_bounds = array<i64: 1, 8, 128>}, {pipeline_mode = #tpu.pipeline_mode<synchronous>, transform_indices = @transform_7, window_bounds = array<i64: 1, 128>}, {pipeline_mode = #tpu.pipeline_mode<synchronous>, transform_indices = @transform_8, window_bounds = array<i64: 1, 128>}, {transform_indices = @transform_9, window_bounds = array<i64: 1, 8, 128>}]} {
    %c0 = arith.constant 0 : index
    %c0_0 = arith.constant 0 : index
    %c0_1 = arith.constant 0 : index
    %0 = vector.load %arg2[%c0, %c0_0, %c0_1] : memref<1x8x128xbf16, #tpu.memory_space<vmem>>, vector<1x8x128xbf16>
    %1 = vector.shape_cast %0 : vector<1x8x128xbf16> to vector<8x128xbf16>
    %c0_2 = arith.constant 0 : index
    %c0_3 = arith.constant 0 : index
    %c0_4 = arith.constant 0 : index
    %2 = vector.load %arg3[%c0_2, %c0_3, %c0_4] : memref<1x16x128xbf16, #tpu.memory_space<vmem>>, vector<1x16x128xbf16>
    %3 = vector.shape_cast %2 : vector<1x16x128xbf16> to vector<16x128xbf16>
    %c0_5 = arith.constant 0 : index
    %c0_6 = arith.constant 0 : index
    %c0_7 = arith.constant 0 : index
    %4 = vector.load %arg4[%c0_5, %c0_6, %c0_7] : memref<1x16x128xbf16, #tpu.memory_space<vmem>>, vector<1x16x128xbf16>
    %5 = vector.shape_cast %4 : vector<1x16x128xbf16> to vector<16x128xbf16>
    %c0_8 = arith.constant 0 : index
    %c0_9 = arith.constant 0 : index
    %c0_10 = arith.constant 0 : index
    %6 = vector.load %arg5[%c0_8, %c0_9, %c0_10] : memref<1x1x16xf32, #tpu.memory_space<vmem>>, vector<1x1x16xf32>
    %7 = vector.shape_cast %6 : vector<1x1x16xf32> to vector<1x16xf32>
    %cst = arith.constant 5.000000e-01 : f32
    %8 = vector.broadcast %cst : f32 to vector<1x16xf32>
    %9 = arith.cmpf ogt, %7, %8 : vector<1x16xf32>
    %cst_11 = arith.constant 0.000000e+00 : f32
    %cst_12 = arith.constant -1.000000e+09 : f32
    %10 = vector.broadcast %cst_11 : f32 to vector<1x16xf32>
    %11 = vector.broadcast %cst_12 : f32 to vector<1x16xf32>
    %12 = arith.select %9, %10, %11 : vector<1x16xi1>, vector<1x16xf32>
    %13 = vector.extract_strided_slice %1 {offsets = [0, 0], sizes = [8, 32], strides = [1, 1]} : vector<8x128xbf16> to vector<8x32xbf16>
    %14 = vector.extract_strided_slice %3 {offsets = [0, 0], sizes = [16, 32], strides = [1, 1]} : vector<16x128xbf16> to vector<16x32xbf16>
    %cst_13 = arith.constant dense<0.000000e+00> : vector<8x16xf32>
    %15 = tpu.matmul %13, %14, %cst_13 {dimension_numbers = #tpu.dot_dimension_numbers<[1], [1], [0], [0], [0, 0, 1, 0], [], []>} : vector<8x32xbf16>, vector<16x32xbf16>, vector<8x16xf32> -> vector<8x16xf32>
    %cst_14 = arith.constant 0.176776692 : f32
    %16 = vector.broadcast %cst_14 : f32 to vector<8x16xf32>
    %17 = arith.mulf %15, %16 : vector<8x16xf32>
    %18 = vector.broadcast %12 : vector<1x16xf32> to vector<8x16xf32>
    %19 = arith.addf %17, %18 : vector<8x16xf32>
    %cst_15 = arith.constant dense<0xFF800000> : vector<8xf32>
    %20 = vector.multi_reduction <maximumf>, %19, %cst_15 [1] : vector<8x16xf32> to vector<8xf32>
    %21 = vector.shape_cast %20 : vector<8xf32> to vector<8x1xf32>
    %22 = vector.broadcast %21 : vector<8x1xf32> to vector<8x16xf32>
    %23 = arith.subf %19, %22 : vector<8x16xf32>
    %24 = math.exp %23 : vector<8x16xf32>
    %cst_16 = arith.constant dense<0.000000e+00> : vector<8xf32>
    %25 = vector.multi_reduction <add>, %24, %cst_16 [1] : vector<8x16xf32> to vector<8xf32>
    %26 = vector.shape_cast %25 : vector<8xf32> to vector<8x1xf32>
    %27 = tpu.reciprocal %26 {approx = true} : vector<8x1xf32> -> vector<8x1xf32>
    %28 = vector.broadcast %27 : vector<8x1xf32> to vector<8x16xf32>
    %29 = arith.mulf %24, %28 : vector<8x16xf32>
    %30 = arith.truncf %29 : vector<8x16xf32> to vector<8x16xbf16>
    %31 = vector.extract_strided_slice %5 {offsets = [0, 0], sizes = [16, 32], strides = [1, 1]} : vector<16x128xbf16> to vector<16x32xbf16>
    %cst_17 = arith.constant dense<0.000000e+00> : vector<8x32xf32>
    %32 = tpu.matmul %30, %31, %cst_17 {dimension_numbers = #tpu.dot_dimension_numbers<[1], [0], [0], [1], [0, 0, 1, 1], [], []>} : vector<8x16xbf16>, vector<16x32xbf16>, vector<8x32xf32> -> vector<8x32xf32>
    %33 = vector.extract_strided_slice %1 {offsets = [0, 32], sizes = [8, 32], strides = [1, 1]} : vector<8x128xbf16> to vector<8x32xbf16>
    %34 = vector.extract_strided_slice %3 {offsets = [0, 32], sizes = [16, 32], strides = [1, 1]} : vector<16x128xbf16> to vector<16x32xbf16>
    %cst_18 = arith.constant dense<0.000000e+00> : vector<8x16xf32>
    %35 = tpu.matmul %33, %34, %cst_18 {dimension_numbers = #tpu.dot_dimension_numbers<[1], [1], [0], [0], [0, 0, 1, 0], [], []>} : vector<8x32xbf16>, vector<16x32xbf16>, vector<8x16xf32> -> vector<8x16xf32>
    %cst_19 = arith.constant 0.176776692 : f32
    %36 = vector.broadcast %cst_19 : f32 to vector<8x16xf32>
    %37 = arith.mulf %35, %36 : vector<8x16xf32>
    %38 = vector.broadcast %12 : vector<1x16xf32> to vector<8x16xf32>
    %39 = arith.addf %37, %38 : vector<8x16xf32>
    %cst_20 = arith.constant dense<0xFF800000> : vector<8xf32>
    %40 = vector.multi_reduction <maximumf>, %39, %cst_20 [1] : vector<8x16xf32> to vector<8xf32>
    %41 = vector.shape_cast %40 : vector<8xf32> to vector<8x1xf32>
    %42 = vector.broadcast %41 : vector<8x1xf32> to vector<8x16xf32>
    %43 = arith.subf %39, %42 : vector<8x16xf32>
    %44 = math.exp %43 : vector<8x16xf32>
    %cst_21 = arith.constant dense<0.000000e+00> : vector<8xf32>
    %45 = vector.multi_reduction <add>, %44, %cst_21 [1] : vector<8x16xf32> to vector<8xf32>
    %46 = vector.shape_cast %45 : vector<8xf32> to vector<8x1xf32>
    %47 = tpu.reciprocal %46 {approx = true} : vector<8x1xf32> -> vector<8x1xf32>
    %48 = vector.broadcast %47 : vector<8x1xf32> to vector<8x16xf32>
    %49 = arith.mulf %44, %48 : vector<8x16xf32>
    %50 = arith.truncf %49 : vector<8x16xf32> to vector<8x16xbf16>
    %51 = vector.extract_strided_slice %5 {offsets = [0, 32], sizes = [16, 32], strides = [1, 1]} : vector<16x128xbf16> to vector<16x32xbf16>
    %cst_22 = arith.constant dense<0.000000e+00> : vector<8x32xf32>
    %52 = tpu.matmul %50, %51, %cst_22 {dimension_numbers = #tpu.dot_dimension_numbers<[1], [0], [0], [1], [0, 0, 1, 1], [], []>} : vector<8x16xbf16>, vector<16x32xbf16>, vector<8x32xf32> -> vector<8x32xf32>
    %53 = vector.extract_strided_slice %1 {offsets = [0, 64], sizes = [8, 32], strides = [1, 1]} : vector<8x128xbf16> to vector<8x32xbf16>
    %54 = vector.extract_strided_slice %3 {offsets = [0, 64], sizes = [16, 32], strides = [1, 1]} : vector<16x128xbf16> to vector<16x32xbf16>
    %cst_23 = arith.constant dense<0.000000e+00> : vector<8x16xf32>
    %55 = tpu.matmul %53, %54, %cst_23 {dimension_numbers = #tpu.dot_dimension_numbers<[1], [1], [0], [0], [0, 0, 1, 0], [], []>} : vector<8x32xbf16>, vector<16x32xbf16>, vector<8x16xf32> -> vector<8x16xf32>
    %cst_24 = arith.constant 0.176776692 : f32
    %56 = vector.broadcast %cst_24 : f32 to vector<8x16xf32>
    %57 = arith.mulf %55, %56 : vector<8x16xf32>
    %58 = vector.broadcast %12 : vector<1x16xf32> to vector<8x16xf32>
    %59 = arith.addf %57, %58 : vector<8x16xf32>
    %cst_25 = arith.constant dense<0xFF800000> : vector<8xf32>
    %60 = vector.multi_reduction <maximumf>, %59, %cst_25 [1] : vector<8x16xf32> to vector<8xf32>
    %61 = vector.shape_cast %60 : vector<8xf32> to vector<8x1xf32>
    %62 = vector.broadcast %61 : vector<8x1xf32> to vector<8x16xf32>
    %63 = arith.subf %59, %62 : vector<8x16xf32>
    %64 = math.exp %63 : vector<8x16xf32>
    %cst_26 = arith.constant dense<0.000000e+00> : vector<8xf32>
    %65 = vector.multi_reduction <add>, %64, %cst_26 [1] : vector<8x16xf32> to vector<8xf32>
    %66 = vector.shape_cast %65 : vector<8xf32> to vector<8x1xf32>
    %67 = tpu.reciprocal %66 {approx = true} : vector<8x1xf32> -> vector<8x1xf32>
    %68 = vector.broadcast %67 : vector<8x1xf32> to vector<8x16xf32>
    %69 = arith.mulf %64, %68 : vector<8x16xf32>
    %70 = arith.truncf %69 : vector<8x16xf32> to vector<8x16xbf16>
    %71 = vector.extract_strided_slice %5 {offsets = [0, 64], sizes = [16, 32], strides = [1, 1]} : vector<16x128xbf16> to vector<16x32xbf16>
    %cst_27 = arith.constant dense<0.000000e+00> : vector<8x32xf32>
    %72 = tpu.matmul %70, %71, %cst_27 {dimension_numbers = #tpu.dot_dimension_numbers<[1], [0], [0], [1], [0, 0, 1, 1], [], []>} : vector<8x16xbf16>, vector<16x32xbf16>, vector<8x32xf32> -> vector<8x32xf32>
    %73 = vector.extract_strided_slice %1 {offsets = [0, 96], sizes = [8, 32], strides = [1, 1]} : vector<8x128xbf16> to vector<8x32xbf16>
    %74 = vector.extract_strided_slice %3 {offsets = [0, 96], sizes = [16, 32], strides = [1, 1]} : vector<16x128xbf16> to vector<16x32xbf16>
    %cst_28 = arith.constant dense<0.000000e+00> : vector<8x16xf32>
    %75 = tpu.matmul %73, %74, %cst_28 {dimension_numbers = #tpu.dot_dimension_numbers<[1], [1], [0], [0], [0, 0, 1, 0], [], []>} : vector<8x32xbf16>, vector<16x32xbf16>, vector<8x16xf32> -> vector<8x16xf32>
    %cst_29 = arith.constant 0.176776692 : f32
    %76 = vector.broadcast %cst_29 : f32 to vector<8x16xf32>
    %77 = arith.mulf %75, %76 : vector<8x16xf32>
    %78 = vector.broadcast %12 : vector<1x16xf32> to vector<8x16xf32>
    %79 = arith.addf %77, %78 : vector<8x16xf32>
    %cst_30 = arith.constant dense<0xFF800000> : vector<8xf32>
    %80 = vector.multi_reduction <maximumf>, %79, %cst_30 [1] : vector<8x16xf32> to vector<8xf32>
    %81 = vector.shape_cast %80 : vector<8xf32> to vector<8x1xf32>
    %82 = vector.broadcast %81 : vector<8x1xf32> to vector<8x16xf32>
    %83 = arith.subf %79, %82 : vector<8x16xf32>
    %84 = math.exp %83 : vector<8x16xf32>
    %cst_31 = arith.constant dense<0.000000e+00> : vector<8xf32>
    %85 = vector.multi_reduction <add>, %84, %cst_31 [1] : vector<8x16xf32> to vector<8xf32>
    %86 = vector.shape_cast %85 : vector<8xf32> to vector<8x1xf32>
    %87 = tpu.reciprocal %86 {approx = true} : vector<8x1xf32> -> vector<8x1xf32>
    %88 = vector.broadcast %87 : vector<8x1xf32> to vector<8x16xf32>
    %89 = arith.mulf %84, %88 : vector<8x16xf32>
    %90 = arith.truncf %89 : vector<8x16xf32> to vector<8x16xbf16>
    %91 = vector.extract_strided_slice %5 {offsets = [0, 96], sizes = [16, 32], strides = [1, 1]} : vector<16x128xbf16> to vector<16x32xbf16>
    %cst_32 = arith.constant dense<0.000000e+00> : vector<8x32xf32>
    %92 = tpu.matmul %90, %91, %cst_32 {dimension_numbers = #tpu.dot_dimension_numbers<[1], [0], [0], [1], [0, 0, 1, 1], [], []>} : vector<8x16xbf16>, vector<16x32xbf16>, vector<8x32xf32> -> vector<8x32xf32>
    %93 = tpu.concatenate %32, %52, %72, %92 in 1 : vector<8x32xf32>, vector<8x32xf32>, vector<8x32xf32>, vector<8x32xf32> -> vector<8x128xf32>
    %94 = arith.truncf %93 : vector<8x128xf32> to vector<8x128xbf16>
    %c0_33 = arith.constant 0 : index
    %c0_34 = arith.constant 0 : index
    %95 = vector.load %arg6[%c0_33, %c0_34] : memref<128x128xbf16, #tpu.memory_space<vmem>>, vector<128x128xbf16>
    %cst_35 = arith.constant dense<0.000000e+00> : vector<8x128xf32>
    %96 = tpu.matmul %94, %95, %cst_35 {dimension_numbers = #tpu.dot_dimension_numbers<[1], [0], [0], [1], [0, 0, 1, 1], [], []>} : vector<8x128xbf16>, vector<128x128xbf16>, vector<8x128xf32> -> vector<8x128xf32>
    %c0_36 = arith.constant 0 : index
    %c0_37 = arith.constant 0 : index
    %97 = vector.load %arg7[%c0_36, %c0_37] : memref<1x128xf32, #tpu.memory_space<vmem>>, vector<1x128xf32>
    %98 = vector.broadcast %97 : vector<1x128xf32> to vector<8x128xf32>
    %99 = arith.addf %96, %98 : vector<8x128xf32>
    %c0_38 = arith.constant 0 : index
    %c0_39 = arith.constant 0 : index
    %c0_40 = arith.constant 0 : index
    %100 = vector.load %arg8[%c0_38, %c0_39, %c0_40] : memref<1x8x128xbf16, #tpu.memory_space<vmem>>, vector<1x8x128xbf16>
    %101 = vector.shape_cast %100 : vector<1x8x128xbf16> to vector<8x128xbf16>
    %102 = arith.extf %101 : vector<8x128xbf16> to vector<8x128xf32>
    %103 = arith.addf %99, %102 : vector<8x128xf32>
    %cst_41 = arith.constant dense<0.000000e+00> : vector<8xf32>
    %104 = vector.multi_reduction <add>, %103, %cst_41 [1] : vector<8x128xf32> to vector<8xf32>
    %105 = vector.shape_cast %104 : vector<8xf32> to vector<8x1xf32>
    %cst_42 = arith.constant 1.280000e+02 : f32
    %106 = vector.broadcast %cst_42 : f32 to vector<8x1xf32>
    %107 = arith.divf %105, %106 : vector<8x1xf32>
    %108 = vector.broadcast %107 : vector<8x1xf32> to vector<8x128xf32>
    %109 = arith.subf %103, %108 : vector<8x128xf32>
    %110 = arith.mulf %109, %109 : vector<8x128xf32>
    %cst_43 = arith.constant dense<0.000000e+00> : vector<8xf32>
    %111 = vector.multi_reduction <add>, %110, %cst_43 [1] : vector<8x128xf32> to vector<8xf32>
    %112 = vector.shape_cast %111 : vector<8xf32> to vector<8x1xf32>
    %cst_44 = arith.constant 1.280000e+02 : f32
    %113 = vector.broadcast %cst_44 : f32 to vector<8x1xf32>
    %114 = arith.divf %112, %113 : vector<8x1xf32>
    %115 = vector.broadcast %107 : vector<8x1xf32> to vector<8x128xf32>
    %116 = arith.subf %103, %115 : vector<8x128xf32>
    %cst_45 = arith.constant 9.99999974E-6 : f32
    %117 = vector.broadcast %cst_45 : f32 to vector<8x1xf32>
    %118 = arith.addf %114, %117 : vector<8x1xf32>
    %119 = math.rsqrt %118 : vector<8x1xf32>
    %120 = vector.broadcast %119 : vector<8x1xf32> to vector<8x128xf32>
    %121 = arith.mulf %116, %120 : vector<8x128xf32>
    %c0_46 = arith.constant 0 : index
    %c0_47 = arith.constant 0 : index
    %122 = vector.load %arg9[%c0_46, %c0_47] : memref<1x128xf32, #tpu.memory_space<vmem>>, vector<1x128xf32>
    %123 = vector.broadcast %122 : vector<1x128xf32> to vector<8x128xf32>
    %124 = arith.mulf %121, %123 : vector<8x128xf32>
    %c0_48 = arith.constant 0 : index
    %c0_49 = arith.constant 0 : index
    %125 = vector.load %arg10[%c0_48, %c0_49] : memref<1x128xf32, #tpu.memory_space<vmem>>, vector<1x128xf32>
    %126 = vector.broadcast %125 : vector<1x128xf32> to vector<8x128xf32>
    %127 = arith.addf %124, %126 : vector<8x128xf32>
    %128 = arith.truncf %127 : vector<8x128xf32> to vector<8x128xbf16>
    %c0_50 = arith.constant 0 : index
    %c0_51 = arith.constant 0 : index
    %c0_52 = arith.constant 0 : index
    %129 = vector.load %arg11[%c0_50, %c0_51, %c0_52] : memref<1x8x128xbf16, #tpu.memory_space<vmem>>, vector<1x8x128xbf16>
    %130 = vector.shape_cast %129 : vector<1x8x128xbf16> to vector<8x128xbf16>
    %131 = vector.shape_cast %128 : vector<8x128xbf16> to vector<1x8x128xbf16>
    tpu.vector_store %arg11[%c0_50, %c0_51, %c0_52], %131 {strides = array<i32>} : memref<1x8x128xbf16, #tpu.memory_space<vmem>>, vector<1x8x128xbf16>,
    return
  }
  func.func @transform_0(%arg0: i32, %arg1: i32) -> (i32, i32, i32) {
    %c0_i32 = arith.constant 0 : i32
    %c0_i32_0 = arith.constant 0 : i32
    return %arg0, %arg1, %c0_i32 : i32, i32, i32
  }
  func.func @transform_1(%arg0: i32, %arg1: i32) -> (i32, i32, i32) {
    %c0_i32 = arith.constant 0 : i32
    %c1_i32 = arith.constant 1 : i32
    %c0_i32_0 = arith.constant 0 : i32
    return %arg0, %c0_i32, %c1_i32 : i32, i32, i32
  }
  func.func @transform_2(%arg0: i32, %arg1: i32) -> (i32, i32, i32) {
    %c0_i32 = arith.constant 0 : i32
    %c2_i32 = arith.constant 2 : i32
    %c0_i32_0 = arith.constant 0 : i32
    return %arg0, %c0_i32, %c2_i32 : i32, i32, i32
  }
  func.func @transform_3(%arg0: i32, %arg1: i32) -> (i32, i32, i32) {
    %c0_i32 = arith.constant 0 : i32
    %c0_i32_0 = arith.constant 0 : i32
    %c0_i32_1 = arith.constant 0 : i32
    return %arg0, %c0_i32, %c0_i32_0 : i32, i32, i32
  }
  func.func @transform_4(%arg0: i32, %arg1: i32) -> (i32, i32) {
    %c0_i32 = arith.constant 0 : i32
    %c0_i32_0 = arith.constant 0 : i32
    %c0_i32_1 = arith.constant 0 : i32
    return %c0_i32, %c0_i32_0 : i32, i32
  }
  func.func @transform_5(%arg0: i32, %arg1: i32) -> (i32, i32) {
    %c0_i32 = arith.constant 0 : i32
    %c0_i32_0 = arith.constant 0 : i32
    %c0_i32_1 = arith.constant 0 : i32
    return %c0_i32, %c0_i32_0 : i32, i32
  }
  func.func @transform_6(%arg0: i32, %arg1: i32) -> (i32, i32, i32) {
    %c0_i32 = arith.constant 0 : i32
    %c0_i32_0 = arith.constant 0 : i32
    return %arg0, %arg1, %c0_i32 : i32, i32, i32
  }
  func.func @transform_7(%arg0: i32, %arg1: i32) -> (i32, i32) {
    %c0_i32 = arith.constant 0 : i32
    %c0_i32_0 = arith.constant 0 : i32
    %c0_i32_1 = arith.constant 0 : i32
    return %c0_i32, %c0_i32_0 : i32, i32
  }
  func.func @transform_8(%arg0: i32, %arg1: i32) -> (i32, i32) {
    %c0_i32 = arith.constant 0 : i32
    %c0_i32_0 = arith.constant 0 : i32
    %c0_i32_1 = arith.constant 0 : i32
    return %c0_i32, %c0_i32_0 : i32, i32
  }
  func.func @transform_9(%arg0: i32, %arg1: i32) -> (i32, i32, i32) {
    %c0_i32 = arith.constant 0 : i32
    %c0_i32_0 = arith.constant 0 : i32
    return %arg0, %arg1, %c0_i32 : i32, i32, i32
  }
}

module attributes {stable_mosaic.version = 11 : i64} {
  func.func @_layernorm_kernel(%arg0: i32, %arg1: memref<16x128xbf16, #tpu.memory_space<vmem>>, %arg2: memref<1x128xf32, #tpu.memory_space<vmem>>, %arg3: memref<1x128xf32, #tpu.memory_space<vmem>>, %arg4: memref<16x128xbf16, #tpu.memory_space<vmem>>) attributes {dimension_semantics = [#tpu.dimension_semantics<parallel>], iteration_bounds = array<i64: 2>, scalar_prefetch = 0 : i64, scratch_operands = 0 : i64, tpu.core_type = #tpu.core_type<tc>, window_params = [{transform_indices = @transform_0, window_bounds = array<i64: 16, 128>}, {pipeline_mode = #tpu.pipeline_mode<synchronous>, transform_indices = @transform_1, window_bounds = array<i64: 1, 128>}, {pipeline_mode = #tpu.pipeline_mode<synchronous>, transform_indices = @transform_2, window_bounds = array<i64: 1, 128>}, {transform_indices = @transform_3, window_bounds = array<i64: 16, 128>}]} {
    %c0 = arith.constant 0 : index
    %c0_0 = arith.constant 0 : index
    %0 = vector.load %arg1[%c0, %c0_0] : memref<16x128xbf16, #tpu.memory_space<vmem>>, vector<16x128xbf16>
    %1 = arith.extf %0 : vector<16x128xbf16> to vector<16x128xf32>
    %cst = arith.constant dense<0.000000e+00> : vector<16xf32>
    %2 = vector.multi_reduction <add>, %1, %cst [1] : vector<16x128xf32> to vector<16xf32>
    %3 = vector.shape_cast %2 : vector<16xf32> to vector<16x1xf32>
    %cst_1 = arith.constant 1.280000e+02 : f32
    %4 = vector.broadcast %cst_1 : f32 to vector<16x1xf32>
    %5 = arith.divf %3, %4 : vector<16x1xf32>
    %6 = vector.broadcast %5 : vector<16x1xf32> to vector<16x128xf32>
    %7 = arith.subf %1, %6 : vector<16x128xf32>
    %8 = arith.mulf %7, %7 : vector<16x128xf32>
    %cst_2 = arith.constant dense<0.000000e+00> : vector<16xf32>
    %9 = vector.multi_reduction <add>, %8, %cst_2 [1] : vector<16x128xf32> to vector<16xf32>
    %10 = vector.shape_cast %9 : vector<16xf32> to vector<16x1xf32>
    %cst_3 = arith.constant 1.280000e+02 : f32
    %11 = vector.broadcast %cst_3 : f32 to vector<16x1xf32>
    %12 = arith.divf %10, %11 : vector<16x1xf32>
    %13 = vector.broadcast %5 : vector<16x1xf32> to vector<16x128xf32>
    %14 = arith.subf %1, %13 : vector<16x128xf32>
    %cst_4 = arith.constant 9.99999974E-6 : f32
    %15 = vector.broadcast %cst_4 : f32 to vector<16x1xf32>
    %16 = arith.addf %12, %15 : vector<16x1xf32>
    %17 = math.rsqrt %16 : vector<16x1xf32>
    %18 = vector.broadcast %17 : vector<16x1xf32> to vector<16x128xf32>
    %19 = arith.mulf %14, %18 : vector<16x128xf32>
    %c0_5 = arith.constant 0 : index
    %c0_6 = arith.constant 0 : index
    %20 = vector.load %arg2[%c0_5, %c0_6] : memref<1x128xf32, #tpu.memory_space<vmem>>, vector<1x128xf32>
    %21 = vector.broadcast %20 : vector<1x128xf32> to vector<16x128xf32>
    %22 = arith.mulf %19, %21 : vector<16x128xf32>
    %c0_7 = arith.constant 0 : index
    %c0_8 = arith.constant 0 : index
    %23 = vector.load %arg3[%c0_7, %c0_8] : memref<1x128xf32, #tpu.memory_space<vmem>>, vector<1x128xf32>
    %24 = vector.broadcast %23 : vector<1x128xf32> to vector<16x128xf32>
    %25 = arith.addf %22, %24 : vector<16x128xf32>
    %26 = arith.truncf %25 : vector<16x128xf32> to vector<16x128xbf16>
    %c0_9 = arith.constant 0 : index
    %c0_10 = arith.constant 0 : index
    %27 = vector.load %arg4[%c0_9, %c0_10] : memref<16x128xbf16, #tpu.memory_space<vmem>>, vector<16x128xbf16>
    tpu.vector_store %arg4[%c0_9, %c0_10], %26 {strides = array<i32>} : memref<16x128xbf16, #tpu.memory_space<vmem>>, vector<16x128xbf16>,
    return
  }
  func.func @transform_0(%arg0: i32) -> (i32, i32) {
    %c0_i32 = arith.constant 0 : i32
    %c0_i32_0 = arith.constant 0 : i32
    return %arg0, %c0_i32 : i32, i32
  }
  func.func @transform_1(%arg0: i32) -> (i32, i32) {
    %c0_i32 = arith.constant 0 : i32
    %c0_i32_0 = arith.constant 0 : i32
    %c0_i32_1 = arith.constant 0 : i32
    return %c0_i32, %c0_i32_0 : i32, i32
  }
  func.func @transform_2(%arg0: i32) -> (i32, i32) {
    %c0_i32 = arith.constant 0 : i32
    %c0_i32_0 = arith.constant 0 : i32
    %c0_i32_1 = arith.constant 0 : i32
    return %c0_i32, %c0_i32_0 : i32, i32
  }
  func.func @transform_3(%arg0: i32) -> (i32, i32) {
    %c0_i32 = arith.constant 0 : i32
    %c0_i32_0 = arith.constant 0 : i32
    return %arg0, %c0_i32 : i32, i32
  }
}

module attributes {stable_mosaic.version = 11 : i64} {
  func.func @_ffn_block_kernel(%arg0: i32, %arg1: memref<16x128xbf16, #tpu.memory_space<vmem>>, %arg2: memref<128x256xbf16, #tpu.memory_space<vmem>>, %arg3: memref<1x256xf32, #tpu.memory_space<vmem>>, %arg4: memref<256x128xbf16, #tpu.memory_space<vmem>>, %arg5: memref<1x128xf32, #tpu.memory_space<vmem>>, %arg6: memref<1x128xf32, #tpu.memory_space<vmem>>, %arg7: memref<1x128xf32, #tpu.memory_space<vmem>>, %arg8: memref<16x128xbf16, #tpu.memory_space<vmem>>) attributes {dimension_semantics = [#tpu.dimension_semantics<parallel>], iteration_bounds = array<i64: 2>, scalar_prefetch = 0 : i64, scratch_operands = 0 : i64, tpu.core_type = #tpu.core_type<tc>, window_params = [{transform_indices = @transform_0, window_bounds = array<i64: 16, 128>}, {pipeline_mode = #tpu.pipeline_mode<synchronous>, transform_indices = @transform_1, window_bounds = array<i64: 128, 256>}, {pipeline_mode = #tpu.pipeline_mode<synchronous>, transform_indices = @transform_2, window_bounds = array<i64: 1, 256>}, {pipeline_mode = #tpu.pipeline_mode<synchronous>, transform_indices = @transform_3, window_bounds = array<i64: 256, 128>}, {pipeline_mode = #tpu.pipeline_mode<synchronous>, transform_indices = @transform_4, window_bounds = array<i64: 1, 128>}, {pipeline_mode = #tpu.pipeline_mode<synchronous>, transform_indices = @transform_5, window_bounds = array<i64: 1, 128>}, {pipeline_mode = #tpu.pipeline_mode<synchronous>, transform_indices = @transform_6, window_bounds = array<i64: 1, 128>}, {transform_indices = @transform_7, window_bounds = array<i64: 16, 128>}]} {
    %c0 = arith.constant 0 : index
    %c0_0 = arith.constant 0 : index
    %0 = vector.load %arg1[%c0, %c0_0] : memref<16x128xbf16, #tpu.memory_space<vmem>>, vector<16x128xbf16>
    %c0_1 = arith.constant 0 : index
    %c0_2 = arith.constant 0 : index
    %1 = vector.load %arg2[%c0_1, %c0_2] : memref<128x256xbf16, #tpu.memory_space<vmem>>, vector<128x256xbf16>
    %cst = arith.constant dense<0.000000e+00> : vector<16x256xf32>
    %2 = tpu.matmul %0, %1, %cst {dimension_numbers = #tpu.dot_dimension_numbers<[1], [0], [0], [1], [0, 0, 1, 1], [], []>} : vector<16x128xbf16>, vector<128x256xbf16>, vector<16x256xf32> -> vector<16x256xf32>
    %c0_3 = arith.constant 0 : index
    %c0_4 = arith.constant 0 : index
    %3 = vector.load %arg3[%c0_3, %c0_4] : memref<1x256xf32, #tpu.memory_space<vmem>>, vector<1x256xf32>
    %4 = vector.broadcast %3 : vector<1x256xf32> to vector<16x256xf32>
    %5 = arith.addf %2, %4 : vector<16x256xf32>
    %6 = arith.mulf %5, %5 : vector<16x256xf32>
    %7 = arith.mulf %5, %6 : vector<16x256xf32>
    %cst_5 = arith.constant 4.471500e-02 : f32
    %8 = vector.broadcast %cst_5 : f32 to vector<16x256xf32>
    %9 = arith.mulf %8, %7 : vector<16x256xf32>
    %10 = arith.addf %5, %9 : vector<16x256xf32>
    %cst_6 = arith.constant 0.797884583 : f32
    %11 = vector.broadcast %cst_6 : f32 to vector<16x256xf32>
    %12 = arith.mulf %11, %10 : vector<16x256xf32>
    %13 = math.tanh %12 : vector<16x256xf32>
    %cst_7 = arith.constant 1.000000e+00 : f32
    %14 = vector.broadcast %cst_7 : f32 to vector<16x256xf32>
    %15 = arith.addf %14, %13 : vector<16x256xf32>
    %cst_8 = arith.constant 5.000000e-01 : f32
    %16 = vector.broadcast %cst_8 : f32 to vector<16x256xf32>
    %17 = arith.mulf %16, %15 : vector<16x256xf32>
    %18 = arith.mulf %5, %17 : vector<16x256xf32>
    %19 = arith.truncf %18 : vector<16x256xf32> to vector<16x256xbf16>
    %c0_9 = arith.constant 0 : index
    %c0_10 = arith.constant 0 : index
    %20 = vector.load %arg4[%c0_9, %c0_10] : memref<256x128xbf16, #tpu.memory_space<vmem>>, vector<256x128xbf16>
    %cst_11 = arith.constant dense<0.000000e+00> : vector<16x128xf32>
    %21 = tpu.matmul %19, %20, %cst_11 {dimension_numbers = #tpu.dot_dimension_numbers<[1], [0], [0], [1], [0, 0, 1, 1], [], []>} : vector<16x256xbf16>, vector<256x128xbf16>, vector<16x128xf32> -> vector<16x128xf32>
    %c0_12 = arith.constant 0 : index
    %c0_13 = arith.constant 0 : index
    %22 = vector.load %arg5[%c0_12, %c0_13] : memref<1x128xf32, #tpu.memory_space<vmem>>, vector<1x128xf32>
    %23 = vector.broadcast %22 : vector<1x128xf32> to vector<16x128xf32>
    %24 = arith.addf %21, %23 : vector<16x128xf32>
    %25 = arith.extf %0 : vector<16x128xbf16> to vector<16x128xf32>
    %26 = arith.addf %24, %25 : vector<16x128xf32>
    %cst_14 = arith.constant dense<0.000000e+00> : vector<16xf32>
    %27 = vector.multi_reduction <add>, %26, %cst_14 [1] : vector<16x128xf32> to vector<16xf32>
    %28 = vector.shape_cast %27 : vector<16xf32> to vector<16x1xf32>
    %cst_15 = arith.constant 1.280000e+02 : f32
    %29 = vector.broadcast %cst_15 : f32 to vector<16x1xf32>
    %30 = arith.divf %28, %29 : vector<16x1xf32>
    %31 = vector.broadcast %30 : vector<16x1xf32> to vector<16x128xf32>
    %32 = arith.subf %26, %31 : vector<16x128xf32>
    %33 = arith.mulf %32, %32 : vector<16x128xf32>
    %cst_16 = arith.constant dense<0.000000e+00> : vector<16xf32>
    %34 = vector.multi_reduction <add>, %33, %cst_16 [1] : vector<16x128xf32> to vector<16xf32>
    %35 = vector.shape_cast %34 : vector<16xf32> to vector<16x1xf32>
    %cst_17 = arith.constant 1.280000e+02 : f32
    %36 = vector.broadcast %cst_17 : f32 to vector<16x1xf32>
    %37 = arith.divf %35, %36 : vector<16x1xf32>
    %38 = vector.broadcast %30 : vector<16x1xf32> to vector<16x128xf32>
    %39 = arith.subf %26, %38 : vector<16x128xf32>
    %cst_18 = arith.constant 9.99999974E-6 : f32
    %40 = vector.broadcast %cst_18 : f32 to vector<16x1xf32>
    %41 = arith.addf %37, %40 : vector<16x1xf32>
    %42 = math.rsqrt %41 : vector<16x1xf32>
    %43 = vector.broadcast %42 : vector<16x1xf32> to vector<16x128xf32>
    %44 = arith.mulf %39, %43 : vector<16x128xf32>
    %c0_19 = arith.constant 0 : index
    %c0_20 = arith.constant 0 : index
    %45 = vector.load %arg6[%c0_19, %c0_20] : memref<1x128xf32, #tpu.memory_space<vmem>>, vector<1x128xf32>
    %46 = vector.broadcast %45 : vector<1x128xf32> to vector<16x128xf32>
    %47 = arith.mulf %44, %46 : vector<16x128xf32>
    %c0_21 = arith.constant 0 : index
    %c0_22 = arith.constant 0 : index
    %48 = vector.load %arg7[%c0_21, %c0_22] : memref<1x128xf32, #tpu.memory_space<vmem>>, vector<1x128xf32>
    %49 = vector.broadcast %48 : vector<1x128xf32> to vector<16x128xf32>
    %50 = arith.addf %47, %49 : vector<16x128xf32>
    %51 = arith.truncf %50 : vector<16x128xf32> to vector<16x128xbf16>
    %c0_23 = arith.constant 0 : index
    %c0_24 = arith.constant 0 : index
    %52 = vector.load %arg8[%c0_23, %c0_24] : memref<16x128xbf16, #tpu.memory_space<vmem>>, vector<16x128xbf16>
    tpu.vector_store %arg8[%c0_23, %c0_24], %51 {strides = array<i32>} : memref<16x128xbf16, #tpu.memory_space<vmem>>, vector<16x128xbf16>,
    return
  }
  func.func @transform_0(%arg0: i32) -> (i32, i32) {
    %c0_i32 = arith.constant 0 : i32
    %c0_i32_0 = arith.constant 0 : i32
    return %arg0, %c0_i32 : i32, i32
  }
  func.func @transform_1(%arg0: i32) -> (i32, i32) {
    %c0_i32 = arith.constant 0 : i32
    %c0_i32_0 = arith.constant 0 : i32
    %c0_i32_1 = arith.constant 0 : i32
    return %c0_i32, %c0_i32_0 : i32, i32
  }
  func.func @transform_2(%arg0: i32) -> (i32, i32) {
    %c0_i32 = arith.constant 0 : i32
    %c0_i32_0 = arith.constant 0 : i32
    %c0_i32_1 = arith.constant 0 : i32
    return %c0_i32, %c0_i32_0 : i32, i32
  }
  func.func @transform_3(%arg0: i32) -> (i32, i32) {
    %c0_i32 = arith.constant 0 : i32
    %c0_i32_0 = arith.constant 0 : i32
    %c0_i32_1 = arith.constant 0 : i32
    return %c0_i32, %c0_i32_0 : i32, i32
  }
  func.func @transform_4(%arg0: i32) -> (i32, i32) {
    %c0_i32 = arith.constant 0 : i32
    %c0_i32_0 = arith.constant 0 : i32
    %c0_i32_1 = arith.constant 0 : i32
    return %c0_i32, %c0_i32_0 : i32, i32
  }
  func.func @transform_5(%arg0: i32) -> (i32, i32) {
    %c0_i32 = arith.constant 0 : i32
    %c0_i32_0 = arith.constant 0 : i32
    %c0_i32_1 = arith.constant 0 : i32
    return %c0_i32, %c0_i32_0 : i32, i32
  }
  func.func @transform_6(%arg0: i32) -> (i32, i32) {
    %c0_i32 = arith.constant 0 : i32
    %c0_i32_0 = arith.constant 0 : i32
    %c0_i32_1 = arith.constant 0 : i32
    return %c0_i32, %c0_i32_0 : i32, i32
  }
  func.func @transform_7(%arg0: i32) -> (i32, i32) {
    %c0_i32 = arith.constant 0 : i32
    %c0_i32_0 = arith.constant 0 : i32
    return %arg0, %c0_i32 : i32, i32
  }
}

module attributes {stable_mosaic.version = 11 : i64} {
  func.func @_matmul_kernel(%arg0: i32, %arg1: i32, %arg2: i32, %arg3: memref<16x128xbf16, #tpu.memory_space<vmem>>, %arg4: memref<128x256xbf16, #tpu.memory_space<vmem>>, %arg5: memref<1x256xf32, #tpu.memory_space<vmem>>, %arg6: memref<16x256xbf16, #tpu.memory_space<vmem>>, %arg7: memref<16x256xf32, #tpu.memory_space<vmem>>) attributes {dimension_semantics = [#tpu.dimension_semantics<parallel>, #tpu.dimension_semantics<parallel>, #tpu.dimension_semantics<arbitrary>], iteration_bounds = array<i64: 2, 1, 1>, scalar_prefetch = 0 : i64, scratch_operands = 1 : i64, tpu.core_type = #tpu.core_type<tc>, window_params = [{transform_indices = @transform_0, window_bounds = array<i64: 16, 128>}, {transform_indices = @transform_1, window_bounds = array<i64: 128, 256>}, {transform_indices = @transform_2, window_bounds = array<i64: 1, 256>}, {transform_indices = @transform_3, window_bounds = array<i64: 16, 256>}]} {
    %c0_i32 = arith.constant 0 : i32
    %0 = arith.cmpi eq, %arg2, %c0_i32 : i32
    %1 = arith.extui %0 : i1 to i32
    %c0_i32_0 = arith.constant 0 : i32
    %2 = arith.cmpi ne, %1, %c0_i32_0 : i32
    scf.if %2 {
      %cst_10 = arith.constant 0.000000e+00 : f32
      %12 = vector.broadcast %cst_10 : f32 to vector<16x256xf32>
      %c0_11 = arith.constant 0 : index
      %c0_12 = arith.constant 0 : index
      %13 = vector.load %arg7[%c0_11, %c0_12] : memref<16x256xf32, #tpu.memory_space<vmem>>, vector<16x256xf32>
      tpu.vector_store %arg7[%c0_11, %c0_12], %12 {strides = array<i32>} : memref<16x256xf32, #tpu.memory_space<vmem>>, vector<16x256xf32>,
    } else {
    }
    %c0 = arith.constant 0 : index
    %c0_1 = arith.constant 0 : index
    %3 = vector.load %arg7[%c0, %c0_1] : memref<16x256xf32, #tpu.memory_space<vmem>>, vector<16x256xf32>
    %c0_2 = arith.constant 0 : index
    %c0_3 = arith.constant 0 : index
    %4 = vector.load %arg3[%c0_2, %c0_3] : memref<16x128xbf16, #tpu.memory_space<vmem>>, vector<16x128xbf16>
    %c0_4 = arith.constant 0 : index
    %c0_5 = arith.constant 0 : index
    %5 = vector.load %arg4[%c0_4, %c0_5] : memref<128x256xbf16, #tpu.memory_space<vmem>>, vector<128x256xbf16>
    %cst = arith.constant dense<0.000000e+00> : vector<16x256xf32>
    %6 = tpu.matmul %4, %5, %cst {dimension_numbers = #tpu.dot_dimension_numbers<[1], [0], [0], [1], [0, 0, 1, 1], [], []>} : vector<16x128xbf16>, vector<128x256xbf16>, vector<16x256xf32> -> vector<16x256xf32>
    %7 = arith.addf %3, %6 : vector<16x256xf32>
    %c0_6 = arith.constant 0 : index
    %c0_7 = arith.constant 0 : index
    %8 = vector.load %arg7[%c0_6, %c0_7] : memref<16x256xf32, #tpu.memory_space<vmem>>, vector<16x256xf32>
    tpu.vector_store %arg7[%c0_6, %c0_7], %7 {strides = array<i32>} : memref<16x256xf32, #tpu.memory_space<vmem>>, vector<16x256xf32>,
    %c0_i32_8 = arith.constant 0 : i32
    %9 = arith.cmpi eq, %arg2, %c0_i32_8 : i32
    %10 = arith.extui %9 : i1 to i32
    %c0_i32_9 = arith.constant 0 : i32
    %11 = arith.cmpi ne, %10, %c0_i32_9 : i32
    scf.if %11 {
      %c0_10 = arith.constant 0 : index
      %c0_11 = arith.constant 0 : index
      %12 = vector.load %arg7[%c0_10, %c0_11] : memref<16x256xf32, #tpu.memory_space<vmem>>, vector<16x256xf32>
      %c0_12 = arith.constant 0 : index
      %c0_13 = arith.constant 0 : index
      %13 = vector.load %arg5[%c0_12, %c0_13] : memref<1x256xf32, #tpu.memory_space<vmem>>, vector<1x256xf32>
      %14 = vector.broadcast %13 : vector<1x256xf32> to vector<16x256xf32>
      %15 = arith.addf %12, %14 : vector<16x256xf32>
      %16 = arith.truncf %15 : vector<16x256xf32> to vector<16x256xbf16>
      %c0_14 = arith.constant 0 : index
      %c0_15 = arith.constant 0 : index
      %17 = vector.load %arg6[%c0_14, %c0_15] : memref<16x256xbf16, #tpu.memory_space<vmem>>, vector<16x256xbf16>
      tpu.vector_store %arg6[%c0_14, %c0_15], %16 {strides = array<i32>} : memref<16x256xbf16, #tpu.memory_space<vmem>>, vector<16x256xbf16>,
    } else {
    }
    return
  }
  func.func @transform_0(%arg0: i32, %arg1: i32, %arg2: i32) -> (i32, i32) {
    %c0_i32 = arith.constant 0 : i32
    return %arg0, %arg2 : i32, i32
  }
  func.func @transform_1(%arg0: i32, %arg1: i32, %arg2: i32) -> (i32, i32) {
    %c0_i32 = arith.constant 0 : i32
    return %arg2, %arg1 : i32, i32
  }
  func.func @transform_2(%arg0: i32, %arg1: i32, %arg2: i32) -> (i32, i32) {
    %c0_i32 = arith.constant 0 : i32
    %c0_i32_0 = arith.constant 0 : i32
    return %c0_i32, %arg1 : i32, i32
  }
  func.func @transform_3(%arg0: i32, %arg1: i32, %arg2: i32) -> (i32, i32) {
    %c0_i32 = arith.constant 0 : i32
    return %arg0, %arg1 : i32, i32
  }
}

module attributes {stable_mosaic.version = 11 : i64} {
  func.func @_matmul_kernel(%arg0: i32, %arg1: i32, %arg2: i32, %arg3: memref<8x128xbf16, #tpu.memory_space<vmem>>, %arg4: memref<128x128xbf16, #tpu.memory_space<vmem>>, %arg5: memref<1x128xf32, #tpu.memory_space<vmem>>, %arg6: memref<8x128xbf16, #tpu.memory_space<vmem>>, %arg7: memref<8x128xf32, #tpu.memory_space<vmem>>) attributes {dimension_semantics = [#tpu.dimension_semantics<parallel>, #tpu.dimension_semantics<parallel>, #tpu.dimension_semantics<arbitrary>], iteration_bounds = array<i64: 2, 3, 1>, scalar_prefetch = 0 : i64, scratch_operands = 1 : i64, tpu.core_type = #tpu.core_type<tc>, window_params = [{transform_indices = @transform_0, window_bounds = array<i64: 8, 128>}, {transform_indices = @transform_1, window_bounds = array<i64: 128, 128>}, {transform_indices = @transform_2, window_bounds = array<i64: 1, 128>}, {transform_indices = @transform_3, window_bounds = array<i64: 8, 128>}]} {
    %c0_i32 = arith.constant 0 : i32
    %0 = arith.cmpi eq, %arg2, %c0_i32 : i32
    %1 = arith.extui %0 : i1 to i32
    %c0_i32_0 = arith.constant 0 : i32
    %2 = arith.cmpi ne, %1, %c0_i32_0 : i32
    scf.if %2 {
      %cst_10 = arith.constant 0.000000e+00 : f32
      %12 = vector.broadcast %cst_10 : f32 to vector<8x128xf32>
      %c0_11 = arith.constant 0 : index
      %c0_12 = arith.constant 0 : index
      %13 = vector.load %arg7[%c0_11, %c0_12] : memref<8x128xf32, #tpu.memory_space<vmem>>, vector<8x128xf32>
      tpu.vector_store %arg7[%c0_11, %c0_12], %12 {strides = array<i32>} : memref<8x128xf32, #tpu.memory_space<vmem>>, vector<8x128xf32>,
    } else {
    }
    %c0 = arith.constant 0 : index
    %c0_1 = arith.constant 0 : index
    %3 = vector.load %arg7[%c0, %c0_1] : memref<8x128xf32, #tpu.memory_space<vmem>>, vector<8x128xf32>
    %c0_2 = arith.constant 0 : index
    %c0_3 = arith.constant 0 : index
    %4 = vector.load %arg3[%c0_2, %c0_3] : memref<8x128xbf16, #tpu.memory_space<vmem>>, vector<8x128xbf16>
    %c0_4 = arith.constant 0 : index
    %c0_5 = arith.constant 0 : index
    %5 = vector.load %arg4[%c0_4, %c0_5] : memref<128x128xbf16, #tpu.memory_space<vmem>>, vector<128x128xbf16>
    %cst = arith.constant dense<0.000000e+00> : vector<8x128xf32>
    %6 = tpu.matmul %4, %5, %cst {dimension_numbers = #tpu.dot_dimension_numbers<[1], [0], [0], [1], [0, 0, 1, 1], [], []>} : vector<8x128xbf16>, vector<128x128xbf16>, vector<8x128xf32> -> vector<8x128xf32>
    %7 = arith.addf %3, %6 : vector<8x128xf32>
    %c0_6 = arith.constant 0 : index
    %c0_7 = arith.constant 0 : index
    %8 = vector.load %arg7[%c0_6, %c0_7] : memref<8x128xf32, #tpu.memory_space<vmem>>, vector<8x128xf32>
    tpu.vector_store %arg7[%c0_6, %c0_7], %7 {strides = array<i32>} : memref<8x128xf32, #tpu.memory_space<vmem>>, vector<8x128xf32>,
    %c0_i32_8 = arith.constant 0 : i32
    %9 = arith.cmpi eq, %arg2, %c0_i32_8 : i32
    %10 = arith.extui %9 : i1 to i32
    %c0_i32_9 = arith.constant 0 : i32
    %11 = arith.cmpi ne, %10, %c0_i32_9 : i32
    scf.if %11 {
      %c0_10 = arith.constant 0 : index
      %c0_11 = arith.constant 0 : index
      %12 = vector.load %arg7[%c0_10, %c0_11] : memref<8x128xf32, #tpu.memory_space<vmem>>, vector<8x128xf32>
      %c0_12 = arith.constant 0 : index
      %c0_13 = arith.constant 0 : index
      %13 = vector.load %arg5[%c0_12, %c0_13] : memref<1x128xf32, #tpu.memory_space<vmem>>, vector<1x128xf32>
      %14 = vector.broadcast %13 : vector<1x128xf32> to vector<8x128xf32>
      %15 = arith.addf %12, %14 : vector<8x128xf32>
      %16 = arith.truncf %15 : vector<8x128xf32> to vector<8x128xbf16>
      %c0_14 = arith.constant 0 : index
      %c0_15 = arith.constant 0 : index
      %17 = vector.load %arg6[%c0_14, %c0_15] : memref<8x128xbf16, #tpu.memory_space<vmem>>, vector<8x128xbf16>
      tpu.vector_store %arg6[%c0_14, %c0_15], %16 {strides = array<i32>} : memref<8x128xbf16, #tpu.memory_space<vmem>>, vector<8x128xbf16>,
    } else {
    }
    return
  }
  func.func @transform_0(%arg0: i32, %arg1: i32, %arg2: i32) -> (i32, i32) {
    %c0_i32 = arith.constant 0 : i32
    return %arg0, %arg2 : i32, i32
  }
  func.func @transform_1(%arg0: i32, %arg1: i32, %arg2: i32) -> (i32, i32) {
    %c0_i32 = arith.constant 0 : i32
    return %arg2, %arg1 : i32, i32
  }
  func.func @transform_2(%arg0: i32, %arg1: i32, %arg2: i32) -> (i32, i32) {
    %c0_i32 = arith.constant 0 : i32
    %c0_i32_0 = arith.constant 0 : i32
    return %c0_i32, %arg1 : i32, i32
  }
  func.func @transform_3(%arg0: i32, %arg1: i32, %arg2: i32) -> (i32, i32) {
    %c0_i32 = arith.constant 0 : i32
    return %arg0, %arg1 : i32, i32
  }
}

module attributes {stable_mosaic.version = 11 : i64} {
  func.func @_matmul_kernel(%arg0: i32, %arg1: i32, %arg2: i32, %arg3: memref<8x128xbf16, #tpu.memory_space<vmem>>, %arg4: memref<128x128xbf16, #tpu.memory_space<vmem>>, %arg5: memref<1x128xf32, #tpu.memory_space<vmem>>, %arg6: memref<8x128xbf16, #tpu.memory_space<vmem>>, %arg7: memref<8x128xf32, #tpu.memory_space<vmem>>) attributes {dimension_semantics = [#tpu.dimension_semantics<parallel>, #tpu.dimension_semantics<parallel>, #tpu.dimension_semantics<arbitrary>], iteration_bounds = array<i64: 2, 1, 1>, scalar_prefetch = 0 : i64, scratch_operands = 1 : i64, tpu.core_type = #tpu.core_type<tc>, window_params = [{transform_indices = @transform_0, window_bounds = array<i64: 8, 128>}, {transform_indices = @transform_1, window_bounds = array<i64: 128, 128>}, {transform_indices = @transform_2, window_bounds = array<i64: 1, 128>}, {transform_indices = @transform_3, window_bounds = array<i64: 8, 128>}]} {
    %c0_i32 = arith.constant 0 : i32
    %0 = arith.cmpi eq, %arg2, %c0_i32 : i32
    %1 = arith.extui %0 : i1 to i32
    %c0_i32_0 = arith.constant 0 : i32
    %2 = arith.cmpi ne, %1, %c0_i32_0 : i32
    scf.if %2 {
      %cst_10 = arith.constant 0.000000e+00 : f32
      %12 = vector.broadcast %cst_10 : f32 to vector<8x128xf32>
      %c0_11 = arith.constant 0 : index
      %c0_12 = arith.constant 0 : index
      %13 = vector.load %arg7[%c0_11, %c0_12] : memref<8x128xf32, #tpu.memory_space<vmem>>, vector<8x128xf32>
      tpu.vector_store %arg7[%c0_11, %c0_12], %12 {strides = array<i32>} : memref<8x128xf32, #tpu.memory_space<vmem>>, vector<8x128xf32>,
    } else {
    }
    %c0 = arith.constant 0 : index
    %c0_1 = arith.constant 0 : index
    %3 = vector.load %arg7[%c0, %c0_1] : memref<8x128xf32, #tpu.memory_space<vmem>>, vector<8x128xf32>
    %c0_2 = arith.constant 0 : index
    %c0_3 = arith.constant 0 : index
    %4 = vector.load %arg3[%c0_2, %c0_3] : memref<8x128xbf16, #tpu.memory_space<vmem>>, vector<8x128xbf16>
    %c0_4 = arith.constant 0 : index
    %c0_5 = arith.constant 0 : index
    %5 = vector.load %arg4[%c0_4, %c0_5] : memref<128x128xbf16, #tpu.memory_space<vmem>>, vector<128x128xbf16>
    %cst = arith.constant dense<0.000000e+00> : vector<8x128xf32>
    %6 = tpu.matmul %4, %5, %cst {dimension_numbers = #tpu.dot_dimension_numbers<[1], [0], [0], [1], [0, 0, 1, 1], [], []>} : vector<8x128xbf16>, vector<128x128xbf16>, vector<8x128xf32> -> vector<8x128xf32>
    %7 = arith.addf %3, %6 : vector<8x128xf32>
    %c0_6 = arith.constant 0 : index
    %c0_7 = arith.constant 0 : index
    %8 = vector.load %arg7[%c0_6, %c0_7] : memref<8x128xf32, #tpu.memory_space<vmem>>, vector<8x128xf32>
    tpu.vector_store %arg7[%c0_6, %c0_7], %7 {strides = array<i32>} : memref<8x128xf32, #tpu.memory_space<vmem>>, vector<8x128xf32>,
    %c0_i32_8 = arith.constant 0 : i32
    %9 = arith.cmpi eq, %arg2, %c0_i32_8 : i32
    %10 = arith.extui %9 : i1 to i32
    %c0_i32_9 = arith.constant 0 : i32
    %11 = arith.cmpi ne, %10, %c0_i32_9 : i32
    scf.if %11 {
      %c0_10 = arith.constant 0 : index
      %c0_11 = arith.constant 0 : index
      %12 = vector.load %arg7[%c0_10, %c0_11] : memref<8x128xf32, #tpu.memory_space<vmem>>, vector<8x128xf32>
      %c0_12 = arith.constant 0 : index
      %c0_13 = arith.constant 0 : index
      %13 = vector.load %arg5[%c0_12, %c0_13] : memref<1x128xf32, #tpu.memory_space<vmem>>, vector<1x128xf32>
      %14 = vector.broadcast %13 : vector<1x128xf32> to vector<8x128xf32>
      %15 = arith.addf %12, %14 : vector<8x128xf32>
      %16 = arith.truncf %15 : vector<8x128xf32> to vector<8x128xbf16>
      %c0_14 = arith.constant 0 : index
      %c0_15 = arith.constant 0 : index
      %17 = vector.load %arg6[%c0_14, %c0_15] : memref<8x128xbf16, #tpu.memory_space<vmem>>, vector<8x128xbf16>
      tpu.vector_store %arg6[%c0_14, %c0_15], %16 {strides = array<i32>} : memref<8x128xbf16, #tpu.memory_space<vmem>>, vector<8x128xbf16>,
    } else {
    }
    return
  }
  func.func @transform_0(%arg0: i32, %arg1: i32, %arg2: i32) -> (i32, i32) {
    %c0_i32 = arith.constant 0 : i32
    return %arg0, %arg2 : i32, i32
  }
  func.func @transform_1(%arg0: i32, %arg1: i32, %arg2: i32) -> (i32, i32) {
    %c0_i32 = arith.constant 0 : i32
    return %arg2, %arg1 : i32, i32
  }
  func.func @transform_2(%arg0: i32, %arg1: i32, %arg2: i32) -> (i32, i32) {
    %c0_i32 = arith.constant 0 : i32
    %c0_i32_0 = arith.constant 0 : i32
    return %c0_i32, %arg1 : i32, i32
  }
  func.func @transform_3(%arg0: i32, %arg1: i32, %arg2: i32) -> (i32, i32) {
    %c0_i32 = arith.constant 0 : i32
    return %arg0, %arg1 : i32, i32
  }
}

module attributes {stable_mosaic.version = 11 : i64} {
  func.func @_mha_block_kernel(%arg0: i32, %arg1: i32, %arg2: memref<1x8x128xbf16, #tpu.memory_space<vmem>>, %arg3: memref<1x8x128xbf16, #tpu.memory_space<vmem>>, %arg4: memref<1x8x128xbf16, #tpu.memory_space<vmem>>, %arg5: memref<1x1x8xf32, #tpu.memory_space<vmem>>, %arg6: memref<128x128xbf16, #tpu.memory_space<vmem>>, %arg7: memref<1x128xf32, #tpu.memory_space<vmem>>, %arg8: memref<1x8x128xbf16, #tpu.memory_space<vmem>>, %arg9: memref<1x128xf32, #tpu.memory_space<vmem>>, %arg10: memref<1x128xf32, #tpu.memory_space<vmem>>, %arg11: memref<1x8x128xbf16, #tpu.memory_space<vmem>>) attributes {dimension_semantics = [#tpu.dimension_semantics<parallel>, #tpu.dimension_semantics<parallel>], iteration_bounds = array<i64: 2, 1>, scalar_prefetch = 0 : i64, scratch_operands = 0 : i64, tpu.core_type = #tpu.core_type<tc>, window_params = [{transform_indices = @transform_0, window_bounds = array<i64: 1, 8, 128>}, {transform_indices = @transform_1, window_bounds = array<i64: 1, 8, 128>}, {transform_indices = @transform_2, window_bounds = array<i64: 1, 8, 128>}, {transform_indices = @transform_3, window_bounds = array<i64: 1, 1, 8>}, {pipeline_mode = #tpu.pipeline_mode<synchronous>, transform_indices = @transform_4, window_bounds = array<i64: 128, 128>}, {pipeline_mode = #tpu.pipeline_mode<synchronous>, transform_indices = @transform_5, window_bounds = array<i64: 1, 128>}, {transform_indices = @transform_6, window_bounds = array<i64: 1, 8, 128>}, {pipeline_mode = #tpu.pipeline_mode<synchronous>, transform_indices = @transform_7, window_bounds = array<i64: 1, 128>}, {pipeline_mode = #tpu.pipeline_mode<synchronous>, transform_indices = @transform_8, window_bounds = array<i64: 1, 128>}, {transform_indices = @transform_9, window_bounds = array<i64: 1, 8, 128>}]} {
    %c0 = arith.constant 0 : index
    %c0_0 = arith.constant 0 : index
    %c0_1 = arith.constant 0 : index
    %0 = vector.load %arg2[%c0, %c0_0, %c0_1] : memref<1x8x128xbf16, #tpu.memory_space<vmem>>, vector<1x8x128xbf16>
    %1 = vector.shape_cast %0 : vector<1x8x128xbf16> to vector<8x128xbf16>
    %c0_2 = arith.constant 0 : index
    %c0_3 = arith.constant 0 : index
    %c0_4 = arith.constant 0 : index
    %2 = vector.load %arg3[%c0_2, %c0_3, %c0_4] : memref<1x8x128xbf16, #tpu.memory_space<vmem>>, vector<1x8x128xbf16>
    %3 = vector.shape_cast %2 : vector<1x8x128xbf16> to vector<8x128xbf16>
    %c0_5 = arith.constant 0 : index
    %c0_6 = arith.constant 0 : index
    %c0_7 = arith.constant 0 : index
    %4 = vector.load %arg4[%c0_5, %c0_6, %c0_7] : memref<1x8x128xbf16, #tpu.memory_space<vmem>>, vector<1x8x128xbf16>
    %5 = vector.shape_cast %4 : vector<1x8x128xbf16> to vector<8x128xbf16>
    %c0_8 = arith.constant 0 : index
    %c0_9 = arith.constant 0 : index
    %c0_10 = arith.constant 0 : index
    %6 = vector.load %arg5[%c0_8, %c0_9, %c0_10] : memref<1x1x8xf32, #tpu.memory_space<vmem>>, vector<1x1x8xf32>
    %7 = vector.shape_cast %6 : vector<1x1x8xf32> to vector<1x8xf32>
    %cst = arith.constant 5.000000e-01 : f32
    %8 = vector.broadcast %cst : f32 to vector<1x8xf32>
    %9 = arith.cmpf ogt, %7, %8 : vector<1x8xf32>
    %c8_i32 = arith.constant 8 : i32
    %10 = arith.muli %arg1, %c8_i32 : i32
    %11 = tpu.iota {dimensions = array<i32: 0>} : vector<8x8xi32>
    %12 = vector.broadcast %10 : i32 to vector<8x8xi32>
    %13 = arith.addi %11, %12 : vector<8x8xi32>
    %14 = tpu.iota {dimensions = array<i32: 1>} : vector<8x8xi32>
    %15 = arith.cmpi sle, %14, %13 : vector<8x8xi32>
    %16 = vector.broadcast %9 : vector<1x8xi1> to vector<8x8xi1>
    %17 = arith.andi %16, %15 : vector<8x8xi1>
    %cst_11 = arith.constant 0.000000e+00 : f32
    %cst_12 = arith.constant -1.000000e+09 : f32
    %18 = vector.broadcast %cst_11 : f32 to vector<8x8xf32>
    %19 = vector.broadcast %cst_12 : f32 to vector<8x8xf32>
    %20 = arith.select %17, %18, %19 : vector<8x8xi1>, vector<8x8xf32>
    %21 = vector.extract_strided_slice %1 {offsets = [0, 0], sizes = [8, 32], strides = [1, 1]} : vector<8x128xbf16> to vector<8x32xbf16>
    %22 = vector.extract_strided_slice %3 {offsets = [0, 0], sizes = [8, 32], strides = [1, 1]} : vector<8x128xbf16> to vector<8x32xbf16>
    %cst_13 = arith.constant dense<0.000000e+00> : vector<8x8xf32>
    %23 = tpu.matmul %21, %22, %cst_13 {dimension_numbers = #tpu.dot_dimension_numbers<[1], [1], [0], [0], [0, 0, 1, 0], [], []>} : vector<8x32xbf16>, vector<8x32xbf16>, vector<8x8xf32> -> vector<8x8xf32>
    %cst_14 = arith.constant 0.176776692 : f32
    %24 = vector.broadcast %cst_14 : f32 to vector<8x8xf32>
    %25 = arith.mulf %23, %24 : vector<8x8xf32>
    %26 = arith.addf %25, %20 : vector<8x8xf32>
    %cst_15 = arith.constant dense<0xFF800000> : vector<8xf32>
    %27 = vector.multi_reduction <maximumf>, %26, %cst_15 [1] : vector<8x8xf32> to vector<8xf32>
    %28 = vector.shape_cast %27 : vector<8xf32> to vector<8x1xf32>
    %29 = vector.broadcast %28 : vector<8x1xf32> to vector<8x8xf32>
    %30 = arith.subf %26, %29 : vector<8x8xf32>
    %31 = math.exp %30 : vector<8x8xf32>
    %cst_16 = arith.constant dense<0.000000e+00> : vector<8xf32>
    %32 = vector.multi_reduction <add>, %31, %cst_16 [1] : vector<8x8xf32> to vector<8xf32>
    %33 = vector.shape_cast %32 : vector<8xf32> to vector<8x1xf32>
    %34 = tpu.reciprocal %33 {approx = true} : vector<8x1xf32> -> vector<8x1xf32>
    %35 = vector.broadcast %34 : vector<8x1xf32> to vector<8x8xf32>
    %36 = arith.mulf %31, %35 : vector<8x8xf32>
    %37 = arith.truncf %36 : vector<8x8xf32> to vector<8x8xbf16>
    %38 = vector.extract_strided_slice %5 {offsets = [0, 0], sizes = [8, 32], strides = [1, 1]} : vector<8x128xbf16> to vector<8x32xbf16>
    %cst_17 = arith.constant dense<0.000000e+00> : vector<8x32xf32>
    %39 = tpu.matmul %37, %38, %cst_17 {dimension_numbers = #tpu.dot_dimension_numbers<[1], [0], [0], [1], [0, 0, 1, 1], [], []>} : vector<8x8xbf16>, vector<8x32xbf16>, vector<8x32xf32> -> vector<8x32xf32>
    %40 = vector.extract_strided_slice %1 {offsets = [0, 32], sizes = [8, 32], strides = [1, 1]} : vector<8x128xbf16> to vector<8x32xbf16>
    %41 = vector.extract_strided_slice %3 {offsets = [0, 32], sizes = [8, 32], strides = [1, 1]} : vector<8x128xbf16> to vector<8x32xbf16>
    %cst_18 = arith.constant dense<0.000000e+00> : vector<8x8xf32>
    %42 = tpu.matmul %40, %41, %cst_18 {dimension_numbers = #tpu.dot_dimension_numbers<[1], [1], [0], [0], [0, 0, 1, 0], [], []>} : vector<8x32xbf16>, vector<8x32xbf16>, vector<8x8xf32> -> vector<8x8xf32>
    %cst_19 = arith.constant 0.176776692 : f32
    %43 = vector.broadcast %cst_19 : f32 to vector<8x8xf32>
    %44 = arith.mulf %42, %43 : vector<8x8xf32>
    %45 = arith.addf %44, %20 : vector<8x8xf32>
    %cst_20 = arith.constant dense<0xFF800000> : vector<8xf32>
    %46 = vector.multi_reduction <maximumf>, %45, %cst_20 [1] : vector<8x8xf32> to vector<8xf32>
    %47 = vector.shape_cast %46 : vector<8xf32> to vector<8x1xf32>
    %48 = vector.broadcast %47 : vector<8x1xf32> to vector<8x8xf32>
    %49 = arith.subf %45, %48 : vector<8x8xf32>
    %50 = math.exp %49 : vector<8x8xf32>
    %cst_21 = arith.constant dense<0.000000e+00> : vector<8xf32>
    %51 = vector.multi_reduction <add>, %50, %cst_21 [1] : vector<8x8xf32> to vector<8xf32>
    %52 = vector.shape_cast %51 : vector<8xf32> to vector<8x1xf32>
    %53 = tpu.reciprocal %52 {approx = true} : vector<8x1xf32> -> vector<8x1xf32>
    %54 = vector.broadcast %53 : vector<8x1xf32> to vector<8x8xf32>
    %55 = arith.mulf %50, %54 : vector<8x8xf32>
    %56 = arith.truncf %55 : vector<8x8xf32> to vector<8x8xbf16>
    %57 = vector.extract_strided_slice %5 {offsets = [0, 32], sizes = [8, 32], strides = [1, 1]} : vector<8x128xbf16> to vector<8x32xbf16>
    %cst_22 = arith.constant dense<0.000000e+00> : vector<8x32xf32>
    %58 = tpu.matmul %56, %57, %cst_22 {dimension_numbers = #tpu.dot_dimension_numbers<[1], [0], [0], [1], [0, 0, 1, 1], [], []>} : vector<8x8xbf16>, vector<8x32xbf16>, vector<8x32xf32> -> vector<8x32xf32>
    %59 = vector.extract_strided_slice %1 {offsets = [0, 64], sizes = [8, 32], strides = [1, 1]} : vector<8x128xbf16> to vector<8x32xbf16>
    %60 = vector.extract_strided_slice %3 {offsets = [0, 64], sizes = [8, 32], strides = [1, 1]} : vector<8x128xbf16> to vector<8x32xbf16>
    %cst_23 = arith.constant dense<0.000000e+00> : vector<8x8xf32>
    %61 = tpu.matmul %59, %60, %cst_23 {dimension_numbers = #tpu.dot_dimension_numbers<[1], [1], [0], [0], [0, 0, 1, 0], [], []>} : vector<8x32xbf16>, vector<8x32xbf16>, vector<8x8xf32> -> vector<8x8xf32>
    %cst_24 = arith.constant 0.176776692 : f32
    %62 = vector.broadcast %cst_24 : f32 to vector<8x8xf32>
    %63 = arith.mulf %61, %62 : vector<8x8xf32>
    %64 = arith.addf %63, %20 : vector<8x8xf32>
    %cst_25 = arith.constant dense<0xFF800000> : vector<8xf32>
    %65 = vector.multi_reduction <maximumf>, %64, %cst_25 [1] : vector<8x8xf32> to vector<8xf32>
    %66 = vector.shape_cast %65 : vector<8xf32> to vector<8x1xf32>
    %67 = vector.broadcast %66 : vector<8x1xf32> to vector<8x8xf32>
    %68 = arith.subf %64, %67 : vector<8x8xf32>
    %69 = math.exp %68 : vector<8x8xf32>
    %cst_26 = arith.constant dense<0.000000e+00> : vector<8xf32>
    %70 = vector.multi_reduction <add>, %69, %cst_26 [1] : vector<8x8xf32> to vector<8xf32>
    %71 = vector.shape_cast %70 : vector<8xf32> to vector<8x1xf32>
    %72 = tpu.reciprocal %71 {approx = true} : vector<8x1xf32> -> vector<8x1xf32>
    %73 = vector.broadcast %72 : vector<8x1xf32> to vector<8x8xf32>
    %74 = arith.mulf %69, %73 : vector<8x8xf32>
    %75 = arith.truncf %74 : vector<8x8xf32> to vector<8x8xbf16>
    %76 = vector.extract_strided_slice %5 {offsets = [0, 64], sizes = [8, 32], strides = [1, 1]} : vector<8x128xbf16> to vector<8x32xbf16>
    %cst_27 = arith.constant dense<0.000000e+00> : vector<8x32xf32>
    %77 = tpu.matmul %75, %76, %cst_27 {dimension_numbers = #tpu.dot_dimension_numbers<[1], [0], [0], [1], [0, 0, 1, 1], [], []>} : vector<8x8xbf16>, vector<8x32xbf16>, vector<8x32xf32> -> vector<8x32xf32>
    %78 = vector.extract_strided_slice %1 {offsets = [0, 96], sizes = [8, 32], strides = [1, 1]} : vector<8x128xbf16> to vector<8x32xbf16>
    %79 = vector.extract_strided_slice %3 {offsets = [0, 96], sizes = [8, 32], strides = [1, 1]} : vector<8x128xbf16> to vector<8x32xbf16>
    %cst_28 = arith.constant dense<0.000000e+00> : vector<8x8xf32>
    %80 = tpu.matmul %78, %79, %cst_28 {dimension_numbers = #tpu.dot_dimension_numbers<[1], [1], [0], [0], [0, 0, 1, 0], [], []>} : vector<8x32xbf16>, vector<8x32xbf16>, vector<8x8xf32> -> vector<8x8xf32>
    %cst_29 = arith.constant 0.176776692 : f32
    %81 = vector.broadcast %cst_29 : f32 to vector<8x8xf32>
    %82 = arith.mulf %80, %81 : vector<8x8xf32>
    %83 = arith.addf %82, %20 : vector<8x8xf32>
    %cst_30 = arith.constant dense<0xFF800000> : vector<8xf32>
    %84 = vector.multi_reduction <maximumf>, %83, %cst_30 [1] : vector<8x8xf32> to vector<8xf32>
    %85 = vector.shape_cast %84 : vector<8xf32> to vector<8x1xf32>
    %86 = vector.broadcast %85 : vector<8x1xf32> to vector<8x8xf32>
    %87 = arith.subf %83, %86 : vector<8x8xf32>
    %88 = math.exp %87 : vector<8x8xf32>
    %cst_31 = arith.constant dense<0.000000e+00> : vector<8xf32>
    %89 = vector.multi_reduction <add>, %88, %cst_31 [1] : vector<8x8xf32> to vector<8xf32>
    %90 = vector.shape_cast %89 : vector<8xf32> to vector<8x1xf32>
    %91 = tpu.reciprocal %90 {approx = true} : vector<8x1xf32> -> vector<8x1xf32>
    %92 = vector.broadcast %91 : vector<8x1xf32> to vector<8x8xf32>
    %93 = arith.mulf %88, %92 : vector<8x8xf32>
    %94 = arith.truncf %93 : vector<8x8xf32> to vector<8x8xbf16>
    %95 = vector.extract_strided_slice %5 {offsets = [0, 96], sizes = [8, 32], strides = [1, 1]} : vector<8x128xbf16> to vector<8x32xbf16>
    %cst_32 = arith.constant dense<0.000000e+00> : vector<8x32xf32>
    %96 = tpu.matmul %94, %95, %cst_32 {dimension_numbers = #tpu.dot_dimension_numbers<[1], [0], [0], [1], [0, 0, 1, 1], [], []>} : vector<8x8xbf16>, vector<8x32xbf16>, vector<8x32xf32> -> vector<8x32xf32>
    %97 = tpu.concatenate %39, %58, %77, %96 in 1 : vector<8x32xf32>, vector<8x32xf32>, vector<8x32xf32>, vector<8x32xf32> -> vector<8x128xf32>
    %98 = arith.truncf %97 : vector<8x128xf32> to vector<8x128xbf16>
    %c0_33 = arith.constant 0 : index
    %c0_34 = arith.constant 0 : index
    %99 = vector.load %arg6[%c0_33, %c0_34] : memref<128x128xbf16, #tpu.memory_space<vmem>>, vector<128x128xbf16>
    %cst_35 = arith.constant dense<0.000000e+00> : vector<8x128xf32>
    %100 = tpu.matmul %98, %99, %cst_35 {dimension_numbers = #tpu.dot_dimension_numbers<[1], [0], [0], [1], [0, 0, 1, 1], [], []>} : vector<8x128xbf16>, vector<128x128xbf16>, vector<8x128xf32> -> vector<8x128xf32>
    %c0_36 = arith.constant 0 : index
    %c0_37 = arith.constant 0 : index
    %101 = vector.load %arg7[%c0_36, %c0_37] : memref<1x128xf32, #tpu.memory_space<vmem>>, vector<1x128xf32>
    %102 = vector.broadcast %101 : vector<1x128xf32> to vector<8x128xf32>
    %103 = arith.addf %100, %102 : vector<8x128xf32>
    %c0_38 = arith.constant 0 : index
    %c0_39 = arith.constant 0 : index
    %c0_40 = arith.constant 0 : index
    %104 = vector.load %arg8[%c0_38, %c0_39, %c0_40] : memref<1x8x128xbf16, #tpu.memory_space<vmem>>, vector<1x8x128xbf16>
    %105 = vector.shape_cast %104 : vector<1x8x128xbf16> to vector<8x128xbf16>
    %106 = arith.extf %105 : vector<8x128xbf16> to vector<8x128xf32>
    %107 = arith.addf %103, %106 : vector<8x128xf32>
    %cst_41 = arith.constant dense<0.000000e+00> : vector<8xf32>
    %108 = vector.multi_reduction <add>, %107, %cst_41 [1] : vector<8x128xf32> to vector<8xf32>
    %109 = vector.shape_cast %108 : vector<8xf32> to vector<8x1xf32>
    %cst_42 = arith.constant 1.280000e+02 : f32
    %110 = vector.broadcast %cst_42 : f32 to vector<8x1xf32>
    %111 = arith.divf %109, %110 : vector<8x1xf32>
    %112 = vector.broadcast %111 : vector<8x1xf32> to vector<8x128xf32>
    %113 = arith.subf %107, %112 : vector<8x128xf32>
    %114 = arith.mulf %113, %113 : vector<8x128xf32>
    %cst_43 = arith.constant dense<0.000000e+00> : vector<8xf32>
    %115 = vector.multi_reduction <add>, %114, %cst_43 [1] : vector<8x128xf32> to vector<8xf32>
    %116 = vector.shape_cast %115 : vector<8xf32> to vector<8x1xf32>
    %cst_44 = arith.constant 1.280000e+02 : f32
    %117 = vector.broadcast %cst_44 : f32 to vector<8x1xf32>
    %118 = arith.divf %116, %117 : vector<8x1xf32>
    %119 = vector.broadcast %111 : vector<8x1xf32> to vector<8x128xf32>
    %120 = arith.subf %107, %119 : vector<8x128xf32>
    %cst_45 = arith.constant 9.99999974E-6 : f32
    %121 = vector.broadcast %cst_45 : f32 to vector<8x1xf32>
    %122 = arith.addf %118, %121 : vector<8x1xf32>
    %123 = math.rsqrt %122 : vector<8x1xf32>
    %124 = vector.broadcast %123 : vector<8x1xf32> to vector<8x128xf32>
    %125 = arith.mulf %120, %124 : vector<8x128xf32>
    %c0_46 = arith.constant 0 : index
    %c0_47 = arith.constant 0 : index
    %126 = vector.load %arg9[%c0_46, %c0_47] : memref<1x128xf32, #tpu.memory_space<vmem>>, vector<1x128xf32>
    %127 = vector.broadcast %126 : vector<1x128xf32> to vector<8x128xf32>
    %128 = arith.mulf %125, %127 : vector<8x128xf32>
    %c0_48 = arith.constant 0 : index
    %c0_49 = arith.constant 0 : index
    %129 = vector.load %arg10[%c0_48, %c0_49] : memref<1x128xf32, #tpu.memory_space<vmem>>, vector<1x128xf32>
    %130 = vector.broadcast %129 : vector<1x128xf32> to vector<8x128xf32>
    %131 = arith.addf %128, %130 : vector<8x128xf32>
    %132 = arith.truncf %131 : vector<8x128xf32> to vector<8x128xbf16>
    %c0_50 = arith.constant 0 : index
    %c0_51 = arith.constant 0 : index
    %c0_52 = arith.constant 0 : index
    %133 = vector.load %arg11[%c0_50, %c0_51, %c0_52] : memref<1x8x128xbf16, #tpu.memory_space<vmem>>, vector<1x8x128xbf16>
    %134 = vector.shape_cast %133 : vector<1x8x128xbf16> to vector<8x128xbf16>
    %135 = vector.shape_cast %132 : vector<8x128xbf16> to vector<1x8x128xbf16>
    tpu.vector_store %arg11[%c0_50, %c0_51, %c0_52], %135 {strides = array<i32>} : memref<1x8x128xbf16, #tpu.memory_space<vmem>>, vector<1x8x128xbf16>,
    return
  }
  func.func @transform_0(%arg0: i32, %arg1: i32) -> (i32, i32, i32) {
    %c0_i32 = arith.constant 0 : i32
    %c0_i32_0 = arith.constant 0 : i32
    return %arg0, %arg1, %c0_i32 : i32, i32, i32
  }
  func.func @transform_1(%arg0: i32, %arg1: i32) -> (i32, i32, i32) {
    %c0_i32 = arith.constant 0 : i32
    %c1_i32 = arith.constant 1 : i32
    %c0_i32_0 = arith.constant 0 : i32
    return %arg0, %c0_i32, %c1_i32 : i32, i32, i32
  }
  func.func @transform_2(%arg0: i32, %arg1: i32) -> (i32, i32, i32) {
    %c0_i32 = arith.constant 0 : i32
    %c2_i32 = arith.constant 2 : i32
    %c0_i32_0 = arith.constant 0 : i32
    return %arg0, %c0_i32, %c2_i32 : i32, i32, i32
  }
  func.func @transform_3(%arg0: i32, %arg1: i32) -> (i32, i32, i32) {
    %c0_i32 = arith.constant 0 : i32
    %c0_i32_0 = arith.constant 0 : i32
    %c0_i32_1 = arith.constant 0 : i32
    return %arg0, %c0_i32, %c0_i32_0 : i32, i32, i32
  }
  func.func @transform_4(%arg0: i32, %arg1: i32) -> (i32, i32) {
    %c0_i32 = arith.constant 0 : i32
    %c0_i32_0 = arith.constant 0 : i32
    %c0_i32_1 = arith.constant 0 : i32
    return %c0_i32, %c0_i32_0 : i32, i32
  }
  func.func @transform_5(%arg0: i32, %arg1: i32) -> (i32, i32) {
    %c0_i32 = arith.constant 0 : i32
    %c0_i32_0 = arith.constant 0 : i32
    %c0_i32_1 = arith.constant 0 : i32
    return %c0_i32, %c0_i32_0 : i32, i32
  }
  func.func @transform_6(%arg0: i32, %arg1: i32) -> (i32, i32, i32) {
    %c0_i32 = arith.constant 0 : i32
    %c0_i32_0 = arith.constant 0 : i32
    return %arg0, %arg1, %c0_i32 : i32, i32, i32
  }
  func.func @transform_7(%arg0: i32, %arg1: i32) -> (i32, i32) {
    %c0_i32 = arith.constant 0 : i32
    %c0_i32_0 = arith.constant 0 : i32
    %c0_i32_1 = arith.constant 0 : i32
    return %c0_i32, %c0_i32_0 : i32, i32
  }
  func.func @transform_8(%arg0: i32, %arg1: i32) -> (i32, i32) {
    %c0_i32 = arith.constant 0 : i32
    %c0_i32_0 = arith.constant 0 : i32
    %c0_i32_1 = arith.constant 0 : i32
    return %c0_i32, %c0_i32_0 : i32, i32
  }
  func.func @transform_9(%arg0: i32, %arg1: i32) -> (i32, i32, i32) {
    %c0_i32 = arith.constant 0 : i32
    %c0_i32_0 = arith.constant 0 : i32
    return %arg0, %arg1, %c0_i32 : i32, i32, i32
  }
}

module attributes {stable_mosaic.version = 11 : i64} {
  func.func @_mha_block_kernel(%arg0: i32, %arg1: i32, %arg2: memref<1x8x128xbf16, #tpu.memory_space<vmem>>, %arg3: memref<1x16x128xbf16, #tpu.memory_space<vmem>>, %arg4: memref<1x16x128xbf16, #tpu.memory_space<vmem>>, %arg5: memref<1x1x16xf32, #tpu.memory_space<vmem>>, %arg6: memref<128x128xbf16, #tpu.memory_space<vmem>>, %arg7: memref<1x128xf32, #tpu.memory_space<vmem>>, %arg8: memref<1x8x128xbf16, #tpu.memory_space<vmem>>, %arg9: memref<1x128xf32, #tpu.memory_space<vmem>>, %arg10: memref<1x128xf32, #tpu.memory_space<vmem>>, %arg11: memref<1x8x128xbf16, #tpu.memory_space<vmem>>) attributes {dimension_semantics = [#tpu.dimension_semantics<parallel>, #tpu.dimension_semantics<parallel>], iteration_bounds = array<i64: 2, 1>, scalar_prefetch = 0 : i64, scratch_operands = 0 : i64, tpu.core_type = #tpu.core_type<tc>, window_params = [{transform_indices = @transform_0, window_bounds = array<i64: 1, 8, 128>}, {transform_indices = @transform_1, window_bounds = array<i64: 1, 16, 128>}, {transform_indices = @transform_2, window_bounds = array<i64: 1, 16, 128>}, {transform_indices = @transform_3, window_bounds = array<i64: 1, 1, 16>}, {pipeline_mode = #tpu.pipeline_mode<synchronous>, transform_indices = @transform_4, window_bounds = array<i64: 128, 128>}, {pipeline_mode = #tpu.pipeline_mode<synchronous>, transform_indices = @transform_5, window_bounds = array<i64: 1, 128>}, {transform_indices = @transform_6, window_bounds = array<i64: 1, 8, 128>}, {pipeline_mode = #tpu.pipeline_mode<synchronous>, transform_indices = @transform_7, window_bounds = array<i64: 1, 128>}, {pipeline_mode = #tpu.pipeline_mode<synchronous>, transform_indices = @transform_8, window_bounds = array<i64: 1, 128>}, {transform_indices = @transform_9, window_bounds = array<i64: 1, 8, 128>}]} {
    %c0 = arith.constant 0 : index
    %c0_0 = arith.constant 0 : index
    %c0_1 = arith.constant 0 : index
    %0 = vector.load %arg2[%c0, %c0_0, %c0_1] : memref<1x8x128xbf16, #tpu.memory_space<vmem>>, vector<1x8x128xbf16>
    %1 = vector.shape_cast %0 : vector<1x8x128xbf16> to vector<8x128xbf16>
    %c0_2 = arith.constant 0 : index
    %c0_3 = arith.constant 0 : index
    %c0_4 = arith.constant 0 : index
    %2 = vector.load %arg3[%c0_2, %c0_3, %c0_4] : memref<1x16x128xbf16, #tpu.memory_space<vmem>>, vector<1x16x128xbf16>
    %3 = vector.shape_cast %2 : vector<1x16x128xbf16> to vector<16x128xbf16>
    %c0_5 = arith.constant 0 : index
    %c0_6 = arith.constant 0 : index
    %c0_7 = arith.constant 0 : index
    %4 = vector.load %arg4[%c0_5, %c0_6, %c0_7] : memref<1x16x128xbf16, #tpu.memory_space<vmem>>, vector<1x16x128xbf16>
    %5 = vector.shape_cast %4 : vector<1x16x128xbf16> to vector<16x128xbf16>
    %c0_8 = arith.constant 0 : index
    %c0_9 = arith.constant 0 : index
    %c0_10 = arith.constant 0 : index
    %6 = vector.load %arg5[%c0_8, %c0_9, %c0_10] : memref<1x1x16xf32, #tpu.memory_space<vmem>>, vector<1x1x16xf32>
    %7 = vector.shape_cast %6 : vector<1x1x16xf32> to vector<1x16xf32>
    %cst = arith.constant 5.000000e-01 : f32
    %8 = vector.broadcast %cst : f32 to vector<1x16xf32>
    %9 = arith.cmpf ogt, %7, %8 : vector<1x16xf32>
    %cst_11 = arith.constant 0.000000e+00 : f32
    %cst_12 = arith.constant -1.000000e+09 : f32
    %10 = vector.broadcast %cst_11 : f32 to vector<1x16xf32>
    %11 = vector.broadcast %cst_12 : f32 to vector<1x16xf32>
    %12 = arith.select %9, %10, %11 : vector<1x16xi1>, vector<1x16xf32>
    %13 = vector.extract_strided_slice %1 {offsets = [0, 0], sizes = [8, 32], strides = [1, 1]} : vector<8x128xbf16> to vector<8x32xbf16>
    %14 = vector.extract_strided_slice %3 {offsets = [0, 0], sizes = [16, 32], strides = [1, 1]} : vector<16x128xbf16> to vector<16x32xbf16>
    %cst_13 = arith.constant dense<0.000000e+00> : vector<8x16xf32>
    %15 = tpu.matmul %13, %14, %cst_13 {dimension_numbers = #tpu.dot_dimension_numbers<[1], [1], [0], [0], [0, 0, 1, 0], [], []>} : vector<8x32xbf16>, vector<16x32xbf16>, vector<8x16xf32> -> vector<8x16xf32>
    %cst_14 = arith.constant 0.176776692 : f32
    %16 = vector.broadcast %cst_14 : f32 to vector<8x16xf32>
    %17 = arith.mulf %15, %16 : vector<8x16xf32>
    %18 = vector.broadcast %12 : vector<1x16xf32> to vector<8x16xf32>
    %19 = arith.addf %17, %18 : vector<8x16xf32>
    %cst_15 = arith.constant dense<0xFF800000> : vector<8xf32>
    %20 = vector.multi_reduction <maximumf>, %19, %cst_15 [1] : vector<8x16xf32> to vector<8xf32>
    %21 = vector.shape_cast %20 : vector<8xf32> to vector<8x1xf32>
    %22 = vector.broadcast %21 : vector<8x1xf32> to vector<8x16xf32>
    %23 = arith.subf %19, %22 : vector<8x16xf32>
    %24 = math.exp %23 : vector<8x16xf32>
    %cst_16 = arith.constant dense<0.000000e+00> : vector<8xf32>
    %25 = vector.multi_reduction <add>, %24, %cst_16 [1] : vector<8x16xf32> to vector<8xf32>
    %26 = vector.shape_cast %25 : vector<8xf32> to vector<8x1xf32>
    %27 = tpu.reciprocal %26 {approx = true} : vector<8x1xf32> -> vector<8x1xf32>
    %28 = vector.broadcast %27 : vector<8x1xf32> to vector<8x16xf32>
    %29 = arith.mulf %24, %28 : vector<8x16xf32>
    %30 = arith.truncf %29 : vector<8x16xf32> to vector<8x16xbf16>
    %31 = vector.extract_strided_slice %5 {offsets = [0, 0], sizes = [16, 32], strides = [1, 1]} : vector<16x128xbf16> to vector<16x32xbf16>
    %cst_17 = arith.constant dense<0.000000e+00> : vector<8x32xf32>
    %32 = tpu.matmul %30, %31, %cst_17 {dimension_numbers = #tpu.dot_dimension_numbers<[1], [0], [0], [1], [0, 0, 1, 1], [], []>} : vector<8x16xbf16>, vector<16x32xbf16>, vector<8x32xf32> -> vector<8x32xf32>
    %33 = vector.extract_strided_slice %1 {offsets = [0, 32], sizes = [8, 32], strides = [1, 1]} : vector<8x128xbf16> to vector<8x32xbf16>
    %34 = vector.extract_strided_slice %3 {offsets = [0, 32], sizes = [16, 32], strides = [1, 1]} : vector<16x128xbf16> to vector<16x32xbf16>
    %cst_18 = arith.constant dense<0.000000e+00> : vector<8x16xf32>
    %35 = tpu.matmul %33, %34, %cst_18 {dimension_numbers = #tpu.dot_dimension_numbers<[1], [1], [0], [0], [0, 0, 1, 0], [], []>} : vector<8x32xbf16>, vector<16x32xbf16>, vector<8x16xf32> -> vector<8x16xf32>
    %cst_19 = arith.constant 0.176776692 : f32
    %36 = vector.broadcast %cst_19 : f32 to vector<8x16xf32>
    %37 = arith.mulf %35, %36 : vector<8x16xf32>
    %38 = vector.broadcast %12 : vector<1x16xf32> to vector<8x16xf32>
    %39 = arith.addf %37, %38 : vector<8x16xf32>
    %cst_20 = arith.constant dense<0xFF800000> : vector<8xf32>
    %40 = vector.multi_reduction <maximumf>, %39, %cst_20 [1] : vector<8x16xf32> to vector<8xf32>
    %41 = vector.shape_cast %40 : vector<8xf32> to vector<8x1xf32>
    %42 = vector.broadcast %41 : vector<8x1xf32> to vector<8x16xf32>
    %43 = arith.subf %39, %42 : vector<8x16xf32>
    %44 = math.exp %43 : vector<8x16xf32>
    %cst_21 = arith.constant dense<0.000000e+00> : vector<8xf32>
    %45 = vector.multi_reduction <add>, %44, %cst_21 [1] : vector<8x16xf32> to vector<8xf32>
    %46 = vector.shape_cast %45 : vector<8xf32> to vector<8x1xf32>
    %47 = tpu.reciprocal %46 {approx = true} : vector<8x1xf32> -> vector<8x1xf32>
    %48 = vector.broadcast %47 : vector<8x1xf32> to vector<8x16xf32>
    %49 = arith.mulf %44, %48 : vector<8x16xf32>
    %50 = arith.truncf %49 : vector<8x16xf32> to vector<8x16xbf16>
    %51 = vector.extract_strided_slice %5 {offsets = [0, 32], sizes = [16, 32], strides = [1, 1]} : vector<16x128xbf16> to vector<16x32xbf16>
    %cst_22 = arith.constant dense<0.000000e+00> : vector<8x32xf32>
    %52 = tpu.matmul %50, %51, %cst_22 {dimension_numbers = #tpu.dot_dimension_numbers<[1], [0], [0], [1], [0, 0, 1, 1], [], []>} : vector<8x16xbf16>, vector<16x32xbf16>, vector<8x32xf32> -> vector<8x32xf32>
    %53 = vector.extract_strided_slice %1 {offsets = [0, 64], sizes = [8, 32], strides = [1, 1]} : vector<8x128xbf16> to vector<8x32xbf16>
    %54 = vector.extract_strided_slice %3 {offsets = [0, 64], sizes = [16, 32], strides = [1, 1]} : vector<16x128xbf16> to vector<16x32xbf16>
    %cst_23 = arith.constant dense<0.000000e+00> : vector<8x16xf32>
    %55 = tpu.matmul %53, %54, %cst_23 {dimension_numbers = #tpu.dot_dimension_numbers<[1], [1], [0], [0], [0, 0, 1, 0], [], []>} : vector<8x32xbf16>, vector<16x32xbf16>, vector<8x16xf32> -> vector<8x16xf32>
    %cst_24 = arith.constant 0.176776692 : f32
    %56 = vector.broadcast %cst_24 : f32 to vector<8x16xf32>
    %57 = arith.mulf %55, %56 : vector<8x16xf32>
    %58 = vector.broadcast %12 : vector<1x16xf32> to vector<8x16xf32>
    %59 = arith.addf %57, %58 : vector<8x16xf32>
    %cst_25 = arith.constant dense<0xFF800000> : vector<8xf32>
    %60 = vector.multi_reduction <maximumf>, %59, %cst_25 [1] : vector<8x16xf32> to vector<8xf32>
    %61 = vector.shape_cast %60 : vector<8xf32> to vector<8x1xf32>
    %62 = vector.broadcast %61 : vector<8x1xf32> to vector<8x16xf32>
    %63 = arith.subf %59, %62 : vector<8x16xf32>
    %64 = math.exp %63 : vector<8x16xf32>
    %cst_26 = arith.constant dense<0.000000e+00> : vector<8xf32>
    %65 = vector.multi_reduction <add>, %64, %cst_26 [1] : vector<8x16xf32> to vector<8xf32>
    %66 = vector.shape_cast %65 : vector<8xf32> to vector<8x1xf32>
    %67 = tpu.reciprocal %66 {approx = true} : vector<8x1xf32> -> vector<8x1xf32>
    %68 = vector.broadcast %67 : vector<8x1xf32> to vector<8x16xf32>
    %69 = arith.mulf %64, %68 : vector<8x16xf32>
    %70 = arith.truncf %69 : vector<8x16xf32> to vector<8x16xbf16>
    %71 = vector.extract_strided_slice %5 {offsets = [0, 64], sizes = [16, 32], strides = [1, 1]} : vector<16x128xbf16> to vector<16x32xbf16>
    %cst_27 = arith.constant dense<0.000000e+00> : vector<8x32xf32>
    %72 = tpu.matmul %70, %71, %cst_27 {dimension_numbers = #tpu.dot_dimension_numbers<[1], [0], [0], [1], [0, 0, 1, 1], [], []>} : vector<8x16xbf16>, vector<16x32xbf16>, vector<8x32xf32> -> vector<8x32xf32>
    %73 = vector.extract_strided_slice %1 {offsets = [0, 96], sizes = [8, 32], strides = [1, 1]} : vector<8x128xbf16> to vector<8x32xbf16>
    %74 = vector.extract_strided_slice %3 {offsets = [0, 96], sizes = [16, 32], strides = [1, 1]} : vector<16x128xbf16> to vector<16x32xbf16>
    %cst_28 = arith.constant dense<0.000000e+00> : vector<8x16xf32>
    %75 = tpu.matmul %73, %74, %cst_28 {dimension_numbers = #tpu.dot_dimension_numbers<[1], [1], [0], [0], [0, 0, 1, 0], [], []>} : vector<8x32xbf16>, vector<16x32xbf16>, vector<8x16xf32> -> vector<8x16xf32>
    %cst_29 = arith.constant 0.176776692 : f32
    %76 = vector.broadcast %cst_29 : f32 to vector<8x16xf32>
    %77 = arith.mulf %75, %76 : vector<8x16xf32>
    %78 = vector.broadcast %12 : vector<1x16xf32> to vector<8x16xf32>
    %79 = arith.addf %77, %78 : vector<8x16xf32>
    %cst_30 = arith.constant dense<0xFF800000> : vector<8xf32>
    %80 = vector.multi_reduction <maximumf>, %79, %cst_30 [1] : vector<8x16xf32> to vector<8xf32>
    %81 = vector.shape_cast %80 : vector<8xf32> to vector<8x1xf32>
    %82 = vector.broadcast %81 : vector<8x1xf32> to vector<8x16xf32>
    %83 = arith.subf %79, %82 : vector<8x16xf32>
    %84 = math.exp %83 : vector<8x16xf32>
    %cst_31 = arith.constant dense<0.000000e+00> : vector<8xf32>
    %85 = vector.multi_reduction <add>, %84, %cst_31 [1] : vector<8x16xf32> to vector<8xf32>
    %86 = vector.shape_cast %85 : vector<8xf32> to vector<8x1xf32>
    %87 = tpu.reciprocal %86 {approx = true} : vector<8x1xf32> -> vector<8x1xf32>
    %88 = vector.broadcast %87 : vector<8x1xf32> to vector<8x16xf32>
    %89 = arith.mulf %84, %88 : vector<8x16xf32>
    %90 = arith.truncf %89 : vector<8x16xf32> to vector<8x16xbf16>
    %91 = vector.extract_strided_slice %5 {offsets = [0, 96], sizes = [16, 32], strides = [1, 1]} : vector<16x128xbf16> to vector<16x32xbf16>
    %cst_32 = arith.constant dense<0.000000e+00> : vector<8x32xf32>
    %92 = tpu.matmul %90, %91, %cst_32 {dimension_numbers = #tpu.dot_dimension_numbers<[1], [0], [0], [1], [0, 0, 1, 1], [], []>} : vector<8x16xbf16>, vector<16x32xbf16>, vector<8x32xf32> -> vector<8x32xf32>
    %93 = tpu.concatenate %32, %52, %72, %92 in 1 : vector<8x32xf32>, vector<8x32xf32>, vector<8x32xf32>, vector<8x32xf32> -> vector<8x128xf32>
    %94 = arith.truncf %93 : vector<8x128xf32> to vector<8x128xbf16>
    %c0_33 = arith.constant 0 : index
    %c0_34 = arith.constant 0 : index
    %95 = vector.load %arg6[%c0_33, %c0_34] : memref<128x128xbf16, #tpu.memory_space<vmem>>, vector<128x128xbf16>
    %cst_35 = arith.constant dense<0.000000e+00> : vector<8x128xf32>
    %96 = tpu.matmul %94, %95, %cst_35 {dimension_numbers = #tpu.dot_dimension_numbers<[1], [0], [0], [1], [0, 0, 1, 1], [], []>} : vector<8x128xbf16>, vector<128x128xbf16>, vector<8x128xf32> -> vector<8x128xf32>
    %c0_36 = arith.constant 0 : index
    %c0_37 = arith.constant 0 : index
    %97 = vector.load %arg7[%c0_36, %c0_37] : memref<1x128xf32, #tpu.memory_space<vmem>>, vector<1x128xf32>
    %98 = vector.broadcast %97 : vector<1x128xf32> to vector<8x128xf32>
    %99 = arith.addf %96, %98 : vector<8x128xf32>
    %c0_38 = arith.constant 0 : index
    %c0_39 = arith.constant 0 : index
    %c0_40 = arith.constant 0 : index
    %100 = vector.load %arg8[%c0_38, %c0_39, %c0_40] : memref<1x8x128xbf16, #tpu.memory_space<vmem>>, vector<1x8x128xbf16>
    %101 = vector.shape_cast %100 : vector<1x8x128xbf16> to vector<8x128xbf16>
    %102 = arith.extf %101 : vector<8x128xbf16> to vector<8x128xf32>
    %103 = arith.addf %99, %102 : vector<8x128xf32>
    %cst_41 = arith.constant dense<0.000000e+00> : vector<8xf32>
    %104 = vector.multi_reduction <add>, %103, %cst_41 [1] : vector<8x128xf32> to vector<8xf32>
    %105 = vector.shape_cast %104 : vector<8xf32> to vector<8x1xf32>
    %cst_42 = arith.constant 1.280000e+02 : f32
    %106 = vector.broadcast %cst_42 : f32 to vector<8x1xf32>
    %107 = arith.divf %105, %106 : vector<8x1xf32>
    %108 = vector.broadcast %107 : vector<8x1xf32> to vector<8x128xf32>
    %109 = arith.subf %103, %108 : vector<8x128xf32>
    %110 = arith.mulf %109, %109 : vector<8x128xf32>
    %cst_43 = arith.constant dense<0.000000e+00> : vector<8xf32>
    %111 = vector.multi_reduction <add>, %110, %cst_43 [1] : vector<8x128xf32> to vector<8xf32>
    %112 = vector.shape_cast %111 : vector<8xf32> to vector<8x1xf32>
    %cst_44 = arith.constant 1.280000e+02 : f32
    %113 = vector.broadcast %cst_44 : f32 to vector<8x1xf32>
    %114 = arith.divf %112, %113 : vector<8x1xf32>
    %115 = vector.broadcast %107 : vector<8x1xf32> to vector<8x128xf32>
    %116 = arith.subf %103, %115 : vector<8x128xf32>
    %cst_45 = arith.constant 9.99999974E-6 : f32
    %117 = vector.broadcast %cst_45 : f32 to vector<8x1xf32>
    %118 = arith.addf %114, %117 : vector<8x1xf32>
    %119 = math.rsqrt %118 : vector<8x1xf32>
    %120 = vector.broadcast %119 : vector<8x1xf32> to vector<8x128xf32>
    %121 = arith.mulf %116, %120 : vector<8x128xf32>
    %c0_46 = arith.constant 0 : index
    %c0_47 = arith.constant 0 : index
    %122 = vector.load %arg9[%c0_46, %c0_47] : memref<1x128xf32, #tpu.memory_space<vmem>>, vector<1x128xf32>
    %123 = vector.broadcast %122 : vector<1x128xf32> to vector<8x128xf32>
    %124 = arith.mulf %121, %123 : vector<8x128xf32>
    %c0_48 = arith.constant 0 : index
    %c0_49 = arith.constant 0 : index
    %125 = vector.load %arg10[%c0_48, %c0_49] : memref<1x128xf32, #tpu.memory_space<vmem>>, vector<1x128xf32>
    %126 = vector.broadcast %125 : vector<1x128xf32> to vector<8x128xf32>
    %127 = arith.addf %124, %126 : vector<8x128xf32>
    %128 = arith.truncf %127 : vector<8x128xf32> to vector<8x128xbf16>
    %c0_50 = arith.constant 0 : index
    %c0_51 = arith.constant 0 : index
    %c0_52 = arith.constant 0 : index
    %129 = vector.load %arg11[%c0_50, %c0_51, %c0_52] : memref<1x8x128xbf16, #tpu.memory_space<vmem>>, vector<1x8x128xbf16>
    %130 = vector.shape_cast %129 : vector<1x8x128xbf16> to vector<8x128xbf16>
    %131 = vector.shape_cast %128 : vector<8x128xbf16> to vector<1x8x128xbf16>
    tpu.vector_store %arg11[%c0_50, %c0_51, %c0_52], %131 {strides = array<i32>} : memref<1x8x128xbf16, #tpu.memory_space<vmem>>, vector<1x8x128xbf16>,
    return
  }
  func.func @transform_0(%arg0: i32, %arg1: i32) -> (i32, i32, i32) {
    %c0_i32 = arith.constant 0 : i32
    %c0_i32_0 = arith.constant 0 : i32
    return %arg0, %arg1, %c0_i32 : i32, i32, i32
  }
  func.func @transform_1(%arg0: i32, %arg1: i32) -> (i32, i32, i32) {
    %c0_i32 = arith.constant 0 : i32
    %c0_i32_0 = arith.constant 0 : i32
    %c0_i32_1 = arith.constant 0 : i32
    return %arg0, %c0_i32, %c0_i32_0 : i32, i32, i32
  }
  func.func @transform_2(%arg0: i32, %arg1: i32) -> (i32, i32, i32) {
    %c0_i32 = arith.constant 0 : i32
    %c1_i32 = arith.constant 1 : i32
    %c0_i32_0 = arith.constant 0 : i32
    return %arg0, %c0_i32, %c1_i32 : i32, i32, i32
  }
  func.func @transform_3(%arg0: i32, %arg1: i32) -> (i32, i32, i32) {
    %c0_i32 = arith.constant 0 : i32
    %c0_i32_0 = arith.constant 0 : i32
    %c0_i32_1 = arith.constant 0 : i32
    return %arg0, %c0_i32, %c0_i32_0 : i32, i32, i32
  }
  func.func @transform_4(%arg0: i32, %arg1: i32) -> (i32, i32) {
    %c0_i32 = arith.constant 0 : i32
    %c0_i32_0 = arith.constant 0 : i32
    %c0_i32_1 = arith.constant 0 : i32
    return %c0_i32, %c0_i32_0 : i32, i32
  }
  func.func @transform_5(%arg0: i32, %arg1: i32) -> (i32, i32) {
    %c0_i32 = arith.constant 0 : i32
    %c0_i32_0 = arith.constant 0 : i32
    %c0_i32_1 = arith.constant 0 : i32
    return %c0_i32, %c0_i32_0 : i32, i32
  }
  func.func @transform_6(%arg0: i32, %arg1: i32) -> (i32, i32, i32) {
    %c0_i32 = arith.constant 0 : i32
    %c0_i32_0 = arith.constant 0 : i32
    return %arg0, %arg1, %c0_i32 : i32, i32, i32
  }
  func.func @transform_7(%arg0: i32, %arg1: i32) -> (i32, i32) {
    %c0_i32 = arith.constant 0 : i32
    %c0_i32_0 = arith.constant 0 : i32
    %c0_i32_1 = arith.constant 0 : i32
    return %c0_i32, %c0_i32_0 : i32, i32
  }
  func.func @transform_8(%arg0: i32, %arg1: i32) -> (i32, i32) {
    %c0_i32 = arith.constant 0 : i32
    %c0_i32_0 = arith.constant 0 : i32
    %c0_i32_1 = arith.constant 0 : i32
    return %c0_i32, %c0_i32_0 : i32, i32
  }
  func.func @transform_9(%arg0: i32, %arg1: i32) -> (i32, i32, i32) {
    %c0_i32 = arith.constant 0 : i32
    %c0_i32_0 = arith.constant 0 : i32
    return %arg0, %arg1, %c0_i32 : i32, i32, i32
  }
}

module attributes {stable_mosaic.version = 11 : i64} {
  func.func @_ffn_block_kernel(%arg0: i32, %arg1: memref<8x128xbf16, #tpu.memory_space<vmem>>, %arg2: memref<128x256xbf16, #tpu.memory_space<vmem>>, %arg3: memref<1x256xf32, #tpu.memory_space<vmem>>, %arg4: memref<256x128xbf16, #tpu.memory_space<vmem>>, %arg5: memref<1x128xf32, #tpu.memory_space<vmem>>, %arg6: memref<1x128xf32, #tpu.memory_space<vmem>>, %arg7: memref<1x128xf32, #tpu.memory_space<vmem>>, %arg8: memref<8x128xbf16, #tpu.memory_space<vmem>>) attributes {dimension_semantics = [#tpu.dimension_semantics<parallel>], iteration_bounds = array<i64: 2>, scalar_prefetch = 0 : i64, scratch_operands = 0 : i64, tpu.core_type = #tpu.core_type<tc>, window_params = [{transform_indices = @transform_0, window_bounds = array<i64: 8, 128>}, {pipeline_mode = #tpu.pipeline_mode<synchronous>, transform_indices = @transform_1, window_bounds = array<i64: 128, 256>}, {pipeline_mode = #tpu.pipeline_mode<synchronous>, transform_indices = @transform_2, window_bounds = array<i64: 1, 256>}, {pipeline_mode = #tpu.pipeline_mode<synchronous>, transform_indices = @transform_3, window_bounds = array<i64: 256, 128>}, {pipeline_mode = #tpu.pipeline_mode<synchronous>, transform_indices = @transform_4, window_bounds = array<i64: 1, 128>}, {pipeline_mode = #tpu.pipeline_mode<synchronous>, transform_indices = @transform_5, window_bounds = array<i64: 1, 128>}, {pipeline_mode = #tpu.pipeline_mode<synchronous>, transform_indices = @transform_6, window_bounds = array<i64: 1, 128>}, {transform_indices = @transform_7, window_bounds = array<i64: 8, 128>}]} {
    %c0 = arith.constant 0 : index
    %c0_0 = arith.constant 0 : index
    %0 = vector.load %arg1[%c0, %c0_0] : memref<8x128xbf16, #tpu.memory_space<vmem>>, vector<8x128xbf16>
    %c0_1 = arith.constant 0 : index
    %c0_2 = arith.constant 0 : index
    %1 = vector.load %arg2[%c0_1, %c0_2] : memref<128x256xbf16, #tpu.memory_space<vmem>>, vector<128x256xbf16>
    %cst = arith.constant dense<0.000000e+00> : vector<8x256xf32>
    %2 = tpu.matmul %0, %1, %cst {dimension_numbers = #tpu.dot_dimension_numbers<[1], [0], [0], [1], [0, 0, 1, 1], [], []>} : vector<8x128xbf16>, vector<128x256xbf16>, vector<8x256xf32> -> vector<8x256xf32>
    %c0_3 = arith.constant 0 : index
    %c0_4 = arith.constant 0 : index
    %3 = vector.load %arg3[%c0_3, %c0_4] : memref<1x256xf32, #tpu.memory_space<vmem>>, vector<1x256xf32>
    %4 = vector.broadcast %3 : vector<1x256xf32> to vector<8x256xf32>
    %5 = arith.addf %2, %4 : vector<8x256xf32>
    %6 = arith.mulf %5, %5 : vector<8x256xf32>
    %7 = arith.mulf %5, %6 : vector<8x256xf32>
    %cst_5 = arith.constant 4.471500e-02 : f32
    %8 = vector.broadcast %cst_5 : f32 to vector<8x256xf32>
    %9 = arith.mulf %8, %7 : vector<8x256xf32>
    %10 = arith.addf %5, %9 : vector<8x256xf32>
    %cst_6 = arith.constant 0.797884583 : f32
    %11 = vector.broadcast %cst_6 : f32 to vector<8x256xf32>
    %12 = arith.mulf %11, %10 : vector<8x256xf32>
    %13 = math.tanh %12 : vector<8x256xf32>
    %cst_7 = arith.constant 1.000000e+00 : f32
    %14 = vector.broadcast %cst_7 : f32 to vector<8x256xf32>
    %15 = arith.addf %14, %13 : vector<8x256xf32>
    %cst_8 = arith.constant 5.000000e-01 : f32
    %16 = vector.broadcast %cst_8 : f32 to vector<8x256xf32>
    %17 = arith.mulf %16, %15 : vector<8x256xf32>
    %18 = arith.mulf %5, %17 : vector<8x256xf32>
    %19 = arith.truncf %18 : vector<8x256xf32> to vector<8x256xbf16>
    %c0_9 = arith.constant 0 : index
    %c0_10 = arith.constant 0 : index
    %20 = vector.load %arg4[%c0_9, %c0_10] : memref<256x128xbf16, #tpu.memory_space<vmem>>, vector<256x128xbf16>
    %cst_11 = arith.constant dense<0.000000e+00> : vector<8x128xf32>
    %21 = tpu.matmul %19, %20, %cst_11 {dimension_numbers = #tpu.dot_dimension_numbers<[1], [0], [0], [1], [0, 0, 1, 1], [], []>} : vector<8x256xbf16>, vector<256x128xbf16>, vector<8x128xf32> -> vector<8x128xf32>
    %c0_12 = arith.constant 0 : index
    %c0_13 = arith.constant 0 : index
    %22 = vector.load %arg5[%c0_12, %c0_13] : memref<1x128xf32, #tpu.memory_space<vmem>>, vector<1x128xf32>
    %23 = vector.broadcast %22 : vector<1x128xf32> to vector<8x128xf32>
    %24 = arith.addf %21, %23 : vector<8x128xf32>
    %25 = arith.extf %0 : vector<8x128xbf16> to vector<8x128xf32>
    %26 = arith.addf %24, %25 : vector<8x128xf32>
    %cst_14 = arith.constant dense<0.000000e+00> : vector<8xf32>
    %27 = vector.multi_reduction <add>, %26, %cst_14 [1] : vector<8x128xf32> to vector<8xf32>
    %28 = vector.shape_cast %27 : vector<8xf32> to vector<8x1xf32>
    %cst_15 = arith.constant 1.280000e+02 : f32
    %29 = vector.broadcast %cst_15 : f32 to vector<8x1xf32>
    %30 = arith.divf %28, %29 : vector<8x1xf32>
    %31 = vector.broadcast %30 : vector<8x1xf32> to vector<8x128xf32>
    %32 = arith.subf %26, %31 : vector<8x128xf32>
    %33 = arith.mulf %32, %32 : vector<8x128xf32>
    %cst_16 = arith.constant dense<0.000000e+00> : vector<8xf32>
    %34 = vector.multi_reduction <add>, %33, %cst_16 [1] : vector<8x128xf32> to vector<8xf32>
    %35 = vector.shape_cast %34 : vector<8xf32> to vector<8x1xf32>
    %cst_17 = arith.constant 1.280000e+02 : f32
    %36 = vector.broadcast %cst_17 : f32 to vector<8x1xf32>
    %37 = arith.divf %35, %36 : vector<8x1xf32>
    %38 = vector.broadcast %30 : vector<8x1xf32> to vector<8x128xf32>
    %39 = arith.subf %26, %38 : vector<8x128xf32>
    %cst_18 = arith.constant 9.99999974E-6 : f32
    %40 = vector.broadcast %cst_18 : f32 to vector<8x1xf32>
    %41 = arith.addf %37, %40 : vector<8x1xf32>
    %42 = math.rsqrt %41 : vector<8x1xf32>
    %43 = vector.broadcast %42 : vector<8x1xf32> to vector<8x128xf32>
    %44 = arith.mulf %39, %43 : vector<8x128xf32>
    %c0_19 = arith.constant 0 : index
    %c0_20 = arith.constant 0 : index
    %45 = vector.load %arg6[%c0_19, %c0_20] : memref<1x128xf32, #tpu.memory_space<vmem>>, vector<1x128xf32>
    %46 = vector.broadcast %45 : vector<1x128xf32> to vector<8x128xf32>
    %47 = arith.mulf %44, %46 : vector<8x128xf32>
    %c0_21 = arith.constant 0 : index
    %c0_22 = arith.constant 0 : index
    %48 = vector.load %arg7[%c0_21, %c0_22] : memref<1x128xf32, #tpu.memory_space<vmem>>, vector<1x128xf32>
    %49 = vector.broadcast %48 : vector<1x128xf32> to vector<8x128xf32>
    %50 = arith.addf %47, %49 : vector<8x128xf32>
    %51 = arith.truncf %50 : vector<8x128xf32> to vector<8x128xbf16>
    %c0_23 = arith.constant 0 : index
    %c0_24 = arith.constant 0 : index
    %52 = vector.load %arg8[%c0_23, %c0_24] : memref<8x128xbf16, #tpu.memory_space<vmem>>, vector<8x128xbf16>
    tpu.vector_store %arg8[%c0_23, %c0_24], %51 {strides = array<i32>} : memref<8x128xbf16, #tpu.memory_space<vmem>>, vector<8x128xbf16>,
    return
  }
  func.func @transform_0(%arg0: i32) -> (i32, i32) {
    %c0_i32 = arith.constant 0 : i32
    %c0_i32_0 = arith.constant 0 : i32
    return %arg0, %c0_i32 : i32, i32
  }
  func.func @transform_1(%arg0: i32) -> (i32, i32) {
    %c0_i32 = arith.constant 0 : i32
    %c0_i32_0 = arith.constant 0 : i32
    %c0_i32_1 = arith.constant 0 : i32
    return %c0_i32, %c0_i32_0 : i32, i32
  }
  func.func @transform_2(%arg0: i32) -> (i32, i32) {
    %c0_i32 = arith.constant 0 : i32
    %c0_i32_0 = arith.constant 0 : i32
    %c0_i32_1 = arith.constant 0 : i32
    return %c0_i32, %c0_i32_0 : i32, i32
  }
  func.func @transform_3(%arg0: i32) -> (i32, i32) {
    %c0_i32 = arith.constant 0 : i32
    %c0_i32_0 = arith.constant 0 : i32
    %c0_i32_1 = arith.constant 0 : i32
    return %c0_i32, %c0_i32_0 : i32, i32
  }
  func.func @transform_4(%arg0: i32) -> (i32, i32) {
    %c0_i32 = arith.constant 0 : i32
    %c0_i32_0 = arith.constant 0 : i32
    %c0_i32_1 = arith.constant 0 : i32
    return %c0_i32, %c0_i32_0 : i32, i32
  }
  func.func @transform_5(%arg0: i32) -> (i32, i32) {
    %c0_i32 = arith.constant 0 : i32
    %c0_i32_0 = arith.constant 0 : i32
    %c0_i32_1 = arith.constant 0 : i32
    return %c0_i32, %c0_i32_0 : i32, i32
  }
  func.func @transform_6(%arg0: i32) -> (i32, i32) {
    %c0_i32 = arith.constant 0 : i32
    %c0_i32_0 = arith.constant 0 : i32
    %c0_i32_1 = arith.constant 0 : i32
    return %c0_i32, %c0_i32_0 : i32, i32
  }
  func.func @transform_7(%arg0: i32) -> (i32, i32) {
    %c0_i32 = arith.constant 0 : i32
    %c0_i32_0 = arith.constant 0 : i32
    return %arg0, %c0_i32 : i32, i32
  }
}

module attributes {stable_mosaic.version = 11 : i64} {
  func.func @_mha_block_kernel(%arg0: i32, %arg1: i32, %arg2: memref<1x8x128xbf16, #tpu.memory_space<vmem>>, %arg3: memref<1x8x128xbf16, #tpu.memory_space<vmem>>, %arg4: memref<1x8x128xbf16, #tpu.memory_space<vmem>>, %arg5: memref<1x1x8xf32, #tpu.memory_space<vmem>>, %arg6: memref<128x128xbf16, #tpu.memory_space<vmem>>, %arg7: memref<1x128xf32, #tpu.memory_space<vmem>>, %arg8: memref<1x8x128xbf16, #tpu.memory_space<vmem>>, %arg9: memref<1x128xf32, #tpu.memory_space<vmem>>, %arg10: memref<1x128xf32, #tpu.memory_space<vmem>>, %arg11: memref<1x8x128xbf16, #tpu.memory_space<vmem>>) attributes {dimension_semantics = [#tpu.dimension_semantics<parallel>, #tpu.dimension_semantics<parallel>], iteration_bounds = array<i64: 2, 1>, scalar_prefetch = 0 : i64, scratch_operands = 0 : i64, tpu.core_type = #tpu.core_type<tc>, window_params = [{transform_indices = @transform_0, window_bounds = array<i64: 1, 8, 128>}, {transform_indices = @transform_1, window_bounds = array<i64: 1, 8, 128>}, {transform_indices = @transform_2, window_bounds = array<i64: 1, 8, 128>}, {transform_indices = @transform_3, window_bounds = array<i64: 1, 1, 8>}, {pipeline_mode = #tpu.pipeline_mode<synchronous>, transform_indices = @transform_4, window_bounds = array<i64: 128, 128>}, {pipeline_mode = #tpu.pipeline_mode<synchronous>, transform_indices = @transform_5, window_bounds = array<i64: 1, 128>}, {transform_indices = @transform_6, window_bounds = array<i64: 1, 8, 128>}, {pipeline_mode = #tpu.pipeline_mode<synchronous>, transform_indices = @transform_7, window_bounds = array<i64: 1, 128>}, {pipeline_mode = #tpu.pipeline_mode<synchronous>, transform_indices = @transform_8, window_bounds = array<i64: 1, 128>}, {transform_indices = @transform_9, window_bounds = array<i64: 1, 8, 128>}]} {
    %c0 = arith.constant 0 : index
    %c0_0 = arith.constant 0 : index
    %c0_1 = arith.constant 0 : index
    %0 = vector.load %arg2[%c0, %c0_0, %c0_1] : memref<1x8x128xbf16, #tpu.memory_space<vmem>>, vector<1x8x128xbf16>
    %1 = vector.shape_cast %0 : vector<1x8x128xbf16> to vector<8x128xbf16>
    %c0_2 = arith.constant 0 : index
    %c0_3 = arith.constant 0 : index
    %c0_4 = arith.constant 0 : index
    %2 = vector.load %arg3[%c0_2, %c0_3, %c0_4] : memref<1x8x128xbf16, #tpu.memory_space<vmem>>, vector<1x8x128xbf16>
    %3 = vector.shape_cast %2 : vector<1x8x128xbf16> to vector<8x128xbf16>
    %c0_5 = arith.constant 0 : index
    %c0_6 = arith.constant 0 : index
    %c0_7 = arith.constant 0 : index
    %4 = vector.load %arg4[%c0_5, %c0_6, %c0_7] : memref<1x8x128xbf16, #tpu.memory_space<vmem>>, vector<1x8x128xbf16>
    %5 = vector.shape_cast %4 : vector<1x8x128xbf16> to vector<8x128xbf16>
    %c0_8 = arith.constant 0 : index
    %c0_9 = arith.constant 0 : index
    %c0_10 = arith.constant 0 : index
    %6 = vector.load %arg5[%c0_8, %c0_9, %c0_10] : memref<1x1x8xf32, #tpu.memory_space<vmem>>, vector<1x1x8xf32>
    %7 = vector.shape_cast %6 : vector<1x1x8xf32> to vector<1x8xf32>
    %cst = arith.constant 5.000000e-01 : f32
    %8 = vector.broadcast %cst : f32 to vector<1x8xf32>
    %9 = arith.cmpf ogt, %7, %8 : vector<1x8xf32>
    %c8_i32 = arith.constant 8 : i32
    %10 = arith.muli %arg1, %c8_i32 : i32
    %11 = tpu.iota {dimensions = array<i32: 0>} : vector<8x8xi32>
    %12 = vector.broadcast %10 : i32 to vector<8x8xi32>
    %13 = arith.addi %11, %12 : vector<8x8xi32>
    %14 = tpu.iota {dimensions = array<i32: 1>} : vector<8x8xi32>
    %15 = arith.cmpi sle, %14, %13 : vector<8x8xi32>
    %16 = vector.broadcast %9 : vector<1x8xi1> to vector<8x8xi1>
    %17 = arith.andi %16, %15 : vector<8x8xi1>
    %cst_11 = arith.constant 0.000000e+00 : f32
    %cst_12 = arith.constant -1.000000e+09 : f32
    %18 = vector.broadcast %cst_11 : f32 to vector<8x8xf32>
    %19 = vector.broadcast %cst_12 : f32 to vector<8x8xf32>
    %20 = arith.select %17, %18, %19 : vector<8x8xi1>, vector<8x8xf32>
    %21 = vector.extract_strided_slice %1 {offsets = [0, 0], sizes = [8, 32], strides = [1, 1]} : vector<8x128xbf16> to vector<8x32xbf16>
    %22 = vector.extract_strided_slice %3 {offsets = [0, 0], sizes = [8, 32], strides = [1, 1]} : vector<8x128xbf16> to vector<8x32xbf16>
    %cst_13 = arith.constant dense<0.000000e+00> : vector<8x8xf32>
    %23 = tpu.matmul %21, %22, %cst_13 {dimension_numbers = #tpu.dot_dimension_numbers<[1], [1], [0], [0], [0, 0, 1, 0], [], []>} : vector<8x32xbf16>, vector<8x32xbf16>, vector<8x8xf32> -> vector<8x8xf32>
    %cst_14 = arith.constant 0.176776692 : f32
    %24 = vector.broadcast %cst_14 : f32 to vector<8x8xf32>
    %25 = arith.mulf %23, %24 : vector<8x8xf32>
    %26 = arith.addf %25, %20 : vector<8x8xf32>
    %cst_15 = arith.constant dense<0xFF800000> : vector<8xf32>
    %27 = vector.multi_reduction <maximumf>, %26, %cst_15 [1] : vector<8x8xf32> to vector<8xf32>
    %28 = vector.shape_cast %27 : vector<8xf32> to vector<8x1xf32>
    %29 = vector.broadcast %28 : vector<8x1xf32> to vector<8x8xf32>
    %30 = arith.subf %26, %29 : vector<8x8xf32>
    %31 = math.exp %30 : vector<8x8xf32>
    %cst_16 = arith.constant dense<0.000000e+00> : vector<8xf32>
    %32 = vector.multi_reduction <add>, %31, %cst_16 [1] : vector<8x8xf32> to vector<8xf32>
    %33 = vector.shape_cast %32 : vector<8xf32> to vector<8x1xf32>
    %34 = tpu.reciprocal %33 {approx = true} : vector<8x1xf32> -> vector<8x1xf32>
    %35 = vector.broadcast %34 : vector<8x1xf32> to vector<8x8xf32>
    %36 = arith.mulf %31, %35 : vector<8x8xf32>
    %37 = arith.truncf %36 : vector<8x8xf32> to vector<8x8xbf16>
    %38 = vector.extract_strided_slice %5 {offsets = [0, 0], sizes = [8, 32], strides = [1, 1]} : vector<8x128xbf16> to vector<8x32xbf16>
    %cst_17 = arith.constant dense<0.000000e+00> : vector<8x32xf32>
    %39 = tpu.matmul %37, %38, %cst_17 {dimension_numbers = #tpu.dot_dimension_numbers<[1], [0], [0], [1], [0, 0, 1, 1], [], []>} : vector<8x8xbf16>, vector<8x32xbf16>, vector<8x32xf32> -> vector<8x32xf32>
    %40 = vector.extract_strided_slice %1 {offsets = [0, 32], sizes = [8, 32], strides = [1, 1]} : vector<8x128xbf16> to vector<8x32xbf16>
    %41 = vector.extract_strided_slice %3 {offsets = [0, 32], sizes = [8, 32], strides = [1, 1]} : vector<8x128xbf16> to vector<8x32xbf16>
    %cst_18 = arith.constant dense<0.000000e+00> : vector<8x8xf32>
    %42 = tpu.matmul %40, %41, %cst_18 {dimension_numbers = #tpu.dot_dimension_numbers<[1], [1], [0], [0], [0, 0, 1, 0], [], []>} : vector<8x32xbf16>, vector<8x32xbf16>, vector<8x8xf32> -> vector<8x8xf32>
    %cst_19 = arith.constant 0.176776692 : f32
    %43 = vector.broadcast %cst_19 : f32 to vector<8x8xf32>
    %44 = arith.mulf %42, %43 : vector<8x8xf32>
    %45 = arith.addf %44, %20 : vector<8x8xf32>
    %cst_20 = arith.constant dense<0xFF800000> : vector<8xf32>
    %46 = vector.multi_reduction <maximumf>, %45, %cst_20 [1] : vector<8x8xf32> to vector<8xf32>
    %47 = vector.shape_cast %46 : vector<8xf32> to vector<8x1xf32>
    %48 = vector.broadcast %47 : vector<8x1xf32> to vector<8x8xf32>
    %49 = arith.subf %45, %48 : vector<8x8xf32>
    %50 = math.exp %49 : vector<8x8xf32>
    %cst_21 = arith.constant dense<0.000000e+00> : vector<8xf32>
    %51 = vector.multi_reduction <add>, %50, %cst_21 [1] : vector<8x8xf32> to vector<8xf32>
    %52 = vector.shape_cast %51 : vector<8xf32> to vector<8x1xf32>
    %53 = tpu.reciprocal %52 {approx = true} : vector<8x1xf32> -> vector<8x1xf32>
    %54 = vector.broadcast %53 : vector<8x1xf32> to vector<8x8xf32>
    %55 = arith.mulf %50, %54 : vector<8x8xf32>
    %56 = arith.truncf %55 : vector<8x8xf32> to vector<8x8xbf16>
    %57 = vector.extract_strided_slice %5 {offsets = [0, 32], sizes = [8, 32], strides = [1, 1]} : vector<8x128xbf16> to vector<8x32xbf16>
    %cst_22 = arith.constant dense<0.000000e+00> : vector<8x32xf32>
    %58 = tpu.matmul %56, %57, %cst_22 {dimension_numbers = #tpu.dot_dimension_numbers<[1], [0], [0], [1], [0, 0, 1, 1], [], []>} : vector<8x8xbf16>, vector<8x32xbf16>, vector<8x32xf32> -> vector<8x32xf32>
    %59 = vector.extract_strided_slice %1 {offsets = [0, 64], sizes = [8, 32], strides = [1, 1]} : vector<8x128xbf16> to vector<8x32xbf16>
    %60 = vector.extract_strided_slice %3 {offsets = [0, 64], sizes = [8, 32], strides = [1, 1]} : vector<8x128xbf16> to vector<8x32xbf16>
    %cst_23 = arith.constant dense<0.000000e+00> : vector<8x8xf32>
    %61 = tpu.matmul %59, %60, %cst_23 {dimension_numbers = #tpu.dot_dimension_numbers<[1], [1], [0], [0], [0, 0, 1, 0], [], []>} : vector<8x32xbf16>, vector<8x32xbf16>, vector<8x8xf32> -> vector<8x8xf32>
    %cst_24 = arith.constant 0.176776692 : f32
    %62 = vector.broadcast %cst_24 : f32 to vector<8x8xf32>
    %63 = arith.mulf %61, %62 : vector<8x8xf32>
    %64 = arith.addf %63, %20 : vector<8x8xf32>
    %cst_25 = arith.constant dense<0xFF800000> : vector<8xf32>
    %65 = vector.multi_reduction <maximumf>, %64, %cst_25 [1] : vector<8x8xf32> to vector<8xf32>
    %66 = vector.shape_cast %65 : vector<8xf32> to vector<8x1xf32>
    %67 = vector.broadcast %66 : vector<8x1xf32> to vector<8x8xf32>
    %68 = arith.subf %64, %67 : vector<8x8xf32>
    %69 = math.exp %68 : vector<8x8xf32>
    %cst_26 = arith.constant dense<0.000000e+00> : vector<8xf32>
    %70 = vector.multi_reduction <add>, %69, %cst_26 [1] : vector<8x8xf32> to vector<8xf32>
    %71 = vector.shape_cast %70 : vector<8xf32> to vector<8x1xf32>
    %72 = tpu.reciprocal %71 {approx = true} : vector<8x1xf32> -> vector<8x1xf32>
    %73 = vector.broadcast %72 : vector<8x1xf32> to vector<8x8xf32>
    %74 = arith.mulf %69, %73 : vector<8x8xf32>
    %75 = arith.truncf %74 : vector<8x8xf32> to vector<8x8xbf16>
    %76 = vector.extract_strided_slice %5 {offsets = [0, 64], sizes = [8, 32], strides = [1, 1]} : vector<8x128xbf16> to vector<8x32xbf16>
    %cst_27 = arith.constant dense<0.000000e+00> : vector<8x32xf32>
    %77 = tpu.matmul %75, %76, %cst_27 {dimension_numbers = #tpu.dot_dimension_numbers<[1], [0], [0], [1], [0, 0, 1, 1], [], []>} : vector<8x8xbf16>, vector<8x32xbf16>, vector<8x32xf32> -> vector<8x32xf32>
    %78 = vector.extract_strided_slice %1 {offsets = [0, 96], sizes = [8, 32], strides = [1, 1]} : vector<8x128xbf16> to vector<8x32xbf16>
    %79 = vector.extract_strided_slice %3 {offsets = [0, 96], sizes = [8, 32], strides = [1, 1]} : vector<8x128xbf16> to vector<8x32xbf16>
    %cst_28 = arith.constant dense<0.000000e+00> : vector<8x8xf32>
    %80 = tpu.matmul %78, %79, %cst_28 {dimension_numbers = #tpu.dot_dimension_numbers<[1], [1], [0], [0], [0, 0, 1, 0], [], []>} : vector<8x32xbf16>, vector<8x32xbf16>, vector<8x8xf32> -> vector<8x8xf32>
    %cst_29 = arith.constant 0.176776692 : f32
    %81 = vector.broadcast %cst_29 : f32 to vector<8x8xf32>
    %82 = arith.mulf %80, %81 : vector<8x8xf32>
    %83 = arith.addf %82, %20 : vector<8x8xf32>
    %cst_30 = arith.constant dense<0xFF800000> : vector<8xf32>
    %84 = vector.multi_reduction <maximumf>, %83, %cst_30 [1] : vector<8x8xf32> to vector<8xf32>
    %85 = vector.shape_cast %84 : vector<8xf32> to vector<8x1xf32>
    %86 = vector.broadcast %85 : vector<8x1xf32> to vector<8x8xf32>
    %87 = arith.subf %83, %86 : vector<8x8xf32>
    %88 = math.exp %87 : vector<8x8xf32>
    %cst_31 = arith.constant dense<0.000000e+00> : vector<8xf32>
    %89 = vector.multi_reduction <add>, %88, %cst_31 [1] : vector<8x8xf32> to vector<8xf32>
    %90 = vector.shape_cast %89 : vector<8xf32> to vector<8x1xf32>
    %91 = tpu.reciprocal %90 {approx = true} : vector<8x1xf32> -> vector<8x1xf32>
    %92 = vector.broadcast %91 : vector<8x1xf32> to vector<8x8xf32>
    %93 = arith.mulf %88, %92 : vector<8x8xf32>
    %94 = arith.truncf %93 : vector<8x8xf32> to vector<8x8xbf16>
    %95 = vector.extract_strided_slice %5 {offsets = [0, 96], sizes = [8, 32], strides = [1, 1]} : vector<8x128xbf16> to vector<8x32xbf16>
    %cst_32 = arith.constant dense<0.000000e+00> : vector<8x32xf32>
    %96 = tpu.matmul %94, %95, %cst_32 {dimension_numbers = #tpu.dot_dimension_numbers<[1], [0], [0], [1], [0, 0, 1, 1], [], []>} : vector<8x8xbf16>, vector<8x32xbf16>, vector<8x32xf32> -> vector<8x32xf32>
    %97 = tpu.concatenate %39, %58, %77, %96 in 1 : vector<8x32xf32>, vector<8x32xf32>, vector<8x32xf32>, vector<8x32xf32> -> vector<8x128xf32>
    %98 = arith.truncf %97 : vector<8x128xf32> to vector<8x128xbf16>
    %c0_33 = arith.constant 0 : index
    %c0_34 = arith.constant 0 : index
    %99 = vector.load %arg6[%c0_33, %c0_34] : memref<128x128xbf16, #tpu.memory_space<vmem>>, vector<128x128xbf16>
    %cst_35 = arith.constant dense<0.000000e+00> : vector<8x128xf32>
    %100 = tpu.matmul %98, %99, %cst_35 {dimension_numbers = #tpu.dot_dimension_numbers<[1], [0], [0], [1], [0, 0, 1, 1], [], []>} : vector<8x128xbf16>, vector<128x128xbf16>, vector<8x128xf32> -> vector<8x128xf32>
    %c0_36 = arith.constant 0 : index
    %c0_37 = arith.constant 0 : index
    %101 = vector.load %arg7[%c0_36, %c0_37] : memref<1x128xf32, #tpu.memory_space<vmem>>, vector<1x128xf32>
    %102 = vector.broadcast %101 : vector<1x128xf32> to vector<8x128xf32>
    %103 = arith.addf %100, %102 : vector<8x128xf32>
    %c0_38 = arith.constant 0 : index
    %c0_39 = arith.constant 0 : index
    %c0_40 = arith.constant 0 : index
    %104 = vector.load %arg8[%c0_38, %c0_39, %c0_40] : memref<1x8x128xbf16, #tpu.memory_space<vmem>>, vector<1x8x128xbf16>
    %105 = vector.shape_cast %104 : vector<1x8x128xbf16> to vector<8x128xbf16>
    %106 = arith.extf %105 : vector<8x128xbf16> to vector<8x128xf32>
    %107 = arith.addf %103, %106 : vector<8x128xf32>
    %cst_41 = arith.constant dense<0.000000e+00> : vector<8xf32>
    %108 = vector.multi_reduction <add>, %107, %cst_41 [1] : vector<8x128xf32> to vector<8xf32>
    %109 = vector.shape_cast %108 : vector<8xf32> to vector<8x1xf32>
    %cst_42 = arith.constant 1.280000e+02 : f32
    %110 = vector.broadcast %cst_42 : f32 to vector<8x1xf32>
    %111 = arith.divf %109, %110 : vector<8x1xf32>
    %112 = vector.broadcast %111 : vector<8x1xf32> to vector<8x128xf32>
    %113 = arith.subf %107, %112 : vector<8x128xf32>
    %114 = arith.mulf %113, %113 : vector<8x128xf32>
    %cst_43 = arith.constant dense<0.000000e+00> : vector<8xf32>
    %115 = vector.multi_reduction <add>, %114, %cst_43 [1] : vector<8x128xf32> to vector<8xf32>
    %116 = vector.shape_cast %115 : vector<8xf32> to vector<8x1xf32>
    %cst_44 = arith.constant 1.280000e+02 : f32
    %117 = vector.broadcast %cst_44 : f32 to vector<8x1xf32>
    %118 = arith.divf %116, %117 : vector<8x1xf32>
    %119 = vector.broadcast %111 : vector<8x1xf32> to vector<8x128xf32>
    %120 = arith.subf %107, %119 : vector<8x128xf32>
    %cst_45 = arith.constant 9.99999974E-6 : f32
    %121 = vector.broadcast %cst_45 : f32 to vector<8x1xf32>
    %122 = arith.addf %118, %121 : vector<8x1xf32>
    %123 = math.rsqrt %122 : vector<8x1xf32>
    %124 = vector.broadcast %123 : vector<8x1xf32> to vector<8x128xf32>
    %125 = arith.mulf %120, %124 : vector<8x128xf32>
    %c0_46 = arith.constant 0 : index
    %c0_47 = arith.constant 0 : index
    %126 = vector.load %arg9[%c0_46, %c0_47] : memref<1x128xf32, #tpu.memory_space<vmem>>, vector<1x128xf32>
    %127 = vector.broadcast %126 : vector<1x128xf32> to vector<8x128xf32>
    %128 = arith.mulf %125, %127 : vector<8x128xf32>
    %c0_48 = arith.constant 0 : index
    %c0_49 = arith.constant 0 : index
    %129 = vector.load %arg10[%c0_48, %c0_49] : memref<1x128xf32, #tpu.memory_space<vmem>>, vector<1x128xf32>
    %130 = vector.broadcast %129 : vector<1x128xf32> to vector<8x128xf32>
    %131 = arith.addf %128, %130 : vector<8x128xf32>
    %132 = arith.truncf %131 : vector<8x128xf32> to vector<8x128xbf16>
    %c0_50 = arith.constant 0 : index
    %c0_51 = arith.constant 0 : index
    %c0_52 = arith.constant 0 : index
    %133 = vector.load %arg11[%c0_50, %c0_51, %c0_52] : memref<1x8x128xbf16, #tpu.memory_space<vmem>>, vector<1x8x128xbf16>
    %134 = vector.shape_cast %133 : vector<1x8x128xbf16> to vector<8x128xbf16>
    %135 = vector.shape_cast %132 : vector<8x128xbf16> to vector<1x8x128xbf16>
    tpu.vector_store %arg11[%c0_50, %c0_51, %c0_52], %135 {strides = array<i32>} : memref<1x8x128xbf16, #tpu.memory_space<vmem>>, vector<1x8x128xbf16>,
    return
  }
  func.func @transform_0(%arg0: i32, %arg1: i32) -> (i32, i32, i32) {
    %c0_i32 = arith.constant 0 : i32
    %c0_i32_0 = arith.constant 0 : i32
    return %arg0, %arg1, %c0_i32 : i32, i32, i32
  }
  func.func @transform_1(%arg0: i32, %arg1: i32) -> (i32, i32, i32) {
    %c0_i32 = arith.constant 0 : i32
    %c1_i32 = arith.constant 1 : i32
    %c0_i32_0 = arith.constant 0 : i32
    return %arg0, %c0_i32, %c1_i32 : i32, i32, i32
  }
  func.func @transform_2(%arg0: i32, %arg1: i32) -> (i32, i32, i32) {
    %c0_i32 = arith.constant 0 : i32
    %c2_i32 = arith.constant 2 : i32
    %c0_i32_0 = arith.constant 0 : i32
    return %arg0, %c0_i32, %c2_i32 : i32, i32, i32
  }
  func.func @transform_3(%arg0: i32, %arg1: i32) -> (i32, i32, i32) {
    %c0_i32 = arith.constant 0 : i32
    %c0_i32_0 = arith.constant 0 : i32
    %c0_i32_1 = arith.constant 0 : i32
    return %arg0, %c0_i32, %c0_i32_0 : i32, i32, i32
  }
  func.func @transform_4(%arg0: i32, %arg1: i32) -> (i32, i32) {
    %c0_i32 = arith.constant 0 : i32
    %c0_i32_0 = arith.constant 0 : i32
    %c0_i32_1 = arith.constant 0 : i32
    return %c0_i32, %c0_i32_0 : i32, i32
  }
  func.func @transform_5(%arg0: i32, %arg1: i32) -> (i32, i32) {
    %c0_i32 = arith.constant 0 : i32
    %c0_i32_0 = arith.constant 0 : i32
    %c0_i32_1 = arith.constant 0 : i32
    return %c0_i32, %c0_i32_0 : i32, i32
  }
  func.func @transform_6(%arg0: i32, %arg1: i32) -> (i32, i32, i32) {
    %c0_i32 = arith.constant 0 : i32
    %c0_i32_0 = arith.constant 0 : i32
    return %arg0, %arg1, %c0_i32 : i32, i32, i32
  }
  func.func @transform_7(%arg0: i32, %arg1: i32) -> (i32, i32) {
    %c0_i32 = arith.constant 0 : i32
    %c0_i32_0 = arith.constant 0 : i32
    %c0_i32_1 = arith.constant 0 : i32
    return %c0_i32, %c0_i32_0 : i32, i32
  }
  func.func @transform_8(%arg0: i32, %arg1: i32) -> (i32, i32) {
    %c0_i32 = arith.constant 0 : i32
    %c0_i32_0 = arith.constant 0 : i32
    %c0_i32_1 = arith.constant 0 : i32
    return %c0_i32, %c0_i32_0 : i32, i32
  }
  func.func @transform_9(%arg0: i32, %arg1: i32) -> (i32, i32, i32) {
    %c0_i32 = arith.constant 0 : i32
    %c0_i32_0 = arith.constant 0 : i32
    return %arg0, %arg1, %c0_i32 : i32, i32, i32
  }
}

module attributes {stable_mosaic.version = 11 : i64} {
  func.func @_logits_ce_kernel(%arg0: i32, %arg1: i32, %arg2: memref<8x128xbf16, #tpu.memory_space<vmem>>, %arg3: memref<256x128xbf16, #tpu.memory_space<vmem>>, %arg4: memref<8x256xbf16, #tpu.memory_space<vmem>>, %arg5: memref<8x1xi32, #tpu.memory_space<vmem>>, %arg6: memref<8x1xf32, #tpu.memory_space<vmem>>, %arg7: memref<8x1xf32, #tpu.memory_space<vmem>>, %arg8: memref<8x1xf32, #tpu.memory_space<vmem>>, %arg9: memref<8x1xf32, #tpu.memory_space<vmem>>, %arg10: memref<8x1xf32, #tpu.memory_space<vmem>>) attributes {dimension_semantics = [#tpu.dimension_semantics<parallel>, #tpu.dimension_semantics<arbitrary>], iteration_bounds = array<i64: 2, 1>, scalar_prefetch = 0 : i64, scratch_operands = 3 : i64, tpu.core_type = #tpu.core_type<tc>, window_params = [{transform_indices = @transform_0, window_bounds = array<i64: 8, 128>}, {transform_indices = @transform_1, window_bounds = array<i64: 256, 128>}, {transform_indices = @transform_2, window_bounds = array<i64: 8, 256>}, {transform_indices = @transform_3, window_bounds = array<i64: 8, 1>}, {transform_indices = @transform_4, window_bounds = array<i64: 8, 1>}, {transform_indices = @transform_5, window_bounds = array<i64: 8, 1>}]} {
    %c0_i32 = arith.constant 0 : i32
    %0 = arith.cmpi eq, %arg1, %c0_i32 : i32
    %1 = arith.extui %0 : i1 to i32
    %c0_i32_0 = arith.constant 0 : i32
    %2 = arith.cmpi ne, %1, %c0_i32_0 : i32
    scf.if %2 {
      %cst_28 = arith.constant 0xFF800000 : f32
      %46 = vector.broadcast %cst_28 : f32 to vector<8x1xf32>
      %c0_29 = arith.constant 0 : index
      %c0_30 = arith.constant 0 : index
      %47 = vector.load %arg8[%c0_29, %c0_30] : memref<8x1xf32, #tpu.memory_space<vmem>>, vector<8x1xf32>
      tpu.vector_store %arg8[%c0_29, %c0_30], %46 {strides = array<i32>} : memref<8x1xf32, #tpu.memory_space<vmem>>, vector<8x1xf32>,
      %cst_31 = arith.constant 0.000000e+00 : f32
      %48 = vector.broadcast %cst_31 : f32 to vector<8x1xf32>
      %c0_32 = arith.constant 0 : index
      %c0_33 = arith.constant 0 : index
      %49 = vector.load %arg9[%c0_32, %c0_33] : memref<8x1xf32, #tpu.memory_space<vmem>>, vector<8x1xf32>
      tpu.vector_store %arg9[%c0_32, %c0_33], %48 {strides = array<i32>} : memref<8x1xf32, #tpu.memory_space<vmem>>, vector<8x1xf32>,
      %cst_34 = arith.constant 0.000000e+00 : f32
      %50 = vector.broadcast %cst_34 : f32 to vector<8x1xf32>
      %c0_35 = arith.constant 0 : index
      %c0_36 = arith.constant 0 : index
      %51 = vector.load %arg10[%c0_35, %c0_36] : memref<8x1xf32, #tpu.memory_space<vmem>>, vector<8x1xf32>
      tpu.vector_store %arg10[%c0_35, %c0_36], %50 {strides = array<i32>} : memref<8x1xf32, #tpu.memory_space<vmem>>, vector<8x1xf32>,
    } else {
    }
    %c0 = arith.constant 0 : index
    %c0_1 = arith.constant 0 : index
    %3 = vector.load %arg2[%c0, %c0_1] : memref<8x128xbf16, #tpu.memory_space<vmem>>, vector<8x128xbf16>
    %c0_2 = arith.constant 0 : index
    %c0_3 = arith.constant 0 : index
    %4 = vector.load %arg3[%c0_2, %c0_3] : memref<256x128xbf16, #tpu.memory_space<vmem>>, vector<256x128xbf16>
    %cst = arith.constant dense<0.000000e+00> : vector<8x256xf32>
    %5 = tpu.matmul %3, %4, %cst {dimension_numbers = #tpu.dot_dimension_numbers<[1], [1], [0], [0], [0, 0, 1, 0], [], []>} : vector<8x128xbf16>, vector<256x128xbf16>, vector<8x256xf32> -> vector<8x256xf32>
    %c0_4 = arith.constant 0 : index
    %c0_5 = arith.constant 0 : index
    %6 = vector.load %arg4[%c0_4, %c0_5] : memref<8x256xbf16, #tpu.memory_space<vmem>>, vector<8x256xbf16>
    %7 = arith.extf %6 : vector<8x256xbf16> to vector<8x256xf32>
    %8 = arith.addf %5, %7 : vector<8x256xf32>
    %9 = tpu.iota {dimensions = array<i32: 1>} : vector<8x256xi32>
    %c256_i32 = arith.constant 256 : i32
    %10 = arith.muli %arg1, %c256_i32 : i32
    %11 = vector.broadcast %10 : i32 to vector<8x256xi32>
    %12 = arith.addi %9, %11 : vector<8x256xi32>
    %c256_i32_6 = arith.constant 256 : i32
    %13 = vector.broadcast %c256_i32_6 : i32 to vector<8x256xi32>
    %14 = arith.cmpi slt, %12, %13 : vector<8x256xi32>
    %cst_7 = arith.constant -1.000000e+30 : f32
    %15 = vector.broadcast %cst_7 : f32 to vector<8x256xf32>
    %16 = arith.select %14, %8, %15 : vector<8x256xi1>, vector<8x256xf32>
    %c0_8 = arith.constant 0 : index
    %c0_9 = arith.constant 0 : index
    %17 = vector.load %arg5[%c0_8, %c0_9] : memref<8x1xi32, #tpu.memory_space<vmem>>, vector<8x1xi32>
    %c0_10 = arith.constant 0 : index
    %c0_11 = arith.constant 0 : index
    %18 = vector.load %arg10[%c0_10, %c0_11] : memref<8x1xf32, #tpu.memory_space<vmem>>, vector<8x1xf32>
    %19 = vector.broadcast %17 : vector<8x1xi32> to vector<8x256xi32>
    %20 = arith.cmpi eq, %12, %19 : vector<8x256xi32>
    %cst_12 = arith.constant 0.000000e+00 : f32
    %21 = vector.broadcast %cst_12 : f32 to vector<8x256xf32>
    %22 = arith.select %20, %16, %21 : vector<8x256xi1>, vector<8x256xf32>
    %cst_13 = arith.constant dense<0.000000e+00> : vector<8xf32>
    %23 = vector.multi_reduction <add>, %22, %cst_13 [1] : vector<8x256xf32> to vector<8xf32>
    %24 = vector.shape_cast %23 : vector<8xf32> to vector<8x1xf32>
    %25 = arith.addf %18, %24 : vector<8x1xf32>
    %c0_14 = arith.constant 0 : index
    %c0_15 = arith.constant 0 : index
    %26 = vector.load %arg10[%c0_14, %c0_15] : memref<8x1xf32, #tpu.memory_space<vmem>>, vector<8x1xf32>
    tpu.vector_store %arg10[%c0_14, %c0_15], %25 {strides = array<i32>} : memref<8x1xf32, #tpu.memory_space<vmem>>, vector<8x1xf32>,
    %c0_16 = arith.constant 0 : index
    %c0_17 = arith.constant 0 : index
    %27 = vector.load %arg8[%c0_16, %c0_17] : memref<8x1xf32, #tpu.memory_space<vmem>>, vector<8x1xf32>
    %cst_18 = arith.constant dense<0xFF800000> : vector<8xf32>
    %28 = vector.multi_reduction <maximumf>, %16, %cst_18 [1] : vector<8x256xf32> to vector<8xf32>
    %29 = vector.shape_cast %28 : vector<8xf32> to vector<8x1xf32>
    %30 = arith.maximumf %27, %29 : vector<8x1xf32>
    %c0_19 = arith.constant 0 : index
    %c0_20 = arith.constant 0 : index
    %31 = vector.load %arg9[%c0_19, %c0_20] : memref<8x1xf32, #tpu.memory_space<vmem>>, vector<8x1xf32>
    %32 = arith.subf %27, %30 : vector<8x1xf32>
    %33 = math.exp %32 : vector<8x1xf32>
    %34 = arith.mulf %31, %33 : vector<8x1xf32>
    %35 = vector.broadcast %30 : vector<8x1xf32> to vector<8x256xf32>
    %36 = arith.subf %16, %35 : vector<8x256xf32>
    %37 = math.exp %36 : vector<8x256xf32>
    %cst_21 = arith.constant dense<0.000000e+00> : vector<8xf32>
    %38 = vector.multi_reduction <add>, %37, %cst_21 [1] : vector<8x256xf32> to vector<8xf32>
    %39 = vector.shape_cast %38 : vector<8xf32> to vector<8x1xf32>
    %40 = arith.addf %34, %39 : vector<8x1xf32>
    %c0_22 = arith.constant 0 : index
    %c0_23 = arith.constant 0 : index
    %41 = vector.load %arg9[%c0_22, %c0_23] : memref<8x1xf32, #tpu.memory_space<vmem>>, vector<8x1xf32>
    tpu.vector_store %arg9[%c0_22, %c0_23], %40 {strides = array<i32>} : memref<8x1xf32, #tpu.memory_space<vmem>>, vector<8x1xf32>,
    %c0_24 = arith.constant 0 : index
    %c0_25 = arith.constant 0 : index
    %42 = vector.load %arg8[%c0_24, %c0_25] : memref<8x1xf32, #tpu.memory_space<vmem>>, vector<8x1xf32>
    tpu.vector_store %arg8[%c0_24, %c0_25], %30 {strides = array<i32>} : memref<8x1xf32, #tpu.memory_space<vmem>>, vector<8x1xf32>,
    %c0_i32_26 = arith.constant 0 : i32
    %43 = arith.cmpi eq, %arg1, %c0_i32_26 : i32
    %44 = arith.extui %43 : i1 to i32
    %c0_i32_27 = arith.constant 0 : i32
    %45 = arith.cmpi ne, %44, %c0_i32_27 : i32
    scf.if %45 {
      %c0_28 = arith.constant 0 : index
      %c0_29 = arith.constant 0 : index
      %46 = vector.load %arg8[%c0_28, %c0_29] : memref<8x1xf32, #tpu.memory_space<vmem>>, vector<8x1xf32>
      %c0_30 = arith.constant 0 : index
      %c0_31 = arith.constant 0 : index
      %47 = vector.load %arg9[%c0_30, %c0_31] : memref<8x1xf32, #tpu.memory_space<vmem>>, vector<8x1xf32>
      %48 = math.log %47 : vector<8x1xf32>
      %49 = arith.addf %46, %48 : vector<8x1xf32>
      %c0_i32_32 = arith.constant 0 : i32
      %50 = vector.broadcast %c0_i32_32 : i32 to vector<8x1xi32>
      %51 = arith.cmpi ne, %17, %50 : vector<8x1xi32>
      %52 = arith.extui %51 : vector<8x1xi1> to vector<8x1xi32>
      %53 = arith.sitofp %52 : vector<8x1xi32> to vector<8x1xf32>
      %c0_33 = arith.constant 0 : index
      %c0_34 = arith.constant 0 : index
      %54 = vector.load %arg10[%c0_33, %c0_34] : memref<8x1xf32, #tpu.memory_space<vmem>>, vector<8x1xf32>
      %55 = arith.subf %49, %54 : vector<8x1xf32>
      %56 = arith.mulf %55, %53 : vector<8x1xf32>
      %c0_35 = arith.constant 0 : index
      %c0_36 = arith.constant 0 : index
      %57 = vector.load %arg6[%c0_35, %c0_36] : memref<8x1xf32, #tpu.memory_space<vmem>>, vector<8x1xf32>
      tpu.vector_store %arg6[%c0_35, %c0_36], %56 {strides = array<i32>} : memref<8x1xf32, #tpu.memory_space<vmem>>, vector<8x1xf32>,
      %c0_37 = arith.constant 0 : index
      %c0_38 = arith.constant 0 : index
      %58 = vector.load %arg7[%c0_37, %c0_38] : memref<8x1xf32, #tpu.memory_space<vmem>>, vector<8x1xf32>
      tpu.vector_store %arg7[%c0_37, %c0_38], %53 {strides = array<i32>} : memref<8x1xf32, #tpu.memory_space<vmem>>, vector<8x1xf32>,
    } else {
    }
    return
  }
  func.func @transform_0(%arg0: i32, %arg1: i32) -> (i32, i32) {
    %c0_i32 = arith.constant 0 : i32
    %c0_i32_0 = arith.constant 0 : i32
    return %arg0, %c0_i32 : i32, i32
  }
  func.func @transform_1(%arg0: i32, %arg1: i32) -> (i32, i32) {
    %c0_i32 = arith.constant 0 : i32
    %c0_i32_0 = arith.constant 0 : i32
    return %arg1, %c0_i32 : i32, i32
  }
  func.func @transform_2(%arg0: i32, %arg1: i32) -> (i32, i32) {
    %c0_i32 = arith.constant 0 : i32
    return %arg0, %arg1 : i32, i32
  }
  func.func @transform_3(%arg0: i32, %arg1: i32) -> (i32, i32) {
    %c0_i32 = arith.constant 0 : i32
    %c0_i32_0 = arith.constant 0 : i32
    return %arg0, %c0_i32 : i32, i32
  }
  func.func @transform_4(%arg0: i32, %arg1: i32) -> (i32, i32) {
    %c0_i32 = arith.constant 0 : i32
    %c0_i32_0 = arith.constant 0 : i32
    return %arg0, %c0_i32 : i32, i32
  }
  func.func @transform_5(%arg0: i32, %arg1: i32) -> (i32, i32) {
    %c0_i32 = arith.constant 0 : i32
    %c0_i32_0 = arith.constant 0 : i32
    return %arg0, %c0_i32 : i32, i32
  }
}

</mosaic_0001>

<bundles_post_ra>
// kernel: bert2tf_forward.21
= control target key start
LH: loop header
LB: loop body
LE: loop exit
PB: predicated region body
PF: predicated region fallthrough
CT: control target
= control target key end

     0   :  { %s363_s12 = smov 0   ;;  %s393_s0 = inlined_call_operand.vmem [shape: bf16[32,128], index: 0, kind: input, shape index: {}]   ;;  %s394_s1 = inlined_call_operand.vmem [shape: f32[1,128], index: 1, kind: input, shape index: {}]   ;;  %s395_s2 = inlined_call_operand.vmem [shape: f32[1,128], index: 2, kind: input, shape index: {}]   ;;  %s396_s3 = inlined_call_operand.vmem [shape: bf16[32,128], index: 3, kind: output, shape index: {}]  }
   0x1 LB: > { %s297_s13 = sadd.s32 4294967295, %s340_s12   ;;  %p301_p0 = scmp.ge.s32.totalorder %s340_s12, 1  ;;  %s340_s12 = sphi %s363_s12, %s13_s12  }
   0x2   : > { %p138_p1 = scmp.lt.s32.totalorder %s340_s12, 3 }
   0x4   : > { %p139_p2 = pnand %p301_p0, %p138_p1 }
   0x5   : > { %s302_s14 = sshll.u32 (!%p139_p2), %s297_s13, 1 }
   0x6   : > { %142 = sbr.rel (%p139_p2) target bundleno = 294 (0x126), region = 32  ;;  %p163_p3 = scmp.lt.s32.totalorder (!%p139_p2), %s302_s14, 3 }
   0xb   : > { %s398_s14 = smov (!%p163_p3, %s302_s14), 3  ;;  %v342_v3 = vmov 128.0   ;;  %v326_v36 = vld [vmem:[%s394_s1] ss:$0 sm:$0xff] }
   0xc   : > { %s303_s15 = sshll.u32 %s398_s14, 2  ;;  %328 = vrcp.f32 %v342_v3  ;;  %v327_v40 = vld [vmem:[%s395_s2] ss:$0 sm:$0xff] }
   0xd   : > { %s166_s18 = scalar_lea.vmem %s393_s0, %s303_s15  ;;  %s172_s25 = scalar_lea.vmem %s396_s3, %s303_s15 }
   0xe   : > { %v309_v0 = vld [vmem:[%s166_s18] sm:$0xff]  }
   0xf   : > { %v310_v1 = vunpack.c.l.bf16 %v309_v0  ;;  %v311_v2 = vunpack.c.h.bf16 %v309_v0 }
  0x11   : > { %178 = vadd.xlane.f32.xlu0 %v310_v1 }
  0x12   : > { %v329_v4 = vpop.eup %328 }
  0x13   : > { %v183_v5 = vmul.f32 128.0, %v329_v4  ;;  %vm187_vm0 = vweird.f32 %v329_v4 }
  0x15   : > { %v184_v6 = vsub.f32 1.0, %v183_v5 }
  0x17   : > { %v185_v7 = vmul.f32 %v329_v4, %v184_v6 }
  0x19   : > { %180 = vadd.xlane.f32.xlu0 %v311_v2  ;;  %v186_v8 = vadd.f32 %v329_v4, %v185_v7 }
  0x1b   : > { %v188_v9 = vsel %vm187_vm0, %v329_v4, %v186_v8 }
  0x84   : > { %v179_v10 = vpop.xlane.xlu0 %178 }
  0x85   : > { %v189_v11 = vmul.f32 %v188_v9, %v179_v10 }
  0x87   : > { %v191_v12 = vsub.f32 %v310_v1, %v189_v11 }
  0x89   : > { %v193_v13 = vmul.f32 %v191_v12, %v191_v12 }
  0x8b   : > { %195 = vadd.xlane.f32.xlu1 %v193_v13 }
  0x8c   : > { %v181_v14 = vpop.xlane.xlu0 %180 }
  0x8d   : > { %v190_v15 = vmul.f32 %v188_v9, %v181_v14 }
  0x8f   : > { %v192_v16 = vsub.f32 %v311_v2, %v190_v15 }
  0x91   : > { %v194_v17 = vmul.f32 %v192_v16, %v192_v16 }
  0x93   : > { %197 = vadd.xlane.f32.xlu1 %v194_v17 }
  0xfe   : > { %v196_v18 = vpop.xlane.xlu1 %195 }
  0xff   : > { %v199_v19 = vmul.f32 %v196_v18, %v188_v9 }
 0x101   : > { %v201_v20 = vadd.f32 1e-05, %v199_v19 }
 0x103   : > { %330 = vrsqrt.f32 %v201_v20  ;;  %vm209_vm2 = vweird.f32 %v201_v20 }
 0x106   : > { %v198_v21 = vpop.xlane.xlu1 %197 }
 0x107   : > { %v200_v22 = vmul.f32 %v198_v21, %v188_v9 }
 0x109   : > { %v331_v23 = vpop.eup %330  ;;  %v202_v24 = vadd.f32 1e-05, %v200_v22 }
 0x10a   : > { %v204_v25 = vmul.f32 %v331_v23, %v201_v20  ;;  %vm210_vm1 = vweird.f32 %v331_v23 }
 0x10b   : > { %332 = vrsqrt.f32 %v202_v24  ;;  %vm211_vm3 = vmor %vm209_vm2, %vm210_vm1  ;;  %vm219_vm5 = vweird.f32 %v202_v24 }
 0x10c   : > { %v205_v26 = vmul.f32 %v331_v23, %v204_v25 }
 0x10e   : > { %v206_v27 = vmul.f32 0.5, %v205_v26 }
 0x110   : > { %v207_v28 = vsub.f32 1.5, %v206_v27 }
 0x111   : > { %v333_v29 = vpop.eup %332 }
 0x112   : > { %v208_v30 = vmul.f32 %v331_v23, %v207_v28  ;;  %v214_v31 = vmul.f32 %v333_v29, %v202_v24  ;;  %vm220_vm4 = vweird.f32 %v333_v29 }
 0x113   : > { %vm221_vm6 = vmor %vm219_vm5, %vm220_vm4 }
 0x114   : > { %v215_v32 = vmul.f32 %v333_v29, %v214_v31  ;;  %v212_v33 = vsel %vm211_vm3, %v331_v23, %v208_v30 }
 0x115   : > { %v223_v37 = vmul.f32 %v212_v33, %v191_v12 }
 0x116   : > { %v216_v34 = vmul.f32 0.5, %v215_v32 }
 0x117   : > { %v229_v41 = vmul.f32 %v326_v36, %v223_v37 }
 0x118   : > { %v217_v35 = vsub.f32 1.5, %v216_v34 }
 0x119   : > { %v235_v44 = vadd.f32 %v327_v40, %v229_v41 }
 0x11a   : > { %v218_v38 = vmul.f32 %v333_v29, %v217_v35 }
 0x11c   : > { %v222_v39 = vsel %vm221_vm6, %v333_v29, %v218_v38 }
 0x11d   : > { %v224_v42 = vmul.f32 %v222_v39, %v192_v16 }
 0x11f   : > { %v230_v43 = vmul.f32 %v326_v36, %v224_v42 }
 0x121   : > { %v236_v45 = vadd.f32 %v327_v40, %v230_v43 }
 0x123   : > { %v315_v46 = vpack.c.bf16 %v236_v45, %v235_v44 }
 0x125   : > { %316 = vst [vmem:[%s172_s25] sm:$0xff] %v315_v46  }
 0x126 PF: > { %s13_s12 = sadd.s32 1, %s340_s12  }
 0x127   : > { %p10_p4 = scmp.ge.s32.totalorder %s13_s12, 4  }
 0x129   :  { %12 = sbr.rel (!%p10_p4) target bundleno = 1 (0x1), region = 62 }

// kernel: bert2tf_forward.22
= control target key start
LH: loop header
LB: loop body
LE: loop exit
PB: predicated region body
PF: predicated region fallthrough
CT: control target
= control target key end

     0   :  { %8 = vsyncpa [#allocation4], 0  ;;  %s979_s0 = inlined_call_operand.vmem [shape: bf16[32,128], index: 0, kind: input, shape index: {}]   ;;  %s980_s1 = inlined_call_operand.hbm [shape: bf16[128,384], index: 1, kind: input, shape index: {}]   ;;  %s981_s2 = inlined_call_operand.vmem [shape: f32[1,384], index: 2, kind: input, shape index: {}]   ;;  %s982_s3 = inlined_call_operand.vmem [shape: bf16[32,384], index: 3, kind: output, shape index: {}]  }
   0x1   :  { %10 = vsyncpa [#allocation4 + $0x1], 0  ;;  %s831_s12 = smov 0   ;;  %s833_s13 = smov 0  }
   0x2   :  { %s835_s14 = smov 0   ;;  %s837_s15 = smov 0  }
   0x3   :  { %s839_s16 = smov 0   ;;  %s841_s17 = smov 0  }
   0x4   :  { %s843_s18 = smov 0   ;;  %s845_s19 = smov 0  }
   0x5   :  { %s847_s20 = smov 0   ;;  %s849_s21 = smov 0  }
   0x6 LB: > { %s535_s22 = sadd.s32 4294967295, %s806_s21   ;;  %s31_s23 = sadd.s32 1, %s798_s19  ;;  %s806_s21 = sphi %s849_s21, %s16_s21   ;;  %s802_s20 = sphi %s847_s20, %s1000_s20   ;;  %s798_s19 = sphi %s845_s19, %s999_s19   ;;  %s794_s18 = sphi %s843_s18, %s998_s18   ;;  %s790_s17 = sphi %s841_s17, %s997_s17   ;;  %s786_s16 = sphi %s839_s16, %s996_s16   ;;  %s782_s15 = sphi %s837_s15, %s995_s15   ;;  %s778_s14 = sphi %s835_s14, %s994_s14   ;;  %s774_s13 = sphi %s833_s13, %s993_s13   ;;  %s770_s12 = sphi %s831_s12, %s992_s12  }
   0x7   : > { %p33_p0 = scmp.ge.s32.totalorder %s31_s23, 3  ;;  %s35_s24 = sadd.s32 1, %s802_s20 }
   0x8   : > { %s72_s25 = sadd.s32 1, %s786_s16  ;;  %p79_p1 = scmp.ne.s32.totalorder %s786_s16, %s782_s15 }
   0x9   : > { %s1002_s23 = smov (%p33_p0, %s31_s23), 0  ;;  %s1004_s24 = smov (!%p33_p0, %s35_s24), %s802_s20 }
   0xa   : > { %985 = sst [smem:[#allocation7_spill]] %s1002_s23  ;;  %s68_s26 = ssub.s32 %s798_s19, %s1002_s23 }
   0xb   : > { %p80_p2 = scmp.eq.s32.totalorder %s806_s21, 0  ;;  %p37_p3 = scmp.ge.s32.totalorder %s1004_s24, 2 }
   0xc   : > { %p70_p4 = scmp.eq.s32.totalorder %s68_s26, 0  ;;  %p85_p6 = scmp.ne.s32.totalorder %s782_s15, %s778_s14 }
   0xd   : > { %p891_p5 = por %p80_p2, %p79_p1  ;;  %s1006_s24 = smov (%p37_p3, %s1004_s24), 0 }
   0xe   : > { %987 = sst [smem:[#allocation8_spill]] %s1006_s24  ;;  %p86_p7 = scmp.eq.s32.totalorder %s535_s22, 0 }
   0xf   : > { %s899_s28 = scalar_select %p70_p4, %s786_s16, %s72_s25  }
  0x10   : > { %s121_s29 = ssub.s32 %s802_s20, %s1006_s24  ;;  %s126_s4 = sadd.s32 1, %s774_s13 }
  0x11   : > { %s123_s30 = sor.u32 %s121_s29, %s68_s26  ;;  %p904_p8 = por %p86_p7, %p85_p6 }
  0x12   : > { %p124_p9 = scmp.eq.s32.totalorder %s123_s30, 0  ;;  %p136_p10 = scmp.ne.s32.totalorder %s774_s13, %s770_s12 }
  0x13   : > { %p137_p11 = scmp.eq.s32.totalorder %s535_s22, 5  ;;  %p609_p13 = scmp.lt.s32.totalorder %s806_s21, 6 }
  0x14   : > { %s911_s6 = scalar_select %p124_p9, %s774_s13, %s126_s4  }
  0x15   : > { %p913_p12 = por %p137_p11, %p136_p10  ;;  %s175_s8 = sand.u32 1, %s786_s16  }
  0x16   : > { %s539_s9 = sshll.u32 %s175_s8, 6  ;;  %s540_s10 = sshll.u32 %s798_s19, 2 }
  0x17   : > { %s186_s25 = scalar_lea.hbm %s980_s1, %s540_s10  ;;  %s179_s26 = scalar_lea.vmem [#allocation3], %s539_s9 }
  0x18   : > { %s189_s29 = sshll.u32 %s179_s26, 4  ;;  %s187_s30 = sshll.u32 %s186_s25, 4  ;;  %s190_s29 = int_to_ptr.vmem [resolvable:$true] %s189_s29  ;;  %s188_s30 = int_to_ptr.hbm [resolvable:$true] %s187_s30 }
  0x19   : > { %p606_p0 = pnand %p609_p13, %p891_p5  ;;  %s176_s22 = scalar_lea.sflag [#allocation4], %s175_s8 }
  0x1a   : > { %s808_s4 = smov 192   ;;  %s809_s24 = smov 64  }
  0x1b   : > { %s810_s23 = smov 4   ;;  %p541_p1 = scmp.ge.s32.totalorder %s806_s21, 1 }
  0x1c   : > { %608 = dma.hbm_to_vmem [thread:$0]  (!%p606_p0), %s188_s30, 1024, %s190_s29, %s176_s22, %s808_s4, %s809_s24, %s810_s23  }
  0x1d   : > { %p203_p2 = scmp.lt.s32.totalorder %s806_s21, 7 }
  0x1f   : > { %p204_p3 = pnand %p541_p1, %p203_p2 }
  0x20   : > { %s209_s11 = sand.u32 (!%p204_p3), 1, %s782_s15  }
  0x21   : > { %207 = sbr.rel (%p204_p3) target bundleno = 219 (0xdb), region = 32  ;;  %s542_s10 = sshll.u32 (!%p204_p3), %s209_s11, 6 }
  0x22   : > { %s210_s9 = scalar_lea.sflag (!%p204_p3), [#allocation4], %s209_s11  ;;  %s213_s14 = scalar_lea.vmem (!%p204_p3), [#allocation3], %s542_s10 }
  0x26   : > { %765 = dma.done.wait (%p904_p8), %s210_s9, 1024  }
  0x27   : > { %767 = vsyncadd (%p904_p8), %s210_s9, 4294966272  ;;  %p257_p4 = scmp.lt.s32.totalorder %s790_s17, 2  ;;  %v596_v0 = vld [vmem:[%s213_s14 + $0x38] sm:$0xff]  ;;  %v595_v1 = vld [vmem:[%s213_s14 + $0x30] sm:$0xff]  ;;  %s544_s25 = sshll.u32 %s794_s18, 1 }
  0x28   : > { %341 = vmatpush.bf16.msra.mxu0 %v596_v0  ;;  %v594_v2 = vld [vmem:[%s213_s14 + $0x28] sm:$0xff]  ;;  %v593_v3 = vld [vmem:[%s213_s14 + $0x20] sm:$0xff]  ;;  %v592_v4 = vld [vmem:[%s213_s14 + $0x18] sm:$0xff]  ;;  %p248_p5 = scmp.lt.s32.totalorder %s544_s25, 3  ;;  %s244_s22 = sand.u32 1, %s770_s12  }
  0x29   : > { %s258_s23 = scalar_select %p257_p4, %s790_s17, 2  ;;  %v591_v5 = vld [vmem:[%s213_s14 + $0x10] sm:$0xff]  ;;  %v590_v6 = vld [vmem:[%s213_s14 + $0x8] sm:$0xff]  ;;  %v589_v7 = vld [vmem:[%s213_s14] sm:$0xff] }
  0x2a   : > { %s1008_s25 = smov (!%p248_p5, %s544_s25), 3  ;;  %s543_s4 = sshll.u32 %s244_s22, 3 }
  0x2b   : > { %s259_s8 = scalar_lea.vmem %s981_s2, %s258_s23  ;;  %s545_s5 = sshll.u32 %s1008_s25, 2 }
  0x2c   : > { %342 = vmatpush.bf16.msra.mxu0 %v595_v1  ;;  %s254_s30 = scalar_lea.vmem %s979_s0, %s545_s5  ;;  %v693_v10 = vld [vmem:[%s259_s8] ss:$0 sm:$0xff]  ;;  %s246_s11 = scalar_lea.vmem [#allocation5], %s543_s4 }
  0x2d   : > { %v588_v8 = vld [vmem:[%s254_s30] sm:$0xff]  ;;  %s602_s10 = smul.u32 (%p913_p12), 6, %s794_s18 }
  0x2f   : > { %s383_s9 = sadd.s32 (%p913_p12), %s790_s17, %s602_s10 }
  0x30   : > { %343 = vmatpush.bf16.msra.mxu0 %v594_v2  ;;  %s585_s14 = sshll.u32 (%p913_p12), %s383_s9, 2 }
  0x31   : > { %s385_s24 = scalar_lea.vmem (%p913_p12), %s982_s3, %s585_s14 }
  0x34   : > { %344 = vmatpush.bf16.msra.mxu0 %v593_v3 }
  0x38   : > { %345 = vmatpush.bf16.msra.mxu0 %v592_v4 }
  0x3c   : > { %346 = vmatpush.bf16.msra.mxu0 %v591_v5 }
  0x40   : > { %347 = vmatpush.bf16.msra.mxu0 %v590_v6 }
  0x44   : > { %348 = vmatpush.bf16.msra.mxu0 %v589_v7 }
  0x47   : > { %349 = vmatmul.bf16.vlgmr.msra.gmra.mxu0 %v588_v8 }
  0xc4   : > { %v350_v9 = vpop.f32.mrf.mxu0 }
  0xc5   : > { %v368_v12 = vadd.f32 %v693_v10, %v350_v9 }
  0xcc   : > { %v352_v11 = vpop.f32.mrf.mxu0 }
  0xcd   : > { %v369_v13 = vadd.f32 %v693_v10, %v352_v11  ;;  %380 = sbr.rel (!%p913_p12) target bundleno = 219 (0xdb), region = 48 }
  0xcf   : > { %v600_v14 = vpack.c.bf16 %v369_v13, %v368_v12 }
  0xd1   : > { %601 = vst [vmem:[%s246_s11] sm:$0xff] %v600_v14  }
  0xd8   : > { %v402_v15 = vld [vmem:[%s246_s11] sm:$0xf]  ;;  %v404_v16 = vld [vmem:[%s246_s11 + $0x4] sm:$0xf] }
  0xd9   : > { %403 = vst [vmem:[%s385_s24] sm:$0xf] %v402_v15 }
  0xda   : > { %405 = vst [vmem:[%s385_s24 + $0xc] sm:$0xf] %v404_v16 }
  0xdb PF: > { %s16_s21 = sadd.s32 1, %s806_s21   ;;  %s990_s7 = sld [smem:[#allocation7_spill]] }
  0xdc   : > { %p13_p6 = scmp.ge.s32.totalorder %s16_s21, 8   ;;  %s991_s27 = sld [smem:[#allocation8_spill]] }
  0xdd   : > { %s992_s12 = smov %s774_s13  ;;  %s993_s13 = smov %s911_s6 }
  0xde   : > { %s994_s14 = smov %s782_s15  ;;  %s995_s15 = smov %s786_s16 }
  0xdf   : > { %s996_s16 = smov %s899_s28  ;;  %s997_s17 = smov %s798_s19 }
  0xe0   : > { %s998_s18 = smov %s802_s20  ;;  %15 = sbr.rel (!%p13_p6) target bundleno = 6 (0x6), region = 127 }
  0xe1   : > { %s999_s19 = smov %s990_s7 }
  0xe2   : > { %s1000_s20 = smov %s991_s27 }
  0xe5   :  { %443 = vsyncpa [#allocation4], 1 }
  0xe6   :  { %445 = vsyncpa [#allocation4 + $0x1], 1 }

// kernel: bert2tf_forward.24
= control target key start
LH: loop header
LB: loop body
LE: loop exit
PB: predicated region body
PF: predicated region fallthrough
CT: control target
= control target key end

     0   :  { %12 = vsyncpa [#allocation3], 0  ;;  %s1228_s0 = inlined_call_operand.vmem [shape: bf16[32,128], index: 0, kind: input, shape index: {}]   ;;  %s1229_s1 = inlined_call_operand.hbm [shape: bf16[128,256], index: 1, kind: input, shape index: {}]   ;;  %s1230_s2 = inlined_call_operand.vmem [shape: f32[1,256], index: 2, kind: input, shape index: {}]   ;;  %s1231_s3 = inlined_call_operand.hbm [shape: bf16[256,128], index: 3, kind: input, shape index: {}]   ;;  %s1232_s4 = inlined_call_operand.vmem [shape: f32[1,128], index: 4, kind: input, shape index: {}]   ;;  %s1233_s5 = inlined_call_operand.vmem [shape: f32[1,128], index: 5, kind: input, shape index: {}]   ;;  %s1234_s6 = inlined_call_operand.vmem [shape: f32[1,128], index: 6, kind: input, shape index: {}]   ;;  %s1235_s7 = inlined_call_operand.vmem [shape: bf16[32,128], index: 7, kind: output, shape index: {}]  }
   0x1   :  { %13 = vsyncpa [#allocation5], 0  ;;  %s1156_s24 = smov 0  }
   0x2 LB: > { %s213_s27 = sshll.u32 %s1229_s1, 4  ;;  %s797_s28 = sadd.s32 4294967295, %s1107_s24   ;;  %s1107_s24 = sphi %s1156_s24, %s19_s24   ;;  %s214_s27 = int_to_ptr.hbm [resolvable:$true] %s213_s27 }
   0x3   : > { %p799_p0 = scmp.ge.s32.totalorder %s1107_s24, 1  ;;  %p202_p1 = scmp.lt.s32.totalorder %s1107_s24, 3 }
   0x4   : > { %p1169_p2 = scmp.eq.s32.totalorder %s797_s28, 0  ;;  %s1109_s8 = smov [#allocation2]  }
   0x5   : > { %p1173_p3 = pnand %p799_p0, %p202_p1  ;;  %s215_s9 = sshll.u32 %s1109_s8, 4  ;;  %s216_s9 = int_to_ptr.vmem [resolvable:$true] %s215_s9 }
   0x6   : > { %s230_s12 = sshll.u32 %s1231_s3, 4  ;;  %s1110_s13 = smov [#allocation4]   ;;  %s231_s12 = int_to_ptr.hbm [resolvable:$true] %s230_s12 }
   0x7   : > { %p990_p4 = pneg %p1173_p3  ;;  %s232_s14 = sshll.u32 %s1110_s13, 4  ;;  %s233_s14 = int_to_ptr.vmem [resolvable:$true] %s232_s14 }
   0x8   : > { %s1111_s15 = smov 128   ;;  %s1112_s16 = smov 8  }
   0x9   : > { %p991_p5 = pnand %p1169_p2, %p990_p4  ;;  %s1113_s17 = smov 64  }
   0xa   : > { %s1114_s18 = smov 4   ;;  %266 = sbr.rel (%p1173_p3) target bundleno = 628 (0x274), region = 48 }
   0xb   : > { %993 = dma.hbm_to_vmem [thread:$0]  (!%p991_p5), %s214_s27, 2048, %s216_s9, [#allocation3], %s1111_s15, %s1111_s15, %s1112_s16  }
   0xc   : > { %996 = dma.hbm_to_vmem [thread:$0]  (!%p991_p5), %s231_s12, 2048, %s233_s14, [#allocation5], %s1113_s17, %s1113_s17, %s1114_s18  }
   0xf   : > { %1098 = dma.done.wait (%p1169_p2), [#allocation3], 2048  }
  0x10   : > { %1100 = vsyncadd (%p1169_p2), [#allocation3], 4294965248 }
  0x11   : > { %1102 = dma.done.wait (%p1169_p2), [#allocation5], 2048  }
  0x12   : > { %1104 = vsyncadd (%p1169_p2), [#allocation5], 4294965248  ;;  %v872_v0 = vld [vmem:[#allocation2 + $0x70] sm:$0xf]  ;;  %v960_v1 = vld [vmem:[#allocation2 + $0x74] sm:$0xf0] }
  0x13   : > { %v959_v2 = vld [vmem:[#allocation2 + $0x74] sm:$0xf]  ;;  %v873_v3 = vor.u32 %v960_v1, %v872_v0  ;;  %v874_v4 = vld [vmem:[#allocation2 + $0x78] sm:$0xf0]  ;;  %v864_v5 = vld [vmem:[#allocation2 + $0x60] sm:$0xf] }
  0x14   : > { %v958_v6 = vld [vmem:[#allocation2 + $0x64] sm:$0xf0]  ;;  %v877_v7 = vor.u32 %v959_v2, %v874_v4  ;;  %v957_v8 = vld [vmem:[#allocation2 + $0x64] sm:$0xf]  ;;  %v866_v9 = vld [vmem:[#allocation2 + $0x68] sm:$0xf0] }
  0x15   : > { %426 = vmatpush.bf16.msra.mxu0 %v873_v3  ;;  %v865_v10 = vor.u32 %v958_v6, %v864_v5  ;;  %v869_v11 = vor.u32 %v957_v8, %v866_v9  ;;  %v856_v12 = vld [vmem:[#allocation2 + $0x50] sm:$0xf]  ;;  %v956_v13 = vld [vmem:[#allocation2 + $0x54] sm:$0xf0]  ;;  %v955_v14 = vld [vmem:[#allocation2 + $0x54] sm:$0xf] }
  0x16   : > { %440 = vmatpush.bf16.msra.mxu1 %v877_v7  ;;  %v858_v15 = vld [vmem:[#allocation2 + $0x58] sm:$0xf0]  ;;  %v857_v16 = vor.u32 %v956_v13, %v856_v12  ;;  %v848_v18 = vld [vmem:[#allocation2 + $0x40] sm:$0xf]  ;;  %v954_v19 = vld [vmem:[#allocation2 + $0x44] sm:$0xf0] }
  0x17   : > { %v861_v17 = vor.u32 %v955_v14, %v858_v15  ;;  %v953_v20 = vld [vmem:[#allocation2 + $0x44] sm:$0xf]  ;;  %v850_v21 = vld [vmem:[#allocation2 + $0x48] sm:$0xf0]  ;;  %v849_v22 = vor.u32 %v954_v19, %v848_v18  ;;  %v840_v24 = vld [vmem:[#allocation2 + $0x30] sm:$0xf] }
  0x18   : > { %v853_v23 = vor.u32 %v953_v20, %v850_v21  ;;  %v952_v25 = vld [vmem:[#allocation2 + $0x34] sm:$0xf0]  ;;  %v951_v26 = vld [vmem:[#allocation2 + $0x34] sm:$0xf]  ;;  %v842_v27 = vld [vmem:[#allocation2 + $0x38] sm:$0xf0] }
  0x19   : > { %427 = vmatpush.bf16.msra.mxu0 %v865_v10  ;;  %s806_s19 = sshll.u32 %s797_s28, 1  ;;  %v841_v28 = vor.u32 %v952_v25, %v840_v24  ;;  %v845_v29 = vor.u32 %v951_v26, %v842_v27  ;;  %v832_v30 = vld [vmem:[#allocation2 + $0x20] sm:$0xf]  ;;  %v950_v31 = vld [vmem:[#allocation2 + $0x24] sm:$0xf0]  ;;  %v968_v49 = vld [vmem:[#allocation4 + $0x38] sm:$0xff] }
  0x1a   : > { %441 = vmatpush.bf16.msra.mxu1 %v869_v11  ;;  %p305_p6 = scmp.lt.s32.totalorder %s806_s19, 3  ;;  %v949_v32 = vld [vmem:[#allocation2 + $0x24] sm:$0xf]  ;;  %v834_v33 = vld [vmem:[#allocation2 + $0x28] sm:$0xf0]  ;;  %v833_v34 = vor.u32 %v950_v31, %v832_v30  ;;  %v976_v50 = vld [vmem:[#allocation4 + $0x78] sm:$0xff]  ;;  %624 = vmatpush.bf16.msra.mxu2 %v968_v49 }
  0x1b   : > { %v837_v35 = vor.u32 %v949_v32, %v834_v33  ;;  %v824_v36 = vld [vmem:[#allocation2 + $0x10] sm:$0xf]  ;;  %v948_v37 = vld [vmem:[#allocation2 + $0x14] sm:$0xf0]  ;;  %v947_v38 = vld [vmem:[#allocation2 + $0x14] sm:$0xf]  ;;  %638 = vmatpush.bf16.msra.mxu3 %v976_v50 }
  0x1c   : > { %s1239_s19 = smov (!%p305_p6, %s806_s19), 3  ;;  %v826_v39 = vld [vmem:[#allocation2 + $0x18] sm:$0xf0]  ;;  %v825_v40 = vor.u32 %v948_v37, %v824_v36  ;;  %v816_v42 = vld [vmem:[#allocation2] sm:$0xf]  ;;  %v967_v51 = vld [vmem:[#allocation4 + $0x30] sm:$0xff] }
  0x1d   : > { %428 = vmatpush.bf16.msra.mxu0 %v857_v16  ;;  %v829_v41 = vor.u32 %v947_v38, %v826_v39  ;;  %v946_v43 = vld [vmem:[#allocation2 + $0x4] sm:$0xf0]  ;;  %s807_s20 = sshll.u32 %s1239_s19, 2  ;;  %v945_v44 = vld [vmem:[#allocation2 + $0x4] sm:$0xf]  ;;  %v975_v52 = vld [vmem:[#allocation4 + $0x70] sm:$0xff] }
  0x1e   : > { %442 = vmatpush.bf16.msra.mxu1 %v861_v17  ;;  %v818_v45 = vld [vmem:[#allocation2 + $0x8] sm:$0xf0]  ;;  %v817_v46 = vor.u32 %v946_v43, %v816_v42  ;;  %s1204_s23 = scalar_lea.vmem %s1228_s0, %s807_s20  ;;  %625 = vmatpush.bf16.msra.mxu2 %v967_v51  ;;  %v965_v55 = vld [vmem:[#allocation4 + $0x20] sm:$0xff]  ;;  %v964_v57 = vld [vmem:[#allocation4 + $0x18] sm:$0xff]  ;;  %s314_s12 = scalar_lea.vmem %s1235_s7, %s807_s20 }
  0x1f   : > { %v821_v47 = vor.u32 %v945_v44, %v818_v45  ;;  %v944_v48 = vld [vmem:[%s1204_s23] sm:$0xff]  ;;  %639 = vmatpush.bf16.msra.mxu3 %v975_v52  ;;  %v966_v53 = vld [vmem:[#allocation4 + $0x28] sm:$0xff]  ;;  %v972_v58 = vld [vmem:[#allocation4 + $0x58] sm:$0xff] }
  0x20   : > { %v974_v54 = vld [vmem:[#allocation4 + $0x68] sm:$0xff]  ;;  %v973_v56 = vld [vmem:[#allocation4 + $0x60] sm:$0xff]  ;;  %v963_v59 = vld [vmem:[#allocation4 + $0x10] sm:$0xff] }
  0x21   : > { %429 = vmatpush.bf16.msra.mxu0 %v849_v22  ;;  %v971_v60 = vld [vmem:[#allocation4 + $0x50] sm:$0xff]  ;;  %v334_v61 = vld [vmem:[%s1230_s2] sm:$0x3]  ;;  %v962_v62 = vld [vmem:[#allocation4 + $0x8] sm:$0xff] }
  0x22   : > { %443 = vmatpush.bf16.msra.mxu1 %v853_v23  ;;  %626 = vmatpush.bf16.msra.mxu2 %v966_v53  ;;  %v970_v63 = vld [vmem:[#allocation4 + $0x48] sm:$0xff]  ;;  %v336_v0 = vperm.slane %v334_v61, 0  ;;  %v337_v1 = vperm.slane %v334_v61, 1  ;;  %v961_v2 = vld [vmem:[#allocation4] sm:$0xff] }
  0x23   : > { %640 = vmatpush.bf16.msra.mxu3 %v974_v54  ;;  %v969_v3 = vld [vmem:[#allocation4 + $0x40] sm:$0xff] }
  0x24   : > { %v1016_v50 = vld [vmem:[%s1232_s4] ss:$0 sm:$0xff] }
  0x25   : > { %430 = vmatpush.bf16.msra.mxu0 %v841_v28  ;;  %v316_v51 = vld [vmem:[%s1204_s23] sm:$0xff]  }
  0x26   : > { %444 = vmatpush.bf16.msra.mxu1 %v845_v29  ;;  %627 = vmatpush.bf16.msra.mxu2 %v965_v55  ;;  %v652_v55 = vunpack.c.l.bf16 %v316_v51 }
  0x27   : > { %641 = vmatpush.bf16.msra.mxu3 %v973_v56 }
  0x29   : > { %431 = vmatpush.bf16.msra.mxu0 %v833_v34 }
  0x2a   : > { %445 = vmatpush.bf16.msra.mxu1 %v837_v35  ;;  %628 = vmatpush.bf16.msra.mxu2 %v964_v57 }
  0x2b   : > { %642 = vmatpush.bf16.msra.mxu3 %v972_v58 }
  0x2d   : > { %432 = vmatpush.bf16.msra.mxu0 %v825_v40 }
  0x2e   : > { %446 = vmatpush.bf16.msra.mxu1 %v829_v41  ;;  %629 = vmatpush.bf16.msra.mxu2 %v963_v59 }
  0x2f   : > { %643 = vmatpush.bf16.msra.mxu3 %v971_v60  ;;  %v653_v60 = vunpack.c.h.bf16 %v316_v51 }
  0x31   : > { %433 = vmatpush.bf16.msra.mxu0 %v817_v46 }
  0x32   : > { %447 = vmatpush.bf16.msra.mxu1 %v821_v47  ;;  %630 = vmatpush.bf16.msra.mxu2 %v962_v62 }
  0x33   : > { %644 = vmatpush.bf16.msra.mxu3 %v970_v63 }
  0x34   : > { %434 = vmatmul.bf16.vlgmr.msra.gmra.mxu0 %v944_v48 }
  0x35   : > { %448 = vmatmul.bf16.vlgmr.msra.gmra.mxu1 %v944_v48 }
  0x36   : > { %631 = vmatpush.bf16.msra.mxu2 %v961_v2 }
  0x37   : > { %645 = vmatpush.bf16.msra.mxu3 %v969_v3 }
  0xb1   : > { %v435_v4 = vpop.f32.mrf.mxu0 }
  0xb2   : > { %v436_v5 = vadd.f32 %v435_v4, %v336_v0  ;;  %v449_v6 = vpop.f32.mrf.mxu1 }
  0xb3   : > { %v450_v7 = vadd.f32 %v449_v6, %v337_v1 }
  0xb4   : > { %v454_v8 = vmul.f32 %v436_v5, %v436_v5 }
  0xb5   : > { %v455_v9 = vmul.f32 %v450_v7, %v450_v7 }
  0xb6   : > { %v458_v10 = vmul.f32 %v454_v8, %v436_v5 }
  0xb7   : > { %v459_v11 = vmul.f32 %v455_v9, %v450_v7 }
  0xb8   : > { %v462_v12 = vmul.f32 0.044715, %v458_v10 }
  0xb9   : > { %v463_v13 = vmul.f32 0.044715, %v459_v11  ;;  %v437_v14 = vpop.f32.mrf.mxu0 }
  0xba   : > { %v466_v15 = vadd.f32 %v462_v12, %v436_v5  ;;  %v438_v16 = vadd.f32 %v437_v14, %v336_v0  ;;  %v451_v17 = vpop.f32.mrf.mxu1  ;;  %v1115_v0 = vmov 128.0  }
  0xbb   : > { %v467_v18 = vadd.f32 %v463_v13, %v450_v7  ;;  %v452_v19 = vadd.f32 %v451_v17, %v337_v1 }
  0xbc   : > { %v456_v20 = vmul.f32 %v438_v16, %v438_v16  ;;  %v470_v21 = vmul.f32 0.7978846, %v466_v15 }
  0xbd   : > { %v457_v22 = vmul.f32 %v452_v19, %v452_v19  ;;  %v471_v23 = vmul.f32 0.7978846, %v467_v18 }
  0xbe   : > { %v460_v24 = vmul.f32 %v456_v20, %v438_v16  ;;  %1019 = vtanh.f32 %v470_v21 }
  0xbf   : > { %v461_v25 = vmul.f32 %v457_v22, %v452_v19  ;;  %1021 = vtanh.f32 %v471_v23 }
  0xc0   : > { %v464_v26 = vmul.f32 0.044715, %v460_v24 }
  0xc1   : > { %v465_v27 = vmul.f32 0.044715, %v461_v25 }
  0xc2   : > { %v468_v28 = vadd.f32 %v464_v26, %v438_v16 }
  0xc3   : > { %v469_v29 = vadd.f32 %v465_v27, %v452_v19 }
  0xc4   : > { %v472_v30 = vmul.f32 0.7978846, %v468_v28  ;;  %v1020_v32 = vpop.eup %1019 }
  0xc5   : > { %v473_v31 = vmul.f32 0.7978846, %v469_v29  ;;  %v1022_v33 = vpop.eup %1021  ;;  %v478_v34 = vadd.f32 1.0, %v1020_v32 }
  0xc6   : > { %1023 = vtanh.f32 %v472_v30  ;;  %v479_v35 = vadd.f32 1.0, %v1022_v33  ;;  %v1017_v33 = vld [vmem:[%s1233_s5] ss:$0 sm:$0xff] }
  0xc7   : > { %1025 = vtanh.f32 %v473_v31  ;;  %v482_v39 = vmul.f32 0.5, %v478_v34 }
  0xc8   : > { %v483_v41 = vmul.f32 0.5, %v479_v35  ;;  %1027 = vrcp.f32 %v1115_v0 }
  0xc9   : > { %v486_v44 = vmul.f32 %v482_v39, %v436_v5 }
  0xca   : > { %v487_v46 = vmul.f32 %v483_v41, %v450_v7 }
  0xcc   : > { %v1024_v36 = vpop.eup %1023 }
  0xcd   : > { %v1026_v37 = vpop.eup %1025  ;;  %v480_v38 = vadd.f32 1.0, %v1024_v36 }
  0xce   : > { %v481_v40 = vadd.f32 1.0, %v1026_v37  ;;  %v1028_v1 = vpop.eup %1027  ;;  %v1018_v37 = vld [vmem:[%s1234_s6] ss:$0 sm:$0xff] }
  0xcf   : > { %v484_v42 = vmul.f32 0.5, %v480_v38  ;;  %v661_v2 = vmul.f32 128.0, %v1028_v1  ;;  %vm665_vm0 = vweird.f32 %v1028_v1 }
  0xd0   : > { %v485_v43 = vmul.f32 0.5, %v481_v40 }
  0xd1   : > { %v488_v45 = vmul.f32 %v484_v42, %v438_v16  ;;  %v662_v3 = vsub.f32 1.0, %v661_v2 }
  0xd2   : > { %v489_v47 = vmul.f32 %v485_v43, %v452_v19 }
  0xd3   : > { %v490_v48 = vpack.c.bf16 %v488_v45, %v486_v44  ;;  %v663_v4 = vmul.f32 %v1028_v1, %v662_v3 }
  0xd4   : > { %v491_v49 = vpack.c.bf16 %v489_v47, %v487_v46 }
  0xd5   : > { %632 = vmatmul.bf16.vlgmr.msra.gmra.mxu2 %v490_v48  ;;  %v664_v5 = vadd.f32 %v1028_v1, %v663_v4 }
  0xd6   : > { %646 = vmatmul.bf16.vlgmr.msra.gmra.mxu3 %v491_v49 }
  0xd7   : > { %v666_v6 = vsel %vm665_vm0, %v1028_v1, %v664_v5 }
 0x158   : > { %v633_v52 = vpop.f32.mrf.mxu2 }
 0x159   : > { %v634_v53 = vadd.f32 %v1016_v50, %v633_v52  ;;  %v647_v54 = vpop.f32.mrf.mxu3 }
 0x15b   : > { %v648_v56 = vadd.f32 %v647_v54, %v634_v53 }
 0x15d   : > { %v654_v57 = vadd.f32 %v652_v55, %v648_v56 }
 0x15f   : > { %656 = vadd.xlane.f32.xlu0 %v654_v57 }
 0x160   : > { %v635_v58 = vpop.f32.mrf.mxu2 }
 0x161   : > { %v636_v59 = vadd.f32 %v1016_v50, %v635_v58  ;;  %v649_v61 = vpop.f32.mrf.mxu3 }
 0x163   : > { %v650_v62 = vadd.f32 %v649_v61, %v636_v59 }
 0x165   : > { %v655_v63 = vadd.f32 %v653_v60, %v650_v62 }
 0x167   : > { %658 = vadd.xlane.f32.xlu0 %v655_v63 }
 0x1d2   : > { %v657_v7 = vpop.xlane.xlu0 %656 }
 0x1d3   : > { %v667_v8 = vmul.f32 %v666_v6, %v657_v7 }
 0x1d5   : > { %v669_v9 = vsub.f32 %v654_v57, %v667_v8 }
 0x1d7   : > { %v671_v10 = vmul.f32 %v669_v9, %v669_v9 }
 0x1d9   : > { %673 = vadd.xlane.f32.xlu1 %v671_v10 }
 0x1da   : > { %v659_v11 = vpop.xlane.xlu0 %658 }
 0x1db   : > { %v668_v12 = vmul.f32 %v666_v6, %v659_v11 }
 0x1dd   : > { %v670_v13 = vsub.f32 %v655_v63, %v668_v12 }
 0x1df   : > { %v672_v14 = vmul.f32 %v670_v13, %v670_v13 }
 0x1e1   : > { %675 = vadd.xlane.f32.xlu1 %v672_v14 }
 0x24c   : > { %v674_v15 = vpop.xlane.xlu1 %673 }
 0x24d   : > { %v677_v16 = vmul.f32 %v674_v15, %v666_v6 }
 0x24f   : > { %v679_v17 = vadd.f32 1e-05, %v677_v16 }
 0x251   : > { %1029 = vrsqrt.f32 %v679_v17  ;;  %vm687_vm2 = vweird.f32 %v679_v17 }
 0x254   : > { %v676_v18 = vpop.xlane.xlu1 %675 }
 0x255   : > { %v678_v19 = vmul.f32 %v676_v18, %v666_v6 }
 0x257   : > { %v1030_v20 = vpop.eup %1029  ;;  %v680_v21 = vadd.f32 1e-05, %v678_v19 }
 0x258   : > { %v682_v22 = vmul.f32 %v1030_v20, %v679_v17  ;;  %vm688_vm1 = vweird.f32 %v1030_v20 }
 0x259   : > { %1031 = vrsqrt.f32 %v680_v21  ;;  %vm689_vm3 = vmor %vm687_vm2, %vm688_vm1  ;;  %vm697_vm5 = vweird.f32 %v680_v21 }
 0x25a   : > { %v683_v23 = vmul.f32 %v1030_v20, %v682_v22 }
 0x25c   : > { %v684_v24 = vmul.f32 0.5, %v683_v23 }
 0x25e   : > { %v685_v25 = vsub.f32 1.5, %v684_v24 }
 0x25f   : > { %v1032_v26 = vpop.eup %1031 }
 0x260   : > { %v686_v27 = vmul.f32 %v1030_v20, %v685_v25  ;;  %v692_v28 = vmul.f32 %v1032_v26, %v680_v21  ;;  %vm698_vm4 = vweird.f32 %v1032_v26 }
 0x261   : > { %vm699_vm6 = vmor %vm697_vm5, %vm698_vm4 }
 0x262   : > { %v693_v29 = vmul.f32 %v1032_v26, %v692_v28  ;;  %v690_v30 = vsel %vm689_vm3, %v1030_v20, %v686_v27 }
 0x263   : > { %v701_v34 = vmul.f32 %v690_v30, %v669_v9 }
 0x264   : > { %v694_v31 = vmul.f32 0.5, %v693_v29 }
 0x265   : > { %v707_v38 = vmul.f32 %v1017_v33, %v701_v34 }
 0x266   : > { %v695_v32 = vsub.f32 1.5, %v694_v31 }
 0x267   : > { %v713_v41 = vadd.f32 %v1018_v37, %v707_v38 }
 0x268   : > { %v696_v35 = vmul.f32 %v1032_v26, %v695_v32 }
 0x26a   : > { %v700_v36 = vsel %vm699_vm6, %v1032_v26, %v696_v35 }
 0x26b   : > { %v702_v39 = vmul.f32 %v700_v36, %v670_v13 }
 0x26d   : > { %v708_v40 = vmul.f32 %v1017_v33, %v702_v39 }
 0x26f   : > { %v714_v42 = vadd.f32 %v1018_v37, %v708_v40 }
 0x271   : > { %v980_v43 = vpack.c.bf16 %v714_v42, %v713_v41 }
 0x273   : > { %981 = vst [vmem:[%s314_s12] sm:$0xff] %v980_v43  }
 0x274 PF: > { %s19_s24 = sadd.s32 1, %s1107_s24  }
 0x275   : > { %p16_p7 = scmp.ge.s32.totalorder %s19_s24, 4  }
 0x277   :  { %18 = sbr.rel (!%p16_p7) target bundleno = 2 (0x2), region = 87 }
 0x27c   :  { %741 = vsyncpa [#allocation3], 1 }
 0x27d   :  { %743 = vsyncpa [#allocation3 + $0x1], 1 }
 0x27e   :  { %744 = vsyncpa [#allocation5], 1 }

// kernel: bert2tf_forward.23
= control target key start
LH: loop header
LB: loop body
LE: loop exit
PB: predicated region body
PF: predicated region fallthrough
CT: control target
= control target key end

     0   :  { %s1651_s0 = inlined_call_operand.vmem [shape: bf16[2,16,384], index: 0, kind: input, shape index: {}, may-alias: {0,1,2}]   ;;  %s1652_s1 = inlined_call_operand.vmem [shape: bf16[2,16,384], index: 1, kind: input, shape index: {}, may-alias: {0,1,2}]   ;;  %s1653_s2 = inlined_call_operand.vmem [shape: bf16[2,16,384], index: 2, kind: input, shape index: {}, may-alias: {0,1,2}]   ;;  %s1654_s3 = inlined_call_operand.vmem [shape: f32[2,1,16], index: 3, kind: input, shape index: {}]   ;;  %s1655_s4 = inlined_call_operand.hbm [shape: bf16[128,128], index: 4, kind: input, shape index: {}]   ;;  %s1656_s5 = inlined_call_operand.vmem [shape: f32[1,128], index: 5, kind: input, shape index: {}]   ;;  %s1657_s6 = inlined_call_operand.vmem [shape: bf16[2,16,128], index: 6, kind: input, shape index: {}]   ;;  %s1658_s7 = inlined_call_operand.vmem [shape: f32[1,128], index: 7, kind: input, shape index: {}]   ;;  %s1659_s8 = inlined_call_operand.vmem [shape: f32[1,128], index: 8, kind: input, shape index: {}]   ;;  %s1660_s9 = inlined_call_operand.vmem [shape: bf16[2,16,128], index: 9, kind: output, shape index: {}]  }
   0x1   :  { %1663 = sst [smem:[#allocation10_spill]] %s1655_s4 }
   0x2   :  { %14 = vsyncpa [#allocation5], 0  ;;  %s1451_s30 = smov 0   ;;  %s1453_s10 = smov 0  }
   0x3   :  { %s1455_s11 = smov 0   ;;  %s1457_s12 = smov 0  }
   0x4   :  { %s1459_s13 = smov 0   ;;  %s1461_s14 = smov 0  }
   0x5   :  { %s1463_s15 = smov 0  }
   0x6 LB: > { %1664 = sst [smem:[#allocation7_spill]] %s1383_s13  ;;  %s1122_s16 = sadd.s32 4294967295, %s1391_s15   ;;  %s1391_s15 = sphi %s1463_s15, %s20_s15   ;;  %s1387_s14 = sphi %s1461_s14, %s1677_s14   ;;  %s1383_s13 = sphi %s1459_s13, %s1672_s13   ;;  %s1379_s12 = sphi %s1457_s12, %s1676_s12   ;;  %s1375_s11 = sphi %s1455_s11, %s1671_s11   ;;  %s1371_s10 = sphi %s1453_s10, %s1675_s10   ;;  %s1367_s30 = sphi %s1451_s30, %s1674_s30  }
   0x7   : > { %s29_s17 = sadd.s32 1, %s1383_s13  ;;  %s32_s18 = sadd.s32 1, %s1387_s14 }
   0x8   : > { %p30_p0 = scmp.ge.s32.totalorder %s29_s17, 2  ;;  %s67_s19 = sadd.s32 1, %s1371_s10 }
   0x9   : > { %p74_p1 = scmp.ne.s32.totalorder %s1371_s10, %s1367_s30  ;;  %p75_p2 = scmp.eq.s32.totalorder %s1391_s15, 0 }
   0xa   : > { %s1679_s17 = smov (%p30_p0, %s29_s17), 0  ;;  %s1681_s18 = smov (!%p30_p0, %s32_s18), %s1387_s14 }
   0xb   : > { %1665 = sst [smem:[#allocation8_spill]] %s1679_s17  ;;  %p1124_p3 = scmp.ge.s32.totalorder %s1391_s15, 1 }
   0xc   : > { %p34_p4 = scmp.ge.s32.totalorder %s1681_s18, 2  ;;  %p283_p5 = scmp.lt.s32.totalorder %s1391_s15, 5 }
   0xd   : > { %p1498_p6 = por %p75_p2, %p74_p1  ;;  %p1508_p8 = scmp.eq.s32.totalorder %s1122_s16, 0 }
   0xe   : > { %s1683_s18 = smov (%p34_p4, %s1681_s18), 0  ;;  %p1504_p7 = pnand %p1124_p3, %p283_p5 }
   0xf   : > { %1667 = sst [smem:[#allocation9_spill]] %s1683_s18  ;;  %s64_s23 = ssub.s32 %s1387_s14, %s1683_s18 }
  0x10   : > { %s1670_s4 = sld [smem:[#allocation10_spill]]  ;;  %p65_p9 = scmp.eq.s32.totalorder %s64_s23, 0 }
  0x11   : > { %p1210_p10 = pneg %p1504_p7  ;;  %s1393_s28 = smov [#allocation4]  }
  0x12   : > { %s1520_s27 = scalar_select %p65_p9, %s1371_s10, %s67_s19  }
  0x13   : > { %s296_s29 = sshll.u32 %s1393_s28, 4  ;;  %p1211_p11 = pnand %p1508_p8, %p1210_p10  ;;  %s297_s29 = int_to_ptr.vmem [resolvable:$true] %s296_s29 }
  0x14   : > { %s1394_s16 = smov 64   ;;  %s1395_s17 = smov 4  }
  0x15   : > { %p1126_p12 = scmp.ge.s32.totalorder %s1391_s15, 4 }
  0x16   : > { %s294_s26 = sshll.u32 %s1670_s4, 4  ;;  %s295_s26 = int_to_ptr.hbm [resolvable:$true] %s294_s26 }
  0x17   : > { %1213 = dma.hbm_to_vmem [thread:$0]  (!%p1211_p11), %s295_s26, 1024, %s297_s29, [#allocation5], %s1394_s16, %s1394_s16, %s1395_s17  }
  0x18   : > { %315 = sbr.rel (%p1126_p12) target bundleno = 43 (0x2b), region = 32 }
  0x1d   : > { %330 = sbr.rel (!%p1498_p6) target bundleno = 36 (0x24), region = 40  ;;  %s332_s23 = sand.u32 (%p1498_p6), 1, %s1371_s10  }
  0x1e   : > { %s1128_s24 = smul.u32 (%p1498_p6), 24, %s1387_s14  ;;  %s1127_s19 = sshll.u32 (%p1498_p6), %s332_s23, 3 }
  0x1f   : > { %s334_s18 = scalar_lea.vmem (%p1498_p6), [#allocation2], %s1127_s19 }
  0x20   : > { %s992_s28 = scalar_lea.vmem (%p1498_p6), %s1652_s1, %s1128_s24 }
  0x21   : > { %v1129_v0 = vld [vmem:[%s992_s28 + $0x4] sm:$0xf] (%p1498_p6)  ;;  %v1130_v1 = vld [vmem:[%s992_s28 + $0x10] sm:$0xf] (%p1498_p6) }
  0x22   : > { %356 = vst [vmem:[%s334_s18] sm:$0xf] %v1129_v0 }
  0x23   : > { %358 = vst [vmem:[%s334_s18 + $0x4] sm:$0xf] %v1130_v1 }
  0x24 PF: > { %386 = sbr.rel (!%p1498_p6) target bundleno = 43 (0x2b), region = 81  ;;  %s388_s17 = sand.u32 (%p1498_p6), 1, %s1371_s10  }
  0x25   : > { %s1132_s26 = smul.u32 (%p1498_p6), 24, %s1387_s14  ;;  %s1131_s29 = sshll.u32 (%p1498_p6), %s388_s17, 3 }
  0x26   : > { %s390_s4 = scalar_lea.vmem (%p1498_p6), [#allocation3], %s1131_s29 }
  0x27   : > { %s998_s13 = scalar_lea.vmem (%p1498_p6), %s1653_s2, %s1132_s26 }
  0x28   : > { %v1133_v2 = vld [vmem:[%s998_s13 + $0x8] sm:$0xf] (%p1498_p6)  ;;  %v1134_v3 = vld [vmem:[%s998_s13 + $0x14] sm:$0xf] (%p1498_p6) }
  0x29   : > { %412 = vst [vmem:[%s390_s4] sm:$0xf] %v1133_v2 }
  0x2a   : > { %414 = vst [vmem:[%s390_s4 + $0x4] sm:$0xf] %v1134_v3 }
  0x2b PF: > { %462 = sbr.rel (%p1504_p7) target bundleno = 1628 (0x65c), region = 130  ;;  %s465_s18 = sand.u32 (!%p1504_p7), 1, %s1367_s30  }
  0x2c   : > { %s1542_s20 = sshll.u32 (!%p1504_p7), %s465_s18, 3 }
  0x2d   : > { %s467_s24 = scalar_lea.vmem (!%p1504_p7), [#allocation2], %s1542_s20  ;;  %s474_s19 = scalar_lea.vmem (!%p1504_p7), [#allocation3], %s1542_s20 }
  0x30   : > { %1362 = dma.done.wait (%p1508_p8), [#allocation5], 1024  }
  0x31   : > { %1364 = vsyncadd (%p1508_p8), [#allocation5], 4294966272  ;;  %p539_p13 = scmp.lt.s32.totalorder %s1379_s12, 1  ;;  %p541_p0 = scmp.lt.s32.totalorder %s1375_s11, 1  ;;  %v1194_v4 = vld [vmem:[%s467_s24] sm:$0xff]  ;;  %vm581_vm0 = vcmask 261120  }
  0x32   : > { %s1396_s28 = smov 96   ;;  %s1397_s29 = smov 32   ;;  %v1568_v11 = vld [vmem:[%s474_s19] sm:$0xff]  ;;  %v586_v12 = vsel %vm581_vm0, %v1194_v4, 0  ;;  %v1399_v14 = vmov -1e+09  }
  0x33   : > { %s1685_s12 = smov (!%p539_p13, %s1379_s12), 1  ;;  %s1687_s11 = smov (!%p541_p0, %s1375_s11), 1  ;;  %646 = vrot.lane.b32.xlu0 %v1194_v4, %s1396_s28  ;;  %595 = vmatpush.bf16.xpose.msra.mxu0 %v586_v12  ;;  %vm606_vm2 = vcmask 130048   ;;  %vm825_vm3 = vcmask 523264   ;;  %vm827_vm4 = vcmask 785408  }
  0x34   : > { %s1205_s30 = smul.u32 6, %s1685_s12  ;;  %681 = vrot.lane.b32.xlu2 %v1568_v11, %s1396_s28  ;;  %635 = vmatpush.bf16.msra.mxu1 %v1568_v11  ;;  %s1398_s16 = smov 64  }
  0x35   : > { %s1204_s13 = smul.u32 3, %s1687_s11  ;;  %s550_s18 = scalar_lea.vmem %s1654_s3, %s1685_s12 }
  0x36   : > { %v573_v13 = vld [vmem:[%s550_s18] sm:$0x1]  ;;  %s1140_s20 = sshll.u32 %s1685_s12, 1 }
  0x37   : > { %s545_s21 = sadd.s32 %s1205_s30, %s1204_s13  ;;  %vm574_vm1 = vcmp.gt.f32.partialorder %v573_v13, 0.5  ;;  %s1608_s24 = sadd.s32 %s1140_s20, %s1687_s11 }
  0x38   : > { %s1139_s25 = sshll.u32 %s545_s21, 2  ;;  %v575_v15 = vsel %vm574_vm1, 0.0, %v1399_v14  ;;  %s1141_s19 = sshll.u32 %s1608_s24, 2 }
  0x39   : > { %s547_s26 = scalar_lea.vmem %s1651_s0, %s1139_s25  ;;  %v603_v16 = vperm.slane %v575_v15, 0  ;;  %s558_s21 = scalar_lea.vmem %s1657_s6, %s1141_s19 }
  0x3a   : > { %v568_v5 = vld [vmem:[%s547_s26] sm:$0xf] }
  0x3b   : > { %v642_v6 = vunpack.c.l.b16 %v568_v5  ;;  %1148 = vmatmul.msk.bf16.vlgmr.msra.gmra.mxu0 %vm581_vm0, %v568_v5 }
  0x3c   : > { %702 = vrot.lane.b32.xlu2 %v1194_v4, %s1398_s16 }
  0x3d   : > { %v643_v7 = vpack.c.b16 %v642_v6, %v642_v6 }
  0x3f   : > { %644 = vrot.lane.b32.xlu0 %v643_v7, %s1396_s28 }
  0x44   : > { %756 = vrot.lane.b32.xlu2 %v643_v7, %s1397_s29 }
  0x47   : > { %758 = vrot.lane.b32.xlu0 %v1194_v4, %s1397_s29 }
  0x8e   : > { %v682_v22 = vpop.permute.xlu2 %681 }
  0x8f   : > { %694 = vmatpush.bf16.msra.mxu3 %v682_v22 }
  0x96   : > { %v703_v25 = vpop.permute.xlu2 %702 }
  0x97   : > { %v708_v37 = vsel %vm581_vm0, %v703_v25, 0  ;;  %v1203_v25 = vld [vmem:[#allocation4 + $0x38] sm:$0xff] }
  0x98   : > { %717 = vmatpush.bf16.xpose.msrb.mxu3 %v708_v37  ;;  %898 = vmatpush.bf16.msrb.mxu1 %v1203_v25 }
  0x9e   : > { %v757_v29 = vpop.permute.xlu2 %756 }
  0xa5   : > { %v647_v8 = vpop.permute.xlu0 %646 }
  0xa6   : > { %v652_v9 = vsel %vm581_vm0, %v647_v8, 0 }
  0xa7   : > { %661 = vmatpush.bf16.xpose.msra.mxu2 %v652_v9 }
  0xb1   : > { %v645_v10 = vpop.permute.xlu0 %644 }
  0xb2   : > { %1154 = vmatmul.msk.bf16.vlgmr.msra.gmra.mxu2 %vm581_vm0, %v645_v10 }
  0xb8   : > { %v597_v30 = vpop.f32.mrf.mxu0 }
  0xb9   : > { %v759_v23 = vpop.permute.xlu0 %758  ;;  %v601_v34 = vmul.f32 0.17677669, %v597_v30  ;;  %v1197_v30 = vld [vmem:[#allocation4 + $0x8] sm:$0xff] }
  0xba   : > { %v764_v24 = vsel %vm581_vm0, %v759_v23, 0 }
  0xbb   : > { %773 = vmatpush.bf16.xpose.msrb.mxu0 %v764_v24  ;;  %v605_v35 = vadd.f32 %v603_v16, %v601_v34 }
  0xbd   : > { %v607_v36 = vsel %vm606_vm2, %v605_v35, -inf }
  0xc0   : > { %v599_v33 = vpop.f32.mrf.mxu0 }
  0xc1   : > { %v1196_v33 = vld [vmem:[#allocation4] sm:$0xff] }
  0xc2   : > { %1158 = vmatmul.msk.bf16.vlgmr.msrb.gmra.mxu0 %vm581_vm0, %v757_v29  ;;  %v1198_v29 = vld [vmem:[#allocation4 + $0x10] sm:$0xff] }
 0x135   : > { %v663_v17 = vpop.f32.mrf.mxu2 }
 0x136   : > { %v667_v18 = vmul.f32 0.17677669, %v663_v17 }
 0x138   : > { %v668_v19 = vadd.f32 %v667_v18, %v603_v16 }
 0x13a   : > { %v669_v20 = vsel %vm606_vm2, %v668_v19, -inf }
 0x13b   : > { %670 = vmax.xlane.f32.xlu1 %v669_v20 }
 0x13d   : > { %v665_v21 = vpop.f32.mrf.mxu2 }
 0x13f   : > { %v775_v39 = vpop.f32.mrf.mxu0 }
 0x140   : > { %v779_v40 = vmul.f32 0.17677669, %v775_v39 }
 0x142   : > { %v780_v42 = vadd.f32 %v779_v40, %v603_v16 }
 0x144   : > { %v781_v44 = vsel %vm606_vm2, %v780_v42, -inf }
 0x145   : > { %782 = vmax.xlane.f32.xlu2 %v781_v44 }
 0x147   : > { %v777_v46 = vpop.f32.mrf.mxu0 }
 0x1ae   : > { %v671_v26 = vpop.xlane.xlu1 %670 }
 0x1af   : > { %v672_v27 = vsub.f32 %v668_v19, %v671_v26  ;;  %v1202_v26 = vld [vmem:[#allocation4 + $0x30] sm:$0xff] }
 0x1b0   : > { %899 = vmatpush.bf16.msrb.mxu1 %v1202_v26 }
 0x1b1   : > { %v673_v28 = vmul.f32 1.442695, %v672_v27  ;;  %v1200_v27 = vld [vmem:[#allocation4 + $0x20] sm:$0xff] }
 0x1b3   : > { %1283 = vpow2.f32 %v673_v28  ;;  %v1199_v28 = vld [vmem:[#allocation4 + $0x18] sm:$0xff] }
 0x1b8   : > { %v783_v54 = vpop.xlane.xlu2 %782 }
 0x1b9   : > { %v1284_v31 = vpop.eup %1283  ;;  %v784_v56 = vsub.f32 %v780_v42, %v783_v54  ;;  %v1280_v42 = vld [vmem:[%s1656_s5] ss:$0 sm:$0xff] }
 0x1ba   : > { %v675_v32 = vsel %vm606_vm2, %v1284_v31, 0.0 }
 0x1bb   : > { %676 = vadd.xlane.f32.xlu1 %v675_v32  ;;  %v785_v57 = vmul.f32 1.442695, %v784_v56 }
 0x1d4   : > { %700 = vrot.lane.b32.xlu1 %v643_v7, %s1398_s16 }
 0x1fe   : > { %608 = vmax.xlane.f32.xlu1 %v607_v36 }
 0x22e   : > { %v677_v38 = vpop.xlane.xlu1 %676 }
 0x22f   : > { %1285 = vrcp.f32 %v677_v38 }
 0x235   : > { %v1286_v41 = vpop.eup %1285 }
 0x236   : > { %v679_v43 = vmul.f32 %v1286_v41, %v1284_v31  ;;  %v911_v41 = vld [vmem:[%s558_s21] sm:$0xf] }
 0x238   : > { %v680_v45 = vpack.c.bf16 %v679_v43, %v679_v43  ;;  %v912_v43 = vunpack.c.l.bf16 %v911_v41 }
 0x23a   : > { %1155 = vmatmul.msk.bf16.vlgmr.msra.gmra.mxu3 %vm606_vm2, %v680_v45 }
 0x246   : > { %v701_v47 = vpop.permute.xlu1 %700 }
 0x24a   : > { %1156 = vmatmul.msk.bf16.vlgmr.msrb.gmra.mxu3 %vm581_vm0, %v701_v47 }
 0x271   : > { %v609_v48 = vpop.xlane.xlu1 %608 }
 0x272   : > { %v610_v49 = vsub.f32 %v605_v35, %v609_v48  ;;  %v1400_v48 = vmov 128.0  }
 0x274   : > { %v611_v50 = vmul.f32 1.442695, %v610_v49 }
 0x276   : > { %1287 = vpow2.f32 %v611_v50 }
 0x277   : > { %1289 = vpow2.f32 %v785_v57 }
 0x27c   : > { %v1288_v51 = vpop.eup %1287 }
 0x27d   : > { %v613_v52 = vsel %vm606_vm2, %v1288_v51, 0.0  ;;  %v1290_v62 = vpop.eup %1289 }
 0x27e   : > { %614 = vadd.xlane.f32.xlu1 %v613_v52  ;;  %v787_v0 = vsel %vm606_vm2, %v1290_v62, 0.0 }
 0x2bd   : > { %v696_v53 = vpop.f32.mrf.mxu3 }
 0x2be   : > { %813 = vrot.lane.b32.xlu1 %v696_v53, %s1397_s29 }
 0x2c5   : > { %v698_v55 = vpop.f32.mrf.mxu3 }
 0x2cd   : > { %v719_v58 = vpop.f32.mrf.mxu3 }
 0x2ce   : > { %v723_v59 = vmul.f32 0.17677669, %v719_v58 }
 0x2d0   : > { %v724_v60 = vadd.f32 %v723_v59, %v603_v16 }
 0x2d2   : > { %v725_v61 = vsel %vm606_vm2, %v724_v60, -inf }
 0x2d3   : > { %726 = vmax.xlane.f32.xlu0 %v725_v61 }
 0x2d5   : > { %v721_v63 = vpop.f32.mrf.mxu3 }
 0x2db   : > { %788 = vadd.xlane.f32.xlu0 %v787_v0 }
 0x2ef   : > { %793 = vrot.lane.b32.xlu0 %v1568_v11, %s1397_s29 }
 0x2f1   : > { %v615_v1 = vpop.xlane.xlu1 %614 }
 0x2f2   : > { %1291 = vrcp.f32 %v615_v1 }
 0x2f8   : > { %v1292_v2 = vpop.eup %1291 }
 0x2f9   : > { %v617_v3 = vmul.f32 %v1292_v2, %v1288_v51 }
 0x2fb   : > { %v618_v4 = vpack.c.bf16 %v617_v3, %v617_v3 }
 0x2fd   : > { %1153 = vmatmul.msk.bf16.vlgmr.msra.gmra.mxu1 %vm606_vm2, %v618_v4  ;;  %v1281_v4 = vld [vmem:[%s1658_s7] ss:$0 sm:$0xff] }
 0x330   : > { %v814_v34 = vpop.permute.xlu1 %813 }
 0x346   : > { %v727_v5 = vpop.xlane.xlu0 %726 }
 0x347   : > { %v728_v6 = vsub.f32 %v724_v60, %v727_v5 }
 0x349   : > { %v729_v7 = vmul.f32 1.442695, %v728_v6  ;;  %v1282_v6 = vld [vmem:[%s1659_s8] ss:$0 sm:$0xff] }
 0x34b   : > { %1293 = vpow2.f32 %v729_v7 }
 0x34e   : > { %v789_v10 = vpop.xlane.xlu0 %788 }
 0x34f   : > { %1295 = vrcp.f32 %v789_v10 }
 0x351   : > { %v1294_v8 = vpop.eup %1293 }
 0x352   : > { %v731_v9 = vsel %vm606_vm2, %v1294_v8, 0.0 }
 0x353   : > { %732 = vadd.xlane.f32.xlu2 %v731_v9 }
 0x355   : > { %v1296_v12 = vpop.eup %1295 }
 0x356   : > { %v791_v13 = vmul.f32 %v1296_v12, %v1290_v62 }
 0x358   : > { %v792_v15 = vpack.c.bf16 %v791_v13, %v791_v13 }
 0x361   : > { %v794_v14 = vpop.permute.xlu0 %793 }
 0x362   : > { %806 = vmatpush.bf16.msrb.mxu2 %v794_v14 }
 0x365   : > { %1159 = vmatmul.msk.bf16.vlgmr.msrb.gmra.mxu2 %vm606_vm2, %v792_v15 }
 0x36b   : > { %737 = vrot.lane.b32.xlu2 %v1568_v11, %s1398_s16  ;;  %v1201_v11 = vld [vmem:[#allocation4 + $0x28] sm:$0xff] }
 0x36c   : > { %900 = vmatpush.bf16.msrb.mxu1 %v1201_v11 }
 0x370   : > { %901 = vmatpush.bf16.msrb.mxu1 %v1200_v27 }
 0x374   : > { %902 = vmatpush.bf16.msrb.mxu1 %v1199_v28 }
 0x378   : > { %903 = vmatpush.bf16.msrb.mxu1 %v1198_v29 }
 0x37a   : > { %v637_v16 = vpop.f32.mrf.mxu1 }
 0x37b   : > { %v824_v35 = vsel %vm581_vm0, %v637_v16, %v814_v34 }
 0x37c   : > { %904 = vmatpush.bf16.msrb.mxu1 %v1197_v30 }
 0x380   : > { %905 = vmatpush.bf16.msrb.mxu1 %v1196_v33 }
 0x382   : > { %v639_v17 = vpop.f32.mrf.mxu1 }
 0x3c6   : > { %v733_v18 = vpop.xlane.xlu2 %732 }
 0x3c7   : > { %1297 = vrcp.f32 %v733_v18 }
 0x3c8   : > { %1299 = vrcp.f32 %v1400_v48 }
 0x3cd   : > { %v1298_v19 = vpop.eup %1297 }
 0x3ce   : > { %v735_v20 = vmul.f32 %v1298_v19, %v1294_v8  ;;  %v738_v21 = vpop.permute.xlu2 %737  ;;  %v1300_v49 = vpop.eup %1299 }
 0x3cf   : > { %750 = vmatpush.bf16.msra.mxu3 %v738_v21  ;;  %v917_v50 = vmul.f32 128.0, %v1300_v49  ;;  %vm921_vm5 = vweird.f32 %v1300_v49 }
 0x3d0   : > { %v736_v22 = vpack.c.bf16 %v735_v20, %v735_v20 }
 0x3d1   : > { %v918_v51 = vsub.f32 1.0, %v917_v50 }
 0x3d2   : > { %1157 = vmatmul.msk.bf16.vlgmr.msra.gmra.mxu3 %vm606_vm2, %v736_v22 }
 0x3d3   : > { %v919_v52 = vmul.f32 %v1300_v49, %v918_v51 }
 0x3d5   : > { %v920_v53 = vadd.f32 %v1300_v49, %v919_v52 }
 0x3d7   : > { %v922_v54 = vsel %vm921_vm5, %v1300_v49, %v920_v53 }
 0x3e8   : > { %v808_v23 = vpop.f32.mrf.mxu2 }
 0x3e9   : > { %821 = vrot.lane.b32.xlu2 %v808_v23, %s1396_s28 }
 0x3f0   : > { %v810_v24 = vpop.f32.mrf.mxu2 }
 0x443   : > { %v822_v37 = vpop.permute.xlu2 %821 }
 0x455   : > { %v752_v31 = vpop.f32.mrf.mxu3 }
 0x456   : > { %817 = vrot.lane.b32.xlu0 %v752_v31, %s1398_s16  ;;  %s566_s16 = scalar_lea.vmem %s1660_s9, %s1141_s19 }
 0x45d   : > { %v754_v32 = vpop.f32.mrf.mxu3 }
 0x4c8   : > { %v818_v36 = vpop.permute.xlu0 %817 }
 0x4c9   : > { %v826_v38 = vsel %vm825_vm3, %v824_v35, %v818_v36 }
 0x4ca   : > { %v828_v39 = vsel %vm827_vm4, %v826_v38, %v822_v37 }
 0x4cb   : > { %v829_v40 = vpack.c.bf16 %v828_v39, %v828_v39 }
 0x4cd   : > { %906 = vmatmul.bf16.vlgmr.msrb.gmra.mxu1 %v829_v40 }
 0x54a   : > { %v907_v44 = vpop.f32.mrf.mxu1 }
 0x54b   : > { %v908_v45 = vadd.f32 %v1280_v42, %v907_v44 }
 0x54d   : > { %v913_v46 = vadd.f32 %v912_v43, %v908_v45 }
 0x54f   : > { %914 = vadd.xlane.f32.xlu0 %v913_v46 }
 0x552   : > { %v909_v47 = vpop.f32.mrf.mxu1 }
 0x5c2   : > { %v915_v55 = vpop.xlane.xlu0 %914 }
 0x5c3   : > { %v923_v56 = vmul.f32 %v922_v54, %v915_v55 }
 0x5c5   : > { %v924_v57 = vsub.f32 %v913_v46, %v923_v56 }
 0x5c7   : > { %v925_v58 = vmul.f32 %v924_v57, %v924_v57 }
 0x5c9   : > { %926 = vadd.xlane.f32.xlu2 %v925_v58 }
 0x63c   : > { %v927_v59 = vpop.xlane.xlu2 %926 }
 0x63d   : > { %v928_v60 = vmul.f32 %v927_v59, %v922_v54 }
 0x63f   : > { %v929_v61 = vadd.f32 1e-05, %v928_v60 }
 0x641   : > { %1301 = vrsqrt.f32 %v929_v61  ;;  %vm936_vm7 = vweird.f32 %v929_v61 }
 0x647   : > { %v1302_v62 = vpop.eup %1301 }
 0x648   : > { %v931_v63 = vmul.f32 %v1302_v62, %v929_v61  ;;  %vm937_vm6 = vweird.f32 %v1302_v62 }
 0x649   : > { %vm938_vm8 = vmor %vm936_vm7, %vm937_vm6 }
 0x64a   : > { %v932_v0 = vmul.f32 %v1302_v62, %v931_v63 }
 0x64c   : > { %v933_v1 = vmul.f32 0.5, %v932_v0 }
 0x64e   : > { %v934_v2 = vsub.f32 1.5, %v933_v1 }
 0x650   : > { %v935_v3 = vmul.f32 %v1302_v62, %v934_v2 }
 0x652   : > { %v939_v5 = vsel %vm938_vm8, %v1302_v62, %v935_v3 }
 0x653   : > { %v940_v7 = vmul.f32 %v939_v5, %v924_v57 }
 0x655   : > { %v945_v8 = vmul.f32 %v1281_v4, %v940_v7 }
 0x657   : > { %v950_v9 = vadd.f32 %v1282_v6, %v945_v8 }
 0x659   : > { %v951_v10 = vpack.c.bf16 %v950_v9, %v950_v9 }
 0x65b   : > { %952 = vst [vmem:[%s566_s16] sm:$0xf] %v951_v10 }
 0x65c PF: > { %s20_s15 = sadd.s32 1, %s1391_s15   ;;  %s1671_s11 = sld [smem:[#allocation7_spill]] }
 0x65d   : > { %p17_p1 = scmp.ge.s32.totalorder %s20_s15, 6   ;;  %s1672_s13 = sld [smem:[#allocation8_spill]] }
 0x65e   : > { %s1673_s23 = sld [smem:[#allocation9_spill]]  ;;  %s1674_s30 = smov %s1371_s10 }
 0x65f   : > { %s1675_s10 = smov %s1520_s27  ;;  %s1676_s12 = smov %s1387_s14 }
 0x660   :  { %19 = sbr.rel (!%p17_p1) target bundleno = 6 (0x6), region = 195 }
 0x664   : > { %s1677_s14 = smov %s1673_s23 }
 0x665   :  { %980 = vsyncpa [#allocation5], 1 }
 0x666   :  { %982 = vsyncpa [#allocation5 + $0x1], 1 }

// kernel: bert2tf_forward.32
= control target key start
LH: loop header
LB: loop body
LE: loop exit
PB: predicated region body
PF: predicated region fallthrough
CT: control target
= control target key end

     0   :  { %8 = vsyncpa [#allocation4], 0  ;;  %s779_s12 = smov 0   ;;  %s781_s13 = smov 0   ;;  %s826_s0 = inlined_call_operand.vmem [shape: bf16[32,128], index: 0, kind: input, shape index: {}]   ;;  %s827_s1 = inlined_call_operand.hbm [shape: bf16[128,256], index: 1, kind: input, shape index: {}]   ;;  %s828_s2 = inlined_call_operand.vmem [shape: f32[1,256], index: 2, kind: input, shape index: {}]   ;;  %s829_s3 = inlined_call_operand.vmem [shape: bf16[32,256], index: 3, kind: output, shape index: {}]  }
   0x1   :  { %s783_s14 = smov 0  }
   0x2 LB: > { %s560_s15 = sadd.s32 4294967295, %s754_s14   ;;  %s33_s16 = sadd.s32 1, %s750_s13  ;;  %s754_s14 = sphi %s783_s14, %s14_s14   ;;  %s750_s13 = sphi %s781_s13, %s831_s13   ;;  %s746_s12 = sphi %s779_s12, %s830_s12  }
   0x3   : > { %p35_p0 = scmp.ge.s32.totalorder %s33_s16, 2  ;;  %p562_p1 = scmp.ge.s32.totalorder %s754_s14, 1 }
   0x4   : > { %p148_p2 = scmp.lt.s32.totalorder %s754_s14, 3  ;;  %p669_p4 = scmp.eq.s32.totalorder %s560_s15, 0 }
   0x5   : > { %s833_s16 = smov (%p35_p0, %s33_s16), 0  ;;  %s165_s19 = sshll.u32 %s827_s1, 4  ;;  %s166_s19 = int_to_ptr.hbm [resolvable:$true] %s165_s19 }
   0x6   : > { %p149_p3 = pnand %p562_p1, %p148_p2  ;;  %s756_s20 = smov [#allocation3]  }
   0x7   : > { %s167_s21 = sshll.u32 %s756_s20, 4  ;;  %s757_s22 = smov 128   ;;  %s168_s21 = int_to_ptr.vmem [resolvable:$true] %s167_s21 }
   0x8   : > { %p665_p5 = pneg %p149_p3  ;;  %s758_s23 = smov 8  }
   0x9   : > { %203 = sbr.rel (%p149_p3) target bundleno = 189 (0xbd), region = 32 }
   0xa   : > { %p666_p6 = pnand %p669_p4, %p665_p5 }
   0xc   : > { %668 = dma.hbm_to_vmem [thread:$0]  (!%p666_p6), %s166_s19, 2048, %s168_s21, [#allocation4], %s757_s22, %s757_s22, %s758_s23  }
   0xe   : > { %741 = dma.done.wait (%p669_p4), [#allocation4], 2048  }
   0xf   : > { %743 = vsyncadd (%p669_p4), [#allocation4], 4294965248  ;;  %v635_v0 = vld [vmem:[#allocation3 + $0x70] sm:$0xf]  ;;  %v660_v1 = vld [vmem:[#allocation3 + $0x74] sm:$0xf0] }
  0x10   : > { %v659_v2 = vld [vmem:[#allocation3 + $0x74] sm:$0xf]  ;;  %v636_v3 = vor.u32 %v660_v1, %v635_v0  ;;  %v637_v4 = vld [vmem:[#allocation3 + $0x78] sm:$0xf0]  ;;  %v627_v5 = vld [vmem:[#allocation3 + $0x60] sm:$0xf] }
  0x11   : > { %v658_v6 = vld [vmem:[#allocation3 + $0x64] sm:$0xf0]  ;;  %v640_v7 = vor.u32 %v659_v2, %v637_v4  ;;  %v657_v8 = vld [vmem:[#allocation3 + $0x64] sm:$0xf]  ;;  %v629_v9 = vld [vmem:[#allocation3 + $0x68] sm:$0xf0] }
  0x12   : > { %384 = vmatpush.bf16.msra.mxu0 %v636_v3  ;;  %v628_v10 = vor.u32 %v658_v6, %v627_v5  ;;  %v632_v11 = vor.u32 %v657_v8, %v629_v9  ;;  %v619_v12 = vld [vmem:[#allocation3 + $0x50] sm:$0xf]  ;;  %v656_v13 = vld [vmem:[#allocation3 + $0x54] sm:$0xf0]  ;;  %v655_v14 = vld [vmem:[#allocation3 + $0x54] sm:$0xf] }
  0x13   : > { %398 = vmatpush.bf16.msra.mxu1 %v640_v7  ;;  %v621_v15 = vld [vmem:[#allocation3 + $0x58] sm:$0xf0]  ;;  %v620_v16 = vor.u32 %v656_v13, %v619_v12  ;;  %v611_v18 = vld [vmem:[#allocation3 + $0x40] sm:$0xf]  ;;  %v654_v19 = vld [vmem:[#allocation3 + $0x44] sm:$0xf0] }
  0x14   : > { %v624_v17 = vor.u32 %v655_v14, %v621_v15  ;;  %v653_v20 = vld [vmem:[#allocation3 + $0x44] sm:$0xf]  ;;  %v613_v21 = vld [vmem:[#allocation3 + $0x48] sm:$0xf0]  ;;  %v612_v22 = vor.u32 %v654_v19, %v611_v18  ;;  %v603_v24 = vld [vmem:[#allocation3 + $0x30] sm:$0xf] }
  0x15   : > { %v616_v23 = vor.u32 %v653_v20, %v613_v21  ;;  %v652_v25 = vld [vmem:[#allocation3 + $0x34] sm:$0xf0]  ;;  %v651_v26 = vld [vmem:[#allocation3 + $0x34] sm:$0xf]  ;;  %v605_v27 = vld [vmem:[#allocation3 + $0x38] sm:$0xf0] }
  0x16   : > { %385 = vmatpush.bf16.msra.mxu0 %v628_v10  ;;  %s568_s24 = sshll.u32 %s746_s12, 1  ;;  %v604_v28 = vor.u32 %v652_v25, %v603_v24  ;;  %v608_v29 = vor.u32 %v651_v26, %v605_v27  ;;  %v595_v30 = vld [vmem:[#allocation3 + $0x20] sm:$0xf]  ;;  %v650_v31 = vld [vmem:[#allocation3 + $0x24] sm:$0xf0] }
  0x17   : > { %399 = vmatpush.bf16.msra.mxu1 %v632_v11  ;;  %p241_p7 = scmp.lt.s32.totalorder %s568_s24, 3  ;;  %v649_v32 = vld [vmem:[#allocation3 + $0x24] sm:$0xf]  ;;  %v597_v33 = vld [vmem:[#allocation3 + $0x28] sm:$0xf0]  ;;  %v596_v34 = vor.u32 %v650_v31, %v595_v30 }
  0x18   : > { %v600_v35 = vor.u32 %v649_v32, %v597_v33  ;;  %v587_v36 = vld [vmem:[#allocation3 + $0x10] sm:$0xf]  ;;  %v648_v37 = vld [vmem:[#allocation3 + $0x14] sm:$0xf0]  ;;  %v647_v38 = vld [vmem:[#allocation3 + $0x14] sm:$0xf] }
  0x19   : > { %s835_s24 = smov (!%p241_p7, %s568_s24), 3  ;;  %v589_v39 = vld [vmem:[#allocation3 + $0x18] sm:$0xf0]  ;;  %v588_v40 = vor.u32 %v648_v37, %v587_v36  ;;  %v579_v42 = vld [vmem:[#allocation3] sm:$0xf] }
  0x1a   : > { %386 = vmatpush.bf16.msra.mxu0 %v620_v16  ;;  %v592_v41 = vor.u32 %v647_v38, %v589_v39  ;;  %v646_v43 = vld [vmem:[#allocation3 + $0x4] sm:$0xf0]  ;;  %s569_s25 = sshll.u32 %s835_s24, 2  ;;  %v645_v44 = vld [vmem:[#allocation3 + $0x4] sm:$0xf]  ;;  %s643_s4 = sshll.u32 %s835_s24, 3 }
  0x1b   : > { %400 = vmatpush.bf16.msra.mxu1 %v624_v17  ;;  %v581_v45 = vld [vmem:[#allocation3 + $0x8] sm:$0xf0]  ;;  %v580_v46 = vor.u32 %v646_v43, %v579_v42  ;;  %s247_s28 = scalar_lea.vmem %s826_s0, %s569_s25  ;;  %v427_v49 = vld [vmem:[%s828_s2] sm:$0x3]  ;;  %s265_s7 = scalar_lea.vmem %s829_s3, %s643_s4 }
  0x1c   : > { %v584_v47 = vor.u32 %v645_v44, %v581_v45  ;;  %v644_v48 = vld [vmem:[%s247_s28] sm:$0xff]  ;;  %v429_v50 = vperm.slane %v427_v49, 0  ;;  %v430_v51 = vperm.slane %v427_v49, 1 }
  0x1e   : > { %387 = vmatpush.bf16.msra.mxu0 %v612_v22 }
  0x1f   : > { %401 = vmatpush.bf16.msra.mxu1 %v616_v23 }
  0x22   : > { %388 = vmatpush.bf16.msra.mxu0 %v604_v28 }
  0x23   : > { %402 = vmatpush.bf16.msra.mxu1 %v608_v29 }
  0x26   : > { %389 = vmatpush.bf16.msra.mxu0 %v596_v34 }
  0x27   : > { %403 = vmatpush.bf16.msra.mxu1 %v600_v35 }
  0x2a   : > { %390 = vmatpush.bf16.msra.mxu0 %v588_v40 }
  0x2b   : > { %404 = vmatpush.bf16.msra.mxu1 %v592_v41 }
  0x2e   : > { %391 = vmatpush.bf16.msra.mxu0 %v580_v46 }
  0x2f   : > { %405 = vmatpush.bf16.msra.mxu1 %v584_v47 }
  0x31   : > { %392 = vmatmul.bf16.vlgmr.msra.gmra.mxu0 %v644_v48 }
  0x32   : > { %406 = vmatmul.bf16.vlgmr.msra.gmra.mxu1 %v644_v48 }
  0xae   : > { %v393_v52 = vpop.f32.mrf.mxu0 }
  0xaf   : > { %v433_v53 = vadd.f32 %v429_v50, %v393_v52  ;;  %v407_v54 = vpop.f32.mrf.mxu1 }
  0xb0   : > { %v434_v55 = vadd.f32 %v430_v51, %v407_v54 }
  0xb2   : > { %v437_v56 = vpack.c.bf16 %v434_v55, %v433_v53 }
  0xb4   : > { %439 = vst [vmem:[%s265_s7] sm:$0xff] %v437_v56 }
  0xb6   : > { %v395_v57 = vpop.f32.mrf.mxu0 }
  0xb7   : > { %v435_v58 = vadd.f32 %v429_v50, %v395_v57  ;;  %v409_v59 = vpop.f32.mrf.mxu1 }
  0xb8   : > { %v436_v60 = vadd.f32 %v430_v51, %v409_v59 }
  0xba   : > { %v438_v61 = vpack.c.bf16 %v436_v60, %v435_v58 }
  0xbc   : > { %440 = vst [vmem:[%s265_s7 + $0x8] sm:$0xff] %v438_v61 }
  0xbd PF: > { %s14_s14 = sadd.s32 1, %s754_s14   ;;  %s830_s12 = smov %s750_s13 }
  0xbe   : > { %p11_p8 = scmp.ge.s32.totalorder %s14_s14, 4   ;;  %s831_s13 = smov %s833_s16 }
  0xc0   :  { %13 = sbr.rel (!%p11_p8) target bundleno = 2 (0x2), region = 79 }
  0xc5   :  { %474 = vsyncpa [#allocation4], 1 }
  0xc6   :  { %476 = vsyncpa [#allocation4 + $0x1], 1 }

// kernel: bert2tf_forward.29
= control target key start
LH: loop header
LB: loop body
LE: loop exit
PB: predicated region body
PF: predicated region fallthrough
CT: control target
= control target key end

     0   :  { %8 = vsyncpa [#allocation4], 0  ;;  %s850_s0 = inlined_call_operand.vmem [shape: bf16[16,128], index: 0, kind: input, shape index: {}]   ;;  %s851_s1 = inlined_call_operand.hbm [shape: bf16[128,384], index: 1, kind: input, shape index: {}]   ;;  %s852_s2 = inlined_call_operand.vmem [shape: f32[1,384], index: 2, kind: input, shape index: {}]   ;;  %s853_s3 = inlined_call_operand.vmem [shape: bf16[16,384], index: 3, kind: output, shape index: {}]  }
   0x1   :  { %10 = vsyncpa [#allocation4 + $0x1], 0  ;;  %s734_s12 = smov 0   ;;  %s736_s13 = smov 0  }
   0x2   :  { %s738_s14 = smov 0   ;;  %s740_s15 = smov 0  }
   0x3   :  { %s742_s16 = smov 0   ;;  %s744_s17 = smov 0  }
   0x4   :  { %s746_s18 = smov 0   ;;  %s748_s19 = smov 0  }
   0x5 LB: > { %s485_s20 = sadd.s32 4294967295, %s709_s19   ;;  %s31_s21 = sadd.s32 1, %s701_s17  ;;  %s709_s19 = sphi %s748_s19, %s16_s19   ;;  %s705_s18 = sphi %s746_s18, %s862_s18   ;;  %s701_s17 = sphi %s744_s17, %s861_s17   ;;  %s697_s16 = sphi %s742_s16, %s860_s16   ;;  %s693_s15 = sphi %s740_s15, %s859_s15   ;;  %s689_s14 = sphi %s738_s14, %s858_s14   ;;  %s685_s13 = sphi %s736_s13, %s857_s13   ;;  %s681_s12 = sphi %s734_s12, %s856_s12  }
   0x6   : > { %p33_p0 = scmp.ge.s32.totalorder %s31_s21, 3  ;;  %s35_s22 = sadd.s32 1, %s705_s18 }
   0x7   : > { %s72_s23 = sadd.s32 1, %s689_s14  ;;  %p79_p1 = scmp.ne.s32.totalorder %s689_s14, %s685_s13 }
   0x8   : > { %s864_s21 = smov (%p33_p0, %s31_s21), 0  ;;  %s866_s22 = smov (!%p33_p0, %s35_s22), %s705_s18 }
   0x9   : > { %s68_s24 = ssub.s32 %s701_s17, %s864_s21  ;;  %p80_p2 = scmp.eq.s32.totalorder %s709_s19, 0 }
   0xa   : > { %p37_p3 = scmp.ge.s32.totalorder %s866_s22, 2  ;;  %p70_p4 = scmp.eq.s32.totalorder %s68_s24, 0 }
   0xb   : > { %p784_p5 = por %p80_p2, %p79_p1  ;;  %p85_p6 = scmp.ne.s32.totalorder %s685_s13, %s681_s12 }
   0xc   : > { %s868_s22 = smov (%p37_p3, %s866_s22), 0  ;;  %p86_p7 = scmp.eq.s32.totalorder %s485_s20, 0 }
   0xd   : > { %s792_s26 = scalar_select %p70_p4, %s689_s14, %s72_s23  }
   0xe   : > { %p544_p8 = scmp.lt.s32.totalorder %s709_s19, 6  ;;  %s173_s27 = sand.u32 1, %s689_s14  }
   0xf   : > { %p796_p9 = por %p86_p7, %p85_p6  ;;  %s489_s29 = sshll.u32 %s173_s27, 6 }
  0x10   : > { %s490_s30 = sshll.u32 %s701_s17, 2  ;;  %s177_s8 = scalar_lea.vmem [#allocation3], %s489_s29 }
  0x11   : > { %s184_s6 = scalar_lea.hbm %s851_s1, %s490_s30  ;;  %s187_s9 = sshll.u32 %s177_s8, 4  ;;  %s188_s9 = int_to_ptr.vmem [resolvable:$true] %s187_s9 }
  0x12   : > { %s185_s7 = sshll.u32 %s184_s6, 4  ;;  %p541_p10 = pnand %p544_p8, %p784_p5  ;;  %s186_s7 = int_to_ptr.hbm [resolvable:$true] %s185_s7 }
  0x13   : > { %p491_p11 = scmp.ge.s32.totalorder %s709_s19, 1  ;;  %s174_s10 = scalar_lea.sflag [#allocation4], %s173_s27 }
  0x14   : > { %s711_s11 = smov 192   ;;  %s712_s12 = smov 64  }
  0x15   : > { %s713_s20 = smov 4   ;;  %p201_p12 = scmp.lt.s32.totalorder %s709_s19, 7 }
  0x16   : > { %543 = dma.hbm_to_vmem [thread:$0]  (!%p541_p10), %s186_s7, 1024, %s188_s9, %s174_s10, %s711_s11, %s712_s12, %s713_s20  }
  0x17   : > { %p202_p13 = pnand %p491_p11, %p201_p12 }
  0x18   : > { %s207_s23 = sand.u32 (!%p202_p13), 1, %s685_s13  }
  0x19   : > { %205 = sbr.rel (%p202_p13) target bundleno = 197 (0xc5), region = 32  ;;  %s492_s24 = sshll.u32 (!%p202_p13), %s207_s23, 6 }
  0x1a   : > { %s208_s30 = scalar_lea.sflag (!%p202_p13), [#allocation4], %s207_s23  ;;  %s211_s29 = scalar_lea.vmem (!%p202_p13), [#allocation3], %s492_s24 }
  0x1e   : > { %676 = dma.done.wait (%p796_p9), %s208_s30, 1024  }
  0x1f   : > { %678 = vsyncadd (%p796_p9), %s208_s30, 4294966272  ;;  %p248_p0 = scmp.lt.s32.totalorder %s697_s16, 1  ;;  %p256_p1 = scmp.lt.s32.totalorder %s693_s15, 2  ;;  %v536_v0 = vld [vmem:[%s211_s29 + $0x38] sm:$0xff]  ;;  %v535_v1 = vld [vmem:[%s211_s29 + $0x30] sm:$0xff] }
  0x20   : > { %338 = vmatpush.bf16.msra.mxu0 %v536_v0  ;;  %v534_v2 = vld [vmem:[%s211_s29 + $0x28] sm:$0xff]  ;;  %v533_v3 = vld [vmem:[%s211_s29 + $0x20] sm:$0xff]  ;;  %v532_v4 = vld [vmem:[%s211_s29 + $0x18] sm:$0xff] }
  0x21   : > { %s870_s16 = smov (!%p248_p0, %s697_s16), 1  ;;  %s872_s15 = smov (!%p256_p1, %s693_s15), 2  ;;  %v531_v5 = vld [vmem:[%s211_s29 + $0x10] sm:$0xff]  ;;  %v530_v6 = vld [vmem:[%s211_s29 + $0x8] sm:$0xff]  ;;  %v529_v7 = vld [vmem:[%s211_s29] sm:$0xff] }
  0x22   : > { %s537_s25 = smul.u32 3, %s870_s16  ;;  %s258_s6 = scalar_lea.vmem %s852_s2, %s872_s15 }
  0x23   : > { %s493_s28 = sshll.u32 %s870_s16, 2  ;;  %v612_v9 = vld [vmem:[%s258_s6] ss:$0 sm:$0xff] }
  0x24   : > { %s264_s27 = sadd.s32 %s537_s25, %s872_s15  ;;  %339 = vmatpush.bf16.msra.mxu0 %v535_v1  ;;  %s254_s9 = scalar_lea.vmem %s850_s0, %s493_s28 }
  0x25   : > { %v273_v8 = vld [vmem:[%s254_s9] sm:$0xf]  ;;  %s494_s15 = sshll.u32 %s264_s27, 2 }
  0x26   : > { %s266_s12 = scalar_lea.vmem %s853_s3, %s494_s15 }
  0x28   : > { %340 = vmatpush.bf16.msra.mxu0 %v534_v2 }
  0x2c   : > { %341 = vmatpush.bf16.msra.mxu0 %v533_v3 }
  0x30   : > { %342 = vmatpush.bf16.msra.mxu0 %v532_v4 }
  0x34   : > { %343 = vmatpush.bf16.msra.mxu0 %v531_v5 }
  0x38   : > { %344 = vmatpush.bf16.msra.mxu0 %v530_v6 }
  0x3c   : > { %345 = vmatpush.bf16.msra.mxu0 %v529_v7 }
  0x3f   : > { %346 = vmatmul.bf16.vlgmr.msra.gmra.mxu0 %v273_v8 }
  0xbc   : > { %v347_v10 = vpop.f32.mrf.mxu0 }
  0xbd   : > { %v361_v11 = vadd.f32 %v612_v9, %v347_v10 }
  0xbf   : > { %v362_v12 = vpack.c.bf16 %v361_v11, %v361_v11 }
  0xc1   : > { %363 = vst [vmem:[%s266_s12] sm:$0xf] %v362_v12 }
  0xc4   : > { %v349_v13 = vpop.f32.mrf.mxu0 }
  0xc5 PF: > { %s16_s19 = sadd.s32 1, %s709_s19   ;;  %s856_s12 = smov %s685_s13 }
  0xc6   : > { %p13_p2 = scmp.ge.s32.totalorder %s16_s19, 8   ;;  %s857_s13 = smov %s689_s14 }
  0xc7   : > { %s858_s14 = smov %s792_s26  ;;  %s859_s15 = smov %s701_s17 }
  0xc8   : > { %s860_s16 = smov %s705_s18  ;;  %s861_s17 = smov %s864_s21 }
  0xc9   : > { %s862_s18 = smov %s868_s22  ;;  %15 = sbr.rel (!%p13_p2) target bundleno = 5 (0x5), region = 86 }
  0xce   :  { %391 = vsyncpa [#allocation4], 1 }
  0xcf   :  { %393 = vsyncpa [#allocation4 + $0x1], 1 }

// kernel: bert2tf_forward.31
= control target key start
LH: loop header
LB: loop body
LE: loop exit
PB: predicated region body
PF: predicated region fallthrough
CT: control target
= control target key end

     0   :  { %8 = vsyncpa [#allocation4], 0  ;;  %s621_s12 = smov 0   ;;  %s623_s13 = smov 0   ;;  %s665_s0 = inlined_call_operand.vmem [shape: bf16[16,128], index: 0, kind: input, shape index: {}]   ;;  %s666_s1 = inlined_call_operand.hbm [shape: bf16[128,128], index: 1, kind: input, shape index: {}]   ;;  %s667_s2 = inlined_call_operand.vmem [shape: f32[1,128], index: 2, kind: input, shape index: {}]   ;;  %s668_s3 = inlined_call_operand.vmem [shape: bf16[16,128], index: 3, kind: output, shape index: {}]  }
   0x1   :  { %s625_s14 = smov 0  }
   0x2 LB: > { %s450_s15 = sadd.s32 4294967295, %s596_s14   ;;  %s33_s16 = sadd.s32 1, %s592_s13  ;;  %s596_s14 = sphi %s625_s14, %s14_s14   ;;  %s592_s13 = sphi %s623_s13, %s670_s13   ;;  %s588_s12 = sphi %s621_s12, %s669_s12  }
   0x3   : > { %p35_p0 = scmp.ge.s32.totalorder %s33_s16, 2  ;;  %p452_p1 = scmp.ge.s32.totalorder %s596_s14, 1 }
   0x4   : > { %p148_p2 = scmp.lt.s32.totalorder %s596_s14, 3  ;;  %p510_p4 = scmp.eq.s32.totalorder %s450_s15, 0 }
   0x5   : > { %s672_s16 = smov (%p35_p0, %s33_s16), 0  ;;  %s163_s19 = sshll.u32 %s666_s1, 4  ;;  %s164_s19 = int_to_ptr.hbm [resolvable:$true] %s163_s19 }
   0x6   : > { %p149_p3 = pnand %p452_p1, %p148_p2  ;;  %s598_s20 = smov [#allocation3]  }
   0x7   : > { %s165_s21 = sshll.u32 %s598_s20, 4  ;;  %s599_s22 = smov 64   ;;  %s166_s21 = int_to_ptr.vmem [resolvable:$true] %s165_s21 }
   0x8   : > { %p506_p5 = pneg %p149_p3  ;;  %s600_s23 = smov 4  }
   0x9   : > { %197 = sbr.rel (%p149_p3) target bundleno = 181 (0xb5), region = 32 }
   0xa   : > { %p507_p6 = pnand %p510_p4, %p506_p5 }
   0xc   : > { %509 = dma.hbm_to_vmem [thread:$0]  (!%p507_p6), %s164_s19, 1024, %s166_s21, [#allocation4], %s599_s22, %s599_s22, %s600_s23  }
   0xe   : > { %583 = dma.done.wait (%p510_p4), [#allocation4], 1024  }
   0xf   : > { %585 = vsyncadd (%p510_p4), [#allocation4], 4294966272  ;;  %v501_v0 = vld [vmem:[#allocation3 + $0x38] sm:$0xff]  ;;  %v500_v1 = vld [vmem:[#allocation3 + $0x30] sm:$0xff]  ;;  %p229_p7 = scmp.lt.s32.totalorder %s588_s12, 1 }
  0x10   : > { %318 = vmatpush.bf16.msra.mxu0 %v501_v0  ;;  %v499_v2 = vld [vmem:[#allocation3 + $0x28] sm:$0xff]  ;;  %v498_v3 = vld [vmem:[#allocation3 + $0x20] sm:$0xff]  ;;  %v497_v4 = vld [vmem:[#allocation3 + $0x18] sm:$0xff] }
  0x11   : > { %v496_v5 = vld [vmem:[#allocation3 + $0x10] sm:$0xff]  ;;  %s674_s12 = smov (!%p229_p7, %s588_s12), 1  ;;  %v495_v6 = vld [vmem:[#allocation3 + $0x8] sm:$0xff]  ;;  %v494_v7 = vld [vmem:[#allocation3] sm:$0xff] }
  0x12   : > { %s458_s24 = sshll.u32 %s674_s12, 2  ;;  %v539_v9 = vld [vmem:[%s667_s2] ss:$0 sm:$0xff] }
  0x13   : > { %s235_s27 = scalar_lea.vmem %s665_s0, %s458_s24  ;;  %s246_s5 = scalar_lea.vmem %s668_s3, %s458_s24 }
  0x14   : > { %319 = vmatpush.bf16.msra.mxu0 %v500_v1  ;;  %v253_v8 = vld [vmem:[%s235_s27] sm:$0xf] }
  0x18   : > { %320 = vmatpush.bf16.msra.mxu0 %v499_v2 }
  0x1c   : > { %321 = vmatpush.bf16.msra.mxu0 %v498_v3 }
  0x20   : > { %322 = vmatpush.bf16.msra.mxu0 %v497_v4 }
  0x24   : > { %323 = vmatpush.bf16.msra.mxu0 %v496_v5 }
  0x28   : > { %324 = vmatpush.bf16.msra.mxu0 %v495_v6 }
  0x2c   : > { %325 = vmatpush.bf16.msra.mxu0 %v494_v7 }
  0x2f   : > { %326 = vmatmul.bf16.vlgmr.msra.gmra.mxu0 %v253_v8 }
  0xac   : > { %v327_v10 = vpop.f32.mrf.mxu0 }
  0xad   : > { %v341_v11 = vadd.f32 %v539_v9, %v327_v10 }
  0xaf   : > { %v342_v12 = vpack.c.bf16 %v341_v11, %v341_v11 }
  0xb1   : > { %343 = vst [vmem:[%s246_s5] sm:$0xf] %v342_v12 }
  0xb4   : > { %v329_v13 = vpop.f32.mrf.mxu0 }
  0xb5 PF: > { %s14_s14 = sadd.s32 1, %s596_s14   ;;  %s669_s12 = smov %s592_s13 }
  0xb6   : > { %p11_p8 = scmp.ge.s32.totalorder %s14_s14, 4   ;;  %s670_s13 = smov %s672_s16 }
  0xb8   :  { %13 = sbr.rel (!%p11_p8) target bundleno = 2 (0x2), region = 79 }
  0xbd   :  { %369 = vsyncpa [#allocation4], 1 }
  0xbe   :  { %371 = vsyncpa [#allocation4 + $0x1], 1 }

// kernel: bert2tf_forward.30
= control target key start
LH: loop header
LB: loop body
LE: loop exit
PB: predicated region body
PF: predicated region fallthrough
CT: control target
= control target key end

     0   :  { %s1187_s30 = smov 0   ;;  %s1189_s10 = smov 0   ;;  %s1326_s0 = inlined_call_operand.vmem [shape: bf16[2,8,384], index: 0, kind: input, shape index: {}, may-alias: {0,1,2}]   ;;  %s1327_s1 = inlined_call_operand.vmem [shape: bf16[2,8,384], index: 1, kind: input, shape index: {}, may-alias: {0,1,2}]   ;;  %s1328_s2 = inlined_call_operand.vmem [shape: bf16[2,8,384], index: 2, kind: input, shape index: {}, may-alias: {0,1,2}]   ;;  %s1329_s3 = inlined_call_operand.vmem [shape: f32[2,1,8], index: 3, kind: input, shape index: {}]   ;;  %s1330_s4 = inlined_call_operand.vmem [shape: bf16[128,128], index: 4, kind: input, shape index: {}]   ;;  %s1331_s5 = inlined_call_operand.vmem [shape: f32[1,128], index: 5, kind: input, shape index: {}]   ;;  %s1332_s6 = inlined_call_operand.vmem [shape: bf16[2,8,128], index: 6, kind: input, shape index: {}]   ;;  %s1333_s7 = inlined_call_operand.vmem [shape: f32[1,128], index: 7, kind: input, shape index: {}]   ;;  %s1334_s8 = inlined_call_operand.vmem [shape: f32[1,128], index: 8, kind: input, shape index: {}]   ;;  %s1335_s9 = inlined_call_operand.vmem [shape: bf16[2,8,128], index: 9, kind: output, shape index: {}]  }
   0x1   :  { %s1191_s11 = smov 0  }
   0x2 LB: > { %s31_s12 = sadd.s32 1, %s1125_s10  ;;  %p995_p0 = scmp.ge.s32.totalorder %s1129_s11, 1  ;;  %s1129_s11 = sphi %s1191_s11, %s19_s11   ;;  %s1125_s10 = sphi %s1189_s10, %s1337_s10   ;;  %s1121_s30 = sphi %s1187_s30, %s1336_s30  }
   0x3   : > { %p33_p1 = scmp.ge.s32.totalorder %s31_s12, 2  ;;  %p351_p2 = scmp.lt.s32.totalorder %s1129_s11, 3 }
   0x5   : > { %s1339_s12 = smov (%p33_p1, %s31_s12), 0  ;;  %p352_p3 = pnand %p995_p0, %p351_p2 }
   0x6   : > { %p415_p4 = scmp.lt.s32.totalorder (!%p352_p3), %s1121_s30, 1  ;;  %s1131_s20 = smov (!%p352_p3), 96  }
   0x7   : > { %355 = sbr.rel (%p352_p3) target bundleno = 1595 (0x63b), region = 56  ;;  %s1132_s21 = smov (!%p352_p3), 32  }
   0x8   : > { %s1134_s28 = smov (!%p352_p3), 64  }
   0xc   : > { %s1341_s30 = smov (!%p415_p4, %s1121_s30), 1  ;;  %vm472_vm0 = vcmask 261120   ;;  %v460_v14 = vlaneseq  ;;  %v1133_v15 = vmov 0   ;;  %v1135_v21 = vmov -1e+09  }
   0xd   : > { %s1053_s13 = smul.u32 12, %s1341_s30  ;;  %s438_s27 = scalar_lea.vmem %s1329_s3, %s1341_s30  ;;  %vm494_vm5 = vcmask 64512   ;;  %vm510_vm6 = vcmask 1043456   ;;  %vm723_vm7 = vcmask 523264   ;;  %vm725_vm8 = vcmask 785408  }
   0xe   : > { %v457_v13 = vld [vmem:[%s438_s27] sm:$0x1]  ;;  %v461_v17 = vshrl.u32 %v460_v14, 7  ;;  %v465_v18 = vand.u32 127, %v460_v14 }
   0xf   : > { %s920_s16 = scalar_lea.vmem %s1327_s1, %s1053_s13  ;;  %s423_s19 = scalar_lea.vmem %s1326_s0, %s1053_s13  ;;  %vm458_vm1 = vcmp.gt.f32.partialorder %v457_v13, 0.5 }
  0x10   : > { %v1001_v0 = vld [vmem:[%s920_s16 + $0x4] sm:$0xf]  ;;  %v454_v2 = vld [vmem:[%s423_s19] sm:$0xf]  ;;  %s924_s24 = scalar_lea.vmem %s1328_s2, %s1053_s13  ;;  %v467_v16 = vsel %vm458_vm1, 1, %v1133_v15  ;;  %vm466_vm2 = vcmp.le.s32.totalorder %v465_v18, %v461_v17 }
  0x11   : > { %v533_v1 = vunpack.c.l.b16 %v1001_v0  ;;  %v528_v4 = vunpack.c.l.b16 %v454_v2  ;;  %v1222_v9 = vld [vmem:[%s924_s24 + $0x8] sm:$0xf]  ;;  %v477_v10 = vsel %vm472_vm0, %v1001_v0, 0  ;;  %v468_v19 = vperm.slane %v467_v16, 0 }
  0x12   : > { %v571_v11 = vunpack.c.l.b16 %v1222_v9  ;;  %486 = vmatpush.bf16.xpose.msra.mxu0 %v477_v10 }
  0x13   : > { %v534_v3 = vpack.c.b16 %v533_v1, %v533_v1  ;;  %v529_v5 = vpack.c.b16 %v528_v4, %v528_v4  ;;  %vm469_vm3 = vcmp.eq.s32.totalorder %v468_v19, 1  ;;  %v512_v4 = vsel %vm510_vm6, %v1222_v9, 0 }
  0x14   : > { %v1230_v12 = vpack.c.b16 %v571_v11, %v571_v11  ;;  %vm470_vm4 = vmand %vm469_vm3, %vm466_vm2  ;;  %521 = vmatpush.bf16.msra.mxu1 %v512_v4 }
  0x15   : > { %535 = vrot.lane.b32.xlu0 %v534_v3, %s1131_s20  ;;  %v1237_v22 = vsel %vm470_vm4, 0.0, %v1135_v21 }
  0x16   : > { %573 = vrot.lane.b32.xlu2 %v1230_v12, %s1131_s20 }
  0x19   : > { %1003 = vmatmul.msk.bf16.vlgmr.msra.gmra.mxu0 %vm472_vm0, %v454_v2 }
  0x1d   : > { %530 = vrot.lane.b32.xlu0 %v529_v5, %s1131_s20 }
  0x1e   : > { %596 = vrot.lane.b32.xlu2 %v534_v3, %s1134_s28 }
  0x25   : > { %654 = vrot.lane.b32.xlu0 %v534_v3, %s1132_s21 }
  0x26   : > { %652 = vrot.lane.b32.xlu2 %v529_v5, %s1132_s21 }
  0x70   : > { %v574_v29 = vpop.permute.xlu2 %573 }
  0x71   : > { %v579_v42 = vsel %vm510_vm6, %v574_v29, 0 }
  0x72   : > { %588 = vmatpush.bf16.msra.mxu3 %v579_v42  ;;  %v1045_v42 = vld [vmem:[%s1330_s4] sm:$0xff] }
  0x78   : > { %v597_v30 = vpop.permute.xlu2 %596 }
  0x79   : > { %v602_v43 = vsel %vm472_vm0, %v597_v30, 0 }
  0x7a   : > { %611 = vmatpush.bf16.xpose.msrb.mxu3 %v602_v43 }
  0x80   : > { %v653_v34 = vpop.permute.xlu2 %652 }
  0x87   : > { %v536_v6 = vpop.permute.xlu0 %535 }
  0x88   : > { %v541_v7 = vsel %vm472_vm0, %v536_v6, 0 }
  0x89   : > { %550 = vmatpush.bf16.xpose.msra.mxu2 %v541_v7 }
  0x8f   : > { %v531_v8 = vpop.permute.xlu0 %530 }
  0x90   : > { %1005 = vmatmul.msk.bf16.vlgmr.msra.gmra.mxu2 %vm472_vm0, %v531_v8 }
  0x96   : > { %v488_v35 = vpop.f32.mrf.mxu0 }
  0x97   : > { %v655_v27 = vpop.permute.xlu0 %654  ;;  %v492_v39 = vmul.f32 0.17677669, %v488_v35  ;;  %v1050_v35 = vld [vmem:[%s1330_s4 + $0x28] sm:$0xff] }
  0x98   : > { %v660_v28 = vsel %vm472_vm0, %v655_v27, 0 }
  0x99   : > { %669 = vmatpush.bf16.xpose.msrb.mxu0 %v660_v28  ;;  %v493_v40 = vadd.f32 %v492_v39, %v1237_v22  ;;  %v1046_v39 = vld [vmem:[%s1330_s4 + $0x8] sm:$0xff] }
  0x9b   : > { %v495_v41 = vsel %vm494_vm5, %v493_v40, -inf }
  0x9e   : > { %v490_v38 = vpop.f32.mrf.mxu0 }
  0x9f   : > { %v1047_v38 = vld [vmem:[%s1330_s4 + $0x10] sm:$0xff] }
  0xa0   : > { %1009 = vmatmul.msk.bf16.vlgmr.msrb.gmra.mxu0 %vm472_vm0, %v653_v34  ;;  %v1051_v34 = vld [vmem:[%s1330_s4 + $0x30] sm:$0xff] }
 0x113   : > { %v552_v20 = vpop.f32.mrf.mxu2 }
 0x114   : > { %v556_v23 = vmul.f32 0.17677669, %v552_v20 }
 0x116   : > { %v557_v24 = vadd.f32 %v556_v23, %v1237_v22 }
 0x118   : > { %v558_v25 = vsel %vm494_vm5, %v557_v24, -inf }
 0x119   : > { %559 = vmax.xlane.f32.xlu1 %v558_v25 }
 0x11b   : > { %v554_v26 = vpop.f32.mrf.mxu2 }
 0x11d   : > { %v671_v45 = vpop.f32.mrf.mxu0 }
 0x11e   : > { %v675_v46 = vmul.f32 0.17677669, %v671_v45 }
 0x120   : > { %v676_v48 = vadd.f32 %v675_v46, %v1237_v22 }
 0x122   : > { %v677_v50 = vsel %vm494_vm5, %v676_v48, -inf }
 0x123   : > { %678 = vmax.xlane.f32.xlu2 %v677_v50 }
 0x125   : > { %v673_v52 = vpop.f32.mrf.mxu0 }
 0x18c   : > { %v560_v31 = vpop.xlane.xlu1 %559 }
 0x18d   : > { %v561_v32 = vsub.f32 %v557_v24, %v560_v31 }
 0x18f   : > { %v562_v33 = vmul.f32 1.442695, %v561_v32 }
 0x191   : > { %1087 = vpow2.f32 %v562_v33 }
 0x196   : > { %v679_v60 = vpop.xlane.xlu2 %678 }
 0x197   : > { %v1088_v36 = vpop.eup %1087  ;;  %v680_v62 = vsub.f32 %v676_v48, %v679_v60 }
 0x198   : > { %v564_v37 = vsel %vm494_vm5, %v1088_v36, 0.0 }
 0x199   : > { %565 = vadd.xlane.f32.xlu1 %v564_v37  ;;  %v681_v63 = vmul.f32 1.442695, %v680_v62  ;;  %v1048_v37 = vld [vmem:[%s1330_s4 + $0x18] sm:$0xff] }
 0x1b2   : > { %594 = vrot.lane.b32.xlu1 %v529_v5, %s1134_s28 }
 0x1dc   : > { %496 = vmax.xlane.f32.xlu1 %v495_v41 }
 0x20c   : > { %v566_v44 = vpop.xlane.xlu1 %565 }
 0x20d   : > { %1089 = vrcp.f32 %v566_v44 }
 0x213   : > { %v1090_v47 = vpop.eup %1089 }
 0x214   : > { %v568_v49 = vmul.f32 %v1090_v47, %v1088_v36  ;;  %v1049_v36 = vld [vmem:[%s1330_s4 + $0x20] sm:$0xff] }
 0x216   : > { %v569_v51 = vpack.c.bf16 %v568_v49, %v568_v49 }
 0x218   : > { %1006 = vmatmul.msk.bf16.vlgmr.msra.gmra.mxu3 %vm494_vm5, %v569_v51  ;;  %v1084_v51 = vld [vmem:[%s1331_s5] ss:$0 sm:$0xff] }
 0x224   : > { %v595_v53 = vpop.permute.xlu1 %594 }
 0x228   : > { %1007 = vmatmul.msk.bf16.vlgmr.msrb.gmra.mxu3 %vm472_vm0, %v595_v53 }
 0x24f   : > { %v497_v54 = vpop.xlane.xlu1 %496 }
 0x250   : > { %v498_v55 = vsub.f32 %v493_v40, %v497_v54 }
 0x252   : > { %v499_v56 = vmul.f32 1.442695, %v498_v55 }
 0x254   : > { %1091 = vpow2.f32 %v499_v56 }
 0x255   : > { %1093 = vpow2.f32 %v681_v63 }
 0x25a   : > { %v1092_v57 = vpop.eup %1091 }
 0x25b   : > { %v501_v58 = vsel %vm494_vm5, %v1092_v57, 0.0  ;;  %v1094_v5 = vpop.eup %1093 }
 0x25c   : > { %502 = vadd.xlane.f32.xlu1 %v501_v58  ;;  %v683_v7 = vsel %vm494_vm5, %v1094_v5, 0.0 }
 0x29b   : > { %v590_v59 = vpop.f32.mrf.mxu3 }
 0x29c   : > { %711 = vrot.lane.b32.xlu1 %v590_v59, %s1132_s21 }
 0x2a3   : > { %v592_v61 = vpop.f32.mrf.mxu3 }
 0x2ab   : > { %v613_v0 = vpop.f32.mrf.mxu3 }
 0x2ac   : > { %v617_v1 = vmul.f32 0.17677669, %v613_v0 }
 0x2ae   : > { %v618_v2 = vadd.f32 %v617_v1, %v1237_v22 }
 0x2b0   : > { %v619_v3 = vsel %vm494_vm5, %v618_v2, -inf }
 0x2b1   : > { %620 = vmax.xlane.f32.xlu0 %v619_v3 }
 0x2b3   : > { %v615_v6 = vpop.f32.mrf.mxu3 }
 0x2b9   : > { %684 = vadd.xlane.f32.xlu0 %v683_v7 }
 0x2cd   : > { %689 = vrot.lane.b32.xlu0 %v1230_v12, %s1132_s21 }
 0x2cf   : > { %v503_v8 = vpop.xlane.xlu1 %502 }
 0x2d0   : > { %1095 = vrcp.f32 %v503_v8 }
 0x2d6   : > { %v1096_v10 = vpop.eup %1095 }
 0x2d7   : > { %v505_v11 = vmul.f32 %v1096_v10, %v1092_v57  ;;  %v1136_v57 = vmov 128.0  }
 0x2d9   : > { %v506_v13 = vpack.c.bf16 %v505_v11, %v505_v11 }
 0x2db   : > { %1004 = vmatmul.msk.bf16.vlgmr.msra.gmra.mxu1 %vm494_vm5, %v506_v13 }
 0x30e   : > { %v712_v43 = vpop.permute.xlu1 %711 }
 0x324   : > { %v621_v14 = vpop.xlane.xlu0 %620 }
 0x325   : > { %v622_v15 = vsub.f32 %v618_v2, %v621_v14 }
 0x327   : > { %v623_v9 = vmul.f32 1.442695, %v622_v15  ;;  %v1085_v15 = vld [vmem:[%s1333_s7] ss:$0 sm:$0xff] }
 0x329   : > { %1097 = vpow2.f32 %v623_v9 }
 0x32c   : > { %v685_v18 = vpop.xlane.xlu0 %684 }
 0x32d   : > { %1099 = vrcp.f32 %v685_v18 }
 0x32f   : > { %v1098_v16 = vpop.eup %1097 }
 0x330   : > { %v625_v17 = vsel %vm494_vm5, %v1098_v16, 0.0 }
 0x331   : > { %626 = vadd.xlane.f32.xlu2 %v625_v17 }
 0x333   : > { %v1100_v19 = vpop.eup %1099 }
 0x334   : > { %v687_v20 = vmul.f32 %v1100_v19, %v1094_v5 }
 0x336   : > { %v688_v23 = vpack.c.bf16 %v687_v20, %v687_v20 }
 0x33f   : > { %v690_v21 = vpop.permute.xlu0 %689 }
 0x340   : > { %v695_v22 = vsel %vm510_vm6, %v690_v21, 0 }
 0x341   : > { %704 = vmatpush.bf16.msrb.mxu2 %v695_v22 }
 0x344   : > { %1010 = vmatmul.msk.bf16.vlgmr.msrb.gmra.mxu2 %vm494_vm5, %v688_v23 }
 0x349   : > { %631 = vrot.lane.b32.xlu2 %v1230_v12, %s1134_s28  ;;  %v1052_v12 = vld [vmem:[%s1330_s4 + $0x38] sm:$0xff] }
 0x34a   : > { %796 = vmatpush.bf16.msrb.mxu1 %v1052_v12 }
 0x34e   : > { %797 = vmatpush.bf16.msrb.mxu1 %v1051_v34 }
 0x352   : > { %798 = vmatpush.bf16.msrb.mxu1 %v1050_v35 }
 0x356   : > { %799 = vmatpush.bf16.msrb.mxu1 %v1049_v36 }
 0x358   : > { %v523_v24 = vpop.f32.mrf.mxu1 }
 0x359   : > { %v722_v44 = vsel %vm472_vm0, %v523_v24, %v712_v43 }
 0x35a   : > { %800 = vmatpush.bf16.msrb.mxu1 %v1048_v37 }
 0x35e   : > { %801 = vmatpush.bf16.msrb.mxu1 %v1047_v38 }
 0x360   : > { %v525_v25 = vpop.f32.mrf.mxu1 }
 0x362   : > { %802 = vmatpush.bf16.msrb.mxu1 %v1046_v39 }
 0x366   : > { %803 = vmatpush.bf16.msrb.mxu1 %v1045_v42 }
 0x3a4   : > { %v627_v26 = vpop.xlane.xlu2 %626 }
 0x3a5   : > { %1101 = vrcp.f32 %v627_v26 }
 0x3a6   : > { %1103 = vrcp.f32 %v1136_v57 }
 0x3ab   : > { %v1102_v27 = vpop.eup %1101 }
 0x3ac   : > { %v629_v28 = vmul.f32 %v1102_v27, %v1098_v16  ;;  %v632_v29 = vpop.permute.xlu2 %631  ;;  %v1104_v58 = vpop.eup %1103  ;;  %v1086_v16 = vld [vmem:[%s1334_s8] ss:$0 sm:$0xff] }
 0x3ad   : > { %v637_v30 = vsel %vm510_vm6, %v632_v29, 0  ;;  %v815_v59 = vmul.f32 128.0, %v1104_v58  ;;  %vm819_vm9 = vweird.f32 %v1104_v58 }
 0x3ae   : > { %v630_v31 = vpack.c.bf16 %v629_v28, %v629_v28  ;;  %646 = vmatpush.bf16.msra.mxu3 %v637_v30 }
 0x3af   : > { %v816_v60 = vsub.f32 1.0, %v815_v59 }
 0x3b1   : > { %1008 = vmatmul.msk.bf16.vlgmr.msra.gmra.mxu3 %vm494_vm5, %v630_v31  ;;  %v817_v61 = vmul.f32 %v1104_v58, %v816_v60 }
 0x3b3   : > { %v818_v62 = vadd.f32 %v1104_v58, %v817_v61 }
 0x3b5   : > { %v820_v63 = vsel %vm819_vm9, %v1104_v58, %v818_v62 }
 0x3c7   : > { %v706_v32 = vpop.f32.mrf.mxu2 }
 0x3c8   : > { %719 = vrot.lane.b32.xlu2 %v706_v32, %s1131_s20 }
 0x3cf   : > { %v708_v33 = vpop.f32.mrf.mxu2 }
 0x422   : > { %v720_v46 = vpop.permute.xlu2 %719 }
 0x434   : > { %v648_v40 = vpop.f32.mrf.mxu3 }
 0x435   : > { %715 = vrot.lane.b32.xlu0 %v648_v40, %s1134_s28  ;;  %s999_s28 = sshll.u32 %s1341_s30, 2 }
 0x436   : > { %s445_s14 = scalar_lea.vmem %s1332_s6, %s999_s28  ;;  %s452_s23 = scalar_lea.vmem %s1335_s9, %s999_s28 }
 0x437   : > { %v809_v50 = vld [vmem:[%s445_s14] sm:$0xf] }
 0x438   : > { %v810_v52 = vunpack.c.l.bf16 %v809_v50 }
 0x43c   : > { %v650_v41 = vpop.f32.mrf.mxu3 }
 0x4a7   : > { %v716_v45 = vpop.permute.xlu0 %715 }
 0x4a8   : > { %v724_v47 = vsel %vm723_vm7, %v722_v44, %v716_v45 }
 0x4a9   : > { %v726_v48 = vsel %vm725_vm8, %v724_v47, %v720_v46 }
 0x4aa   : > { %v727_v49 = vpack.c.bf16 %v726_v48, %v726_v48 }
 0x4ac   : > { %804 = vmatmul.bf16.vlgmr.msrb.gmra.mxu1 %v727_v49 }
 0x529   : > { %v805_v53 = vpop.f32.mrf.mxu1 }
 0x52a   : > { %v806_v54 = vadd.f32 %v1084_v51, %v805_v53 }
 0x52c   : > { %v811_v55 = vadd.f32 %v810_v52, %v806_v54 }
 0x52e   : > { %812 = vadd.xlane.f32.xlu0 %v811_v55 }
 0x531   : > { %v807_v56 = vpop.f32.mrf.mxu1 }
 0x5a1   : > { %v813_v0 = vpop.xlane.xlu0 %812 }
 0x5a2   : > { %v821_v1 = vmul.f32 %v820_v63, %v813_v0 }
 0x5a4   : > { %v822_v2 = vsub.f32 %v811_v55, %v821_v1 }
 0x5a6   : > { %v823_v3 = vmul.f32 %v822_v2, %v822_v2 }
 0x5a8   : > { %824 = vadd.xlane.f32.xlu2 %v823_v3 }
 0x61b   : > { %v825_v4 = vpop.xlane.xlu2 %824 }
 0x61c   : > { %v826_v5 = vmul.f32 %v825_v4, %v820_v63 }
 0x61e   : > { %v827_v6 = vadd.f32 1e-05, %v826_v5 }
 0x620   : > { %1105 = vrsqrt.f32 %v827_v6  ;;  %vm834_vm11 = vweird.f32 %v827_v6 }
 0x626   : > { %v1106_v7 = vpop.eup %1105 }
 0x627   : > { %v829_v8 = vmul.f32 %v1106_v7, %v827_v6  ;;  %vm835_vm10 = vweird.f32 %v1106_v7 }
 0x628   : > { %vm836_vm12 = vmor %vm834_vm11, %vm835_vm10 }
 0x629   : > { %v830_v10 = vmul.f32 %v1106_v7, %v829_v8 }
 0x62b   : > { %v831_v11 = vmul.f32 0.5, %v830_v10 }
 0x62d   : > { %v832_v13 = vsub.f32 1.5, %v831_v11 }
 0x62f   : > { %v833_v14 = vmul.f32 %v1106_v7, %v832_v13 }
 0x631   : > { %v837_v9 = vsel %vm836_vm12, %v1106_v7, %v833_v14 }
 0x632   : > { %v838_v17 = vmul.f32 %v837_v9, %v822_v2 }
 0x634   : > { %v843_v18 = vmul.f32 %v1085_v15, %v838_v17 }
 0x636   : > { %v848_v19 = vadd.f32 %v1086_v16, %v843_v18 }
 0x638   : > { %v849_v20 = vpack.c.bf16 %v848_v19, %v848_v19 }
 0x63a   : > { %850 = vst [vmem:[%s452_s23] sm:$0xf] %v849_v20 }
 0x63b PF: > { %s19_s11 = sadd.s32 1, %s1129_s11   ;;  %s1336_s30 = smov %s1125_s10 }
 0x63c   : > { %p16_p5 = scmp.ge.s32.totalorder %s19_s11, 4   ;;  %s1337_s10 = smov %s1339_s12 }
 0x63e   :  { %18 = sbr.rel (!%p16_p5) target bundleno = 2 (0x2), region = 98 }

// kernel: bert2tf_forward.33
= control target key start
LH: loop header
LB: loop body
LE: loop exit
PB: predicated region body
PF: predicated region fallthrough
CT: control target
= control target key end

     0   :  { %s1548_s0 = inlined_call_operand.vmem [shape: bf16[2,8,128], index: 0, kind: input, shape index: {}]   ;;  %s1549_s1 = inlined_call_operand.vmem [shape: bf16[2,16,256], index: 1, kind: input, shape index: {}, may-alias: {1,2}]   ;;  %s1550_s2 = inlined_call_operand.vmem [shape: bf16[2,16,256], index: 2, kind: input, shape index: {}, may-alias: {1,2}]   ;;  %s1551_s3 = inlined_call_operand.vmem [shape: f32[2,1,16], index: 3, kind: input, shape index: {}]   ;;  %s1552_s4 = inlined_call_operand.hbm [shape: bf16[128,128], index: 4, kind: input, shape index: {}]   ;;  %s1553_s5 = inlined_call_operand.vmem [shape: f32[1,128], index: 5, kind: input, shape index: {}]   ;;  %s1554_s6 = inlined_call_operand.vmem [shape: bf16[2,8,128], index: 6, kind: input, shape index: {}]   ;;  %s1555_s7 = inlined_call_operand.vmem [shape: f32[1,128], index: 7, kind: input, shape index: {}]   ;;  %s1556_s8 = inlined_call_operand.vmem [shape: f32[1,128], index: 8, kind: input, shape index: {}]   ;;  %s1557_s9 = inlined_call_operand.vmem [shape: bf16[2,8,128], index: 9, kind: output, shape index: {}]  }
   0x1   :  { %1558 = sst [smem:[#allocation7_spill]] %s1552_s4 }
   0x2   :  { %14 = vsyncpa [#allocation5], 0  ;;  %s1385_s30 = smov 0   ;;  %s1387_s10 = smov 0  }
   0x3   :  { %s1389_s11 = smov 0   ;;  %s1391_s12 = smov 0  }
   0x4   :  { %s1393_s13 = smov 0  }
   0x5 LB: > { %s1090_s14 = sadd.s32 4294967295, %s1325_s13   ;;  %s32_s15 = sadd.s32 1, %s1321_s12  ;;  %s1325_s13 = sphi %s1393_s13, %s20_s13   ;;  %s1321_s12 = sphi %s1391_s12, %s1566_s12   ;;  %s1317_s11 = sphi %s1389_s11, %s1565_s11   ;;  %s1313_s10 = sphi %s1387_s10, %s1564_s10   ;;  %s1309_s30 = sphi %s1385_s30, %s1563_s30  }
   0x6   : > { %p34_p0 = scmp.ge.s32.totalorder %s32_s15, 2  ;;  %s67_s16 = sadd.s32 1, %s1313_s10 }
   0x7   : > { %p74_p1 = scmp.ne.s32.totalorder %s1313_s10, %s1309_s30  ;;  %p75_p2 = scmp.eq.s32.totalorder %s1325_s13, 0 }
   0x8   : > { %s1568_s15 = smov (%p34_p0, %s32_s15), 0  ;;  %p1092_p4 = scmp.ge.s32.totalorder %s1325_s13, 1 }
   0x9   : > { %p1418_p3 = por %p75_p2, %p74_p1  ;;  %s64_s18 = ssub.s32 %s1321_s12, %s1568_s15 }
   0xa   : > { %p283_p5 = scmp.lt.s32.totalorder %s1325_s13, 3  ;;  %p65_p6 = scmp.eq.s32.totalorder %s64_s18, 0 }
   0xb   : > { %p1430_p8 = scmp.eq.s32.totalorder %s1090_s14, 0  ;;  %s1562_s4 = sld [smem:[#allocation7_spill]] }
   0xc   : > { %p1426_p7 = pnand %p1092_p4, %p283_p5  ;;  %s1327_s25 = smov [#allocation4]  }
   0xd   : > { %s1435_s21 = scalar_select %p65_p6, %s1313_s10, %s67_s16  }
   0xe   : > { %p1176_p9 = pneg %p1426_p7  ;;  %s296_s26 = sshll.u32 %s1327_s25, 4  ;;  %s297_s26 = int_to_ptr.vmem [resolvable:$true] %s296_s26 }
   0xf   : > { %s1328_s27 = smov 64   ;;  %s1329_s28 = smov 4  }
  0x10   : > { %p1177_p10 = pnand %p1430_p8, %p1176_p9  ;;  %p1094_p11 = scmp.ge.s32.totalorder %s1325_s13, 2 }
  0x11   : > { %s294_s24 = sshll.u32 %s1562_s4, 4  ;;  %s295_s24 = int_to_ptr.hbm [resolvable:$true] %s294_s24 }
  0x12   : > { %1179 = dma.hbm_to_vmem [thread:$0]  (!%p1177_p10), %s295_s24, 1024, %s297_s26, [#allocation5], %s1328_s27, %s1328_s27, %s1329_s28  }
  0x13   : > { %315 = sbr.rel (%p1094_p11) target bundleno = 36 (0x24), region = 32 }
  0x18   : > { %328 = sbr.rel (!%p1418_p3) target bundleno = 30 (0x1e), region = 40  ;;  %s330_s29 = sand.u32 (%p1418_p3), 1, %s1313_s10  }
  0x19   : > { %s1160_s14 = sshll.u32 (%p1418_p3), %s1321_s12, 4  ;;  %s1095_s16 = sshll.u32 (%p1418_p3), %s330_s29, 3 }
  0x1a   : > { %s335_s23 = scalar_lea.vmem (%p1418_p3), %s1549_s1, %s1160_s14  ;;  %s332_s25 = scalar_lea.vmem (%p1418_p3), [#allocation2], %s1095_s16 }
  0x1b   : > { %v352_v0 = vld [vmem:[%s335_s23] sm:$0xf] (%p1418_p3)  ;;  %v354_v1 = vld [vmem:[%s335_s23 + $0x8] sm:$0xf] (%p1418_p3) }
  0x1c   : > { %353 = vst [vmem:[%s332_s25] sm:$0xf] (%p1418_p3), %v352_v0 }
  0x1d   : > { %355 = vst [vmem:[%s332_s25 + $0x4] sm:$0xf] %v354_v1 }
  0x1e PF: > { %383 = sbr.rel (!%p1418_p3) target bundleno = 36 (0x24), region = 81  ;;  %s385_s24 = sand.u32 (%p1418_p3), 1, %s1313_s10  }
  0x1f   : > { %s1161_s26 = sshll.u32 (%p1418_p3), %s1321_s12, 4  ;;  %s1098_s27 = sshll.u32 (%p1418_p3), %s385_s24, 3 }
  0x20   : > { %s980_s4 = scalar_lea.vmem (%p1418_p3), %s1550_s2, %s1161_s26  ;;  %s387_s14 = scalar_lea.vmem (%p1418_p3), [#allocation3], %s1098_s27 }
  0x21   : > { %v1101_v2 = vld [vmem:[%s980_s4 + $0x4] sm:$0xf] (%p1418_p3)  ;;  %v1102_v3 = vld [vmem:[%s980_s4 + $0xc] sm:$0xf] (%p1418_p3) }
  0x22   : > { %409 = vst [vmem:[%s387_s14] sm:$0xf] (%p1418_p3), %v1101_v2 }
  0x23   : > { %411 = vst [vmem:[%s387_s14 + $0x4] sm:$0xf] %v1102_v3 }
  0x24 PF: > { %458 = sbr.rel (%p1426_p7) target bundleno = 1617 (0x651), region = 130  ;;  %s461_s17 = sand.u32 (!%p1426_p7), 1, %s1309_s30  }
  0x25   : > { %s1104_s16 = sshll.u32 (!%p1426_p7), %s461_s17, 3 }
  0x26   : > { %s463_s18 = scalar_lea.vmem (!%p1426_p7), [#allocation2], %s1104_s16  ;;  %s470_s22 = scalar_lea.vmem (!%p1426_p7), [#allocation3], %s1104_s16 }
  0x29   : > { %1304 = dma.done.wait (%p1430_p8), [#allocation5], 1024  }
  0x2a   : > { %1306 = vsyncadd (%p1430_p8), [#allocation5], 4294966272  ;;  %p531_p12 = scmp.lt.s32.totalorder %s1317_s11, 1  ;;  %v1162_v4 = vld [vmem:[%s463_s18] sm:$0xff]  ;;  %s1330_s30 = smov 96   ;;  %vm569_vm0 = vcmask 261120  }
  0x2b   : > { %634 = vrot.lane.b32.xlu0 %v1162_v4, %s1330_s30  ;;  %s1331_s20 = smov 32   ;;  %v1479_v11 = vld [vmem:[%s470_s22] sm:$0xff]  ;;  %v574_v12 = vsel %vm569_vm0, %v1162_v4, 0  ;;  %s1332_s24 = smov 64   ;;  %v1333_v14 = vmov -1e+09  }
  0x2c   : > { %s1570_s11 = smov (!%p531_p12, %s1317_s11), 1  ;;  %583 = vmatpush.bf16.xpose.msra.mxu0 %v574_v12  ;;  %669 = vrot.lane.b32.xlu2 %v1479_v11, %s1330_s30  ;;  %vm594_vm2 = vcmask 130048   ;;  %vm813_vm3 = vcmask 523264   ;;  %vm815_vm4 = vcmask 785408  }
  0x2d   : > { %s1468_s4 = sshll.u32 %s1570_s11, 2  ;;  %623 = vmatpush.bf16.msra.mxu1 %v1479_v11  ;;  %s540_s28 = scalar_lea.vmem %s1551_s3, %s1570_s11 }
  0x2e   : > { %s537_s25 = scalar_lea.vmem %s1548_s0, %s1468_s4  ;;  %v561_v13 = vld [vmem:[%s540_s28] sm:$0x1]  ;;  %s547_s14 = scalar_lea.vmem %s1554_s6, %s1468_s4 }
  0x2f   : > { %v556_v5 = vld [vmem:[%s537_s25] sm:$0xf]  ;;  %vm562_vm1 = vcmp.gt.f32.partialorder %v561_v13, 0.5 }
  0x30   : > { %v630_v6 = vunpack.c.l.b16 %v556_v5  ;;  %v563_v15 = vsel %vm562_vm1, 0.0, %v1333_v14 }
  0x31   : > { %v591_v16 = vperm.slane %v563_v15, 0 }
  0x32   : > { %v631_v7 = vpack.c.b16 %v630_v6, %v630_v6 }
  0x33   : > { %1114 = vmatmul.msk.bf16.vlgmr.msra.gmra.mxu0 %vm569_vm0, %v556_v5 }
  0x34   : > { %632 = vrot.lane.b32.xlu0 %v631_v7, %s1330_s30  ;;  %690 = vrot.lane.b32.xlu2 %v1162_v4, %s1332_s24 }
  0x3c   : > { %746 = vrot.lane.b32.xlu0 %v1162_v4, %s1331_s20  ;;  %744 = vrot.lane.b32.xlu2 %v631_v7, %s1331_s20 }
  0x86   : > { %v670_v22 = vpop.permute.xlu2 %669 }
  0x87   : > { %682 = vmatpush.bf16.msra.mxu3 %v670_v22 }
  0x8e   : > { %v691_v25 = vpop.permute.xlu2 %690 }
  0x8f   : > { %v696_v37 = vsel %vm569_vm0, %v691_v25, 0  ;;  %v1171_v25 = vld [vmem:[#allocation4 + $0x38] sm:$0xff] }
  0x90   : > { %705 = vmatpush.bf16.xpose.msrb.mxu3 %v696_v37  ;;  %886 = vmatpush.bf16.msrb.mxu1 %v1171_v25 }
  0x96   : > { %v745_v29 = vpop.permute.xlu2 %744 }
  0x9d   : > { %v635_v8 = vpop.permute.xlu0 %634 }
  0x9e   : > { %v640_v9 = vsel %vm569_vm0, %v635_v8, 0 }
  0x9f   : > { %649 = vmatpush.bf16.xpose.msra.mxu2 %v640_v9 }
  0xa6   : > { %v633_v10 = vpop.permute.xlu0 %632 }
  0xa7   : > { %1120 = vmatmul.msk.bf16.vlgmr.msra.gmra.mxu2 %vm569_vm0, %v633_v10 }
  0xae   : > { %v747_v23 = vpop.permute.xlu0 %746 }
  0xaf   : > { %v752_v24 = vsel %vm569_vm0, %v747_v23, 0 }
  0xb0   : > { %761 = vmatpush.bf16.xpose.msrb.mxu0 %v752_v24  ;;  %v585_v30 = vpop.f32.mrf.mxu0 }
  0xb1   : > { %v589_v34 = vmul.f32 0.17677669, %v585_v30  ;;  %v1165_v30 = vld [vmem:[#allocation4 + $0x8] sm:$0xff] }
  0xb3   : > { %v593_v35 = vadd.f32 %v591_v16, %v589_v34 }
  0xb5   : > { %v595_v36 = vsel %vm594_vm2, %v593_v35, -inf }
  0xb7   : > { %1124 = vmatmul.msk.bf16.vlgmr.msrb.gmra.mxu0 %vm569_vm0, %v745_v29  ;;  %v1166_v29 = vld [vmem:[#allocation4 + $0x10] sm:$0xff] }
  0xb8   : > { %v587_v33 = vpop.f32.mrf.mxu0 }
  0xb9   : > { %v1164_v33 = vld [vmem:[#allocation4] sm:$0xff] }
 0x12a   : > { %v651_v17 = vpop.f32.mrf.mxu2 }
 0x12b   : > { %v655_v18 = vmul.f32 0.17677669, %v651_v17 }
 0x12d   : > { %v656_v19 = vadd.f32 %v655_v18, %v591_v16 }
 0x12f   : > { %v657_v20 = vsel %vm594_vm2, %v656_v19, -inf }
 0x130   : > { %658 = vmax.xlane.f32.xlu1 %v657_v20 }
 0x132   : > { %v653_v21 = vpop.f32.mrf.mxu2 }
 0x134   : > { %v763_v39 = vpop.f32.mrf.mxu0 }
 0x135   : > { %v767_v40 = vmul.f32 0.17677669, %v763_v39 }
 0x137   : > { %v768_v42 = vadd.f32 %v767_v40, %v591_v16 }
 0x139   : > { %v769_v44 = vsel %vm594_vm2, %v768_v42, -inf }
 0x13a   : > { %770 = vmax.xlane.f32.xlu2 %v769_v44 }
 0x13c   : > { %v765_v46 = vpop.f32.mrf.mxu0 }
 0x1a3   : > { %v659_v26 = vpop.xlane.xlu1 %658 }
 0x1a4   : > { %v660_v27 = vsub.f32 %v656_v19, %v659_v26  ;;  %v1170_v26 = vld [vmem:[#allocation4 + $0x30] sm:$0xff] }
 0x1a5   : > { %887 = vmatpush.bf16.msrb.mxu1 %v1170_v26 }
 0x1a6   : > { %v661_v28 = vmul.f32 1.442695, %v660_v27  ;;  %v1168_v27 = vld [vmem:[#allocation4 + $0x20] sm:$0xff] }
 0x1a8   : > { %1233 = vpow2.f32 %v661_v28  ;;  %v1167_v28 = vld [vmem:[#allocation4 + $0x18] sm:$0xff] }
 0x1ad   : > { %v771_v54 = vpop.xlane.xlu2 %770 }
 0x1ae   : > { %v1234_v31 = vpop.eup %1233  ;;  %v772_v56 = vsub.f32 %v768_v42, %v771_v54  ;;  %v1230_v42 = vld [vmem:[%s1553_s5] ss:$0 sm:$0xff] }
 0x1af   : > { %v663_v32 = vsel %vm594_vm2, %v1234_v31, 0.0 }
 0x1b0   : > { %664 = vadd.xlane.f32.xlu1 %v663_v32  ;;  %v773_v57 = vmul.f32 1.442695, %v772_v56 }
 0x1c9   : > { %688 = vrot.lane.b32.xlu1 %v631_v7, %s1332_s24 }
 0x1f3   : > { %596 = vmax.xlane.f32.xlu1 %v595_v36 }
 0x223   : > { %v665_v38 = vpop.xlane.xlu1 %664 }
 0x224   : > { %1235 = vrcp.f32 %v665_v38 }
 0x22a   : > { %v1236_v41 = vpop.eup %1235 }
 0x22b   : > { %v667_v43 = vmul.f32 %v1236_v41, %v1234_v31  ;;  %v899_v41 = vld [vmem:[%s547_s14] sm:$0xf] }
 0x22d   : > { %v668_v45 = vpack.c.bf16 %v667_v43, %v667_v43  ;;  %v900_v43 = vunpack.c.l.bf16 %v899_v41 }
 0x22f   : > { %1121 = vmatmul.msk.bf16.vlgmr.msra.gmra.mxu3 %vm594_vm2, %v668_v45 }
 0x23b   : > { %v689_v47 = vpop.permute.xlu1 %688 }
 0x23f   : > { %1122 = vmatmul.msk.bf16.vlgmr.msrb.gmra.mxu3 %vm569_vm0, %v689_v47 }
 0x266   : > { %v597_v48 = vpop.xlane.xlu1 %596 }
 0x267   : > { %v598_v49 = vsub.f32 %v593_v35, %v597_v48  ;;  %v1334_v48 = vmov 128.0  }
 0x269   : > { %v599_v50 = vmul.f32 1.442695, %v598_v49 }
 0x26b   : > { %1237 = vpow2.f32 %v599_v50 }
 0x26c   : > { %1239 = vpow2.f32 %v773_v57 }
 0x271   : > { %v1238_v51 = vpop.eup %1237 }
 0x272   : > { %v601_v52 = vsel %vm594_vm2, %v1238_v51, 0.0  ;;  %v1240_v62 = vpop.eup %1239 }
 0x273   : > { %602 = vadd.xlane.f32.xlu1 %v601_v52  ;;  %v775_v0 = vsel %vm594_vm2, %v1240_v62, 0.0 }
 0x2b2   : > { %v684_v53 = vpop.f32.mrf.mxu3 }
 0x2b3   : > { %801 = vrot.lane.b32.xlu1 %v684_v53, %s1331_s20 }
 0x2ba   : > { %v686_v55 = vpop.f32.mrf.mxu3 }
 0x2c2   : > { %v707_v58 = vpop.f32.mrf.mxu3 }
 0x2c3   : > { %v711_v59 = vmul.f32 0.17677669, %v707_v58 }
 0x2c5   : > { %v712_v60 = vadd.f32 %v711_v59, %v591_v16 }
 0x2c7   : > { %v713_v61 = vsel %vm594_vm2, %v712_v60, -inf }
 0x2c8   : > { %714 = vmax.xlane.f32.xlu0 %v713_v61 }
 0x2ca   : > { %v709_v63 = vpop.f32.mrf.mxu3 }
 0x2d0   : > { %776 = vadd.xlane.f32.xlu0 %v775_v0 }
 0x2e4   : > { %781 = vrot.lane.b32.xlu0 %v1479_v11, %s1331_s20  ;;  %s554_s20 = scalar_lea.vmem %s1557_s9, %s1468_s4 }
 0x2e6   : > { %v603_v1 = vpop.xlane.xlu1 %602 }
 0x2e7   : > { %1241 = vrcp.f32 %v603_v1 }
 0x2ed   : > { %v1242_v2 = vpop.eup %1241 }
 0x2ee   : > { %v605_v3 = vmul.f32 %v1242_v2, %v1238_v51 }
 0x2f0   : > { %v606_v4 = vpack.c.bf16 %v605_v3, %v605_v3 }
 0x2f2   : > { %1119 = vmatmul.msk.bf16.vlgmr.msra.gmra.mxu1 %vm594_vm2, %v606_v4  ;;  %v1231_v4 = vld [vmem:[%s1555_s7] ss:$0 sm:$0xff] }
 0x325   : > { %v802_v34 = vpop.permute.xlu1 %801 }
 0x33b   : > { %v715_v5 = vpop.xlane.xlu0 %714 }
 0x33c   : > { %v716_v6 = vsub.f32 %v712_v60, %v715_v5 }
 0x33e   : > { %v717_v7 = vmul.f32 1.442695, %v716_v6  ;;  %v1232_v6 = vld [vmem:[%s1556_s8] ss:$0 sm:$0xff] }
 0x340   : > { %1243 = vpow2.f32 %v717_v7 }
 0x343   : > { %v777_v10 = vpop.xlane.xlu0 %776 }
 0x344   : > { %1245 = vrcp.f32 %v777_v10 }
 0x346   : > { %v1244_v8 = vpop.eup %1243 }
 0x347   : > { %v719_v9 = vsel %vm594_vm2, %v1244_v8, 0.0 }
 0x348   : > { %720 = vadd.xlane.f32.xlu2 %v719_v9 }
 0x34a   : > { %v1246_v12 = vpop.eup %1245 }
 0x34b   : > { %v779_v13 = vmul.f32 %v1246_v12, %v1240_v62 }
 0x34d   : > { %v780_v15 = vpack.c.bf16 %v779_v13, %v779_v13 }
 0x356   : > { %v782_v14 = vpop.permute.xlu0 %781 }
 0x357   : > { %794 = vmatpush.bf16.msrb.mxu2 %v782_v14 }
 0x35a   : > { %1125 = vmatmul.msk.bf16.vlgmr.msrb.gmra.mxu2 %vm594_vm2, %v780_v15 }
 0x360   : > { %725 = vrot.lane.b32.xlu2 %v1479_v11, %s1332_s24  ;;  %v1169_v11 = vld [vmem:[#allocation4 + $0x28] sm:$0xff] }
 0x361   : > { %888 = vmatpush.bf16.msrb.mxu1 %v1169_v11 }
 0x365   : > { %889 = vmatpush.bf16.msrb.mxu1 %v1168_v27 }
 0x369   : > { %890 = vmatpush.bf16.msrb.mxu1 %v1167_v28 }
 0x36d   : > { %891 = vmatpush.bf16.msrb.mxu1 %v1166_v29 }
 0x36f   : > { %v625_v16 = vpop.f32.mrf.mxu1 }
 0x370   : > { %v812_v35 = vsel %vm569_vm0, %v625_v16, %v802_v34 }
 0x371   : > { %892 = vmatpush.bf16.msrb.mxu1 %v1165_v30 }
 0x375   : > { %893 = vmatpush.bf16.msrb.mxu1 %v1164_v33 }
 0x377   : > { %v627_v17 = vpop.f32.mrf.mxu1 }
 0x3bb   : > { %v721_v18 = vpop.xlane.xlu2 %720 }
 0x3bc   : > { %1247 = vrcp.f32 %v721_v18 }
 0x3bd   : > { %1249 = vrcp.f32 %v1334_v48 }
 0x3c2   : > { %v1248_v19 = vpop.eup %1247 }
 0x3c3   : > { %v723_v20 = vmul.f32 %v1248_v19, %v1244_v8  ;;  %v726_v21 = vpop.permute.xlu2 %725  ;;  %v1250_v49 = vpop.eup %1249 }
 0x3c4   : > { %738 = vmatpush.bf16.msra.mxu3 %v726_v21  ;;  %v905_v50 = vmul.f32 128.0, %v1250_v49  ;;  %vm909_vm5 = vweird.f32 %v1250_v49 }
 0x3c5   : > { %v724_v22 = vpack.c.bf16 %v723_v20, %v723_v20 }
 0x3c6   : > { %v906_v51 = vsub.f32 1.0, %v905_v50 }
 0x3c7   : > { %1123 = vmatmul.msk.bf16.vlgmr.msra.gmra.mxu3 %vm594_vm2, %v724_v22 }
 0x3c8   : > { %v907_v52 = vmul.f32 %v1250_v49, %v906_v51 }
 0x3ca   : > { %v908_v53 = vadd.f32 %v1250_v49, %v907_v52 }
 0x3cc   : > { %v910_v54 = vsel %vm909_vm5, %v1250_v49, %v908_v53 }
 0x3dd   : > { %v796_v23 = vpop.f32.mrf.mxu2 }
 0x3de   : > { %809 = vrot.lane.b32.xlu2 %v796_v23, %s1330_s30 }
 0x3e5   : > { %v798_v24 = vpop.f32.mrf.mxu2 }
 0x438   : > { %v810_v37 = vpop.permute.xlu2 %809 }
 0x44a   : > { %v740_v31 = vpop.f32.mrf.mxu3 }
 0x44b   : > { %805 = vrot.lane.b32.xlu0 %v740_v31, %s1332_s24 }
 0x452   : > { %v742_v32 = vpop.f32.mrf.mxu3 }
 0x4bd   : > { %v806_v36 = vpop.permute.xlu0 %805 }
 0x4be   : > { %v814_v38 = vsel %vm813_vm3, %v812_v35, %v806_v36 }
 0x4bf   : > { %v816_v39 = vsel %vm815_vm4, %v814_v38, %v810_v37 }
 0x4c0   : > { %v817_v40 = vpack.c.bf16 %v816_v39, %v816_v39 }
 0x4c2   : > { %894 = vmatmul.bf16.vlgmr.msrb.gmra.mxu1 %v817_v40 }
 0x53f   : > { %v895_v44 = vpop.f32.mrf.mxu1 }
 0x540   : > { %v896_v45 = vadd.f32 %v1230_v42, %v895_v44 }
 0x542   : > { %v901_v46 = vadd.f32 %v900_v43, %v896_v45 }
 0x544   : > { %902 = vadd.xlane.f32.xlu0 %v901_v46 }
 0x547   : > { %v897_v47 = vpop.f32.mrf.mxu1 }
 0x5b7   : > { %v903_v55 = vpop.xlane.xlu0 %902 }
 0x5b8   : > { %v911_v56 = vmul.f32 %v910_v54, %v903_v55 }
 0x5ba   : > { %v912_v57 = vsub.f32 %v901_v46, %v911_v56 }
 0x5bc   : > { %v913_v58 = vmul.f32 %v912_v57, %v912_v57 }
 0x5be   : > { %914 = vadd.xlane.f32.xlu2 %v913_v58 }
 0x631   : > { %v915_v59 = vpop.xlane.xlu2 %914 }
 0x632   : > { %v916_v60 = vmul.f32 %v915_v59, %v910_v54 }
 0x634   : > { %v917_v61 = vadd.f32 1e-05, %v916_v60 }
 0x636   : > { %1251 = vrsqrt.f32 %v917_v61  ;;  %vm924_vm7 = vweird.f32 %v917_v61 }
 0x63c   : > { %v1252_v62 = vpop.eup %1251 }
 0x63d   : > { %v919_v63 = vmul.f32 %v1252_v62, %v917_v61  ;;  %vm925_vm6 = vweird.f32 %v1252_v62 }
 0x63e   : > { %vm926_vm8 = vmor %vm924_vm7, %vm925_vm6 }
 0x63f   : > { %v920_v0 = vmul.f32 %v1252_v62, %v919_v63 }
 0x641   : > { %v921_v1 = vmul.f32 0.5, %v920_v0 }
 0x643   : > { %v922_v2 = vsub.f32 1.5, %v921_v1 }
 0x645   : > { %v923_v3 = vmul.f32 %v1252_v62, %v922_v2 }
 0x647   : > { %v927_v5 = vsel %vm926_vm8, %v1252_v62, %v923_v3 }
 0x648   : > { %v928_v7 = vmul.f32 %v927_v5, %v912_v57 }
 0x64a   : > { %v933_v8 = vmul.f32 %v1231_v4, %v928_v7 }
 0x64c   : > { %v938_v9 = vadd.f32 %v1232_v6, %v933_v8 }
 0x64e   : > { %v939_v10 = vpack.c.bf16 %v938_v9, %v938_v9 }
 0x650   : > { %940 = vst [vmem:[%s554_s20] sm:$0xf] %v939_v10 }
 0x651 PF: > { %s20_s13 = sadd.s32 1, %s1325_s13   ;;  %s1563_s30 = smov %s1313_s10 }
 0x652   : > { %p17_p13 = scmp.ge.s32.totalorder %s20_s13, 4   ;;  %s1564_s10 = smov %s1435_s21 }
 0x653   : > { %s1565_s11 = smov %s1321_s12  ;;  %s1566_s12 = smov %s1568_s15 }
 0x654   :  { %19 = sbr.rel (!%p17_p13) target bundleno = 5 (0x5), region = 195 }
 0x659   :  { %966 = vsyncpa [#allocation5], 1 }
 0x65a   :  { %968 = vsyncpa [#allocation5 + $0x1], 1 }

// kernel: bert2tf_forward.34
= control target key start
LH: loop header
LB: loop body
LE: loop exit
PB: predicated region body
PF: predicated region fallthrough
CT: control target
= control target key end

     0   :  { %12 = vsyncpa [#allocation3], 0  ;;  %s1142_s0 = inlined_call_operand.vmem [shape: bf16[16,128], index: 0, kind: input, shape index: {}]   ;;  %s1143_s1 = inlined_call_operand.hbm [shape: bf16[128,256], index: 1, kind: input, shape index: {}]   ;;  %s1144_s2 = inlined_call_operand.vmem [shape: f32[1,256], index: 2, kind: input, shape index: {}]   ;;  %s1145_s3 = inlined_call_operand.hbm [shape: bf16[256,128], index: 3, kind: input, shape index: {}]   ;;  %s1146_s4 = inlined_call_operand.vmem [shape: f32[1,128], index: 4, kind: input, shape index: {}]   ;;  %s1147_s5 = inlined_call_operand.vmem [shape: f32[1,128], index: 5, kind: input, shape index: {}]   ;;  %s1148_s6 = inlined_call_operand.vmem [shape: f32[1,128], index: 6, kind: input, shape index: {}]   ;;  %s1149_s7 = inlined_call_operand.vmem [shape: bf16[16,128], index: 7, kind: output, shape index: {}]  }
   0x1   :  { %13 = vsyncpa [#allocation5], 0  ;;  %s1072_s24 = smov 0  }
   0x2 LB: > { %s213_s27 = sshll.u32 %s1143_s1, 4  ;;  %s1081_s28 = sadd.s32 4294967295, %s1023_s24   ;;  %s1023_s24 = sphi %s1072_s24, %s19_s24   ;;  %s214_s27 = int_to_ptr.hbm [resolvable:$true] %s213_s27 }
   0x3   : > { %p733_p0 = scmp.ge.s32.totalorder %s1023_s24, 1  ;;  %p202_p1 = scmp.lt.s32.totalorder %s1023_s24, 3 }
   0x4   : > { %p919_p2 = scmp.eq.s32.totalorder %s1081_s28, 0  ;;  %s1025_s30 = smov [#allocation2]  }
   0x5   : > { %p1086_p3 = pnand %p733_p0, %p202_p1  ;;  %s215_s8 = sshll.u32 %s1025_s30, 4  ;;  %s216_s8 = int_to_ptr.vmem [resolvable:$true] %s215_s8 }
   0x6   : > { %s230_s11 = sshll.u32 %s1145_s3, 4  ;;  %s1026_s12 = smov [#allocation4]   ;;  %s231_s11 = int_to_ptr.hbm [resolvable:$true] %s230_s11 }
   0x7   : > { %p912_p4 = pneg %p1086_p3  ;;  %s232_s13 = sshll.u32 %s1026_s12, 4  ;;  %s233_s13 = int_to_ptr.vmem [resolvable:$true] %s232_s13 }
   0x8   : > { %s1027_s14 = smov 128   ;;  %s1028_s15 = smov 8  }
   0x9   : > { %p913_p5 = pnand %p919_p2, %p912_p4  ;;  %s1029_s16 = smov 64  }
   0xa   : > { %s1030_s17 = smov 4   ;;  %264 = sbr.rel (%p1086_p3) target bundleno = 612 (0x264), region = 48 }
   0xb   : > { %915 = dma.hbm_to_vmem [thread:$0]  (!%p913_p5), %s214_s27, 2048, %s216_s8, [#allocation3], %s1027_s14, %s1027_s14, %s1028_s15  }
   0xc   : > { %918 = dma.hbm_to_vmem [thread:$0]  (!%p913_p5), %s231_s11, 2048, %s233_s13, [#allocation5], %s1029_s16, %s1029_s16, %s1030_s17  }
   0xf   : > { %1014 = dma.done.wait (%p919_p2), [#allocation3], 2048  }
  0x10   : > { %1016 = vsyncadd (%p919_p2), [#allocation3], 4294965248 }
  0x11   : > { %1018 = dma.done.wait (%p919_p2), [#allocation5], 2048  }
  0x12   : > { %1020 = vsyncadd (%p919_p2), [#allocation5], 4294965248  ;;  %v800_v0 = vld [vmem:[#allocation2 + $0x70] sm:$0xf]  ;;  %v887_v1 = vld [vmem:[#allocation2 + $0x74] sm:$0xf0] }
  0x13   : > { %v886_v2 = vld [vmem:[#allocation2 + $0x74] sm:$0xf]  ;;  %v801_v3 = vor.u32 %v887_v1, %v800_v0  ;;  %v802_v4 = vld [vmem:[#allocation2 + $0x78] sm:$0xf0]  ;;  %v792_v5 = vld [vmem:[#allocation2 + $0x60] sm:$0xf] }
  0x14   : > { %v885_v6 = vld [vmem:[#allocation2 + $0x64] sm:$0xf0]  ;;  %v805_v7 = vor.u32 %v886_v2, %v802_v4  ;;  %v884_v8 = vld [vmem:[#allocation2 + $0x64] sm:$0xf]  ;;  %v794_v9 = vld [vmem:[#allocation2 + $0x68] sm:$0xf0] }
  0x15   : > { %411 = vmatpush.bf16.msra.mxu0 %v801_v3  ;;  %v793_v10 = vor.u32 %v885_v6, %v792_v5  ;;  %v797_v11 = vor.u32 %v884_v8, %v794_v9  ;;  %v784_v12 = vld [vmem:[#allocation2 + $0x50] sm:$0xf]  ;;  %v883_v13 = vld [vmem:[#allocation2 + $0x54] sm:$0xf0]  ;;  %v882_v14 = vld [vmem:[#allocation2 + $0x54] sm:$0xf] }
  0x16   : > { %424 = vmatpush.bf16.msra.mxu1 %v805_v7  ;;  %v786_v15 = vld [vmem:[#allocation2 + $0x58] sm:$0xf0]  ;;  %v785_v16 = vor.u32 %v883_v13, %v784_v12  ;;  %v776_v18 = vld [vmem:[#allocation2 + $0x40] sm:$0xf]  ;;  %v881_v19 = vld [vmem:[#allocation2 + $0x44] sm:$0xf0] }
  0x17   : > { %v789_v17 = vor.u32 %v882_v14, %v786_v15  ;;  %v880_v20 = vld [vmem:[#allocation2 + $0x44] sm:$0xf]  ;;  %v778_v21 = vld [vmem:[#allocation2 + $0x48] sm:$0xf0]  ;;  %v777_v22 = vor.u32 %v881_v19, %v776_v18  ;;  %v768_v23 = vld [vmem:[#allocation2 + $0x30] sm:$0xf] }
  0x18   : > { %v895_v24 = vld [vmem:[#allocation4 + $0x38] sm:$0xff]  ;;  %v781_v26 = vor.u32 %v880_v20, %v778_v21  ;;  %v878_v28 = vld [vmem:[#allocation2 + $0x34] sm:$0xf]  ;;  %v760_v32 = vld [vmem:[#allocation2 + $0x20] sm:$0xf]  ;;  %p300_p6 = scmp.lt.s32.totalorder %s1081_s28, 1 }
  0x19   : > { %412 = vmatpush.bf16.msra.mxu0 %v793_v10  ;;  %v903_v25 = vld [vmem:[#allocation4 + $0x78] sm:$0xff]  ;;  %589 = vmatpush.bf16.msra.mxu2 %v895_v24  ;;  %v877_v33 = vld [vmem:[#allocation2 + $0x24] sm:$0xf0]  ;;  %v876_v34 = vld [vmem:[#allocation2 + $0x24] sm:$0xf] }
  0x1a   : > { %425 = vmatpush.bf16.msra.mxu1 %v797_v11  ;;  %v879_v27 = vld [vmem:[#allocation2 + $0x34] sm:$0xf0]  ;;  %v770_v29 = vld [vmem:[#allocation2 + $0x38] sm:$0xf0]  ;;  %602 = vmatpush.bf16.msra.mxu3 %v903_v25  ;;  %v762_v35 = vld [vmem:[#allocation2 + $0x28] sm:$0xf0]  ;;  %v761_v36 = vor.u32 %v877_v33, %v760_v32 }
  0x1b   : > { %v769_v30 = vor.u32 %v879_v27, %v768_v23  ;;  %v773_v31 = vor.u32 %v878_v28, %v770_v29  ;;  %v765_v37 = vor.u32 %v876_v34, %v762_v35  ;;  %v752_v38 = vld [vmem:[#allocation2 + $0x10] sm:$0xf]  ;;  %v875_v39 = vld [vmem:[#allocation2 + $0x14] sm:$0xf0]  ;;  %v874_v40 = vld [vmem:[#allocation2 + $0x14] sm:$0xf] }
  0x1c   : > { %v754_v41 = vld [vmem:[#allocation2 + $0x18] sm:$0xf0]  ;;  %s1152_s28 = smov (!%p300_p6, %s1081_s28), 1  ;;  %v753_v42 = vor.u32 %v875_v39, %v752_v38  ;;  %v744_v44 = vld [vmem:[#allocation2] sm:$0xf]  ;;  %v894_v51 = vld [vmem:[#allocation4 + $0x30] sm:$0xff] }
  0x1d   : > { %413 = vmatpush.bf16.msra.mxu0 %v785_v16  ;;  %v757_v43 = vor.u32 %v874_v40, %v754_v41  ;;  %v873_v45 = vld [vmem:[#allocation2 + $0x4] sm:$0xf0]  ;;  %v872_v46 = vld [vmem:[#allocation2 + $0x4] sm:$0xf]  ;;  %v746_v47 = vld [vmem:[#allocation2 + $0x8] sm:$0xf0]  ;;  %590 = vmatpush.bf16.msra.mxu2 %v894_v51 }
  0x1e   : > { %426 = vmatpush.bf16.msra.mxu1 %v789_v17  ;;  %s740_s18 = sshll.u32 %s1152_s28, 2  ;;  %v745_v48 = vor.u32 %v873_v45, %v744_v44  ;;  %v749_v49 = vor.u32 %v872_v46, %v746_v47  ;;  %v902_v52 = vld [vmem:[#allocation4 + $0x70] sm:$0xff]  ;;  %v893_v53 = vld [vmem:[#allocation4 + $0x28] sm:$0xff]  ;;  %v892_v55 = vld [vmem:[#allocation4 + $0x20] sm:$0xff]  ;;  %v1031_v39 = vmov 128.0  }
  0x1f   : > { %s303_s21 = scalar_lea.vmem %s1142_s0, %s740_s18  ;;  %603 = vmatpush.bf16.msra.mxu3 %v902_v52  ;;  %v901_v54 = vld [vmem:[#allocation4 + $0x68] sm:$0xff]  ;;  %v900_v56 = vld [vmem:[#allocation4 + $0x60] sm:$0xff]  ;;  %v891_v57 = vld [vmem:[#allocation4 + $0x18] sm:$0xff]  ;;  %s307_s11 = scalar_lea.vmem %s1149_s7, %s740_s18 }
  0x20   : > { %v1117_v50 = vld [vmem:[%s303_s21] sm:$0xf]  ;;  %v899_v58 = vld [vmem:[#allocation4 + $0x58] sm:$0xff]  ;;  %v890_v59 = vld [vmem:[#allocation4 + $0x10] sm:$0xff] }
  0x21   : > { %414 = vmatpush.bf16.msra.mxu0 %v777_v22  ;;  %591 = vmatpush.bf16.msra.mxu2 %v893_v53  ;;  %v898_v60 = vld [vmem:[#allocation4 + $0x50] sm:$0xff]  ;;  %v889_v61 = vld [vmem:[#allocation4 + $0x8] sm:$0xff]  ;;  %v888_v63 = vld [vmem:[#allocation4] sm:$0xff]  ;;  %v615_v34 = vunpack.c.l.bf16 %v1117_v50 }
  0x22   : > { %427 = vmatpush.bf16.msra.mxu1 %v781_v26  ;;  %v897_v62 = vld [vmem:[#allocation4 + $0x48] sm:$0xff]  ;;  %v896_v0 = vld [vmem:[#allocation4 + $0x40] sm:$0xff] }
  0x23   : > { %604 = vmatpush.bf16.msra.mxu3 %v901_v54  ;;  %v325_v1 = vld [vmem:[%s1144_s2] sm:$0x3] }
  0x24   : > { %v327_v2 = vperm.slane %v325_v1, 0  ;;  %v328_v3 = vperm.slane %v325_v1, 1 }
  0x25   : > { %415 = vmatpush.bf16.msra.mxu0 %v769_v30  ;;  %592 = vmatpush.bf16.msra.mxu2 %v892_v55  ;;  %v938_v30 = vld [vmem:[%s1146_s4] ss:$0 sm:$0xff] }
  0x26   : > { %428 = vmatpush.bf16.msra.mxu1 %v773_v31 }
  0x27   : > { %605 = vmatpush.bf16.msra.mxu3 %v900_v56 }
  0x29   : > { %416 = vmatpush.bf16.msra.mxu0 %v761_v36  ;;  %593 = vmatpush.bf16.msra.mxu2 %v891_v57 }
  0x2a   : > { %429 = vmatpush.bf16.msra.mxu1 %v765_v37 }
  0x2b   : > { %606 = vmatpush.bf16.msra.mxu3 %v899_v58 }
  0x2d   : > { %417 = vmatpush.bf16.msra.mxu0 %v753_v42  ;;  %594 = vmatpush.bf16.msra.mxu2 %v890_v59  ;;  %v939_v59 = vld [vmem:[%s1147_s5] ss:$0 sm:$0xff] }
  0x2e   : > { %430 = vmatpush.bf16.msra.mxu1 %v757_v43 }
  0x2f   : > { %607 = vmatpush.bf16.msra.mxu3 %v898_v60 }
  0x31   : > { %418 = vmatpush.bf16.msra.mxu0 %v745_v48  ;;  %595 = vmatpush.bf16.msra.mxu2 %v889_v61  ;;  %v940_v61 = vld [vmem:[%s1148_s6] ss:$0 sm:$0xff] }
  0x32   : > { %431 = vmatpush.bf16.msra.mxu1 %v749_v49 }
  0x33   : > { %608 = vmatpush.bf16.msra.mxu3 %v897_v62 }
  0x34   : > { %419 = vmatmul.bf16.vlgmr.msra.gmra.mxu0 %v1117_v50 }
  0x35   : > { %432 = vmatmul.bf16.vlgmr.msra.gmra.mxu1 %v1117_v50  ;;  %596 = vmatpush.bf16.msra.mxu2 %v888_v63 }
  0x37   : > { %609 = vmatpush.bf16.msra.mxu3 %v896_v0 }
  0xb1   : > { %v420_v4 = vpop.f32.mrf.mxu0 }
  0xb2   : > { %v421_v5 = vadd.f32 %v420_v4, %v327_v2  ;;  %v433_v6 = vpop.f32.mrf.mxu1 }
  0xb3   : > { %v434_v7 = vadd.f32 %v433_v6, %v328_v3 }
  0xb4   : > { %v437_v8 = vmul.f32 %v421_v5, %v421_v5 }
  0xb5   : > { %v438_v9 = vmul.f32 %v434_v7, %v434_v7 }
  0xb6   : > { %v439_v10 = vmul.f32 %v437_v8, %v421_v5 }
  0xb7   : > { %v440_v11 = vmul.f32 %v438_v9, %v434_v7 }
  0xb8   : > { %v441_v12 = vmul.f32 0.044715, %v439_v10 }
  0xb9   : > { %v442_v13 = vmul.f32 0.044715, %v440_v11  ;;  %v422_v14 = vpop.f32.mrf.mxu0 }
  0xba   : > { %v435_v15 = vpop.f32.mrf.mxu1  ;;  %v443_v16 = vadd.f32 %v441_v12, %v421_v5 }
  0xbb   : > { %v444_v17 = vadd.f32 %v442_v13, %v434_v7 }
  0xbc   : > { %v445_v18 = vmul.f32 0.7978846, %v443_v16 }
  0xbd   : > { %v446_v19 = vmul.f32 0.7978846, %v444_v17 }
  0xbe   : > { %941 = vtanh.f32 %v445_v18 }
  0xbf   : > { %943 = vtanh.f32 %v446_v19 }
  0xc0   : > { %945 = vrcp.f32 %v1031_v39 }
  0xc4   : > { %v942_v20 = vpop.eup %941 }
  0xc5   : > { %v944_v21 = vpop.eup %943  ;;  %v449_v22 = vadd.f32 1.0, %v942_v20 }
  0xc6   : > { %v450_v23 = vadd.f32 1.0, %v944_v21  ;;  %v946_v40 = vpop.eup %945 }
  0xc7   : > { %v451_v24 = vmul.f32 0.5, %v449_v22  ;;  %v620_v41 = vmul.f32 128.0, %v946_v40  ;;  %vm624_vm0 = vweird.f32 %v946_v40 }
  0xc8   : > { %v452_v25 = vmul.f32 0.5, %v450_v23 }
  0xc9   : > { %v453_v26 = vmul.f32 %v451_v24, %v421_v5  ;;  %v621_v42 = vsub.f32 1.0, %v620_v41 }
  0xca   : > { %v454_v27 = vmul.f32 %v452_v25, %v434_v7 }
  0xcb   : > { %v455_v28 = vpack.c.bf16 %v453_v26, %v453_v26  ;;  %v622_v43 = vmul.f32 %v946_v40, %v621_v42 }
  0xcc   : > { %v456_v29 = vpack.c.bf16 %v454_v27, %v454_v27 }
  0xcd   : > { %597 = vmatmul.bf16.vlgmr.msra.gmra.mxu2 %v455_v28  ;;  %v623_v44 = vadd.f32 %v946_v40, %v622_v43 }
  0xce   : > { %610 = vmatmul.bf16.vlgmr.msra.gmra.mxu3 %v456_v29 }
  0xcf   : > { %v625_v45 = vsel %vm624_vm0, %v946_v40, %v623_v44 }
 0x150   : > { %v598_v31 = vpop.f32.mrf.mxu2 }
 0x151   : > { %v599_v32 = vadd.f32 %v938_v30, %v598_v31  ;;  %v611_v33 = vpop.f32.mrf.mxu3 }
 0x153   : > { %v612_v35 = vadd.f32 %v611_v33, %v599_v32 }
 0x155   : > { %v616_v36 = vadd.f32 %v615_v34, %v612_v35 }
 0x157   : > { %617 = vadd.xlane.f32.xlu0 %v616_v36 }
 0x158   : > { %v600_v37 = vpop.f32.mrf.mxu2 }
 0x159   : > { %v613_v38 = vpop.f32.mrf.mxu3 }
 0x1ca   : > { %v618_v46 = vpop.xlane.xlu0 %617 }
 0x1cb   : > { %v626_v47 = vmul.f32 %v625_v45, %v618_v46 }
 0x1cd   : > { %v627_v48 = vsub.f32 %v616_v36, %v626_v47 }
 0x1cf   : > { %v628_v49 = vmul.f32 %v627_v48, %v627_v48 }
 0x1d1   : > { %629 = vadd.xlane.f32.xlu0 %v628_v49 }
 0x244   : > { %v630_v50 = vpop.xlane.xlu0 %629 }
 0x245   : > { %v631_v51 = vmul.f32 %v630_v50, %v625_v45 }
 0x247   : > { %v632_v52 = vadd.f32 1e-05, %v631_v51 }
 0x249   : > { %947 = vrsqrt.f32 %v632_v52  ;;  %vm639_vm2 = vweird.f32 %v632_v52 }
 0x24f   : > { %v948_v53 = vpop.eup %947 }
 0x250   : > { %v634_v54 = vmul.f32 %v948_v53, %v632_v52  ;;  %vm640_vm1 = vweird.f32 %v948_v53 }
 0x251   : > { %vm641_vm3 = vmor %vm639_vm2, %vm640_vm1 }
 0x252   : > { %v635_v55 = vmul.f32 %v948_v53, %v634_v54 }
 0x254   : > { %v636_v56 = vmul.f32 0.5, %v635_v55 }
 0x256   : > { %v637_v57 = vsub.f32 1.5, %v636_v56 }
 0x258   : > { %v638_v58 = vmul.f32 %v948_v53, %v637_v57 }
 0x25a   : > { %v642_v60 = vsel %vm641_vm3, %v948_v53, %v638_v58 }
 0x25b   : > { %v643_v62 = vmul.f32 %v642_v60, %v627_v48 }
 0x25d   : > { %v648_v63 = vmul.f32 %v939_v59, %v643_v62 }
 0x25f   : > { %v653_v0 = vadd.f32 %v940_v61, %v648_v63 }
 0x261   : > { %v654_v1 = vpack.c.bf16 %v653_v0, %v653_v0 }
 0x263   : > { %655 = vst [vmem:[%s307_s11] sm:$0xf] %v654_v1 }
 0x264 PF: > { %s19_s24 = sadd.s32 1, %s1023_s24  }
 0x265   : > { %p16_p7 = scmp.ge.s32.totalorder %s19_s24, 4  }
 0x267   :  { %18 = sbr.rel (!%p16_p7) target bundleno = 2 (0x2), region = 87 }
 0x26c   :  { %675 = vsyncpa [#allocation3], 1 }
 0x26d   :  { %677 = vsyncpa [#allocation3 + $0x1], 1 }
 0x26e   :  { %678 = vsyncpa [#allocation5], 1 }

// kernel: bert2tf_forward.36
= control target key start
LH: loop header
LB: loop body
LE: loop exit
PB: predicated region body
PF: predicated region fallthrough
CT: control target
= control target key end

     0   :  { %14 = vsyncpa [#allocation3], 0  ;;  %s1269_s30 = smov 0   ;;  %s1271_s10 = smov 0   ;;  %s1388_s0 = inlined_call_operand.vmem [shape: bf16[2,8,384], index: 0, kind: input, shape index: {}, may-alias: {0,1,2}]   ;;  %s1389_s1 = inlined_call_operand.vmem [shape: bf16[2,8,384], index: 1, kind: input, shape index: {}, may-alias: {0,1,2}]   ;;  %s1390_s2 = inlined_call_operand.vmem [shape: bf16[2,8,384], index: 2, kind: input, shape index: {}, may-alias: {0,1,2}]   ;;  %s1391_s3 = inlined_call_operand.vmem [shape: f32[2,1,8], index: 3, kind: input, shape index: {}]   ;;  %s1392_s4 = inlined_call_operand.hbm [shape: bf16[128,128], index: 4, kind: input, shape index: {}]   ;;  %s1393_s5 = inlined_call_operand.vmem [shape: f32[1,128], index: 5, kind: input, shape index: {}]   ;;  %s1394_s6 = inlined_call_operand.vmem [shape: bf16[2,8,128], index: 6, kind: input, shape index: {}]   ;;  %s1395_s7 = inlined_call_operand.vmem [shape: f32[1,128], index: 7, kind: input, shape index: {}]   ;;  %s1396_s8 = inlined_call_operand.vmem [shape: f32[1,128], index: 8, kind: input, shape index: {}]   ;;  %s1397_s9 = inlined_call_operand.vmem [shape: bf16[2,8,128], index: 9, kind: output, shape index: {}]  }
   0x1   :  { %s1273_s11 = smov 0  }
   0x2 LB: > { %s1021_s12 = sadd.s32 4294967295, %s1208_s11   ;;  %s32_s13 = sadd.s32 1, %s1204_s10  ;;  %s1208_s11 = sphi %s1273_s11, %s20_s11   ;;  %s1204_s10 = sphi %s1271_s10, %s1399_s10   ;;  %s1200_s30 = sphi %s1269_s30, %s1398_s30  }
   0x3   : > { %p34_p0 = scmp.ge.s32.totalorder %s32_s13, 2  ;;  %p1023_p1 = scmp.ge.s32.totalorder %s1208_s11, 1 }
   0x4   : > { %p283_p2 = scmp.lt.s32.totalorder %s1208_s11, 3  ;;  %p1094_p4 = scmp.eq.s32.totalorder %s1021_s12, 0 }
   0x5   : > { %s1401_s13 = smov (%p34_p0, %s32_s13), 0  ;;  %s294_s16 = sshll.u32 %s1392_s4, 4  ;;  %s295_s16 = int_to_ptr.hbm [resolvable:$true] %s294_s16 }
   0x6   : > { %p284_p3 = pnand %p1023_p1, %p283_p2  ;;  %s1210_s17 = smov [#allocation2]  }
   0x7   : > { %s296_s18 = sshll.u32 %s1210_s17, 4  ;;  %s1211_s19 = smov 64   ;;  %s297_s18 = int_to_ptr.vmem [resolvable:$true] %s296_s18 }
   0x8   : > { %p1090_p5 = pneg %p284_p3  ;;  %s1212_s20 = smov 4  }
   0x9   : > { %367 = sbr.rel (%p284_p3) target bundleno = 1600 (0x640), region = 56 }
   0xa   : > { %p1091_p6 = pnand %p1094_p4, %p1090_p5 }
   0xc   : > { %1093 = dma.hbm_to_vmem [thread:$0]  (!%p1091_p6), %s295_s16, 1024, %s297_s18, [#allocation3], %s1211_s19, %s1211_s19, %s1212_s20  }
   0xe   : > { %1195 = dma.done.wait (%p1094_p4), [#allocation3], 1024  }
   0xf   : > { %1197 = vsyncadd (%p1094_p4), [#allocation3], 4294966272  ;;  %p432_p7 = scmp.lt.s32.totalorder %s1200_s30, 1  ;;  %s1213_s28 = smov 96   ;;  %vm489_vm0 = vcmask 261120   ;;  %v477_v14 = vlaneseq  ;;  %v1215_v15 = vmov 0  }
  0x10   : > { %s1214_s29 = smov 32   ;;  %s1216_s19 = smov 64   ;;  %v1217_v21 = vmov -1e+09   ;;  %vm511_vm5 = vcmask 64512   ;;  %vm527_vm6 = vcmask 1043456  }
  0x11   : > { %s1403_s30 = smov (!%p432_p7, %s1200_s30), 1  ;;  %v478_v17 = vshrl.u32 %v477_v14, 7  ;;  %v482_v18 = vand.u32 127, %v477_v14  ;;  %vm740_vm7 = vcmask 523264   ;;  %vm742_vm8 = vcmask 785408  }
  0x12   : > { %s1085_s21 = smul.u32 12, %s1403_s30  ;;  %s455_s18 = scalar_lea.vmem %s1391_s3, %s1403_s30 }
  0x13   : > { %v474_v13 = vld [vmem:[%s455_s18] sm:$0x1]  ;;  %vm483_vm2 = vcmp.le.s32.totalorder %v482_v18, %v478_v17  ;;  %s1031_s20 = sshll.u32 %s1403_s30, 2 }
  0x14   : > { %s940_s24 = scalar_lea.vmem %s1389_s1, %s1085_s21  ;;  %s440_s27 = scalar_lea.vmem %s1388_s0, %s1085_s21  ;;  %vm475_vm1 = vcmp.gt.f32.partialorder %v474_v13, 0.5 }
  0x15   : > { %v1033_v0 = vld [vmem:[%s940_s24 + $0x4] sm:$0xf]  ;;  %v471_v2 = vld [vmem:[%s440_s27] sm:$0xf]  ;;  %s944_s15 = scalar_lea.vmem %s1390_s2, %s1085_s21  ;;  %v484_v16 = vsel %vm475_vm1, 1, %v1215_v15  ;;  %s462_s23 = scalar_lea.vmem %s1394_s6, %s1031_s20 }
  0x16   : > { %v550_v1 = vunpack.c.l.b16 %v1033_v0  ;;  %v545_v4 = vunpack.c.l.b16 %v471_v2  ;;  %v1308_v9 = vld [vmem:[%s944_s15 + $0x8] sm:$0xf]  ;;  %v494_v10 = vsel %vm489_vm0, %v1033_v0, 0  ;;  %v485_v19 = vperm.slane %v484_v16, 0  ;;  %s469_s15 = scalar_lea.vmem %s1397_s9, %s1031_s20 }
  0x17   : > { %v588_v11 = vunpack.c.l.b16 %v1308_v9  ;;  %503 = vmatpush.bf16.xpose.msra.mxu0 %v494_v10 }
  0x18   : > { %v551_v3 = vpack.c.b16 %v550_v1, %v550_v1  ;;  %v546_v5 = vpack.c.b16 %v545_v4, %v545_v4  ;;  %vm486_vm3 = vcmp.eq.s32.totalorder %v485_v19, 1  ;;  %v529_v4 = vsel %vm527_vm6, %v1308_v9, 0 }
  0x19   : > { %v1316_v12 = vpack.c.b16 %v588_v11, %v588_v11  ;;  %vm487_vm4 = vmand %vm486_vm3, %vm483_vm2  ;;  %538 = vmatpush.bf16.msra.mxu1 %v529_v4 }
  0x1a   : > { %552 = vrot.lane.b32.xlu0 %v551_v3, %s1213_s28  ;;  %v1323_v22 = vsel %vm487_vm4, 0.0, %v1217_v21 }
  0x1b   : > { %590 = vrot.lane.b32.xlu2 %v1316_v12, %s1213_s28 }
  0x1e   : > { %1035 = vmatmul.msk.bf16.vlgmr.msra.gmra.mxu0 %vm489_vm0, %v471_v2 }
  0x22   : > { %547 = vrot.lane.b32.xlu0 %v546_v5, %s1213_s28 }
  0x23   : > { %613 = vrot.lane.b32.xlu2 %v551_v3, %s1216_s19 }
  0x2a   : > { %671 = vrot.lane.b32.xlu0 %v551_v3, %s1214_s29 }
  0x2b   : > { %669 = vrot.lane.b32.xlu2 %v546_v5, %s1214_s29 }
  0x75   : > { %v591_v29 = vpop.permute.xlu2 %590 }
  0x76   : > { %v596_v42 = vsel %vm527_vm6, %v591_v29, 0 }
  0x77   : > { %605 = vmatpush.bf16.msra.mxu3 %v596_v42  ;;  %v1077_v42 = vld [vmem:[#allocation2] sm:$0xff] }
  0x7d   : > { %v614_v30 = vpop.permute.xlu2 %613 }
  0x7e   : > { %v619_v43 = vsel %vm489_vm0, %v614_v30, 0 }
  0x7f   : > { %628 = vmatpush.bf16.xpose.msrb.mxu3 %v619_v43 }
  0x85   : > { %v670_v34 = vpop.permute.xlu2 %669 }
  0x8c   : > { %v553_v6 = vpop.permute.xlu0 %552 }
  0x8d   : > { %v558_v7 = vsel %vm489_vm0, %v553_v6, 0 }
  0x8e   : > { %567 = vmatpush.bf16.xpose.msra.mxu2 %v558_v7 }
  0x94   : > { %v548_v8 = vpop.permute.xlu0 %547 }
  0x95   : > { %1037 = vmatmul.msk.bf16.vlgmr.msra.gmra.mxu2 %vm489_vm0, %v548_v8 }
  0x9b   : > { %v505_v35 = vpop.f32.mrf.mxu0 }
  0x9c   : > { %v672_v27 = vpop.permute.xlu0 %671  ;;  %v509_v39 = vmul.f32 0.17677669, %v505_v35  ;;  %v1082_v35 = vld [vmem:[#allocation2 + $0x28] sm:$0xff] }
  0x9d   : > { %v677_v28 = vsel %vm489_vm0, %v672_v27, 0 }
  0x9e   : > { %686 = vmatpush.bf16.xpose.msrb.mxu0 %v677_v28  ;;  %v510_v40 = vadd.f32 %v509_v39, %v1323_v22  ;;  %v1078_v39 = vld [vmem:[#allocation2 + $0x8] sm:$0xff] }
  0xa0   : > { %v512_v41 = vsel %vm511_vm5, %v510_v40, -inf }
  0xa3   : > { %v507_v38 = vpop.f32.mrf.mxu0 }
  0xa4   : > { %v1079_v38 = vld [vmem:[#allocation2 + $0x10] sm:$0xff] }
  0xa5   : > { %1041 = vmatmul.msk.bf16.vlgmr.msrb.gmra.mxu0 %vm489_vm0, %v670_v34  ;;  %v1084_v34 = vld [vmem:[#allocation2 + $0x38] sm:$0xff] }
  0xa6   : > { %813 = vmatpush.bf16.msrb.mxu1 %v1084_v34 }
 0x118   : > { %v569_v20 = vpop.f32.mrf.mxu2 }
 0x119   : > { %v573_v23 = vmul.f32 0.17677669, %v569_v20 }
 0x11b   : > { %v574_v24 = vadd.f32 %v573_v23, %v1323_v22 }
 0x11d   : > { %v575_v25 = vsel %vm511_vm5, %v574_v24, -inf }
 0x11e   : > { %576 = vmax.xlane.f32.xlu1 %v575_v25 }
 0x120   : > { %v571_v26 = vpop.f32.mrf.mxu2 }
 0x122   : > { %v688_v45 = vpop.f32.mrf.mxu0 }
 0x123   : > { %v692_v46 = vmul.f32 0.17677669, %v688_v45 }
 0x125   : > { %v693_v48 = vadd.f32 %v692_v46, %v1323_v22 }
 0x127   : > { %v694_v50 = vsel %vm511_vm5, %v693_v48, -inf }
 0x128   : > { %695 = vmax.xlane.f32.xlu2 %v694_v50  ;;  %v826_v50 = vld [vmem:[%s462_s23] sm:$0xf] }
 0x12a   : > { %v690_v52 = vpop.f32.mrf.mxu0 }
 0x12b   : > { %v827_v52 = vunpack.c.l.bf16 %v826_v50 }
 0x191   : > { %v577_v31 = vpop.xlane.xlu1 %576 }
 0x192   : > { %v578_v32 = vsub.f32 %v574_v24, %v577_v31 }
 0x194   : > { %v579_v33 = vmul.f32 1.442695, %v578_v32 }
 0x196   : > { %1132 = vpow2.f32 %v579_v33 }
 0x19b   : > { %v696_v60 = vpop.xlane.xlu2 %695 }
 0x19c   : > { %v1133_v36 = vpop.eup %1132  ;;  %v697_v62 = vsub.f32 %v693_v48, %v696_v60 }
 0x19d   : > { %v581_v37 = vsel %vm511_vm5, %v1133_v36, 0.0 }
 0x19e   : > { %582 = vadd.xlane.f32.xlu1 %v581_v37  ;;  %v698_v63 = vmul.f32 1.442695, %v697_v62  ;;  %v1080_v37 = vld [vmem:[#allocation2 + $0x18] sm:$0xff] }
 0x1b7   : > { %611 = vrot.lane.b32.xlu1 %v546_v5, %s1216_s19 }
 0x1e1   : > { %513 = vmax.xlane.f32.xlu1 %v512_v41 }
 0x211   : > { %v583_v44 = vpop.xlane.xlu1 %582 }
 0x212   : > { %1134 = vrcp.f32 %v583_v44 }
 0x218   : > { %v1135_v47 = vpop.eup %1134 }
 0x219   : > { %v585_v49 = vmul.f32 %v1135_v47, %v1133_v36  ;;  %v1081_v36 = vld [vmem:[#allocation2 + $0x20] sm:$0xff] }
 0x21b   : > { %v586_v51 = vpack.c.bf16 %v585_v49, %v585_v49 }
 0x21d   : > { %1038 = vmatmul.msk.bf16.vlgmr.msra.gmra.mxu3 %vm511_vm5, %v586_v51  ;;  %v1129_v51 = vld [vmem:[%s1393_s5] ss:$0 sm:$0xff] }
 0x229   : > { %v612_v53 = vpop.permute.xlu1 %611 }
 0x22d   : > { %1039 = vmatmul.msk.bf16.vlgmr.msrb.gmra.mxu3 %vm489_vm0, %v612_v53 }
 0x254   : > { %v514_v54 = vpop.xlane.xlu1 %513 }
 0x255   : > { %v515_v55 = vsub.f32 %v510_v40, %v514_v54 }
 0x257   : > { %v516_v56 = vmul.f32 1.442695, %v515_v55 }
 0x259   : > { %1136 = vpow2.f32 %v516_v56 }
 0x25a   : > { %1138 = vpow2.f32 %v698_v63 }
 0x25f   : > { %v1137_v57 = vpop.eup %1136 }
 0x260   : > { %v518_v58 = vsel %vm511_vm5, %v1137_v57, 0.0  ;;  %v1139_v5 = vpop.eup %1138 }
 0x261   : > { %519 = vadd.xlane.f32.xlu1 %v518_v58  ;;  %v700_v7 = vsel %vm511_vm5, %v1139_v5, 0.0 }
 0x2a0   : > { %v607_v59 = vpop.f32.mrf.mxu3 }
 0x2a1   : > { %728 = vrot.lane.b32.xlu1 %v607_v59, %s1214_s29 }
 0x2a8   : > { %v609_v61 = vpop.f32.mrf.mxu3 }
 0x2b0   : > { %v630_v0 = vpop.f32.mrf.mxu3 }
 0x2b1   : > { %v634_v1 = vmul.f32 0.17677669, %v630_v0 }
 0x2b3   : > { %v635_v2 = vadd.f32 %v634_v1, %v1323_v22 }
 0x2b5   : > { %v636_v3 = vsel %vm511_vm5, %v635_v2, -inf }
 0x2b6   : > { %637 = vmax.xlane.f32.xlu0 %v636_v3 }
 0x2b8   : > { %v632_v6 = vpop.f32.mrf.mxu3 }
 0x2be   : > { %701 = vadd.xlane.f32.xlu0 %v700_v7 }
 0x2d2   : > { %706 = vrot.lane.b32.xlu0 %v1316_v12, %s1214_s29 }
 0x2d4   : > { %v520_v8 = vpop.xlane.xlu1 %519 }
 0x2d5   : > { %1140 = vrcp.f32 %v520_v8 }
 0x2db   : > { %v1141_v10 = vpop.eup %1140 }
 0x2dc   : > { %v522_v11 = vmul.f32 %v1141_v10, %v1137_v57  ;;  %v1218_v57 = vmov 128.0  }
 0x2de   : > { %v523_v13 = vpack.c.bf16 %v522_v11, %v522_v11 }
 0x2e0   : > { %1036 = vmatmul.msk.bf16.vlgmr.msra.gmra.mxu1 %vm511_vm5, %v523_v13 }
 0x313   : > { %v729_v43 = vpop.permute.xlu1 %728 }
 0x329   : > { %v638_v14 = vpop.xlane.xlu0 %637 }
 0x32a   : > { %v639_v15 = vsub.f32 %v635_v2, %v638_v14 }
 0x32c   : > { %v640_v9 = vmul.f32 1.442695, %v639_v15  ;;  %v1130_v15 = vld [vmem:[%s1395_s7] ss:$0 sm:$0xff] }
 0x32e   : > { %1142 = vpow2.f32 %v640_v9 }
 0x331   : > { %v702_v18 = vpop.xlane.xlu0 %701 }
 0x332   : > { %1144 = vrcp.f32 %v702_v18 }
 0x334   : > { %v1143_v16 = vpop.eup %1142 }
 0x335   : > { %v642_v17 = vsel %vm511_vm5, %v1143_v16, 0.0 }
 0x336   : > { %643 = vadd.xlane.f32.xlu2 %v642_v17 }
 0x338   : > { %v1145_v19 = vpop.eup %1144 }
 0x339   : > { %v704_v20 = vmul.f32 %v1145_v19, %v1139_v5 }
 0x33b   : > { %v705_v23 = vpack.c.bf16 %v704_v20, %v704_v20 }
 0x344   : > { %v707_v21 = vpop.permute.xlu0 %706 }
 0x345   : > { %v712_v22 = vsel %vm527_vm6, %v707_v21, 0 }
 0x346   : > { %721 = vmatpush.bf16.msrb.mxu2 %v712_v22 }
 0x349   : > { %1042 = vmatmul.msk.bf16.vlgmr.msrb.gmra.mxu2 %vm511_vm5, %v705_v23 }
 0x34e   : > { %648 = vrot.lane.b32.xlu2 %v1316_v12, %s1216_s19  ;;  %v1083_v12 = vld [vmem:[#allocation2 + $0x30] sm:$0xff] }
 0x34f   : > { %814 = vmatpush.bf16.msrb.mxu1 %v1083_v12 }
 0x353   : > { %815 = vmatpush.bf16.msrb.mxu1 %v1082_v35 }
 0x357   : > { %816 = vmatpush.bf16.msrb.mxu1 %v1081_v36 }
 0x35b   : > { %817 = vmatpush.bf16.msrb.mxu1 %v1080_v37 }
 0x35d   : > { %v540_v24 = vpop.f32.mrf.mxu1 }
 0x35e   : > { %v739_v44 = vsel %vm489_vm0, %v540_v24, %v729_v43 }
 0x35f   : > { %818 = vmatpush.bf16.msrb.mxu1 %v1079_v38 }
 0x363   : > { %819 = vmatpush.bf16.msrb.mxu1 %v1078_v39 }
 0x365   : > { %v542_v25 = vpop.f32.mrf.mxu1 }
 0x367   : > { %820 = vmatpush.bf16.msrb.mxu1 %v1077_v42 }
 0x3a9   : > { %v644_v26 = vpop.xlane.xlu2 %643 }
 0x3aa   : > { %1146 = vrcp.f32 %v644_v26 }
 0x3ab   : > { %1148 = vrcp.f32 %v1218_v57 }
 0x3b0   : > { %v1147_v27 = vpop.eup %1146 }
 0x3b1   : > { %v646_v28 = vmul.f32 %v1147_v27, %v1143_v16  ;;  %v649_v29 = vpop.permute.xlu2 %648  ;;  %v1149_v58 = vpop.eup %1148  ;;  %v1131_v16 = vld [vmem:[%s1396_s8] ss:$0 sm:$0xff] }
 0x3b2   : > { %v654_v30 = vsel %vm527_vm6, %v649_v29, 0  ;;  %v832_v59 = vmul.f32 128.0, %v1149_v58  ;;  %vm836_vm9 = vweird.f32 %v1149_v58 }
 0x3b3   : > { %v647_v31 = vpack.c.bf16 %v646_v28, %v646_v28  ;;  %663 = vmatpush.bf16.msra.mxu3 %v654_v30 }
 0x3b4   : > { %v833_v60 = vsub.f32 1.0, %v832_v59 }
 0x3b6   : > { %1040 = vmatmul.msk.bf16.vlgmr.msra.gmra.mxu3 %vm511_vm5, %v647_v31  ;;  %v834_v61 = vmul.f32 %v1149_v58, %v833_v60 }
 0x3b8   : > { %v835_v62 = vadd.f32 %v1149_v58, %v834_v61 }
 0x3ba   : > { %v837_v63 = vsel %vm836_vm9, %v1149_v58, %v835_v62 }
 0x3cc   : > { %v723_v32 = vpop.f32.mrf.mxu2 }
 0x3cd   : > { %736 = vrot.lane.b32.xlu2 %v723_v32, %s1213_s28 }
 0x3d4   : > { %v725_v33 = vpop.f32.mrf.mxu2 }
 0x427   : > { %v737_v46 = vpop.permute.xlu2 %736 }
 0x439   : > { %v665_v40 = vpop.f32.mrf.mxu3 }
 0x43a   : > { %732 = vrot.lane.b32.xlu0 %v665_v40, %s1216_s19 }
 0x441   : > { %v667_v41 = vpop.f32.mrf.mxu3 }
 0x4ac   : > { %v733_v45 = vpop.permute.xlu0 %732 }
 0x4ad   : > { %v741_v47 = vsel %vm740_vm7, %v739_v44, %v733_v45 }
 0x4ae   : > { %v743_v48 = vsel %vm742_vm8, %v741_v47, %v737_v46 }
 0x4af   : > { %v744_v49 = vpack.c.bf16 %v743_v48, %v743_v48 }
 0x4b1   : > { %821 = vmatmul.bf16.vlgmr.msrb.gmra.mxu1 %v744_v49 }
 0x52e   : > { %v822_v53 = vpop.f32.mrf.mxu1 }
 0x52f   : > { %v823_v54 = vadd.f32 %v1129_v51, %v822_v53 }
 0x531   : > { %v828_v55 = vadd.f32 %v827_v52, %v823_v54 }
 0x533   : > { %829 = vadd.xlane.f32.xlu0 %v828_v55 }
 0x536   : > { %v824_v56 = vpop.f32.mrf.mxu1 }
 0x5a6   : > { %v830_v0 = vpop.xlane.xlu0 %829 }
 0x5a7   : > { %v838_v1 = vmul.f32 %v837_v63, %v830_v0 }
 0x5a9   : > { %v839_v2 = vsub.f32 %v828_v55, %v838_v1 }
 0x5ab   : > { %v840_v3 = vmul.f32 %v839_v2, %v839_v2 }
 0x5ad   : > { %841 = vadd.xlane.f32.xlu2 %v840_v3 }
 0x620   : > { %v842_v4 = vpop.xlane.xlu2 %841 }
 0x621   : > { %v843_v5 = vmul.f32 %v842_v4, %v837_v63 }
 0x623   : > { %v844_v6 = vadd.f32 1e-05, %v843_v5 }
 0x625   : > { %1150 = vrsqrt.f32 %v844_v6  ;;  %vm851_vm11 = vweird.f32 %v844_v6 }
 0x62b   : > { %v1151_v7 = vpop.eup %1150 }
 0x62c   : > { %v846_v8 = vmul.f32 %v1151_v7, %v844_v6  ;;  %vm852_vm10 = vweird.f32 %v1151_v7 }
 0x62d   : > { %vm853_vm12 = vmor %vm851_vm11, %vm852_vm10 }
 0x62e   : > { %v847_v10 = vmul.f32 %v1151_v7, %v846_v8 }
 0x630   : > { %v848_v11 = vmul.f32 0.5, %v847_v10 }
 0x632   : > { %v849_v13 = vsub.f32 1.5, %v848_v11 }
 0x634   : > { %v850_v14 = vmul.f32 %v1151_v7, %v849_v13 }
 0x636   : > { %v854_v9 = vsel %vm853_vm12, %v1151_v7, %v850_v14 }
 0x637   : > { %v855_v17 = vmul.f32 %v854_v9, %v839_v2 }
 0x639   : > { %v860_v18 = vmul.f32 %v1130_v15, %v855_v17 }
 0x63b   : > { %v865_v19 = vadd.f32 %v1131_v16, %v860_v18 }
 0x63d   : > { %v866_v20 = vpack.c.bf16 %v865_v19, %v865_v19 }
 0x63f   : > { %867 = vst [vmem:[%s469_s15] sm:$0xf] %v866_v20 }
 0x640 PF: > { %s20_s11 = sadd.s32 1, %s1208_s11   ;;  %s1398_s30 = smov %s1204_s10 }
 0x641   : > { %p17_p8 = scmp.ge.s32.totalorder %s20_s11, 4   ;;  %s1399_s10 = smov %s1401_s13 }
 0x643   :  { %19 = sbr.rel (!%p17_p8) target bundleno = 2 (0x2), region = 103 }
 0x648   :  { %893 = vsyncpa [#allocation3], 1 }
 0x649   :  { %895 = vsyncpa [#allocation3 + $0x1], 1 }

// kernel: bert2tf_forward.41
= control target key start
LH: loop header
LB: loop body
LE: loop exit
PB: predicated region body
PF: predicated region fallthrough
CT: control target
= control target key end

     0   :  { %s881_s18 = smov 0   ;;  %s883_s19 = smov 0   ;;  %s993_s0 = inlined_call_operand.vmem [shape: bf16[16,128], index: 0, kind: input, shape index: {}]   ;;  %s994_s1 = inlined_call_operand.vmem [shape: bf16[256,128], index: 1, kind: input, shape index: {}]   ;;  %s995_s2 = inlined_call_operand.vmem [shape: bf16[16,256], index: 2, kind: input, shape index: {}]   ;;  %s996_s3 = inlined_call_operand.vmem [shape: s32[16,1], index: 3, kind: input, shape index: {}]   ;;  %s997_s4 = inlined_call_operand.vmem [shape: f32[16,1], index: 4, kind: output, shape index: {0}]   ;;  %s998_s5 = inlined_call_operand.vmem [shape: f32[16,1], index: 5, kind: output, shape index: {1}]  }
   0x1   :  { %s885_s20 = smov 0  }
   0x2 LB: > { %s28_s21 = sadd.s32 1, %s842_s19  ;;  %p696_p0 = scmp.ge.s32.totalorder %s846_s20, 1  ;;  %s846_s20 = sphi %s885_s20, %s16_s20   ;;  %s842_s19 = sphi %s883_s19, %s1000_s19   ;;  %s838_s18 = sphi %s881_s18, %s999_s18  }
   0x3   : > { %p30_p1 = scmp.ge.s32.totalorder %s28_s21, 2  ;;  %p238_p2 = scmp.lt.s32.totalorder %s846_s20, 3 }
   0x5   : > { %s1002_s21 = smov (%p30_p1, %s28_s21), 0  ;;  %p239_p3 = pnand %p696_p0, %p238_p2 }
   0x6   : > { %p286_p4 = scmp.lt.s32.totalorder (!%p239_p3), %s838_s18, 1 }
   0x7   : > { %242 = sbr.rel (%p239_p3) target bundleno = 596 (0x254), region = 36 }
   0xc   : > { %v778_v0 = vld [vmem:[%s994_s1 + $0x38] sm:$0xff]  ;;  %v777_v2 = vld [vmem:[%s994_s1 + $0x30] sm:$0xff]  ;;  %v776_v4 = vld [vmem:[%s994_s1 + $0x28] sm:$0xff]  ;;  %s1004_s18 = smov (!%p286_p4, %s838_s18), 1  ;;  %vm322_vm0 = vcmask 7168   ;;  %v848_v11 = vmov 0.0   ;;  %v484_v22 = vlaneseq }
   0xd   : > { %v786_v1 = vld [vmem:[%s994_s1 + $0x78] sm:$0xff]  ;;  %458 = vmatpush.bf16.xpose.msra.mxu0 %v778_v0  ;;  %v785_v3 = vld [vmem:[%s994_s1 + $0x70] sm:$0xff]  ;;  %v784_v5 = vld [vmem:[%s994_s1 + $0x68] sm:$0xff]  ;;  %s926_s13 = sshll.u32 %s1004_s18, 3  ;;  %324 = vst.msk [vmem:[#allocation3] sm:$0xff] %vm322_vm0, %v848_v11  ;;  %v849_v12 = vmov 0  }
   0xe   : > { %471 = vmatpush.bf16.xpose.msra.mxu1 %v786_v1  ;;  %v775_v6 = vld [vmem:[%s994_s1 + $0x20] sm:$0xff]  ;;  %v774_v8 = vld [vmem:[%s994_s1 + $0x18] sm:$0xff]  ;;  %s309_s24 = scalar_lea.vmem %s996_s3, %s926_s13  ;;  %s317_s27 = scalar_lea.vmem %s998_s5, %s926_s13  ;;  %815 = vset.pattern.permute.xlu1 %v849_v12  ;;  %325 = vst.msk [vmem:[#allocation4] sm:$0xff] %vm322_vm0, %v848_v11  ;;  %v773_v14 = vld [vmem:[%s994_s1 + $0x10] sm:$0xff]  ;;  %v850_v21 = vmov -inf   ;;  %v485_v23 = vand.u32 127, %v484_v22 }
   0xf   : > { %v783_v7 = vld [vmem:[%s994_s1 + $0x60] sm:$0xff]  ;;  %v782_v9 = vld [vmem:[%s994_s1 + $0x58] sm:$0xff]  ;;  %814 = vset.pattern.permute.xlu0 %v849_v12  ;;  %v781_v15 = vld [vmem:[%s994_s1 + $0x50] sm:$0xff]  ;;  %s697_s16 = sshll.u32 %s1004_s18, 2  ;;  %323 = vst.msk [vmem:[#allocation2] sm:$0xff] %vm322_vm0, %v850_v21  ;;  %s304_s26 = scalar_lea.vmem %s995_s2, %s926_s13 }
  0x10   : > { %v495_v10 = vld [vmem:[%s309_s24] sm:$0xff]  ;;  %v772_v16 = vld [vmem:[%s994_s1 + $0x8] sm:$0xff]  ;;  %s289_s23 = scalar_lea.vmem %s993_s0, %s697_s16  ;;  %v486_v25 = vadd.s32 128, %v485_v23  ;;  %s313_s28 = scalar_lea.vmem %s997_s4, %s926_s13 }
  0x11   : > { %vm545_vm1 = vcmp.ne.s32.totalorder %v495_v10, 0  ;;  %498 = vperm.xlu1 %815, %v495_v10   ;;  %v780_v17 = vld [vmem:[%s994_s1 + $0x48] sm:$0xff]  ;;  %v771_v18 = vld [vmem:[%s994_s1] sm:$0xff] }
  0x12   : > { %v944_v13 = vsel %vm545_vm1, 1.0, %v848_v11  ;;  %v779_v19 = vld [vmem:[%s994_s1 + $0x40] sm:$0xff] }
  0x13   : > { %552 = vst.msk [vmem:[%s317_s27] sm:$0xff] %vm322_vm0, %v944_v13  ;;  %v326_v20 = vld [vmem:[%s289_s23] sm:$0xf] }
  0x14   : > { %v359_v24 = vld [vmem:[%s304_s26] sm:$0xff]  ;;  %v515_v56 = vld [vmem:[#allocation3] sm:$0xff] }
  0x15   : > { %459 = vmatpush.bf16.xpose.msra.mxu0 %v777_v2  ;;  %v360_v26 = vunpack.c.l.bf16 %v359_v24  ;;  %v361_v27 = vunpack.c.h.bf16 %v359_v24  ;;  %v496_v40 = vld [vmem:[#allocation4] sm:$0xff] }
  0x16   : > { %472 = vmatpush.bf16.xpose.msra.mxu1 %v785_v3  ;;  %v510_v39 = vld [vmem:[#allocation2] sm:$0xff] }
  0x1d   : > { %460 = vmatpush.bf16.xpose.msra.mxu0 %v776_v4 }
  0x1e   : > { %473 = vmatpush.bf16.xpose.msra.mxu1 %v784_v5 }
  0x25   : > { %461 = vmatpush.bf16.xpose.msra.mxu0 %v775_v6 }
  0x26   : > { %474 = vmatpush.bf16.xpose.msra.mxu1 %v783_v7 }
  0x2d   : > { %462 = vmatpush.bf16.xpose.msra.mxu0 %v774_v8 }
  0x2e   : > { %475 = vmatpush.bf16.xpose.msra.mxu1 %v782_v9 }
  0x35   : > { %463 = vmatpush.bf16.xpose.msra.mxu0 %v773_v14 }
  0x36   : > { %476 = vmatpush.bf16.xpose.msra.mxu1 %v781_v15 }
  0x3d   : > { %464 = vmatpush.bf16.xpose.msra.mxu0 %v772_v16 }
  0x3e   : > { %477 = vmatpush.bf16.xpose.msra.mxu1 %v780_v17 }
  0x45   : > { %465 = vmatpush.bf16.xpose.msra.mxu0 %v771_v18 }
  0x46   : > { %478 = vmatpush.bf16.xpose.msra.mxu1 %v779_v19 }
  0x4c   : > { %466 = vmatmul.bf16.vlgmr.msra.gmra.mxu0 %v326_v20 }
  0x4d   : > { %479 = vmatmul.bf16.vlgmr.msra.gmra.mxu1 %v326_v20 }
  0x83   : > { %v499_v28 = vpop.permute.xlu1 %498 }
  0x84   : > { %vm500_vm2 = vcmp.eq.s32.totalorder %v485_v23, %v499_v28  ;;  %vm501_vm3 = vcmp.eq.s32.totalorder %v486_v25, %v499_v28 }
  0xc9   : > { %v467_v29 = vpop.f32.mrf.mxu0 }
  0xca   : > { %v480_v30 = vpop.f32.mrf.mxu1  ;;  %v468_v31 = vadd.f32 %v467_v29, %v360_v26 }
  0xcb   : > { %v481_v32 = vadd.f32 %v480_v30, %v361_v27 }
  0xcc   : > { %v502_v34 = vsel %vm500_vm2, %v468_v31, 0.0 }
  0xcd   : > { %v511_v33 = vmax.f32 %v468_v31, %v481_v32  ;;  %v503_v35 = vsel %vm501_vm3, %v481_v32, 0.0 }
  0xce   : > { %v504_v36 = vadd.f32 %v503_v35, %v502_v34 }
  0xcf   : > { %512 = vmax.xlane.f32.xlu0 %v511_v33 }
  0xd0   : > { %505 = vadd.xlane.f32.xlu2 %v504_v36 }
  0xd1   : > { %v469_v37 = vpop.f32.mrf.mxu0 }
  0xd2   : > { %v482_v38 = vpop.f32.mrf.mxu1 }
 0x142   : > { %v513_v41 = vpop.xlane.xlu0 %512 }
 0x143   : > { %v514_v42 = vmax.f32 %v510_v39, %v513_v41  ;;  %v506_v43 = vpop.xlane.xlu2 %505 }
 0x144   : > { %v507_v44 = vadd.f32 %v506_v43, %v496_v40 }
 0x145   : > { %v516_v45 = vsub.f32 %v510_v39, %v514_v42  ;;  %536 = vst.msk [vmem:[#allocation2] sm:$0xff] %vm322_vm0, %v514_v42  ;;  %522 = vperm.xlu0 %814, %v514_v42  }
 0x146   : > { %509 = vst.msk [vmem:[#allocation4] sm:$0xff] %vm322_vm0, %v507_v44 }
 0x147   : > { %v517_v54 = vmul.f32 1.442695, %v516_v45 }
 0x14c   : > { %v540_v63 = vld [vmem:[#allocation2] sm:$0xff] }
 0x14d   : > { %v548_v1 = vld [vmem:[#allocation4] sm:$0xff] }
 0x1b7   : > { %v523_v46 = vpop.permute.xlu0 %522 }
 0x1b8   : > { %v525_v47 = vsub.f32 %v468_v31, %v523_v46  ;;  %v526_v48 = vsub.f32 %v481_v32, %v523_v46 }
 0x1ba   : > { %v527_v49 = vmul.f32 1.442695, %v525_v47  ;;  %v529_v50 = vmul.f32 1.442695, %v526_v48 }
 0x1bc   : > { %816 = vpow2.f32 %v527_v49 }
 0x1bd   : > { %818 = vpow2.f32 %v529_v50 }
 0x1be   : > { %820 = vpow2.f32 %v517_v54 }
 0x1c2   : > { %v817_v51 = vpop.eup %816 }
 0x1c3   : > { %v819_v52 = vpop.eup %818 }
 0x1c4   : > { %v531_v53 = vadd.f32 %v819_v52, %v817_v51  ;;  %v821_v55 = vpop.eup %820 }
 0x1c5   : > { %v519_v57 = vmul.f32 %v821_v55, %v515_v56 }
 0x1c6   : > { %532 = vadd.xlane.f32.xlu1 %v531_v53 }
 0x239   : > { %v533_v58 = vpop.xlane.xlu1 %532 }
 0x23a   : > { %v534_v59 = vadd.f32 %v533_v58, %v519_v57 }
 0x23c   : > { %535 = vst.msk [vmem:[#allocation3] sm:$0xff] %vm322_vm0, %v534_v59 }
 0x243   : > { %v541_v60 = vld [vmem:[#allocation3] sm:$0xff] }
 0x244   : > { %822 = vlog2.f32 %v541_v60 }
 0x24a   : > { %v823_v61 = vpop.eup %822 }
 0x24b   : > { %v543_v62 = vmul.f32 0.6931472, %v823_v61 }
 0x24d   : > { %v544_v0 = vadd.f32 %v543_v62, %v540_v63 }
 0x24f   : > { %v549_v2 = vsub.f32 %v544_v0, %v548_v1 }
 0x251   : > { %v550_v3 = vmul.f32 %v944_v13, %v549_v2 }
 0x253   : > { %551 = vst.msk [vmem:[%s313_s28] sm:$0xff] %vm322_vm0, %v550_v3 }
 0x254 PF: > { %s16_s20 = sadd.s32 1, %s846_s20   ;;  %s999_s18 = smov %s842_s19 }
 0x255   : > { %p13_p5 = scmp.ge.s32.totalorder %s16_s20, 4   ;;  %s1000_s19 = smov %s1002_s21 }
 0x257   :  { %15 = sbr.rel (!%p13_p5) target bundleno = 2 (0x2), region = 95 }

</bundles_post_ra>
